<compile_context>
chip_gen: v6e
topology: v6e:2x2x1
jax: 0.10.0
libtpu: 0.0.40
codegen_flags: <defaults>
</compile_context>

<pallas_src>
import functools

import jax
import jax.numpy as jnp
from jax import lax
from jax.experimental import pallas as pl
from jax.experimental.pallas import tpu as pltpu

LANE = 128
SLOPE = 0.2                      # LeakyReLU negative slope
BN_EPS = 1e-5
KW = 4                           # conv kernel size
PADW = 2                         # ceil((4 - 1) / 2)
HALO_BLK = 8                     # halo row block (>= kw - 1, divides th)
TARGET_TILE_ROWS = 512           # target output-pixel rows per grid step
VMEM_LIMIT = 48 * 1024 * 1024    # < 64 MiB (v7x), < 128 MiB (v5e/v6e)


def _round_up(x, m):
    return (x + m - 1) // m * m


def _cdiv(a, b):
    return -(-a // b)


# ----------------------------- Pallas kernels -----------------------------

def _conv_tile(xa_ref, xb_ref, w_ref, keff, th, wot):
    """Form patches in VMEM from a halo'd row block and accumulate the conv
    as keff*keff shifted MXU dots.  Returns a (th*wot, Cp) f32 tile."""
    ce = xa_ref.shape[-1]
    cp = w_ref.shape[-1]
    # Extended row block: th rows + (keff-1) halo rows from the next block.
    x_ext = jnp.concatenate([xa_ref[...], xb_ref[0:keff - 1]], axis=0)
    acc = jnp.zeros((th * wot, cp), jnp.float32)
    for i in range(keff):
        for j in range(keff):
            xs = x_ext[i:i + th, j:j + wot, :].reshape(th * wot, ce)
            acc = acc + jnp.dot(xs, w_ref[i * keff + j],
                                preferred_element_type=jnp.float32)
    return acc


def conv_bias_act_kernel(xa_ref, xb_ref, w_ref, b_ref, o_ref, *,
                         keff, th, wot, act):
    """Conv (in-kernel patches) + bias + activation, fully fused."""
    y = _conv_tile(xa_ref, xb_ref, w_ref, keff, th, wot) + b_ref[...]
    if act == "lrelu":
        y = jnp.where(y >= 0.0, y, y * SLOPE)
    elif act == "sigmoid":
        y = jax.nn.sigmoid(y)
    o_ref[...] = y.astype(o_ref.dtype)


def conv_stats_kernel(xa_ref, xb_ref, w_ref, mask_ref, o_ref, psum_ref,
                      psq_ref, *, keff, th, wot, ho):
    """Conv (in-kernel patches) with fused per-channel BN partial statistics.

    Alignment-padding rows/cols may hold non-zero garbage, so they are masked
    before being written and before contributing to the statistics.
    """
    y = _conv_tile(xa_ref, xb_ref, w_ref, keff, th, wot)
    cp = y.shape[-1]

    hb = pl.program_id(1)
    nvalid = jnp.maximum(jnp.minimum(ho - hb * th, th), 0) * wot
    ridx = lax.broadcasted_iota(jnp.int32, (th * wot, 1), 0)
    valid = mask_ref[...] * (ridx < nvalid).astype(jnp.float32)

    y = y * valid                                    # zero out padding rows/cols
    psum_ref[...] = jnp.sum(y, axis=0, keepdims=True).reshape(1, 1, cp)
    psq_ref[...] = jnp.sum(y * y, axis=0, keepdims=True).reshape(1, 1, cp)
    o_ref[...] = y.astype(o_ref.dtype)


# ----------------------------- host-side prep -----------------------------

def _prep_input(x, stride, ho_pad, wot, keff):
    """Zero-pad (conv padding + halo/alignment) and, for stride 2, apply
    space-to-depth so the conv becomes a stride-1 2x2 conv over 4*Cin chans."""
    n, h, w, c = x.shape
    x = x.astype(jnp.bfloat16)
    hpe = ho_pad + HALO_BLK          # prepped rows (includes halo block)
    wpe = wot + keff - 1             # prepped cols (includes W halo)
    if stride == 2:
        hp, wp = 2 * hpe, 2 * wpe
        xp = jnp.pad(x, ((0, 0), (PADW, hp - h - PADW),
                         (PADW, wp - w - PADW), (0, 0)))
        xs = xp.reshape(n, hpe, 2, wpe, 2, c)
        xs = jnp.transpose(xs, (0, 1, 3, 2, 4, 5)).reshape(n, hpe, wpe, 4 * c)
        ce = 4 * c
    else:
        xs = jnp.pad(x, ((0, 0), (PADW, hpe - h - PADW),
                         (PADW, wpe - w - PADW), (0, 0)))
        ce = c
    ce_pad = _round_up(ce, 8)
    if ce_pad != ce:
        xs = jnp.pad(xs, ((0, 0), (0, 0), (0, 0), (0, ce_pad - ce)))
    return xs, ce_pad


def _prep_weight(w, stride, ce_pad, cp):
    """(Cout, Cin, 4, 4) torch conv weight -> (keff*keff, ce_pad, cp) bf16
    matching the (optionally space-to-depth'd) input channel order."""
    cout, cin, _, _ = w.shape
    wt = jnp.transpose(w, (2, 3, 1, 0))               # (i, j, cin, cout)
    if stride == 2:
        wt = wt.reshape(2, 2, 2, 2, cin, cout)        # (a, di, b, dj, c, o)
        wt = jnp.transpose(wt, (0, 2, 1, 3, 4, 5))    # (a, b, di, dj, c, o)
        wt = wt.reshape(4, 4 * cin, cout)
    else:
        wt = wt.reshape(16, cin, cout)
    ce = wt.shape[1]
    wt = jnp.pad(wt, ((0, 0), (0, ce_pad - ce), (0, cp - cout)))
    return wt.astype(jnp.bfloat16)


# ----------------------------- layer wrapper -----------------------------

def conv4x4_layer(x, w, *, stride, bias=None, gamma=None, beta=None,
                  act="lrelu", out_dtype=jnp.bfloat16):
    """One discriminator block: Conv2d(k=4, s=stride, p=2) followed by either
    bias + activation (fused in-kernel) or BatchNorm(batch stats) + LeakyReLU
    (statistics fused in-kernel, affine folded into the inter-layer relayout)."""
    n, h, wd, _ = x.shape
    cout = w.shape[0]
    ho = (h + 2 * PADW - KW) // stride + 1
    wo = (wd + 2 * PADW - KW) // stride + 1
    keff = 2 if stride == 2 else 4           # 2x2 after space-to-depth, else 4x4
    cp = _round_up(cout, LANE)
    wot = _round_up(wo, 8)                   # tile width (sublane aligned)

    th = _round_up(max(1, min(_cdiv(TARGET_TILE_ROWS, wot), ho)), 16)
    ho_pad = _round_up(ho, th)
    hb_per_n = ho_pad // th
    nsteps = n * hb_per_n
    m_pad = nsteps * th * wot

    x_prep, ce = _prep_input(x, stride, ho_pad, wot, keff)
    w3 = _prep_weight(w, stride, ce, cp)
    wpe = x_prep.shape[2]

    grid = (n, hb_per_n)
    xa_spec = pl.BlockSpec((None, th, wpe, ce), lambda ni, hb: (ni, hb, 0, 0))
    xb_spec = pl.BlockSpec(
        (None, HALO_BLK, wpe, ce),
        lambda ni, hb: (ni, (hb + 1) * (th // HALO_BLK), 0, 0))
    w_spec = pl.BlockSpec((keff * keff, ce, cp), lambda ni, hb: (0, 0, 0))
    out_spec = pl.BlockSpec((th * wot, cp),
                            lambda ni, hb: (ni * hb_per_n + hb, 0))
    cparams = pltpu.CompilerParams(
        dimension_semantics=("parallel", "parallel"),
        vmem_limit_bytes=VMEM_LIMIT)

    if gamma is not None:
        # Conv + BatchNorm(batch statistics) + LeakyReLU.
        colmask = (jnp.arange(th * wot) % wot < wo).astype(
            jnp.float32).reshape(th * wot, 1)
        y2d, psum, psq = pl.pallas_call(
            functools.partial(conv_stats_kernel, keff=keff, th=th, wot=wot,
                              ho=ho),
            out_shape=(jax.ShapeDtypeStruct((m_pad, cp), jnp.bfloat16),
                       jax.ShapeDtypeStruct((nsteps, 1, cp), jnp.float32),
                       jax.ShapeDtypeStruct((nsteps, 1, cp), jnp.float32)),
            grid=grid,
            in_specs=[xa_spec, xb_spec, w_spec,
                      pl.BlockSpec((th * wot, 1), lambda ni, hb: (0, 0))],
            out_specs=(out_spec,
                       pl.BlockSpec((1, 1, cp),
                                    lambda ni, hb: (ni * hb_per_n + hb, 0, 0)),
                       pl.BlockSpec((1, 1, cp),
                                    lambda ni, hb: (ni * hb_per_n + hb, 0, 0))),
            compiler_params=cparams,
        )(x_prep, x_prep, w3, colmask)

        count = float(n * ho * wo)
        s = jnp.sum(psum[:, 0, :cout], axis=0)
        sq = jnp.sum(psq[:, 0, :cout], axis=0)
        mu = s / count
        var = jnp.maximum(sq / count - mu * mu, 0.0)
        scale = gamma.astype(jnp.float32) * lax.rsqrt(var + BN_EPS)
        shift = beta.astype(jnp.float32) - mu * scale

        y = y2d.reshape(n, ho_pad, wot, cp)[:, :ho, :wo, :cout]
        # BN affine + LeakyReLU folded into the XLA-fused inter-layer
        # slice/pad/space-to-depth pass (no dedicated Pallas sweep).
        y = y.astype(jnp.float32) * scale + shift
        y = jnp.where(y >= 0.0, y, y * SLOPE)
        return y.astype(out_dtype)

    # Conv + bias + activation (first / last layer, no norm).
    b2d = jnp.pad(bias.astype(jnp.float32), (0, cp - cout)).reshape(1, cp)
    y2d = pl.pallas_call(
        functools.partial(conv_bias_act_kernel, keff=keff, th=th, wot=wot,
                          act=act),
        out_shape=jax.ShapeDtypeStruct((m_pad, cp), out_dtype),
        grid=grid,
        in_specs=[xa_spec, xb_spec, w_spec,
                  pl.BlockSpec((1, cp), lambda ni, hb: (0, 0))],
        out_specs=out_spec,
        compiler_params=cparams,
    )(x_prep, x_prep, w3, b2d)
    return y2d.reshape(n, ho_pad, wot, cp)[:, :ho, :wo, :cout]


# ----------------------------- model definition -----------------------------

def build_params(key, input_nc, ndf, n_layers):
    """Mirrors NLayerDiscriminator.__init__ (kw=4, padw=2)."""
    specs = [(input_nc, ndf, 2, False)]              # conv + LeakyReLU (no norm)
    nf = ndf
    for _ in range(1, n_layers):
        nf_prev, nf = nf, min(nf * 2, 512)
        specs.append((nf_prev, nf, 2, True))         # conv + BN + LeakyReLU
    nf_prev, nf = nf, min(nf * 2, 512)
    specs.append((nf_prev, nf, 1, True))             # stride-1 conv + BN + LReLU
    specs.append((nf, 1, 1, False))                  # final 1-channel conv

    keys = jax.random.split(key, 2 * len(specs))
    params = []
    for idx, (cin, cout, stride, bn) in enumerate(specs):
        fan_in = cin * KW * KW
        wgt = jax.random.normal(keys[2 * idx], (cout, cin, KW, KW),
                                jnp.float32) * fan_in ** -0.5
        b = jax.random.normal(keys[2 * idx + 1], (cout,), jnp.float32) * 0.01
        params.append(dict(
            w=wgt, b=b,
            gamma=jnp.ones((cout,), jnp.float32) if bn else None,
            beta=jnp.zeros((cout,), jnp.float32) if bn else None,
            stride=stride, bn=bn))
    return params


def nlayer_discriminator_forward(x_nhwc, params, use_sigmoid=False):
    """getIntermFeat=False path: sequential conv stack, returns the final map."""
    h = x_nhwc
    last = len(params) - 1
    for idx, p in enumerate(params):
        if p["bn"]:
            h = conv4x4_layer(h, p["w"], stride=p["stride"],
                              gamma=p["gamma"], beta=p["beta"],
                              out_dtype=jnp.bfloat16)
        else:
            if idx == last:
                act = "sigmoid" if use_sigmoid else "none"
                od = jnp.float32
            else:
                act, od = "lrelu", jnp.bfloat16
            h = conv4x4_layer(h, p["w"], stride=p["stride"], bias=p["b"],
                              act=act, out_dtype=od)
    return h


# ----------------------------- main -----------------------------

if __name__ == "__main__":
    INPUT_NC, NDF, N_LAYERS = 3, 8, 3
    N, H, W = 2, 16, 16

    key = jax.random.PRNGKey(0)
    kx, kp = jax.random.split(key)
    # NHWC input; the equivalent PyTorch NCHW input is (2, 3, 16, 16).
    x = jax.random.normal(kx, (N, H, W, INPUT_NC), jnp.float32)

    params = build_params(kp, INPUT_NC, NDF, N_LAYERS)
    fwd = jax.jit(functools.partial(nlayer_discriminator_forward,
                                    params=params))
    out = jax.block_until_ready(fwd(x))

    # Spatial trace (k=4, p=2): 16 -> 9 -> 5 -> 3 (stride-2) -> 4 -> 5 (stride-1)
    assert out.shape == (N, 5, 5, 1), out.shape
    assert out.dtype == jnp.float32
    assert bool(jnp.all(jnp.isfinite(out)))
    print("KERNEL_OK")
</pallas_src>

<mosaic_0001>
module attributes {stable_mosaic.version = 11 : i64} {
  func.func @conv_bias_act_kernel(%arg0: i32, %arg1: i32, %arg2: memref<1x16x17x16xbf16, #tpu.memory_space<vmem>>, %arg3: memref<1x8x17x16xbf16, #tpu.memory_space<vmem>>, %arg4: memref<4x16x128xbf16, #tpu.memory_space<vmem>>, %arg5: memref<1x128xf32, #tpu.memory_space<vmem>>, %arg6: memref<256x128xbf16, #tpu.memory_space<vmem>>) attributes {dimension_semantics = [#tpu.dimension_semantics<parallel>, #tpu.dimension_semantics<parallel>], iteration_bounds = array<i64: 2, 1>, scalar_prefetch = 0 : i64, scratch_operands = 0 : i64, tpu.core_type = #tpu.core_type<tc>, window_params = [{transform_indices = @transform_0, window_bounds = array<i64: 1, 16, 17, 16>}, {transform_indices = @transform_1, window_bounds = array<i64: 1, 8, 17, 16>}, {pipeline_mode = #tpu.pipeline_mode<synchronous>, transform_indices = @transform_2, window_bounds = array<i64: 4, 16, 128>}, {pipeline_mode = #tpu.pipeline_mode<synchronous>, transform_indices = @transform_3, window_bounds = array<i64: 1, 128>}, {transform_indices = @transform_4, window_bounds = array<i64: 256, 128>}]} {
    %c0 = arith.constant 0 : index
    %c0_0 = arith.constant 0 : index
    %c0_1 = arith.constant 0 : index
    %c0_2 = arith.constant 0 : index
    %0 = vector.load %arg2[%c0, %c0_0, %c0_1, %c0_2] : memref<1x16x17x16xbf16, #tpu.memory_space<vmem>>, vector<1x16x17x16xbf16>
    %1 = vector.shape_cast %0 : vector<1x16x17x16xbf16> to vector<16x17x16xbf16>
    %c0_3 = arith.constant 0 : index
    %c0_4 = arith.constant 0 : index
    %c0_5 = arith.constant 0 : index
    %c0_6 = arith.constant 0 : index
    %2 = vector.load %arg3[%c0_3, %c0_4, %c0_5, %c0_6] : memref<1x8x17x16xbf16, #tpu.memory_space<vmem>>, vector<1x1x17x16xbf16>
    %3 = vector.shape_cast %2 : vector<1x1x17x16xbf16> to vector<1x17x16xbf16>
    %4 = tpu.concatenate %1, %3 in 0 : vector<16x17x16xbf16>, vector<1x17x16xbf16> -> vector<17x17x16xbf16>
    %cst = arith.constant 0.000000e+00 : f32
    %5 = vector.broadcast %cst : f32 to vector<256x128xf32>
    %6 = vector.extract_strided_slice %4 {offsets = [0, 0, 0], sizes = [16, 16, 16], strides = [1, 1, 1]} : vector<17x17x16xbf16> to vector<16x16x16xbf16>
    %7 = vector.shape_cast %6 : vector<16x16x16xbf16> to vector<256x16xbf16>
    %c0_7 = arith.constant 0 : index
    %c0_8 = arith.constant 0 : index
    %c0_9 = arith.constant 0 : index
    %8 = vector.load %arg4[%c0_7, %c0_8, %c0_9] : memref<4x16x128xbf16, #tpu.memory_space<vmem>>, vector<1x16x128xbf16>
    %9 = vector.shape_cast %8 : vector<1x16x128xbf16> to vector<16x128xbf16>
    %cst_10 = arith.constant dense<0.000000e+00> : vector<256x128xf32>
    %10 = tpu.matmul %7, %9, %cst_10 {dimension_numbers = #tpu.dot_dimension_numbers<[1], [0], [0], [1], [0, 0, 1, 1], [], []>} : vector<256x16xbf16>, vector<16x128xbf16>, vector<256x128xf32> -> vector<256x128xf32>
    %11 = arith.addf %5, %10 : vector<256x128xf32>
    %12 = vector.extract_strided_slice %4 {offsets = [0, 1, 0], sizes = [16, 16, 16], strides = [1, 1, 1]} : vector<17x17x16xbf16> to vector<16x16x16xbf16>
    %13 = vector.shape_cast %12 : vector<16x16x16xbf16> to vector<256x16xbf16>
    %c1 = arith.constant 1 : index
    %c0_11 = arith.constant 0 : index
    %c0_12 = arith.constant 0 : index
    %14 = vector.load %arg4[%c1, %c0_11, %c0_12] : memref<4x16x128xbf16, #tpu.memory_space<vmem>>, vector<1x16x128xbf16>
    %15 = vector.shape_cast %14 : vector<1x16x128xbf16> to vector<16x128xbf16>
    %cst_13 = arith.constant dense<0.000000e+00> : vector<256x128xf32>
    %16 = tpu.matmul %13, %15, %cst_13 {dimension_numbers = #tpu.dot_dimension_numbers<[1], [0], [0], [1], [0, 0, 1, 1], [], []>} : vector<256x16xbf16>, vector<16x128xbf16>, vector<256x128xf32> -> vector<256x128xf32>
    %17 = arith.addf %11, %16 : vector<256x128xf32>
    %18 = vector.extract_strided_slice %4 {offsets = [1, 0, 0], sizes = [16, 16, 16], strides = [1, 1, 1]} : vector<17x17x16xbf16> to vector<16x16x16xbf16>
    %19 = vector.shape_cast %18 : vector<16x16x16xbf16> to vector<256x16xbf16>
    %c2 = arith.constant 2 : index
    %c0_14 = arith.constant 0 : index
    %c0_15 = arith.constant 0 : index
    %20 = vector.load %arg4[%c2, %c0_14, %c0_15] : memref<4x16x128xbf16, #tpu.memory_space<vmem>>, vector<1x16x128xbf16>
    %21 = vector.shape_cast %20 : vector<1x16x128xbf16> to vector<16x128xbf16>
    %cst_16 = arith.constant dense<0.000000e+00> : vector<256x128xf32>
    %22 = tpu.matmul %19, %21, %cst_16 {dimension_numbers = #tpu.dot_dimension_numbers<[1], [0], [0], [1], [0, 0, 1, 1], [], []>} : vector<256x16xbf16>, vector<16x128xbf16>, vector<256x128xf32> -> vector<256x128xf32>
    %23 = arith.addf %17, %22 : vector<256x128xf32>
    %24 = vector.extract_strided_slice %4 {offsets = [1, 1, 0], sizes = [16, 16, 16], strides = [1, 1, 1]} : vector<17x17x16xbf16> to vector<16x16x16xbf16>
    %25 = vector.shape_cast %24 : vector<16x16x16xbf16> to vector<256x16xbf16>
    %c3 = arith.constant 3 : index
    %c0_17 = arith.constant 0 : index
    %c0_18 = arith.constant 0 : index
    %26 = vector.load %arg4[%c3, %c0_17, %c0_18] : memref<4x16x128xbf16, #tpu.memory_space<vmem>>, vector<1x16x128xbf16>
    %27 = vector.shape_cast %26 : vector<1x16x128xbf16> to vector<16x128xbf16>
    %cst_19 = arith.constant dense<0.000000e+00> : vector<256x128xf32>
    %28 = tpu.matmul %25, %27, %cst_19 {dimension_numbers = #tpu.dot_dimension_numbers<[1], [0], [0], [1], [0, 0, 1, 1], [], []>} : vector<256x16xbf16>, vector<16x128xbf16>, vector<256x128xf32> -> vector<256x128xf32>
    %29 = arith.addf %23, %28 : vector<256x128xf32>
    %c0_20 = arith.constant 0 : index
    %c0_21 = arith.constant 0 : index
    %30 = vector.load %arg5[%c0_20, %c0_21] : memref<1x128xf32, #tpu.memory_space<vmem>>, vector<1x128xf32>
    %31 = vector.broadcast %30 : vector<1x128xf32> to vector<256x128xf32>
    %32 = arith.addf %29, %31 : vector<256x128xf32>
    %cst_22 = arith.constant 0.000000e+00 : f32
    %33 = vector.broadcast %cst_22 : f32 to vector<256x128xf32>
    %34 = arith.cmpf oge, %32, %33 : vector<256x128xf32>
    %cst_23 = arith.constant 2.000000e-01 : f32
    %35 = vector.broadcast %cst_23 : f32 to vector<256x128xf32>
    %36 = arith.mulf %32, %35 : vector<256x128xf32>
    %37 = arith.select %34, %32, %36 : vector<256x128xi1>, vector<256x128xf32>
    %38 = arith.truncf %37 : vector<256x128xf32> to vector<256x128xbf16>
    %c0_24 = arith.constant 0 : index
    %c0_25 = arith.constant 0 : index
    %39 = vector.load %arg6[%c0_24, %c0_25] : memref<256x128xbf16, #tpu.memory_space<vmem>>, vector<256x128xbf16>
    tpu.vector_store %arg6[%c0_24, %c0_25], %38 {strides = array<i32>} : memref<256x128xbf16, #tpu.memory_space<vmem>>, vector<256x128xbf16>,
    return
  }
  func.func @transform_0(%arg0: i32, %arg1: i32) -> (i32, i32, i32, i32) {
    %c0_i32 = arith.constant 0 : i32
    %c0_i32_0 = arith.constant 0 : i32
    %c0_i32_1 = arith.constant 0 : i32
    return %arg0, %arg1, %c0_i32, %c0_i32_0 : i32, i32, i32, i32
  }
  func.func @transform_1(%arg0: i32, %arg1: i32) -> (i32, i32, i32, i32) {
    %c1_i32 = arith.constant 1 : i32
    %0 = arith.addi %arg1, %c1_i32 : i32
    %c2_i32 = arith.constant 2 : i32
    %1 = arith.muli %0, %c2_i32 : i32
    %c0_i32 = arith.constant 0 : i32
    %c0_i32_0 = arith.constant 0 : i32
    %c0_i32_1 = arith.constant 0 : i32
    return %arg0, %1, %c0_i32, %c0_i32_0 : i32, i32, i32, i32
  }
  func.func @transform_2(%arg0: i32, %arg1: i32) -> (i32, i32, i32) {
    %c0_i32 = arith.constant 0 : i32
    %c0_i32_0 = arith.constant 0 : i32
    %c0_i32_1 = arith.constant 0 : i32
    %c0_i32_2 = arith.constant 0 : i32
    return %c0_i32, %c0_i32_0, %c0_i32_1 : i32, i32, i32
  }
  func.func @transform_3(%arg0: i32, %arg1: i32) -> (i32, i32) {
    %c0_i32 = arith.constant 0 : i32
    %c0_i32_0 = arith.constant 0 : i32
    %c0_i32_1 = arith.constant 0 : i32
    return %c0_i32, %c0_i32_0 : i32, i32
  }
  func.func @transform_4(%arg0: i32, %arg1: i32) -> (i32, i32) {
    %c1_i32 = arith.constant 1 : i32
    %0 = arith.muli %arg0, %c1_i32 : i32
    %1 = arith.addi %0, %arg1 : i32
    %c0_i32 = arith.constant 0 : i32
    %c0_i32_0 = arith.constant 0 : i32
    return %1, %c0_i32 : i32, i32
  }
}

module attributes {stable_mosaic.version = 11 : i64} {
  func.func @conv_stats_kernel(%arg0: i32, %arg1: i32, %arg2: memref<1x16x9x32xbf16, #tpu.memory_space<vmem>>, %arg3: memref<1x8x9x32xbf16, #tpu.memory_space<vmem>>, %arg4: memref<4x32x128xbf16, #tpu.memory_space<vmem>>, %arg5: memref<128x1xf32, #tpu.memory_space<vmem>>, %arg6: memref<128x128xbf16, #tpu.memory_space<vmem>>, %arg7: memref<1x1x128xf32, #tpu.memory_space<vmem>>, %arg8: memref<1x1x128xf32, #tpu.memory_space<vmem>>) attributes {dimension_semantics = [#tpu.dimension_semantics<parallel>, #tpu.dimension_semantics<parallel>], iteration_bounds = array<i64: 2, 1>, scalar_prefetch = 0 : i64, scratch_operands = 0 : i64, tpu.core_type = #tpu.core_type<tc>, window_params = [{transform_indices = @transform_0, window_bounds = array<i64: 1, 16, 9, 32>}, {transform_indices = @transform_1, window_bounds = array<i64: 1, 8, 9, 32>}, {pipeline_mode = #tpu.pipeline_mode<synchronous>, transform_indices = @transform_2, window_bounds = array<i64: 4, 32, 128>}, {pipeline_mode = #tpu.pipeline_mode<synchronous>, transform_indices = @transform_3, window_bounds = array<i64: 128, 1>}, {transform_indices = @transform_4, window_bounds = array<i64: 128, 128>}, {transform_indices = @transform_5, window_bounds = array<i64: 1, 1, 128>}, {transform_indices = @transform_6, window_bounds = array<i64: 1, 1, 128>}]} {
    %c0 = arith.constant 0 : index
    %c0_0 = arith.constant 0 : index
    %c0_1 = arith.constant 0 : index
    %c0_2 = arith.constant 0 : index
    %0 = vector.load %arg2[%c0, %c0_0, %c0_1, %c0_2] : memref<1x16x9x32xbf16, #tpu.memory_space<vmem>>, vector<1x16x9x32xbf16>
    %1 = vector.shape_cast %0 : vector<1x16x9x32xbf16> to vector<16x9x32xbf16>
    %c0_3 = arith.constant 0 : index
    %c0_4 = arith.constant 0 : index
    %c0_5 = arith.constant 0 : index
    %c0_6 = arith.constant 0 : index
    %2 = vector.load %arg3[%c0_3, %c0_4, %c0_5, %c0_6] : memref<1x8x9x32xbf16, #tpu.memory_space<vmem>>, vector<1x1x9x32xbf16>
    %3 = vector.shape_cast %2 : vector<1x1x9x32xbf16> to vector<1x9x32xbf16>
    %4 = tpu.concatenate %1, %3 in 0 : vector<16x9x32xbf16>, vector<1x9x32xbf16> -> vector<17x9x32xbf16>
    %cst = arith.constant 0.000000e+00 : f32
    %5 = vector.broadcast %cst : f32 to vector<128x128xf32>
    %6 = vector.extract_strided_slice %4 {offsets = [0, 0, 0], sizes = [16, 8, 32], strides = [1, 1, 1]} : vector<17x9x32xbf16> to vector<16x8x32xbf16>
    %7 = vector.shape_cast %6 : vector<16x8x32xbf16> to vector<128x32xbf16>
    %c0_7 = arith.constant 0 : index
    %c0_8 = arith.constant 0 : index
    %c0_9 = arith.constant 0 : index
    %8 = vector.load %arg4[%c0_7, %c0_8, %c0_9] : memref<4x32x128xbf16, #tpu.memory_space<vmem>>, vector<1x32x128xbf16>
    %9 = vector.shape_cast %8 : vector<1x32x128xbf16> to vector<32x128xbf16>
    %cst_10 = arith.constant dense<0.000000e+00> : vector<128x128xf32>
    %10 = tpu.matmul %7, %9, %cst_10 {dimension_numbers = #tpu.dot_dimension_numbers<[1], [0], [0], [1], [0, 0, 1, 1], [], []>} : vector<128x32xbf16>, vector<32x128xbf16>, vector<128x128xf32> -> vector<128x128xf32>
    %11 = arith.addf %5, %10 : vector<128x128xf32>
    %12 = vector.extract_strided_slice %4 {offsets = [0, 1, 0], sizes = [16, 8, 32], strides = [1, 1, 1]} : vector<17x9x32xbf16> to vector<16x8x32xbf16>
    %13 = vector.shape_cast %12 : vector<16x8x32xbf16> to vector<128x32xbf16>
    %c1 = arith.constant 1 : index
    %c0_11 = arith.constant 0 : index
    %c0_12 = arith.constant 0 : index
    %14 = vector.load %arg4[%c1, %c0_11, %c0_12] : memref<4x32x128xbf16, #tpu.memory_space<vmem>>, vector<1x32x128xbf16>
    %15 = vector.shape_cast %14 : vector<1x32x128xbf16> to vector<32x128xbf16>
    %cst_13 = arith.constant dense<0.000000e+00> : vector<128x128xf32>
    %16 = tpu.matmul %13, %15, %cst_13 {dimension_numbers = #tpu.dot_dimension_numbers<[1], [0], [0], [1], [0, 0, 1, 1], [], []>} : vector<128x32xbf16>, vector<32x128xbf16>, vector<128x128xf32> -> vector<128x128xf32>
    %17 = arith.addf %11, %16 : vector<128x128xf32>
    %18 = vector.extract_strided_slice %4 {offsets = [1, 0, 0], sizes = [16, 8, 32], strides = [1, 1, 1]} : vector<17x9x32xbf16> to vector<16x8x32xbf16>
    %19 = vector.shape_cast %18 : vector<16x8x32xbf16> to vector<128x32xbf16>
    %c2 = arith.constant 2 : index
    %c0_14 = arith.constant 0 : index
    %c0_15 = arith.constant 0 : index
    %20 = vector.load %arg4[%c2, %c0_14, %c0_15] : memref<4x32x128xbf16, #tpu.memory_space<vmem>>, vector<1x32x128xbf16>
    %21 = vector.shape_cast %20 : vector<1x32x128xbf16> to vector<32x128xbf16>
    %cst_16 = arith.constant dense<0.000000e+00> : vector<128x128xf32>
    %22 = tpu.matmul %19, %21, %cst_16 {dimension_numbers = #tpu.dot_dimension_numbers<[1], [0], [0], [1], [0, 0, 1, 1], [], []>} : vector<128x32xbf16>, vector<32x128xbf16>, vector<128x128xf32> -> vector<128x128xf32>
    %23 = arith.addf %17, %22 : vector<128x128xf32>
    %24 = vector.extract_strided_slice %4 {offsets = [1, 1, 0], sizes = [16, 8, 32], strides = [1, 1, 1]} : vector<17x9x32xbf16> to vector<16x8x32xbf16>
    %25 = vector.shape_cast %24 : vector<16x8x32xbf16> to vector<128x32xbf16>
    %c3 = arith.constant 3 : index
    %c0_17 = arith.constant 0 : index
    %c0_18 = arith.constant 0 : index
    %26 = vector.load %arg4[%c3, %c0_17, %c0_18] : memref<4x32x128xbf16, #tpu.memory_space<vmem>>, vector<1x32x128xbf16>
    %27 = vector.shape_cast %26 : vector<1x32x128xbf16> to vector<32x128xbf16>
    %cst_19 = arith.constant dense<0.000000e+00> : vector<128x128xf32>
    %28 = tpu.matmul %25, %27, %cst_19 {dimension_numbers = #tpu.dot_dimension_numbers<[1], [0], [0], [1], [0, 0, 1, 1], [], []>} : vector<128x32xbf16>, vector<32x128xbf16>, vector<128x128xf32> -> vector<128x128xf32>
    %29 = arith.addf %23, %28 : vector<128x128xf32>
    %c16_i32 = arith.constant 16 : i32
    %30 = arith.muli %arg1, %c16_i32 : i32
    %c5_i32 = arith.constant 5 : i32
    %31 = arith.subi %c5_i32, %30 : i32
    %c16_i32_20 = arith.constant 16 : i32
    %32 = arith.minsi %31, %c16_i32_20 : i32
    %c0_i32 = arith.constant 0 : i32
    %33 = arith.maxsi %32, %c0_i32 : i32
    %c8_i32 = arith.constant 8 : i32
    %34 = arith.muli %33, %c8_i32 : i32
    %35 = tpu.iota {dimensions = array<i32: 0>} : vector<128x1xi32>
    %c0_21 = arith.constant 0 : index
    %c0_22 = arith.constant 0 : index
    %36 = vector.load %arg5[%c0_21, %c0_22] : memref<128x1xf32, #tpu.memory_space<vmem>>, vector<128x1xf32>
    %37 = vector.broadcast %34 : i32 to vector<128x1xi32>
    %38 = arith.cmpi slt, %35, %37 : vector<128x1xi32>
    %39 = arith.extui %38 : vector<128x1xi1> to vector<128x1xi32>
    %40 = arith.sitofp %39 : vector<128x1xi32> to vector<128x1xf32>
    %41 = arith.mulf %36, %40 : vector<128x1xf32>
    %42 = vector.broadcast %41 : vector<128x1xf32> to vector<128x128xf32>
    %43 = arith.mulf %29, %42 : vector<128x128xf32>
    %cst_23 = arith.constant dense<0.000000e+00> : vector<128xf32>
    %44 = vector.multi_reduction <add>, %43, %cst_23 [0] : vector<128x128xf32> to vector<128xf32>
    %45 = vector.shape_cast %44 : vector<128xf32> to vector<1x128xf32>
    %46 = vector.shape_cast %45 : vector<1x128xf32> to vector<1x1x128xf32>
    %c0_24 = arith.constant 0 : index
    %c0_25 = arith.constant 0 : index
    %c0_26 = arith.constant 0 : index
    %47 = vector.load %arg7[%c0_24, %c0_25, %c0_26] : memref<1x1x128xf32, #tpu.memory_space<vmem>>, vector<1x1x128xf32>
    tpu.vector_store %arg7[%c0_24, %c0_25, %c0_26], %46 {strides = array<i32>} : memref<1x1x128xf32, #tpu.memory_space<vmem>>, vector<1x1x128xf32>,
    %48 = arith.mulf %43, %43 : vector<128x128xf32>
    %cst_27 = arith.constant dense<0.000000e+00> : vector<128xf32>
    %49 = vector.multi_reduction <add>, %48, %cst_27 [0] : vector<128x128xf32> to vector<128xf32>
    %50 = vector.shape_cast %49 : vector<128xf32> to vector<1x128xf32>
    %51 = vector.shape_cast %50 : vector<1x128xf32> to vector<1x1x128xf32>
    %c0_28 = arith.constant 0 : index
    %c0_29 = arith.constant 0 : index
    %c0_30 = arith.constant 0 : index
    %52 = vector.load %arg8[%c0_28, %c0_29, %c0_30] : memref<1x1x128xf32, #tpu.memory_space<vmem>>, vector<1x1x128xf32>
    tpu.vector_store %arg8[%c0_28, %c0_29, %c0_30], %51 {strides = array<i32>} : memref<1x1x128xf32, #tpu.memory_space<vmem>>, vector<1x1x128xf32>,
    %53 = arith.truncf %43 : vector<128x128xf32> to vector<128x128xbf16>
    %c0_31 = arith.constant 0 : index
    %c0_32 = arith.constant 0 : index
    %54 = vector.load %arg6[%c0_31, %c0_32] : memref<128x128xbf16, #tpu.memory_space<vmem>>, vector<128x128xbf16>
    tpu.vector_store %arg6[%c0_31, %c0_32], %53 {strides = array<i32>} : memref<128x128xbf16, #tpu.memory_space<vmem>>, vector<128x128xbf16>,
    return
  }
  func.func @transform_0(%arg0: i32, %arg1: i32) -> (i32, i32, i32, i32) {
    %c0_i32 = arith.constant 0 : i32
    %c0_i32_0 = arith.constant 0 : i32
    %c0_i32_1 = arith.constant 0 : i32
    return %arg0, %arg1, %c0_i32, %c0_i32_0 : i32, i32, i32, i32
  }
  func.func @transform_1(%arg0: i32, %arg1: i32) -> (i32, i32, i32, i32) {
    %c1_i32 = arith.constant 1 : i32
    %0 = arith.addi %arg1, %c1_i32 : i32
    %c2_i32 = arith.constant 2 : i32
    %1 = arith.muli %0, %c2_i32 : i32
    %c0_i32 = arith.constant 0 : i32
    %c0_i32_0 = arith.constant 0 : i32
    %c0_i32_1 = arith.constant 0 : i32
    return %arg0, %1, %c0_i32, %c0_i32_0 : i32, i32, i32, i32
  }
  func.func @transform_2(%arg0: i32, %arg1: i32) -> (i32, i32, i32) {
    %c0_i32 = arith.constant 0 : i32
    %c0_i32_0 = arith.constant 0 : i32
    %c0_i32_1 = arith.constant 0 : i32
    %c0_i32_2 = arith.constant 0 : i32
    return %c0_i32, %c0_i32_0, %c0_i32_1 : i32, i32, i32
  }
  func.func @transform_3(%arg0: i32, %arg1: i32) -> (i32, i32) {
    %c0_i32 = arith.constant 0 : i32
    %c0_i32_0 = arith.constant 0 : i32
    %c0_i32_1 = arith.constant 0 : i32
    return %c0_i32, %c0_i32_0 : i32, i32
  }
  func.func @transform_4(%arg0: i32, %arg1: i32) -> (i32, i32) {
    %c1_i32 = arith.constant 1 : i32
    %0 = arith.muli %arg0, %c1_i32 : i32
    %1 = arith.addi %0, %arg1 : i32
    %c0_i32 = arith.constant 0 : i32
    %c0_i32_0 = arith.constant 0 : i32
    return %1, %c0_i32 : i32, i32
  }
  func.func @transform_5(%arg0: i32, %arg1: i32) -> (i32, i32, i32) {
    %c1_i32 = arith.constant 1 : i32
    %0 = arith.muli %arg0, %c1_i32 : i32
    %1 = arith.addi %0, %arg1 : i32
    %c0_i32 = arith.constant 0 : i32
    %c0_i32_0 = arith.constant 0 : i32
    %c0_i32_1 = arith.constant 0 : i32
    return %1, %c0_i32, %c0_i32_0 : i32, i32, i32
  }
  func.func @transform_6(%arg0: i32, %arg1: i32) -> (i32, i32, i32) {
    %c1_i32 = arith.constant 1 : i32
    %0 = arith.muli %arg0, %c1_i32 : i32
    %1 = arith.addi %0, %arg1 : i32
    %c0_i32 = arith.constant 0 : i32
    %c0_i32_0 = arith.constant 0 : i32
    %c0_i32_1 = arith.constant 0 : i32
    return %1, %c0_i32, %c0_i32_0 : i32, i32, i32
  }
}

module attributes {stable_mosaic.version = 11 : i64} {
  func.func @conv_stats_kernel(%arg0: i32, %arg1: i32, %arg2: memref<1x16x9x64xbf16, #tpu.memory_space<vmem>>, %arg3: memref<1x8x9x64xbf16, #tpu.memory_space<vmem>>, %arg4: memref<4x64x128xbf16, #tpu.memory_space<vmem>>, %arg5: memref<128x1xf32, #tpu.memory_space<vmem>>, %arg6: memref<128x128xbf16, #tpu.memory_space<vmem>>, %arg7: memref<1x1x128xf32, #tpu.memory_space<vmem>>, %arg8: memref<1x1x128xf32, #tpu.memory_space<vmem>>) attributes {dimension_semantics = [#tpu.dimension_semantics<parallel>, #tpu.dimension_semantics<parallel>], iteration_bounds = array<i64: 2, 1>, scalar_prefetch = 0 : i64, scratch_operands = 0 : i64, tpu.core_type = #tpu.core_type<tc>, window_params = [{transform_indices = @transform_0, window_bounds = array<i64: 1, 16, 9, 64>}, {transform_indices = @transform_1, window_bounds = array<i64: 1, 8, 9, 64>}, {pipeline_mode = #tpu.pipeline_mode<synchronous>, transform_indices = @transform_2, window_bounds = array<i64: 4, 64, 128>}, {pipeline_mode = #tpu.pipeline_mode<synchronous>, transform_indices = @transform_3, window_bounds = array<i64: 128, 1>}, {transform_indices = @transform_4, window_bounds = array<i64: 128, 128>}, {transform_indices = @transform_5, window_bounds = array<i64: 1, 1, 128>}, {transform_indices = @transform_6, window_bounds = array<i64: 1, 1, 128>}]} {
    %c0 = arith.constant 0 : index
    %c0_0 = arith.constant 0 : index
    %c0_1 = arith.constant 0 : index
    %c0_2 = arith.constant 0 : index
    %0 = vector.load %arg2[%c0, %c0_0, %c0_1, %c0_2] : memref<1x16x9x64xbf16, #tpu.memory_space<vmem>>, vector<1x16x9x64xbf16>
    %1 = vector.shape_cast %0 : vector<1x16x9x64xbf16> to vector<16x9x64xbf16>
    %c0_3 = arith.constant 0 : index
    %c0_4 = arith.constant 0 : index
    %c0_5 = arith.constant 0 : index
    %c0_6 = arith.constant 0 : index
    %2 = vector.load %arg3[%c0_3, %c0_4, %c0_5, %c0_6] : memref<1x8x9x64xbf16, #tpu.memory_space<vmem>>, vector<1x1x9x64xbf16>
    %3 = vector.shape_cast %2 : vector<1x1x9x64xbf16> to vector<1x9x64xbf16>
    %4 = tpu.concatenate %1, %3 in 0 : vector<16x9x64xbf16>, vector<1x9x64xbf16> -> vector<17x9x64xbf16>
    %cst = arith.constant 0.000000e+00 : f32
    %5 = vector.broadcast %cst : f32 to vector<128x128xf32>
    %6 = vector.extract_strided_slice %4 {offsets = [0, 0, 0], sizes = [16, 8, 64], strides = [1, 1, 1]} : vector<17x9x64xbf16> to vector<16x8x64xbf16>
    %7 = vector.shape_cast %6 : vector<16x8x64xbf16> to vector<128x64xbf16>
    %c0_7 = arith.constant 0 : index
    %c0_8 = arith.constant 0 : index
    %c0_9 = arith.constant 0 : index
    %8 = vector.load %arg4[%c0_7, %c0_8, %c0_9] : memref<4x64x128xbf16, #tpu.memory_space<vmem>>, vector<1x64x128xbf16>
    %9 = vector.shape_cast %8 : vector<1x64x128xbf16> to vector<64x128xbf16>
    %cst_10 = arith.constant dense<0.000000e+00> : vector<128x128xf32>
    %10 = tpu.matmul %7, %9, %cst_10 {dimension_numbers = #tpu.dot_dimension_numbers<[1], [0], [0], [1], [0, 0, 1, 1], [], []>} : vector<128x64xbf16>, vector<64x128xbf16>, vector<128x128xf32> -> vector<128x128xf32>
    %11 = arith.addf %5, %10 : vector<128x128xf32>
    %12 = vector.extract_strided_slice %4 {offsets = [0, 1, 0], sizes = [16, 8, 64], strides = [1, 1, 1]} : vector<17x9x64xbf16> to vector<16x8x64xbf16>
    %13 = vector.shape_cast %12 : vector<16x8x64xbf16> to vector<128x64xbf16>
    %c1 = arith.constant 1 : index
    %c0_11 = arith.constant 0 : index
    %c0_12 = arith.constant 0 : index
    %14 = vector.load %arg4[%c1, %c0_11, %c0_12] : memref<4x64x128xbf16, #tpu.memory_space<vmem>>, vector<1x64x128xbf16>
    %15 = vector.shape_cast %14 : vector<1x64x128xbf16> to vector<64x128xbf16>
    %cst_13 = arith.constant dense<0.000000e+00> : vector<128x128xf32>
    %16 = tpu.matmul %13, %15, %cst_13 {dimension_numbers = #tpu.dot_dimension_numbers<[1], [0], [0], [1], [0, 0, 1, 1], [], []>} : vector<128x64xbf16>, vector<64x128xbf16>, vector<128x128xf32> -> vector<128x128xf32>
    %17 = arith.addf %11, %16 : vector<128x128xf32>
    %18 = vector.extract_strided_slice %4 {offsets = [1, 0, 0], sizes = [16, 8, 64], strides = [1, 1, 1]} : vector<17x9x64xbf16> to vector<16x8x64xbf16>
    %19 = vector.shape_cast %18 : vector<16x8x64xbf16> to vector<128x64xbf16>
    %c2 = arith.constant 2 : index
    %c0_14 = arith.constant 0 : index
    %c0_15 = arith.constant 0 : index
    %20 = vector.load %arg4[%c2, %c0_14, %c0_15] : memref<4x64x128xbf16, #tpu.memory_space<vmem>>, vector<1x64x128xbf16>
    %21 = vector.shape_cast %20 : vector<1x64x128xbf16> to vector<64x128xbf16>
    %cst_16 = arith.constant dense<0.000000e+00> : vector<128x128xf32>
    %22 = tpu.matmul %19, %21, %cst_16 {dimension_numbers = #tpu.dot_dimension_numbers<[1], [0], [0], [1], [0, 0, 1, 1], [], []>} : vector<128x64xbf16>, vector<64x128xbf16>, vector<128x128xf32> -> vector<128x128xf32>
    %23 = arith.addf %17, %22 : vector<128x128xf32>
    %24 = vector.extract_strided_slice %4 {offsets = [1, 1, 0], sizes = [16, 8, 64], strides = [1, 1, 1]} : vector<17x9x64xbf16> to vector<16x8x64xbf16>
    %25 = vector.shape_cast %24 : vector<16x8x64xbf16> to vector<128x64xbf16>
    %c3 = arith.constant 3 : index
    %c0_17 = arith.constant 0 : index
    %c0_18 = arith.constant 0 : index
    %26 = vector.load %arg4[%c3, %c0_17, %c0_18] : memref<4x64x128xbf16, #tpu.memory_space<vmem>>, vector<1x64x128xbf16>
    %27 = vector.shape_cast %26 : vector<1x64x128xbf16> to vector<64x128xbf16>
    %cst_19 = arith.constant dense<0.000000e+00> : vector<128x128xf32>
    %28 = tpu.matmul %25, %27, %cst_19 {dimension_numbers = #tpu.dot_dimension_numbers<[1], [0], [0], [1], [0, 0, 1, 1], [], []>} : vector<128x64xbf16>, vector<64x128xbf16>, vector<128x128xf32> -> vector<128x128xf32>
    %29 = arith.addf %23, %28 : vector<128x128xf32>
    %c16_i32 = arith.constant 16 : i32
    %30 = arith.muli %arg1, %c16_i32 : i32
    %c3_i32 = arith.constant 3 : i32
    %31 = arith.subi %c3_i32, %30 : i32
    %c16_i32_20 = arith.constant 16 : i32
    %32 = arith.minsi %31, %c16_i32_20 : i32
    %c0_i32 = arith.constant 0 : i32
    %33 = arith.maxsi %32, %c0_i32 : i32
    %c8_i32 = arith.constant 8 : i32
    %34 = arith.muli %33, %c8_i32 : i32
    %35 = tpu.iota {dimensions = array<i32: 0>} : vector<128x1xi32>
    %c0_21 = arith.constant 0 : index
    %c0_22 = arith.constant 0 : index
    %36 = vector.load %arg5[%c0_21, %c0_22] : memref<128x1xf32, #tpu.memory_space<vmem>>, vector<128x1xf32>
    %37 = vector.broadcast %34 : i32 to vector<128x1xi32>
    %38 = arith.cmpi slt, %35, %37 : vector<128x1xi32>
    %39 = arith.extui %38 : vector<128x1xi1> to vector<128x1xi32>
    %40 = arith.sitofp %39 : vector<128x1xi32> to vector<128x1xf32>
    %41 = arith.mulf %36, %40 : vector<128x1xf32>
    %42 = vector.broadcast %41 : vector<128x1xf32> to vector<128x128xf32>
    %43 = arith.mulf %29, %42 : vector<128x128xf32>
    %cst_23 = arith.constant dense<0.000000e+00> : vector<128xf32>
    %44 = vector.multi_reduction <add>, %43, %cst_23 [0] : vector<128x128xf32> to vector<128xf32>
    %45 = vector.shape_cast %44 : vector<128xf32> to vector<1x128xf32>
    %46 = vector.shape_cast %45 : vector<1x128xf32> to vector<1x1x128xf32>
    %c0_24 = arith.constant 0 : index
    %c0_25 = arith.constant 0 : index
    %c0_26 = arith.constant 0 : index
    %47 = vector.load %arg7[%c0_24, %c0_25, %c0_26] : memref<1x1x128xf32, #tpu.memory_space<vmem>>, vector<1x1x128xf32>
    tpu.vector_store %arg7[%c0_24, %c0_25, %c0_26], %46 {strides = array<i32>} : memref<1x1x128xf32, #tpu.memory_space<vmem>>, vector<1x1x128xf32>,
    %48 = arith.mulf %43, %43 : vector<128x128xf32>
    %cst_27 = arith.constant dense<0.000000e+00> : vector<128xf32>
    %49 = vector.multi_reduction <add>, %48, %cst_27 [0] : vector<128x128xf32> to vector<128xf32>
    %50 = vector.shape_cast %49 : vector<128xf32> to vector<1x128xf32>
    %51 = vector.shape_cast %50 : vector<1x128xf32> to vector<1x1x128xf32>
    %c0_28 = arith.constant 0 : index
    %c0_29 = arith.constant 0 : index
    %c0_30 = arith.constant 0 : index
    %52 = vector.load %arg8[%c0_28, %c0_29, %c0_30] : memref<1x1x128xf32, #tpu.memory_space<vmem>>, vector<1x1x128xf32>
    tpu.vector_store %arg8[%c0_28, %c0_29, %c0_30], %51 {strides = array<i32>} : memref<1x1x128xf32, #tpu.memory_space<vmem>>, vector<1x1x128xf32>,
    %53 = arith.truncf %43 : vector<128x128xf32> to vector<128x128xbf16>
    %c0_31 = arith.constant 0 : index
    %c0_32 = arith.constant 0 : index
    %54 = vector.load %arg6[%c0_31, %c0_32] : memref<128x128xbf16, #tpu.memory_space<vmem>>, vector<128x128xbf16>
    tpu.vector_store %arg6[%c0_31, %c0_32], %53 {strides = array<i32>} : memref<128x128xbf16, #tpu.memory_space<vmem>>, vector<128x128xbf16>,
    return
  }
  func.func @transform_0(%arg0: i32, %arg1: i32) -> (i32, i32, i32, i32) {
    %c0_i32 = arith.constant 0 : i32
    %c0_i32_0 = arith.constant 0 : i32
    %c0_i32_1 = arith.constant 0 : i32
    return %arg0, %arg1, %c0_i32, %c0_i32_0 : i32, i32, i32, i32
  }
  func.func @transform_1(%arg0: i32, %arg1: i32) -> (i32, i32, i32, i32) {
    %c1_i32 = arith.constant 1 : i32
    %0 = arith.addi %arg1, %c1_i32 : i32
    %c2_i32 = arith.constant 2 : i32
    %1 = arith.muli %0, %c2_i32 : i32
    %c0_i32 = arith.constant 0 : i32
    %c0_i32_0 = arith.constant 0 : i32
    %c0_i32_1 = arith.constant 0 : i32
    return %arg0, %1, %c0_i32, %c0_i32_0 : i32, i32, i32, i32
  }
  func.func @transform_2(%arg0: i32, %arg1: i32) -> (i32, i32, i32) {
    %c0_i32 = arith.constant 0 : i32
    %c0_i32_0 = arith.constant 0 : i32
    %c0_i32_1 = arith.constant 0 : i32
    %c0_i32_2 = arith.constant 0 : i32
    return %c0_i32, %c0_i32_0, %c0_i32_1 : i32, i32, i32
  }
  func.func @transform_3(%arg0: i32, %arg1: i32) -> (i32, i32) {
    %c0_i32 = arith.constant 0 : i32
    %c0_i32_0 = arith.constant 0 : i32
    %c0_i32_1 = arith.constant 0 : i32
    return %c0_i32, %c0_i32_0 : i32, i32
  }
  func.func @transform_4(%arg0: i32, %arg1: i32) -> (i32, i32) {
    %c1_i32 = arith.constant 1 : i32
    %0 = arith.muli %arg0, %c1_i32 : i32
    %1 = arith.addi %0, %arg1 : i32
    %c0_i32 = arith.constant 0 : i32
    %c0_i32_0 = arith.constant 0 : i32
    return %1, %c0_i32 : i32, i32
  }
  func.func @transform_5(%arg0: i32, %arg1: i32) -> (i32, i32, i32) {
    %c1_i32 = arith.constant 1 : i32
    %0 = arith.muli %arg0, %c1_i32 : i32
    %1 = arith.addi %0, %arg1 : i32
    %c0_i32 = arith.constant 0 : i32
    %c0_i32_0 = arith.constant 0 : i32
    %c0_i32_1 = arith.constant 0 : i32
    return %1, %c0_i32, %c0_i32_0 : i32, i32, i32
  }
  func.func @transform_6(%arg0: i32, %arg1: i32) -> (i32, i32, i32) {
    %c1_i32 = arith.constant 1 : i32
    %0 = arith.muli %arg0, %c1_i32 : i32
    %1 = arith.addi %0, %arg1 : i32
    %c0_i32 = arith.constant 0 : i32
    %c0_i32_0 = arith.constant 0 : i32
    %c0_i32_1 = arith.constant 0 : i32
    return %1, %c0_i32, %c0_i32_0 : i32, i32, i32
  }
}

module attributes {stable_mosaic.version = 11 : i64} {
  func.func @conv_stats_kernel(%arg0: i32, %arg1: i32, %arg2: memref<1x16x11x32xbf16, #tpu.memory_space<vmem>>, %arg3: memref<1x8x11x32xbf16, #tpu.memory_space<vmem>>, %arg4: memref<16x32x128xbf16, #tpu.memory_space<vmem>>, %arg5: memref<128x1xf32, #tpu.memory_space<vmem>>, %arg6: memref<128x128xbf16, #tpu.memory_space<vmem>>, %arg7: memref<1x1x128xf32, #tpu.memory_space<vmem>>, %arg8: memref<1x1x128xf32, #tpu.memory_space<vmem>>) attributes {dimension_semantics = [#tpu.dimension_semantics<parallel>, #tpu.dimension_semantics<parallel>], iteration_bounds = array<i64: 2, 1>, scalar_prefetch = 0 : i64, scratch_operands = 0 : i64, tpu.core_type = #tpu.core_type<tc>, window_params = [{transform_indices = @transform_0, window_bounds = array<i64: 1, 16, 11, 32>}, {transform_indices = @transform_1, window_bounds = array<i64: 1, 8, 11, 32>}, {pipeline_mode = #tpu.pipeline_mode<synchronous>, transform_indices = @transform_2, window_bounds = array<i64: 16, 32, 128>}, {pipeline_mode = #tpu.pipeline_mode<synchronous>, transform_indices = @transform_3, window_bounds = array<i64: 128, 1>}, {transform_indices = @transform_4, window_bounds = array<i64: 128, 128>}, {transform_indices = @transform_5, window_bounds = array<i64: 1, 1, 128>}, {transform_indices = @transform_6, window_bounds = array<i64: 1, 1, 128>}]} {
    %c0 = arith.constant 0 : index
    %c0_0 = arith.constant 0 : index
    %c0_1 = arith.constant 0 : index
    %c0_2 = arith.constant 0 : index
    %0 = vector.load %arg2[%c0, %c0_0, %c0_1, %c0_2] : memref<1x16x11x32xbf16, #tpu.memory_space<vmem>>, vector<1x16x11x32xbf16>
    %1 = vector.shape_cast %0 : vector<1x16x11x32xbf16> to vector<16x11x32xbf16>
    %c0_3 = arith.constant 0 : index
    %c0_4 = arith.constant 0 : index
    %c0_5 = arith.constant 0 : index
    %c0_6 = arith.constant 0 : index
    %2 = vector.load %arg3[%c0_3, %c0_4, %c0_5, %c0_6] : memref<1x8x11x32xbf16, #tpu.memory_space<vmem>>, vector<1x3x11x32xbf16>
    %3 = vector.shape_cast %2 : vector<1x3x11x32xbf16> to vector<3x11x32xbf16>
    %4 = tpu.concatenate %1, %3 in 0 : vector<16x11x32xbf16>, vector<3x11x32xbf16> -> vector<19x11x32xbf16>
    %cst = arith.constant 0.000000e+00 : f32
    %5 = vector.broadcast %cst : f32 to vector<128x128xf32>
    %6 = vector.extract_strided_slice %4 {offsets = [0, 0, 0], sizes = [16, 8, 32], strides = [1, 1, 1]} : vector<19x11x32xbf16> to vector<16x8x32xbf16>
    %7 = vector.shape_cast %6 : vector<16x8x32xbf16> to vector<128x32xbf16>
    %c0_7 = arith.constant 0 : index
    %c0_8 = arith.constant 0 : index
    %c0_9 = arith.constant 0 : index
    %8 = vector.load %arg4[%c0_7, %c0_8, %c0_9] : memref<16x32x128xbf16, #tpu.memory_space<vmem>>, vector<1x32x128xbf16>
    %9 = vector.shape_cast %8 : vector<1x32x128xbf16> to vector<32x128xbf16>
    %cst_10 = arith.constant dense<0.000000e+00> : vector<128x128xf32>
    %10 = tpu.matmul %7, %9, %cst_10 {dimension_numbers = #tpu.dot_dimension_numbers<[1], [0], [0], [1], [0, 0, 1, 1], [], []>} : vector<128x32xbf16>, vector<32x128xbf16>, vector<128x128xf32> -> vector<128x128xf32>
    %11 = arith.addf %5, %10 : vector<128x128xf32>
    %12 = vector.extract_strided_slice %4 {offsets = [0, 1, 0], sizes = [16, 8, 32], strides = [1, 1, 1]} : vector<19x11x32xbf16> to vector<16x8x32xbf16>
    %13 = vector.shape_cast %12 : vector<16x8x32xbf16> to vector<128x32xbf16>
    %c1 = arith.constant 1 : index
    %c0_11 = arith.constant 0 : index
    %c0_12 = arith.constant 0 : index
    %14 = vector.load %arg4[%c1, %c0_11, %c0_12] : memref<16x32x128xbf16, #tpu.memory_space<vmem>>, vector<1x32x128xbf16>
    %15 = vector.shape_cast %14 : vector<1x32x128xbf16> to vector<32x128xbf16>
    %cst_13 = arith.constant dense<0.000000e+00> : vector<128x128xf32>
    %16 = tpu.matmul %13, %15, %cst_13 {dimension_numbers = #tpu.dot_dimension_numbers<[1], [0], [0], [1], [0, 0, 1, 1], [], []>} : vector<128x32xbf16>, vector<32x128xbf16>, vector<128x128xf32> -> vector<128x128xf32>
    %17 = arith.addf %11, %16 : vector<128x128xf32>
    %18 = vector.extract_strided_slice %4 {offsets = [0, 2, 0], sizes = [16, 8, 32], strides = [1, 1, 1]} : vector<19x11x32xbf16> to vector<16x8x32xbf16>
    %19 = vector.shape_cast %18 : vector<16x8x32xbf16> to vector<128x32xbf16>
    %c2 = arith.constant 2 : index
    %c0_14 = arith.constant 0 : index
    %c0_15 = arith.constant 0 : index
    %20 = vector.load %arg4[%c2, %c0_14, %c0_15] : memref<16x32x128xbf16, #tpu.memory_space<vmem>>, vector<1x32x128xbf16>
    %21 = vector.shape_cast %20 : vector<1x32x128xbf16> to vector<32x128xbf16>
    %cst_16 = arith.constant dense<0.000000e+00> : vector<128x128xf32>
    %22 = tpu.matmul %19, %21, %cst_16 {dimension_numbers = #tpu.dot_dimension_numbers<[1], [0], [0], [1], [0, 0, 1, 1], [], []>} : vector<128x32xbf16>, vector<32x128xbf16>, vector<128x128xf32> -> vector<128x128xf32>
    %23 = arith.addf %17, %22 : vector<128x128xf32>
    %24 = vector.extract_strided_slice %4 {offsets = [0, 3, 0], sizes = [16, 8, 32], strides = [1, 1, 1]} : vector<19x11x32xbf16> to vector<16x8x32xbf16>
    %25 = vector.shape_cast %24 : vector<16x8x32xbf16> to vector<128x32xbf16>
    %c3 = arith.constant 3 : index
    %c0_17 = arith.constant 0 : index
    %c0_18 = arith.constant 0 : index
    %26 = vector.load %arg4[%c3, %c0_17, %c0_18] : memref<16x32x128xbf16, #tpu.memory_space<vmem>>, vector<1x32x128xbf16>
    %27 = vector.shape_cast %26 : vector<1x32x128xbf16> to vector<32x128xbf16>
    %cst_19 = arith.constant dense<0.000000e+00> : vector<128x128xf32>
    %28 = tpu.matmul %25, %27, %cst_19 {dimension_numbers = #tpu.dot_dimension_numbers<[1], [0], [0], [1], [0, 0, 1, 1], [], []>} : vector<128x32xbf16>, vector<32x128xbf16>, vector<128x128xf32> -> vector<128x128xf32>
    %29 = arith.addf %23, %28 : vector<128x128xf32>
    %30 = vector.extract_strided_slice %4 {offsets = [1, 0, 0], sizes = [16, 8, 32], strides = [1, 1, 1]} : vector<19x11x32xbf16> to vector<16x8x32xbf16>
    %31 = vector.shape_cast %30 : vector<16x8x32xbf16> to vector<128x32xbf16>
    %c4 = arith.constant 4 : index
    %c0_20 = arith.constant 0 : index
    %c0_21 = arith.constant 0 : index
    %32 = vector.load %arg4[%c4, %c0_20, %c0_21] : memref<16x32x128xbf16, #tpu.memory_space<vmem>>, vector<1x32x128xbf16>
    %33 = vector.shape_cast %32 : vector<1x32x128xbf16> to vector<32x128xbf16>
    %cst_22 = arith.constant dense<0.000000e+00> : vector<128x128xf32>
    %34 = tpu.matmul %31, %33, %cst_22 {dimension_numbers = #tpu.dot_dimension_numbers<[1], [0], [0], [1], [0, 0, 1, 1], [], []>} : vector<128x32xbf16>, vector<32x128xbf16>, vector<128x128xf32> -> vector<128x128xf32>
    %35 = arith.addf %29, %34 : vector<128x128xf32>
    %36 = vector.extract_strided_slice %4 {offsets = [1, 1, 0], sizes = [16, 8, 32], strides = [1, 1, 1]} : vector<19x11x32xbf16> to vector<16x8x32xbf16>
    %37 = vector.shape_cast %36 : vector<16x8x32xbf16> to vector<128x32xbf16>
    %c5 = arith.constant 5 : index
    %c0_23 = arith.constant 0 : index
    %c0_24 = arith.constant 0 : index
    %38 = vector.load %arg4[%c5, %c0_23, %c0_24] : memref<16x32x128xbf16, #tpu.memory_space<vmem>>, vector<1x32x128xbf16>
    %39 = vector.shape_cast %38 : vector<1x32x128xbf16> to vector<32x128xbf16>
    %cst_25 = arith.constant dense<0.000000e+00> : vector<128x128xf32>
    %40 = tpu.matmul %37, %39, %cst_25 {dimension_numbers = #tpu.dot_dimension_numbers<[1], [0], [0], [1], [0, 0, 1, 1], [], []>} : vector<128x32xbf16>, vector<32x128xbf16>, vector<128x128xf32> -> vector<128x128xf32>
    %41 = arith.addf %35, %40 : vector<128x128xf32>
    %42 = vector.extract_strided_slice %4 {offsets = [1, 2, 0], sizes = [16, 8, 32], strides = [1, 1, 1]} : vector<19x11x32xbf16> to vector<16x8x32xbf16>
    %43 = vector.shape_cast %42 : vector<16x8x32xbf16> to vector<128x32xbf16>
    %c6 = arith.constant 6 : index
    %c0_26 = arith.constant 0 : index
    %c0_27 = arith.constant 0 : index
    %44 = vector.load %arg4[%c6, %c0_26, %c0_27] : memref<16x32x128xbf16, #tpu.memory_space<vmem>>, vector<1x32x128xbf16>
    %45 = vector.shape_cast %44 : vector<1x32x128xbf16> to vector<32x128xbf16>
    %cst_28 = arith.constant dense<0.000000e+00> : vector<128x128xf32>
    %46 = tpu.matmul %43, %45, %cst_28 {dimension_numbers = #tpu.dot_dimension_numbers<[1], [0], [0], [1], [0, 0, 1, 1], [], []>} : vector<128x32xbf16>, vector<32x128xbf16>, vector<128x128xf32> -> vector<128x128xf32>
    %47 = arith.addf %41, %46 : vector<128x128xf32>
    %48 = vector.extract_strided_slice %4 {offsets = [1, 3, 0], sizes = [16, 8, 32], strides = [1, 1, 1]} : vector<19x11x32xbf16> to vector<16x8x32xbf16>
    %49 = vector.shape_cast %48 : vector<16x8x32xbf16> to vector<128x32xbf16>
    %c7 = arith.constant 7 : index
    %c0_29 = arith.constant 0 : index
    %c0_30 = arith.constant 0 : index
    %50 = vector.load %arg4[%c7, %c0_29, %c0_30] : memref<16x32x128xbf16, #tpu.memory_space<vmem>>, vector<1x32x128xbf16>
    %51 = vector.shape_cast %50 : vector<1x32x128xbf16> to vector<32x128xbf16>
    %cst_31 = arith.constant dense<0.000000e+00> : vector<128x128xf32>
    %52 = tpu.matmul %49, %51, %cst_31 {dimension_numbers = #tpu.dot_dimension_numbers<[1], [0], [0], [1], [0, 0, 1, 1], [], []>} : vector<128x32xbf16>, vector<32x128xbf16>, vector<128x128xf32> -> vector<128x128xf32>
    %53 = arith.addf %47, %52 : vector<128x128xf32>
    %54 = vector.extract_strided_slice %4 {offsets = [2, 0, 0], sizes = [16, 8, 32], strides = [1, 1, 1]} : vector<19x11x32xbf16> to vector<16x8x32xbf16>
    %55 = vector.shape_cast %54 : vector<16x8x32xbf16> to vector<128x32xbf16>
    %c8 = arith.constant 8 : index
    %c0_32 = arith.constant 0 : index
    %c0_33 = arith.constant 0 : index
    %56 = vector.load %arg4[%c8, %c0_32, %c0_33] : memref<16x32x128xbf16, #tpu.memory_space<vmem>>, vector<1x32x128xbf16>
    %57 = vector.shape_cast %56 : vector<1x32x128xbf16> to vector<32x128xbf16>
    %cst_34 = arith.constant dense<0.000000e+00> : vector<128x128xf32>
    %58 = tpu.matmul %55, %57, %cst_34 {dimension_numbers = #tpu.dot_dimension_numbers<[1], [0], [0], [1], [0, 0, 1, 1], [], []>} : vector<128x32xbf16>, vector<32x128xbf16>, vector<128x128xf32> -> vector<128x128xf32>
    %59 = arith.addf %53, %58 : vector<128x128xf32>
    %60 = vector.extract_strided_slice %4 {offsets = [2, 1, 0], sizes = [16, 8, 32], strides = [1, 1, 1]} : vector<19x11x32xbf16> to vector<16x8x32xbf16>
    %61 = vector.shape_cast %60 : vector<16x8x32xbf16> to vector<128x32xbf16>
    %c9 = arith.constant 9 : index
    %c0_35 = arith.constant 0 : index
    %c0_36 = arith.constant 0 : index
    %62 = vector.load %arg4[%c9, %c0_35, %c0_36] : memref<16x32x128xbf16, #tpu.memory_space<vmem>>, vector<1x32x128xbf16>
    %63 = vector.shape_cast %62 : vector<1x32x128xbf16> to vector<32x128xbf16>
    %cst_37 = arith.constant dense<0.000000e+00> : vector<128x128xf32>
    %64 = tpu.matmul %61, %63, %cst_37 {dimension_numbers = #tpu.dot_dimension_numbers<[1], [0], [0], [1], [0, 0, 1, 1], [], []>} : vector<128x32xbf16>, vector<32x128xbf16>, vector<128x128xf32> -> vector<128x128xf32>
    %65 = arith.addf %59, %64 : vector<128x128xf32>
    %66 = vector.extract_strided_slice %4 {offsets = [2, 2, 0], sizes = [16, 8, 32], strides = [1, 1, 1]} : vector<19x11x32xbf16> to vector<16x8x32xbf16>
    %67 = vector.shape_cast %66 : vector<16x8x32xbf16> to vector<128x32xbf16>
    %c10 = arith.constant 10 : index
    %c0_38 = arith.constant 0 : index
    %c0_39 = arith.constant 0 : index
    %68 = vector.load %arg4[%c10, %c0_38, %c0_39] : memref<16x32x128xbf16, #tpu.memory_space<vmem>>, vector<1x32x128xbf16>
    %69 = vector.shape_cast %68 : vector<1x32x128xbf16> to vector<32x128xbf16>
    %cst_40 = arith.constant dense<0.000000e+00> : vector<128x128xf32>
    %70 = tpu.matmul %67, %69, %cst_40 {dimension_numbers = #tpu.dot_dimension_numbers<[1], [0], [0], [1], [0, 0, 1, 1], [], []>} : vector<128x32xbf16>, vector<32x128xbf16>, vector<128x128xf32> -> vector<128x128xf32>
    %71 = arith.addf %65, %70 : vector<128x128xf32>
    %72 = vector.extract_strided_slice %4 {offsets = [2, 3, 0], sizes = [16, 8, 32], strides = [1, 1, 1]} : vector<19x11x32xbf16> to vector<16x8x32xbf16>
    %73 = vector.shape_cast %72 : vector<16x8x32xbf16> to vector<128x32xbf16>
    %c11 = arith.constant 11 : index
    %c0_41 = arith.constant 0 : index
    %c0_42 = arith.constant 0 : index
    %74 = vector.load %arg4[%c11, %c0_41, %c0_42] : memref<16x32x128xbf16, #tpu.memory_space<vmem>>, vector<1x32x128xbf16>
    %75 = vector.shape_cast %74 : vector<1x32x128xbf16> to vector<32x128xbf16>
    %cst_43 = arith.constant dense<0.000000e+00> : vector<128x128xf32>
    %76 = tpu.matmul %73, %75, %cst_43 {dimension_numbers = #tpu.dot_dimension_numbers<[1], [0], [0], [1], [0, 0, 1, 1], [], []>} : vector<128x32xbf16>, vector<32x128xbf16>, vector<128x128xf32> -> vector<128x128xf32>
    %77 = arith.addf %71, %76 : vector<128x128xf32>
    %78 = vector.extract_strided_slice %4 {offsets = [3, 0, 0], sizes = [16, 8, 32], strides = [1, 1, 1]} : vector<19x11x32xbf16> to vector<16x8x32xbf16>
    %79 = vector.shape_cast %78 : vector<16x8x32xbf16> to vector<128x32xbf16>
    %c12 = arith.constant 12 : index
    %c0_44 = arith.constant 0 : index
    %c0_45 = arith.constant 0 : index
    %80 = vector.load %arg4[%c12, %c0_44, %c0_45] : memref<16x32x128xbf16, #tpu.memory_space<vmem>>, vector<1x32x128xbf16>
    %81 = vector.shape_cast %80 : vector<1x32x128xbf16> to vector<32x128xbf16>
    %cst_46 = arith.constant dense<0.000000e+00> : vector<128x128xf32>
    %82 = tpu.matmul %79, %81, %cst_46 {dimension_numbers = #tpu.dot_dimension_numbers<[1], [0], [0], [1], [0, 0, 1, 1], [], []>} : vector<128x32xbf16>, vector<32x128xbf16>, vector<128x128xf32> -> vector<128x128xf32>
    %83 = arith.addf %77, %82 : vector<128x128xf32>
    %84 = vector.extract_strided_slice %4 {offsets = [3, 1, 0], sizes = [16, 8, 32], strides = [1, 1, 1]} : vector<19x11x32xbf16> to vector<16x8x32xbf16>
    %85 = vector.shape_cast %84 : vector<16x8x32xbf16> to vector<128x32xbf16>
    %c13 = arith.constant 13 : index
    %c0_47 = arith.constant 0 : index
    %c0_48 = arith.constant 0 : index
    %86 = vector.load %arg4[%c13, %c0_47, %c0_48] : memref<16x32x128xbf16, #tpu.memory_space<vmem>>, vector<1x32x128xbf16>
    %87 = vector.shape_cast %86 : vector<1x32x128xbf16> to vector<32x128xbf16>
    %cst_49 = arith.constant dense<0.000000e+00> : vector<128x128xf32>
    %88 = tpu.matmul %85, %87, %cst_49 {dimension_numbers = #tpu.dot_dimension_numbers<[1], [0], [0], [1], [0, 0, 1, 1], [], []>} : vector<128x32xbf16>, vector<32x128xbf16>, vector<128x128xf32> -> vector<128x128xf32>
    %89 = arith.addf %83, %88 : vector<128x128xf32>
    %90 = vector.extract_strided_slice %4 {offsets = [3, 2, 0], sizes = [16, 8, 32], strides = [1, 1, 1]} : vector<19x11x32xbf16> to vector<16x8x32xbf16>
    %91 = vector.shape_cast %90 : vector<16x8x32xbf16> to vector<128x32xbf16>
    %c14 = arith.constant 14 : index
    %c0_50 = arith.constant 0 : index
    %c0_51 = arith.constant 0 : index
    %92 = vector.load %arg4[%c14, %c0_50, %c0_51] : memref<16x32x128xbf16, #tpu.memory_space<vmem>>, vector<1x32x128xbf16>
    %93 = vector.shape_cast %92 : vector<1x32x128xbf16> to vector<32x128xbf16>
    %cst_52 = arith.constant dense<0.000000e+00> : vector<128x128xf32>
    %94 = tpu.matmul %91, %93, %cst_52 {dimension_numbers = #tpu.dot_dimension_numbers<[1], [0], [0], [1], [0, 0, 1, 1], [], []>} : vector<128x32xbf16>, vector<32x128xbf16>, vector<128x128xf32> -> vector<128x128xf32>
    %95 = arith.addf %89, %94 : vector<128x128xf32>
    %96 = vector.extract_strided_slice %4 {offsets = [3, 3, 0], sizes = [16, 8, 32], strides = [1, 1, 1]} : vector<19x11x32xbf16> to vector<16x8x32xbf16>
    %97 = vector.shape_cast %96 : vector<16x8x32xbf16> to vector<128x32xbf16>
    %c15 = arith.constant 15 : index
    %c0_53 = arith.constant 0 : index
    %c0_54 = arith.constant 0 : index
    %98 = vector.load %arg4[%c15, %c0_53, %c0_54] : memref<16x32x128xbf16, #tpu.memory_space<vmem>>, vector<1x32x128xbf16>
    %99 = vector.shape_cast %98 : vector<1x32x128xbf16> to vector<32x128xbf16>
    %cst_55 = arith.constant dense<0.000000e+00> : vector<128x128xf32>
    %100 = tpu.matmul %97, %99, %cst_55 {dimension_numbers = #tpu.dot_dimension_numbers<[1], [0], [0], [1], [0, 0, 1, 1], [], []>} : vector<128x32xbf16>, vector<32x128xbf16>, vector<128x128xf32> -> vector<128x128xf32>
    %101 = arith.addf %95, %100 : vector<128x128xf32>
    %c16_i32 = arith.constant 16 : i32
    %102 = arith.muli %arg1, %c16_i32 : i32
    %c4_i32 = arith.constant 4 : i32
    %103 = arith.subi %c4_i32, %102 : i32
    %c16_i32_56 = arith.constant 16 : i32
    %104 = arith.minsi %103, %c16_i32_56 : i32
    %c0_i32 = arith.constant 0 : i32
    %105 = arith.maxsi %104, %c0_i32 : i32
    %c8_i32 = arith.constant 8 : i32
    %106 = arith.muli %105, %c8_i32 : i32
    %107 = tpu.iota {dimensions = array<i32: 0>} : vector<128x1xi32>
    %c0_57 = arith.constant 0 : index
    %c0_58 = arith.constant 0 : index
    %108 = vector.load %arg5[%c0_57, %c0_58] : memref<128x1xf32, #tpu.memory_space<vmem>>, vector<128x1xf32>
    %109 = vector.broadcast %106 : i32 to vector<128x1xi32>
    %110 = arith.cmpi slt, %107, %109 : vector<128x1xi32>
    %111 = arith.extui %110 : vector<128x1xi1> to vector<128x1xi32>
    %112 = arith.sitofp %111 : vector<128x1xi32> to vector<128x1xf32>
    %113 = arith.mulf %108, %112 : vector<128x1xf32>
    %114 = vector.broadcast %113 : vector<128x1xf32> to vector<128x128xf32>
    %115 = arith.mulf %101, %114 : vector<128x128xf32>
    %cst_59 = arith.constant dense<0.000000e+00> : vector<128xf32>
    %116 = vector.multi_reduction <add>, %115, %cst_59 [0] : vector<128x128xf32> to vector<128xf32>
    %117 = vector.shape_cast %116 : vector<128xf32> to vector<1x128xf32>
    %118 = vector.shape_cast %117 : vector<1x128xf32> to vector<1x1x128xf32>
    %c0_60 = arith.constant 0 : index
    %c0_61 = arith.constant 0 : index
    %c0_62 = arith.constant 0 : index
    %119 = vector.load %arg7[%c0_60, %c0_61, %c0_62] : memref<1x1x128xf32, #tpu.memory_space<vmem>>, vector<1x1x128xf32>
    tpu.vector_store %arg7[%c0_60, %c0_61, %c0_62], %118 {strides = array<i32>} : memref<1x1x128xf32, #tpu.memory_space<vmem>>, vector<1x1x128xf32>,
    %120 = arith.mulf %115, %115 : vector<128x128xf32>
    %cst_63 = arith.constant dense<0.000000e+00> : vector<128xf32>
    %121 = vector.multi_reduction <add>, %120, %cst_63 [0] : vector<128x128xf32> to vector<128xf32>
    %122 = vector.shape_cast %121 : vector<128xf32> to vector<1x128xf32>
    %123 = vector.shape_cast %122 : vector<1x128xf32> to vector<1x1x128xf32>
    %c0_64 = arith.constant 0 : index
    %c0_65 = arith.constant 0 : index
    %c0_66 = arith.constant 0 : index
    %124 = vector.load %arg8[%c0_64, %c0_65, %c0_66] : memref<1x1x128xf32, #tpu.memory_space<vmem>>, vector<1x1x128xf32>
    tpu.vector_store %arg8[%c0_64, %c0_65, %c0_66], %123 {strides = array<i32>} : memref<1x1x128xf32, #tpu.memory_space<vmem>>, vector<1x1x128xf32>,
    %125 = arith.truncf %115 : vector<128x128xf32> to vector<128x128xbf16>
    %c0_67 = arith.constant 0 : index
    %c0_68 = arith.constant 0 : index
    %126 = vector.load %arg6[%c0_67, %c0_68] : memref<128x128xbf16, #tpu.memory_space<vmem>>, vector<128x128xbf16>
    tpu.vector_store %arg6[%c0_67, %c0_68], %125 {strides = array<i32>} : memref<128x128xbf16, #tpu.memory_space<vmem>>, vector<128x128xbf16>,
    return
  }
  func.func @transform_0(%arg0: i32, %arg1: i32) -> (i32, i32, i32, i32) {
    %c0_i32 = arith.constant 0 : i32
    %c0_i32_0 = arith.constant 0 : i32
    %c0_i32_1 = arith.constant 0 : i32
    return %arg0, %arg1, %c0_i32, %c0_i32_0 : i32, i32, i32, i32
  }
  func.func @transform_1(%arg0: i32, %arg1: i32) -> (i32, i32, i32, i32) {
    %c1_i32 = arith.constant 1 : i32
    %0 = arith.addi %arg1, %c1_i32 : i32
    %c2_i32 = arith.constant 2 : i32
    %1 = arith.muli %0, %c2_i32 : i32
    %c0_i32 = arith.constant 0 : i32
    %c0_i32_0 = arith.constant 0 : i32
    %c0_i32_1 = arith.constant 0 : i32
    return %arg0, %1, %c0_i32, %c0_i32_0 : i32, i32, i32, i32
  }
  func.func @transform_2(%arg0: i32, %arg1: i32) -> (i32, i32, i32) {
    %c0_i32 = arith.constant 0 : i32
    %c0_i32_0 = arith.constant 0 : i32
    %c0_i32_1 = arith.constant 0 : i32
    %c0_i32_2 = arith.constant 0 : i32
    return %c0_i32, %c0_i32_0, %c0_i32_1 : i32, i32, i32
  }
  func.func @transform_3(%arg0: i32, %arg1: i32) -> (i32, i32) {
    %c0_i32 = arith.constant 0 : i32
    %c0_i32_0 = arith.constant 0 : i32
    %c0_i32_1 = arith.constant 0 : i32
    return %c0_i32, %c0_i32_0 : i32, i32
  }
  func.func @transform_4(%arg0: i32, %arg1: i32) -> (i32, i32) {
    %c1_i32 = arith.constant 1 : i32
    %0 = arith.muli %arg0, %c1_i32 : i32
    %1 = arith.addi %0, %arg1 : i32
    %c0_i32 = arith.constant 0 : i32
    %c0_i32_0 = arith.constant 0 : i32
    return %1, %c0_i32 : i32, i32
  }
  func.func @transform_5(%arg0: i32, %arg1: i32) -> (i32, i32, i32) {
    %c1_i32 = arith.constant 1 : i32
    %0 = arith.muli %arg0, %c1_i32 : i32
    %1 = arith.addi %0, %arg1 : i32
    %c0_i32 = arith.constant 0 : i32
    %c0_i32_0 = arith.constant 0 : i32
    %c0_i32_1 = arith.constant 0 : i32
    return %1, %c0_i32, %c0_i32_0 : i32, i32, i32
  }
  func.func @transform_6(%arg0: i32, %arg1: i32) -> (i32, i32, i32) {
    %c1_i32 = arith.constant 1 : i32
    %0 = arith.muli %arg0, %c1_i32 : i32
    %1 = arith.addi %0, %arg1 : i32
    %c0_i32 = arith.constant 0 : i32
    %c0_i32_0 = arith.constant 0 : i32
    %c0_i32_1 = arith.constant 0 : i32
    return %1, %c0_i32, %c0_i32_0 : i32, i32, i32
  }
}

module attributes {stable_mosaic.version = 11 : i64} {
  func.func @conv_bias_act_kernel(%arg0: i32, %arg1: i32, %arg2: memref<1x16x11x64xbf16, #tpu.memory_space<vmem>>, %arg3: memref<1x8x11x64xbf16, #tpu.memory_space<vmem>>, %arg4: memref<16x64x128xbf16, #tpu.memory_space<vmem>>, %arg5: memref<1x128xf32, #tpu.memory_space<vmem>>, %arg6: memref<128x128xf32, #tpu.memory_space<vmem>>) attributes {dimension_semantics = [#tpu.dimension_semantics<parallel>, #tpu.dimension_semantics<parallel>], iteration_bounds = array<i64: 2, 1>, scalar_prefetch = 0 : i64, scratch_operands = 0 : i64, tpu.core_type = #tpu.core_type<tc>, window_params = [{transform_indices = @transform_0, window_bounds = array<i64: 1, 16, 11, 64>}, {transform_indices = @transform_1, window_bounds = array<i64: 1, 8, 11, 64>}, {pipeline_mode = #tpu.pipeline_mode<synchronous>, transform_indices = @transform_2, window_bounds = array<i64: 16, 64, 128>}, {pipeline_mode = #tpu.pipeline_mode<synchronous>, transform_indices = @transform_3, window_bounds = array<i64: 1, 128>}, {transform_indices = @transform_4, window_bounds = array<i64: 128, 128>}]} {
    %c0 = arith.constant 0 : index
    %c0_0 = arith.constant 0 : index
    %c0_1 = arith.constant 0 : index
    %c0_2 = arith.constant 0 : index
    %0 = vector.load %arg2[%c0, %c0_0, %c0_1, %c0_2] : memref<1x16x11x64xbf16, #tpu.memory_space<vmem>>, vector<1x16x11x64xbf16>
    %1 = vector.shape_cast %0 : vector<1x16x11x64xbf16> to vector<16x11x64xbf16>
    %c0_3 = arith.constant 0 : index
    %c0_4 = arith.constant 0 : index
    %c0_5 = arith.constant 0 : index
    %c0_6 = arith.constant 0 : index
    %2 = vector.load %arg3[%c0_3, %c0_4, %c0_5, %c0_6] : memref<1x8x11x64xbf16, #tpu.memory_space<vmem>>, vector<1x3x11x64xbf16>
    %3 = vector.shape_cast %2 : vector<1x3x11x64xbf16> to vector<3x11x64xbf16>
    %4 = tpu.concatenate %1, %3 in 0 : vector<16x11x64xbf16>, vector<3x11x64xbf16> -> vector<19x11x64xbf16>
    %cst = arith.constant 0.000000e+00 : f32
    %5 = vector.broadcast %cst : f32 to vector<128x128xf32>
    %6 = vector.extract_strided_slice %4 {offsets = [0, 0, 0], sizes = [16, 8, 64], strides = [1, 1, 1]} : vector<19x11x64xbf16> to vector<16x8x64xbf16>
    %7 = vector.shape_cast %6 : vector<16x8x64xbf16> to vector<128x64xbf16>
    %c0_7 = arith.constant 0 : index
    %c0_8 = arith.constant 0 : index
    %c0_9 = arith.constant 0 : index
    %8 = vector.load %arg4[%c0_7, %c0_8, %c0_9] : memref<16x64x128xbf16, #tpu.memory_space<vmem>>, vector<1x64x128xbf16>
    %9 = vector.shape_cast %8 : vector<1x64x128xbf16> to vector<64x128xbf16>
    %cst_10 = arith.constant dense<0.000000e+00> : vector<128x128xf32>
    %10 = tpu.matmul %7, %9, %cst_10 {dimension_numbers = #tpu.dot_dimension_numbers<[1], [0], [0], [1], [0, 0, 1, 1], [], []>} : vector<128x64xbf16>, vector<64x128xbf16>, vector<128x128xf32> -> vector<128x128xf32>
    %11 = arith.addf %5, %10 : vector<128x128xf32>
    %12 = vector.extract_strided_slice %4 {offsets = [0, 1, 0], sizes = [16, 8, 64], strides = [1, 1, 1]} : vector<19x11x64xbf16> to vector<16x8x64xbf16>
    %13 = vector.shape_cast %12 : vector<16x8x64xbf16> to vector<128x64xbf16>
    %c1 = arith.constant 1 : index
    %c0_11 = arith.constant 0 : index
    %c0_12 = arith.constant 0 : index
    %14 = vector.load %arg4[%c1, %c0_11, %c0_12] : memref<16x64x128xbf16, #tpu.memory_space<vmem>>, vector<1x64x128xbf16>
    %15 = vector.shape_cast %14 : vector<1x64x128xbf16> to vector<64x128xbf16>
    %cst_13 = arith.constant dense<0.000000e+00> : vector<128x128xf32>
    %16 = tpu.matmul %13, %15, %cst_13 {dimension_numbers = #tpu.dot_dimension_numbers<[1], [0], [0], [1], [0, 0, 1, 1], [], []>} : vector<128x64xbf16>, vector<64x128xbf16>, vector<128x128xf32> -> vector<128x128xf32>
    %17 = arith.addf %11, %16 : vector<128x128xf32>
    %18 = vector.extract_strided_slice %4 {offsets = [0, 2, 0], sizes = [16, 8, 64], strides = [1, 1, 1]} : vector<19x11x64xbf16> to vector<16x8x64xbf16>
    %19 = vector.shape_cast %18 : vector<16x8x64xbf16> to vector<128x64xbf16>
    %c2 = arith.constant 2 : index
    %c0_14 = arith.constant 0 : index
    %c0_15 = arith.constant 0 : index
    %20 = vector.load %arg4[%c2, %c0_14, %c0_15] : memref<16x64x128xbf16, #tpu.memory_space<vmem>>, vector<1x64x128xbf16>
    %21 = vector.shape_cast %20 : vector<1x64x128xbf16> to vector<64x128xbf16>
    %cst_16 = arith.constant dense<0.000000e+00> : vector<128x128xf32>
    %22 = tpu.matmul %19, %21, %cst_16 {dimension_numbers = #tpu.dot_dimension_numbers<[1], [0], [0], [1], [0, 0, 1, 1], [], []>} : vector<128x64xbf16>, vector<64x128xbf16>, vector<128x128xf32> -> vector<128x128xf32>
    %23 = arith.addf %17, %22 : vector<128x128xf32>
    %24 = vector.extract_strided_slice %4 {offsets = [0, 3, 0], sizes = [16, 8, 64], strides = [1, 1, 1]} : vector<19x11x64xbf16> to vector<16x8x64xbf16>
    %25 = vector.shape_cast %24 : vector<16x8x64xbf16> to vector<128x64xbf16>
    %c3 = arith.constant 3 : index
    %c0_17 = arith.constant 0 : index
    %c0_18 = arith.constant 0 : index
    %26 = vector.load %arg4[%c3, %c0_17, %c0_18] : memref<16x64x128xbf16, #tpu.memory_space<vmem>>, vector<1x64x128xbf16>
    %27 = vector.shape_cast %26 : vector<1x64x128xbf16> to vector<64x128xbf16>
    %cst_19 = arith.constant dense<0.000000e+00> : vector<128x128xf32>
    %28 = tpu.matmul %25, %27, %cst_19 {dimension_numbers = #tpu.dot_dimension_numbers<[1], [0], [0], [1], [0, 0, 1, 1], [], []>} : vector<128x64xbf16>, vector<64x128xbf16>, vector<128x128xf32> -> vector<128x128xf32>
    %29 = arith.addf %23, %28 : vector<128x128xf32>
    %30 = vector.extract_strided_slice %4 {offsets = [1, 0, 0], sizes = [16, 8, 64], strides = [1, 1, 1]} : vector<19x11x64xbf16> to vector<16x8x64xbf16>
    %31 = vector.shape_cast %30 : vector<16x8x64xbf16> to vector<128x64xbf16>
    %c4 = arith.constant 4 : index
    %c0_20 = arith.constant 0 : index
    %c0_21 = arith.constant 0 : index
    %32 = vector.load %arg4[%c4, %c0_20, %c0_21] : memref<16x64x128xbf16, #tpu.memory_space<vmem>>, vector<1x64x128xbf16>
    %33 = vector.shape_cast %32 : vector<1x64x128xbf16> to vector<64x128xbf16>
    %cst_22 = arith.constant dense<0.000000e+00> : vector<128x128xf32>
    %34 = tpu.matmul %31, %33, %cst_22 {dimension_numbers = #tpu.dot_dimension_numbers<[1], [0], [0], [1], [0, 0, 1, 1], [], []>} : vector<128x64xbf16>, vector<64x128xbf16>, vector<128x128xf32> -> vector<128x128xf32>
    %35 = arith.addf %29, %34 : vector<128x128xf32>
    %36 = vector.extract_strided_slice %4 {offsets = [1, 1, 0], sizes = [16, 8, 64], strides = [1, 1, 1]} : vector<19x11x64xbf16> to vector<16x8x64xbf16>
    %37 = vector.shape_cast %36 : vector<16x8x64xbf16> to vector<128x64xbf16>
    %c5 = arith.constant 5 : index
    %c0_23 = arith.constant 0 : index
    %c0_24 = arith.constant 0 : index
    %38 = vector.load %arg4[%c5, %c0_23, %c0_24] : memref<16x64x128xbf16, #tpu.memory_space<vmem>>, vector<1x64x128xbf16>
    %39 = vector.shape_cast %38 : vector<1x64x128xbf16> to vector<64x128xbf16>
    %cst_25 = arith.constant dense<0.000000e+00> : vector<128x128xf32>
    %40 = tpu.matmul %37, %39, %cst_25 {dimension_numbers = #tpu.dot_dimension_numbers<[1], [0], [0], [1], [0, 0, 1, 1], [], []>} : vector<128x64xbf16>, vector<64x128xbf16>, vector<128x128xf32> -> vector<128x128xf32>
    %41 = arith.addf %35, %40 : vector<128x128xf32>
    %42 = vector.extract_strided_slice %4 {offsets = [1, 2, 0], sizes = [16, 8, 64], strides = [1, 1, 1]} : vector<19x11x64xbf16> to vector<16x8x64xbf16>
    %43 = vector.shape_cast %42 : vector<16x8x64xbf16> to vector<128x64xbf16>
    %c6 = arith.constant 6 : index
    %c0_26 = arith.constant 0 : index
    %c0_27 = arith.constant 0 : index
    %44 = vector.load %arg4[%c6, %c0_26, %c0_27] : memref<16x64x128xbf16, #tpu.memory_space<vmem>>, vector<1x64x128xbf16>
    %45 = vector.shape_cast %44 : vector<1x64x128xbf16> to vector<64x128xbf16>
    %cst_28 = arith.constant dense<0.000000e+00> : vector<128x128xf32>
    %46 = tpu.matmul %43, %45, %cst_28 {dimension_numbers = #tpu.dot_dimension_numbers<[1], [0], [0], [1], [0, 0, 1, 1], [], []>} : vector<128x64xbf16>, vector<64x128xbf16>, vector<128x128xf32> -> vector<128x128xf32>
    %47 = arith.addf %41, %46 : vector<128x128xf32>
    %48 = vector.extract_strided_slice %4 {offsets = [1, 3, 0], sizes = [16, 8, 64], strides = [1, 1, 1]} : vector<19x11x64xbf16> to vector<16x8x64xbf16>
    %49 = vector.shape_cast %48 : vector<16x8x64xbf16> to vector<128x64xbf16>
    %c7 = arith.constant 7 : index
    %c0_29 = arith.constant 0 : index
    %c0_30 = arith.constant 0 : index
    %50 = vector.load %arg4[%c7, %c0_29, %c0_30] : memref<16x64x128xbf16, #tpu.memory_space<vmem>>, vector<1x64x128xbf16>
    %51 = vector.shape_cast %50 : vector<1x64x128xbf16> to vector<64x128xbf16>
    %cst_31 = arith.constant dense<0.000000e+00> : vector<128x128xf32>
    %52 = tpu.matmul %49, %51, %cst_31 {dimension_numbers = #tpu.dot_dimension_numbers<[1], [0], [0], [1], [0, 0, 1, 1], [], []>} : vector<128x64xbf16>, vector<64x128xbf16>, vector<128x128xf32> -> vector<128x128xf32>
    %53 = arith.addf %47, %52 : vector<128x128xf32>
    %54 = vector.extract_strided_slice %4 {offsets = [2, 0, 0], sizes = [16, 8, 64], strides = [1, 1, 1]} : vector<19x11x64xbf16> to vector<16x8x64xbf16>
    %55 = vector.shape_cast %54 : vector<16x8x64xbf16> to vector<128x64xbf16>
    %c8 = arith.constant 8 : index
    %c0_32 = arith.constant 0 : index
    %c0_33 = arith.constant 0 : index
    %56 = vector.load %arg4[%c8, %c0_32, %c0_33] : memref<16x64x128xbf16, #tpu.memory_space<vmem>>, vector<1x64x128xbf16>
    %57 = vector.shape_cast %56 : vector<1x64x128xbf16> to vector<64x128xbf16>
    %cst_34 = arith.constant dense<0.000000e+00> : vector<128x128xf32>
    %58 = tpu.matmul %55, %57, %cst_34 {dimension_numbers = #tpu.dot_dimension_numbers<[1], [0], [0], [1], [0, 0, 1, 1], [], []>} : vector<128x64xbf16>, vector<64x128xbf16>, vector<128x128xf32> -> vector<128x128xf32>
    %59 = arith.addf %53, %58 : vector<128x128xf32>
    %60 = vector.extract_strided_slice %4 {offsets = [2, 1, 0], sizes = [16, 8, 64], strides = [1, 1, 1]} : vector<19x11x64xbf16> to vector<16x8x64xbf16>
    %61 = vector.shape_cast %60 : vector<16x8x64xbf16> to vector<128x64xbf16>
    %c9 = arith.constant 9 : index
    %c0_35 = arith.constant 0 : index
    %c0_36 = arith.constant 0 : index
    %62 = vector.load %arg4[%c9, %c0_35, %c0_36] : memref<16x64x128xbf16, #tpu.memory_space<vmem>>, vector<1x64x128xbf16>
    %63 = vector.shape_cast %62 : vector<1x64x128xbf16> to vector<64x128xbf16>
    %cst_37 = arith.constant dense<0.000000e+00> : vector<128x128xf32>
    %64 = tpu.matmul %61, %63, %cst_37 {dimension_numbers = #tpu.dot_dimension_numbers<[1], [0], [0], [1], [0, 0, 1, 1], [], []>} : vector<128x64xbf16>, vector<64x128xbf16>, vector<128x128xf32> -> vector<128x128xf32>
    %65 = arith.addf %59, %64 : vector<128x128xf32>
    %66 = vector.extract_strided_slice %4 {offsets = [2, 2, 0], sizes = [16, 8, 64], strides = [1, 1, 1]} : vector<19x11x64xbf16> to vector<16x8x64xbf16>
    %67 = vector.shape_cast %66 : vector<16x8x64xbf16> to vector<128x64xbf16>
    %c10 = arith.constant 10 : index
    %c0_38 = arith.constant 0 : index
    %c0_39 = arith.constant 0 : index
    %68 = vector.load %arg4[%c10, %c0_38, %c0_39] : memref<16x64x128xbf16, #tpu.memory_space<vmem>>, vector<1x64x128xbf16>
    %69 = vector.shape_cast %68 : vector<1x64x128xbf16> to vector<64x128xbf16>
    %cst_40 = arith.constant dense<0.000000e+00> : vector<128x128xf32>
    %70 = tpu.matmul %67, %69, %cst_40 {dimension_numbers = #tpu.dot_dimension_numbers<[1], [0], [0], [1], [0, 0, 1, 1], [], []>} : vector<128x64xbf16>, vector<64x128xbf16>, vector<128x128xf32> -> vector<128x128xf32>
    %71 = arith.addf %65, %70 : vector<128x128xf32>
    %72 = vector.extract_strided_slice %4 {offsets = [2, 3, 0], sizes = [16, 8, 64], strides = [1, 1, 1]} : vector<19x11x64xbf16> to vector<16x8x64xbf16>
    %73 = vector.shape_cast %72 : vector<16x8x64xbf16> to vector<128x64xbf16>
    %c11 = arith.constant 11 : index
    %c0_41 = arith.constant 0 : index
    %c0_42 = arith.constant 0 : index
    %74 = vector.load %arg4[%c11, %c0_41, %c0_42] : memref<16x64x128xbf16, #tpu.memory_space<vmem>>, vector<1x64x128xbf16>
    %75 = vector.shape_cast %74 : vector<1x64x128xbf16> to vector<64x128xbf16>
    %cst_43 = arith.constant dense<0.000000e+00> : vector<128x128xf32>
    %76 = tpu.matmul %73, %75, %cst_43 {dimension_numbers = #tpu.dot_dimension_numbers<[1], [0], [0], [1], [0, 0, 1, 1], [], []>} : vector<128x64xbf16>, vector<64x128xbf16>, vector<128x128xf32> -> vector<128x128xf32>
    %77 = arith.addf %71, %76 : vector<128x128xf32>
    %78 = vector.extract_strided_slice %4 {offsets = [3, 0, 0], sizes = [16, 8, 64], strides = [1, 1, 1]} : vector<19x11x64xbf16> to vector<16x8x64xbf16>
    %79 = vector.shape_cast %78 : vector<16x8x64xbf16> to vector<128x64xbf16>
    %c12 = arith.constant 12 : index
    %c0_44 = arith.constant 0 : index
    %c0_45 = arith.constant 0 : index
    %80 = vector.load %arg4[%c12, %c0_44, %c0_45] : memref<16x64x128xbf16, #tpu.memory_space<vmem>>, vector<1x64x128xbf16>
    %81 = vector.shape_cast %80 : vector<1x64x128xbf16> to vector<64x128xbf16>
    %cst_46 = arith.constant dense<0.000000e+00> : vector<128x128xf32>
    %82 = tpu.matmul %79, %81, %cst_46 {dimension_numbers = #tpu.dot_dimension_numbers<[1], [0], [0], [1], [0, 0, 1, 1], [], []>} : vector<128x64xbf16>, vector<64x128xbf16>, vector<128x128xf32> -> vector<128x128xf32>
    %83 = arith.addf %77, %82 : vector<128x128xf32>
    %84 = vector.extract_strided_slice %4 {offsets = [3, 1, 0], sizes = [16, 8, 64], strides = [1, 1, 1]} : vector<19x11x64xbf16> to vector<16x8x64xbf16>
    %85 = vector.shape_cast %84 : vector<16x8x64xbf16> to vector<128x64xbf16>
    %c13 = arith.constant 13 : index
    %c0_47 = arith.constant 0 : index
    %c0_48 = arith.constant 0 : index
    %86 = vector.load %arg4[%c13, %c0_47, %c0_48] : memref<16x64x128xbf16, #tpu.memory_space<vmem>>, vector<1x64x128xbf16>
    %87 = vector.shape_cast %86 : vector<1x64x128xbf16> to vector<64x128xbf16>
    %cst_49 = arith.constant dense<0.000000e+00> : vector<128x128xf32>
    %88 = tpu.matmul %85, %87, %cst_49 {dimension_numbers = #tpu.dot_dimension_numbers<[1], [0], [0], [1], [0, 0, 1, 1], [], []>} : vector<128x64xbf16>, vector<64x128xbf16>, vector<128x128xf32> -> vector<128x128xf32>
    %89 = arith.addf %83, %88 : vector<128x128xf32>
    %90 = vector.extract_strided_slice %4 {offsets = [3, 2, 0], sizes = [16, 8, 64], strides = [1, 1, 1]} : vector<19x11x64xbf16> to vector<16x8x64xbf16>
    %91 = vector.shape_cast %90 : vector<16x8x64xbf16> to vector<128x64xbf16>
    %c14 = arith.constant 14 : index
    %c0_50 = arith.constant 0 : index
    %c0_51 = arith.constant 0 : index
    %92 = vector.load %arg4[%c14, %c0_50, %c0_51] : memref<16x64x128xbf16, #tpu.memory_space<vmem>>, vector<1x64x128xbf16>
    %93 = vector.shape_cast %92 : vector<1x64x128xbf16> to vector<64x128xbf16>
    %cst_52 = arith.constant dense<0.000000e+00> : vector<128x128xf32>
    %94 = tpu.matmul %91, %93, %cst_52 {dimension_numbers = #tpu.dot_dimension_numbers<[1], [0], [0], [1], [0, 0, 1, 1], [], []>} : vector<128x64xbf16>, vector<64x128xbf16>, vector<128x128xf32> -> vector<128x128xf32>
    %95 = arith.addf %89, %94 : vector<128x128xf32>
    %96 = vector.extract_strided_slice %4 {offsets = [3, 3, 0], sizes = [16, 8, 64], strides = [1, 1, 1]} : vector<19x11x64xbf16> to vector<16x8x64xbf16>
    %97 = vector.shape_cast %96 : vector<16x8x64xbf16> to vector<128x64xbf16>
    %c15 = arith.constant 15 : index
    %c0_53 = arith.constant 0 : index
    %c0_54 = arith.constant 0 : index
    %98 = vector.load %arg4[%c15, %c0_53, %c0_54] : memref<16x64x128xbf16, #tpu.memory_space<vmem>>, vector<1x64x128xbf16>
    %99 = vector.shape_cast %98 : vector<1x64x128xbf16> to vector<64x128xbf16>
    %cst_55 = arith.constant dense<0.000000e+00> : vector<128x128xf32>
    %100 = tpu.matmul %97, %99, %cst_55 {dimension_numbers = #tpu.dot_dimension_numbers<[1], [0], [0], [1], [0, 0, 1, 1], [], []>} : vector<128x64xbf16>, vector<64x128xbf16>, vector<128x128xf32> -> vector<128x128xf32>
    %101 = arith.addf %95, %100 : vector<128x128xf32>
    %c0_56 = arith.constant 0 : index
    %c0_57 = arith.constant 0 : index
    %102 = vector.load %arg5[%c0_56, %c0_57] : memref<1x128xf32, #tpu.memory_space<vmem>>, vector<1x128xf32>
    %103 = vector.broadcast %102 : vector<1x128xf32> to vector<128x128xf32>
    %104 = arith.addf %101, %103 : vector<128x128xf32>
    %c0_58 = arith.constant 0 : index
    %c0_59 = arith.constant 0 : index
    %105 = vector.load %arg6[%c0_58, %c0_59] : memref<128x128xf32, #tpu.memory_space<vmem>>, vector<128x128xf32>
    tpu.vector_store %arg6[%c0_58, %c0_59], %104 {strides = array<i32>} : memref<128x128xf32, #tpu.memory_space<vmem>>, vector<128x128xf32>,
    return
  }
  func.func @transform_0(%arg0: i32, %arg1: i32) -> (i32, i32, i32, i32) {
    %c0_i32 = arith.constant 0 : i32
    %c0_i32_0 = arith.constant 0 : i32
    %c0_i32_1 = arith.constant 0 : i32
    return %arg0, %arg1, %c0_i32, %c0_i32_0 : i32, i32, i32, i32
  }
  func.func @transform_1(%arg0: i32, %arg1: i32) -> (i32, i32, i32, i32) {
    %c1_i32 = arith.constant 1 : i32
    %0 = arith.addi %arg1, %c1_i32 : i32
    %c2_i32 = arith.constant 2 : i32
    %1 = arith.muli %0, %c2_i32 : i32
    %c0_i32 = arith.constant 0 : i32
    %c0_i32_0 = arith.constant 0 : i32
    %c0_i32_1 = arith.constant 0 : i32
    return %arg0, %1, %c0_i32, %c0_i32_0 : i32, i32, i32, i32
  }
  func.func @transform_2(%arg0: i32, %arg1: i32) -> (i32, i32, i32) {
    %c0_i32 = arith.constant 0 : i32
    %c0_i32_0 = arith.constant 0 : i32
    %c0_i32_1 = arith.constant 0 : i32
    %c0_i32_2 = arith.constant 0 : i32
    return %c0_i32, %c0_i32_0, %c0_i32_1 : i32, i32, i32
  }
  func.func @transform_3(%arg0: i32, %arg1: i32) -> (i32, i32) {
    %c0_i32 = arith.constant 0 : i32
    %c0_i32_0 = arith.constant 0 : i32
    %c0_i32_1 = arith.constant 0 : i32
    return %c0_i32, %c0_i32_0 : i32, i32
  }
  func.func @transform_4(%arg0: i32, %arg1: i32) -> (i32, i32) {
    %c1_i32 = arith.constant 1 : i32
    %0 = arith.muli %arg0, %c1_i32 : i32
    %1 = arith.addi %0, %arg1 : i32
    %c0_i32 = arith.constant 0 : i32
    %c0_i32_0 = arith.constant 0 : i32
    return %1, %c0_i32 : i32, i32
  }
}

</mosaic_0001>

<bundles_post_ra>
// kernel: nlayer_discriminator_forward.5
= control target key start
LH: loop header
LB: loop body
LE: loop exit
PB: predicated region body
PF: predicated region fallthrough
CT: control target
= control target key end

     0   :  { %s2733_s15 = smov 0   ;;  %s2735_s16 = smov 0   ;;  %s3308_s0 = inlined_call_operand.vmem [shape: bf16[2,24,17,16], index: 0, kind: input, shape index: {}, may-alias: {0,1}]   ;;  %s3309_s1 = inlined_call_operand.vmem [shape: bf16[2,24,17,16], index: 1, kind: input, shape index: {}, may-alias: {0,1}]   ;;  %s3310_s2 = inlined_call_operand.vmem [shape: bf16[4,16,128], index: 2, kind: input, shape index: {}]   ;;  %s3311_s3 = inlined_call_operand.vmem [shape: f32[1,128], index: 3, kind: input, shape index: {}]   ;;  %s3312_s4 = inlined_call_operand.vmem [shape: bf16[512,128], index: 4, kind: output, shape index: {}]  }
   0x1   :  { %s2737_s17 = smov 0  }
   0x2 LB: > { %s26_s18 = sadd.s32 1, %s2702_s16  ;;  %p2155_p0 = scmp.ge.s32.totalorder %s2706_s17, 1  ;;  %s2706_s17 = sphi %s2737_s17, %s14_s17   ;;  %s2702_s16 = sphi %s2735_s16, %s3326_s16   ;;  %s2698_s15 = sphi %s2733_s15, %s3325_s15  }
   0x3   : > { %p28_p1 = scmp.ge.s32.totalorder %s26_s18, 2  ;;  %p220_p2 = scmp.lt.s32.totalorder %s2706_s17, 3 }
   0x5   : > { %s3328_s18 = smov (%p28_p1, %s26_s18), 0  ;;  %p221_p3 = pnand %p2155_p0, %p220_p2 }
   0x7   : > { %224 = sbr.rel (%p221_p3) target bundleno = 371 (0x173), region = 36 }
   0xc   : > { %v2663_v0 = vld [vmem:[%s3310_s2] sm:$0xff]   ;;  %p275_p4 = scmp.lt.s32.totalorder %s2698_s15, 1  ;;  %v2664_v1 = vld [vmem:[%s3310_s2 + $0x8] sm:$0xff]   ;;  %v2766_v2 = vld [vmem:[%s3310_s2 + $0x10] sm:$0xff]   ;;  %vm811_vm0 = vcmask 130048   ;;  %s2158_s10 = sshll.u32 %s2698_s15, 5 }
   0xd   : > { %2534 = vmatprep.subr.bf16.mxu1 %v2663_v0  ;;  %2500 = vmatprep.subr.bf16.mxu0 %v2664_v1  ;;  %v2668_v3 = vld [vmem:[%s3310_s2 + $0x18] sm:$0xff]   ;;  %vm367_vm1 = vsmask.f32 3328  ;;  %vm368_vm2 = vsmask.f32 7440  ;;  %p307_p5 = scmp.lt.s32.totalorder %s2158_s10, 63 }
   0xe   : > { %s2761_s23 = scalar_select %p275_p4, %s2698_s15, 1  ;;  %2535 = vmatpush3.bf16.msra.mxu1 %v2663_v0  ;;  %2501 = vmatpush3.bf16.msra.mxu0 %v2664_v1  ;;  %vm2792_vm3 = vmor %vm367_vm1, %vm368_vm2 }
   0xf   : > { %2568 = vmatprep.subr.bf16.mxu0 %v2766_v2  ;;  %2602 = vmatprep.subr.bf16.mxu1 %v2668_v3  ;;  %s3330_s10 = smov (!%p307_p5, %s2158_s10), 63 }
  0x10   : > { %s2636_s26 = smul.u32 288, %s2761_s23  ;;  %s2159_s13 = sshll.u32 %s3330_s10, 2 }
  0x11   : > { %s3208_s19 = scalar_lea.vmem %s3312_s4, %s2159_s13 }
  0x12   : > { %s2778_s5 = scalar_lea.vmem %s3308_s0, %s2636_s26  ;;  %s2304_s6 = sadd.s32 192, %s2636_s26 }
  0x13   : > { %v314_v4 = vld [vmem:[%s2778_s5] sm:$0xf]  ;;  %v315_v5 = vld [vmem:[%s2778_s5 + $0x4] sm:$0xf]  ;;  %v317_v6 = vld [vmem:[%s2778_s5 + $0xc] sm:$0xf]  ;;  %s301_s9 = scalar_lea.vmem %s3309_s1, %s2304_s6 }
  0x14   : > { %v371_v7 = vshrl.u32 %v314_v4, 16  ;;  %v374_v8 = vshll.u32 %v314_v4, 16  ;;  %v380_v9 = vshll.u32 %v315_v5, 16  ;;  %v384_v10 = vshrl.u32 %v315_v5, 16  ;;  %v318_v11 = vld [vmem:[%s2778_s5 + $0x10] sm:$0xf] }
  0x15   : > { %v2195_v12 = vcombine.low %v314_v4, %v315_v5  ;;  %v395_v13 = vshrl.u32 %v317_v6, 16  ;;  %v398_v14 = vshll.u32 %v317_v6, 16  ;;  %v404_v15 = vshll.u32 %v318_v11, 16  ;;  %v316_v16 = vld [vmem:[%s2778_s5 + $0x8] sm:$0x1] }
  0x16   : > { %v373_v17 = vrot.slane %v371_v7, 4  ;;  %v376_v18 = vrot.slane %v374_v8, 5  ;;  %v382_v19 = vrot.slane %v380_v9, 5  ;;  %v386_v20 = vrot.slane %v384_v10, 4  ;;  %v319_v21 = vld [vmem:[%s2778_s5 + $0x14] sm:$0x1] }
  0x17   : > { %2536 = vmatprep.mubr.msk.bf16.mxu1 %vm811_vm0, %v2195_v12  ;;  %v397_v22 = vrot.slane %v395_v13, 4  ;;  %v400_v23 = vrot.slane %v398_v14, 5  ;;  %v406_v24 = vrot.slane %v404_v15, 5  ;;  %v408_v25 = vshrl.u32 %v318_v11, 16  ;;  %v320_v26 = vld [vmem:[%s2778_s5 + $0x18] sm:$0xf] }
  0x18   : > { %v2788_v27 = vcombine.low %v317_v6, %v318_v11  ;;  %v377_v28 = vor.u32 %v376_v18, %v373_v17  ;;  %v387_v29 = vor.u32 %v386_v20, %v382_v19  ;;  %v390_v30 = vshll.u32 %v316_v16, 16  ;;  %v321_v35 = vld [vmem:[%s2778_s5 + $0x1c] sm:$0xf]  ;;  %v323_v45 = vld [vmem:[%s2778_s5 + $0x24] sm:$0xf] }
  0x19   : > { %v410_v31 = vrot.slane %v408_v25, 4  ;;  %v401_v33 = vor.u32 %v400_v23, %v397_v22  ;;  %v414_v34 = vshll.u32 %v319_v21, 16  ;;  %v419_v36 = vshrl.u32 %v320_v26, 16  ;;  %v324_v50 = vld [vmem:[%s2778_s5 + $0x28] sm:$0xf] }
  0x1a   : > { %2537 = vmatmul.mubr.msk.bf16.vlgmr.msra.gmra.mxu1 %vm811_vm0, %v2788_v27  ;;  %v378_v37 = vrot.slane %v377_v28, 4  ;;  %v388_v38 = vrot.slane %v387_v29, 4  ;;  %v392_v39 = vrot.slane %v390_v30, 5  ;;  %v422_v40 = vshll.u32 %v320_v26, 16  ;;  %v322_v55 = vld [vmem:[%s2778_s5 + $0x20] sm:$0x1] }
  0x1b   : > { %v402_v41 = vrot.slane %v401_v33, 4  ;;  %v411_v42 = vor.u32 %v410_v31, %v406_v24  ;;  %v416_v43 = vrot.slane %v414_v34, 5  ;;  %2603 = vmatpush3.bf16.msra.mxu1 %v2668_v3  ;;  %v421_v44 = vrot.slane %v419_v36, 4  ;;  %v325_v60 = vld [vmem:[%s2778_s5 + $0x2c] sm:$0x1] }
  0x1c   : > { %v383_v46 = vsel %vm2792_vm3, %v378_v37, %v382_v19  ;;  %v393_v47 = vsel %vm2792_vm3, %v388_v38, %v392_v39  ;;  %v424_v48 = vrot.slane %v422_v40, 5  ;;  %v428_v49 = vshll.u32 %v321_v35, 16  ;;  %v326_v1 = vld [vmem:[%s2778_s5 + $0x30] sm:$0xf]  ;;  %v327_v14 = vld [vmem:[%s2778_s5 + $0x34] sm:$0xf] }
  0x1d   : > { %v2162_v51 = vcombine.low %v383_v46, %v393_v47  ;;  %v407_v52 = vsel %vm2792_vm3, %v402_v41, %v406_v24  ;;  %v412_v53 = vrot.slane %v411_v42, 4  ;;  %v432_v54 = vshrl.u32 %v321_v35, 16  ;;  %v329_v24 = vld [vmem:[%s2778_s5 + $0x3c] sm:$0xf]  ;;  %v330_v30 = vld [vmem:[%s2778_s5 + $0x40] sm:$0xf] }
  0x1e   : > { %v430_v56 = vrot.slane %v428_v49, 5  ;;  %v2808_v57 = vcombine.low %v320_v26, %v321_v35  ;;  %v443_v58 = vshrl.u32 %v323_v45, 16  ;;  %v446_v59 = vshll.u32 %v323_v45, 16  ;;  %v328_v39 = vld [vmem:[%s2778_s5 + $0x38] sm:$0x1] }
  0x1f   : > { %2502 = vmatprep.mubr.msk.bf16.mxu0 %vm811_vm0, %v2162_v51  ;;  %v417_v61 = vsel %vm2792_vm3, %v412_v53, %v416_v43  ;;  %v434_v62 = vrot.slane %v432_v54, 4  ;;  %v452_v63 = vshll.u32 %v324_v50, 16  ;;  %v456_v0 = vshrl.u32 %v324_v50, 16  ;;  %v331_v40 = vld [vmem:[%s2778_s5 + $0x44] sm:$0x1] }
  0x20   : > { %v2815_v3 = vcombine.low %v407_v52, %v417_v61  ;;  %2540 = vmatprep.mubr.msk.bf16.mxu1 %vm811_vm0, %v2808_v57  ;;  %v445_v4 = vrot.slane %v443_v58, 4  ;;  %v448_v5 = vrot.slane %v446_v59, 5  ;;  %v2819_v6 = vcombine.low %v323_v45, %v324_v50  ;;  %v332_v45 = vld [vmem:[%s2778_s5 + $0x48] sm:$0xf]  ;;  %v333_v58 = vld [vmem:[%s2778_s5 + $0x4c] sm:$0xf] }
  0x21   : > { %v454_v7 = vrot.slane %v452_v63, 5  ;;  %v458_v8 = vrot.slane %v456_v0, 4  ;;  %v425_v9 = vor.u32 %v424_v48, %v421_v44  ;;  %v435_v10 = vor.u32 %v434_v62, %v430_v56 }
  0x22   : > { %2503 = vmatmul.mubr.msk.bf16.vlgmr.msra.gmra.mxu0 %vm811_vm0, %v2815_v3  ;;  %2541 = vmatmul.mubr.msk.bf16.gmra.mxu1 %vm811_vm0, %v2819_v6  ;;  %v438_v11 = vshll.u32 %v322_v55, 16  ;;  %v449_v12 = vor.u32 %v448_v5, %v445_v4  ;;  %v462_v13 = vshll.u32 %v325_v60, 16  ;;  %v467_v15 = vshrl.u32 %v326_v1, 16 }
  0x23   : > { %2569 = vmatpush3.bf16.msra.mxu0 %v2766_v2  ;;  %v426_v16 = vrot.slane %v425_v9, 4  ;;  %v436_v17 = vrot.slane %v435_v10, 4  ;;  %v459_v18 = vor.u32 %v458_v8, %v454_v7  ;;  %v470_v19 = vshll.u32 %v326_v1, 16 }
  0x24   : > { %v440_v20 = vrot.slane %v438_v11, 5  ;;  %v450_v21 = vrot.slane %v449_v12, 4  ;;  %v464_v22 = vrot.slane %v462_v13, 5  ;;  %v469_v23 = vrot.slane %v467_v15, 4  ;;  %v336_v12 = vld [vmem:[%s2778_s5 + $0x58] sm:$0xf] }
  0x25   : > { %v431_v25 = vsel %vm2792_vm3, %v426_v16, %v430_v56  ;;  %v460_v26 = vrot.slane %v459_v18, 4  ;;  %v472_v28 = vrot.slane %v470_v19, 5  ;;  %v476_v29 = vshll.u32 %v327_v14, 16 }
  0x26   : > { %v441_v2 = vsel %vm2792_vm3, %v436_v17, %v440_v20  ;;  %v455_v31 = vsel %vm2792_vm3, %v450_v21, %v454_v7  ;;  %v480_v33 = vshrl.u32 %v327_v14, 16  ;;  %v2835_v34 = vcombine.low %v326_v1, %v327_v14  ;;  %v335_v7 = vld [vmem:[%s2778_s5 + $0x54] sm:$0xf]  ;;  %v334_v17 = vld [vmem:[%s2778_s5 + $0x50] sm:$0x1] }
  0x27   : > { %v2837_v35 = vcombine.low %v431_v25, %v441_v2  ;;  %v465_v36 = vsel %vm2792_vm3, %v460_v26, %v464_v22  ;;  %v478_v37 = vrot.slane %v476_v29, 5  ;;  %v491_v38 = vshrl.u32 %v329_v24, 16  ;;  %v337_v22 = vld [vmem:[%s2778_s5 + $0x5c] sm:$0x1] }
  0x28   : > { %v2843_v41 = vcombine.low %v455_v31, %v465_v36  ;;  %v482_v42 = vrot.slane %v480_v33, 4  ;;  %2544 = vmatprep.mubr.msk.bf16.mxu1 %vm811_vm0, %v2835_v34  ;;  %v494_v43 = vshll.u32 %v329_v24, 16  ;;  %v500_v44 = vshll.u32 %v330_v30, 16 }
  0x29   : > { %2506 = vmatprep.mubr.msk.bf16.mxu0 %vm811_vm0, %v2837_v35  ;;  %v493_v46 = vrot.slane %v491_v38, 4  ;;  %v504_v47 = vshrl.u32 %v330_v30, 16  ;;  %v2850_v48 = vcombine.low %v329_v24, %v330_v30  ;;  %v473_v49 = vor.u32 %v472_v28, %v469_v23  ;;  %v338_v28 = vld [vmem:[%s2778_s5 + $0x60] sm:$0xf] }
  0x2a   : > { %2507 = vmatmul.mubr.msk.bf16.gmra.mxu0 %vm811_vm0, %v2843_v41  ;;  %v496_v50 = vrot.slane %v494_v43, 5  ;;  %v502_v51 = vrot.slane %v500_v44, 5  ;;  %v483_v52 = vor.u32 %v482_v42, %v478_v37  ;;  %v486_v53 = vshll.u32 %v328_v39, 16  ;;  %v339_v43 = vld [vmem:[%s2778_s5 + $0x64] sm:$0xf] }
  0x2b   : > { %v506_v54 = vrot.slane %v504_v47, 4  ;;  %2545 = vmatmul.mubr.msk.bf16.gmra.mxu1 %vm811_vm0, %v2850_v48  ;;  %v474_v55 = vrot.slane %v473_v49, 4  ;;  %v510_v56 = vshll.u32 %v331_v40, 16  ;;  %v515_v59 = vshrl.u32 %v332_v45, 16 }
  0x2c   : > { %v484_v60 = vrot.slane %v483_v52, 4  ;;  %v488_v61 = vrot.slane %v486_v53, 5  ;;  %v497_v62 = vor.u32 %v496_v50, %v493_v46  ;;  %v518_v63 = vshll.u32 %v332_v45, 16 }
  0x2d   : > { %v479_v0 = vsel %vm2792_vm3, %v474_v55, %v478_v37  ;;  %v507_v1 = vor.u32 %v506_v54, %v502_v51  ;;  %v512_v4 = vrot.slane %v510_v56, 5  ;;  %v517_v5 = vrot.slane %v515_v59, 4  ;;  %v341_v54 = vld [vmem:[%s2778_s5 + $0x6c] sm:$0xf] }
  0x2e   : > { %v489_v8 = vsel %vm2792_vm3, %v484_v60, %v488_v61  ;;  %v498_v9 = vrot.slane %v497_v62, 4  ;;  %v520_v10 = vrot.slane %v518_v63, 5  ;;  %v524_v11 = vshll.u32 %v333_v58, 16  ;;  %v342_v60 = vld [vmem:[%s2778_s5 + $0x70] sm:$0xf] }
  0x2f   : > { %v2863_v13 = vcombine.low %v479_v0, %v489_v8  ;;  %v508_v14 = vrot.slane %v507_v1, 4  ;;  %v528_v15 = vshrl.u32 %v333_v58, 16  ;;  %v2865_v16 = vcombine.low %v332_v45, %v333_v58  ;;  %v340_v8 = vld [vmem:[%s2778_s5 + $0x68] sm:$0x1] }
  0x30   : > { %v503_v18 = vsel %vm2792_vm3, %v498_v9, %v502_v51  ;;  %v526_v19 = vrot.slane %v524_v11, 5  ;;  %v539_v20 = vshrl.u32 %v335_v7, 16  ;;  %v542_v21 = vshll.u32 %v335_v7, 16  ;;  %v343_v9 = vld [vmem:[%s2778_s5 + $0x74] sm:$0x1] }
  0x31   : > { %2510 = vmatprep.mubr.msk.bf16.mxu0 %vm811_vm0, %v2863_v13  ;;  %v513_v23 = vsel %vm2792_vm3, %v508_v14, %v512_v4  ;;  %v530_v24 = vrot.slane %v528_v15, 4  ;;  %2548 = vmatprep.mubr.msk.bf16.mxu1 %vm811_vm0, %v2865_v16  ;;  %v548_v25 = vshll.u32 %v336_v12, 16  ;;  %v552_v26 = vshrl.u32 %v336_v12, 16  ;;  %v344_v15 = vld [vmem:[%s2778_s5 + $0x78] sm:$0xf] }
  0x32   : > { %v2878_v29 = vcombine.low %v503_v18, %v513_v23  ;;  %v541_v30 = vrot.slane %v539_v20, 4  ;;  %v544_v2 = vrot.slane %v542_v21, 5  ;;  %v2880_v31 = vcombine.low %v335_v7, %v336_v12 }
  0x33   : > { %v550_v33 = vrot.slane %v548_v25, 5  ;;  %v554_v36 = vrot.slane %v552_v26, 4  ;;  %v521_v37 = vor.u32 %v520_v10, %v517_v5  ;;  %v531_v38 = vor.u32 %v530_v24, %v526_v19 }
  0x34   : > { %2511 = vmatmul.mubr.msk.bf16.gmra.mxu0 %vm811_vm0, %v2878_v29  ;;  %2549 = vmatmul.mubr.msk.bf16.gmra.mxu1 %vm811_vm0, %v2880_v31  ;;  %v534_v39 = vshll.u32 %v334_v17, 16  ;;  %v545_v40 = vor.u32 %v544_v2, %v541_v30  ;;  %v558_v42 = vshll.u32 %v337_v22, 16  ;;  %v563_v44 = vshrl.u32 %v338_v28, 16  ;;  %v345_v30 = vld [vmem:[%s2778_s5 + $0x7c] sm:$0xf] }
  0x35   : > { %v522_v45 = vrot.slane %v521_v37, 4  ;;  %v532_v46 = vrot.slane %v531_v38, 4  ;;  %v555_v47 = vor.u32 %v554_v36, %v550_v33  ;;  %v566_v49 = vshll.u32 %v338_v28, 16 }
  0x36   : > { %v536_v50 = vrot.slane %v534_v39, 5  ;;  %v546_v51 = vrot.slane %v545_v40, 4  ;;  %v560_v52 = vrot.slane %v558_v42, 5  ;;  %v565_v53 = vrot.slane %v563_v44, 4  ;;  %v347_v44 = vld [vmem:[%s2778_s5 + $0x84] sm:$0xf] }
  0x37   : > { %v527_v55 = vsel %vm2792_vm3, %v522_v45, %v526_v19  ;;  %v556_v56 = vrot.slane %v555_v47, 4  ;;  %v568_v58 = vrot.slane %v566_v49, 5  ;;  %v572_v59 = vshll.u32 %v339_v43, 16 }
  0x38   : > { %v537_v61 = vsel %vm2792_vm3, %v532_v46, %v536_v50  ;;  %v551_v62 = vsel %vm2792_vm3, %v546_v51, %v550_v33  ;;  %v576_v63 = vshrl.u32 %v339_v43, 16  ;;  %v2895_v0 = vcombine.low %v338_v28, %v339_v43  ;;  %v348_v50 = vld [vmem:[%s2778_s5 + $0x88] sm:$0xf] }
  0x39   : > { %v2897_v1 = vcombine.low %v527_v55, %v537_v61  ;;  %v561_v4 = vsel %vm2792_vm3, %v556_v56, %v560_v52  ;;  %v574_v5 = vrot.slane %v572_v59, 5  ;;  %v587_v7 = vshrl.u32 %v341_v54, 16  ;;  %v346_v55 = vld [vmem:[%s2778_s5 + $0x80] sm:$0x1]  ;;  %v349_v61 = vld [vmem:[%s2778_s5 + $0x8c] sm:$0x1] }
  0x3a   : > { %v2903_v10 = vcombine.low %v551_v62, %v561_v4  ;;  %v578_v11 = vrot.slane %v576_v63, 4  ;;  %2552 = vmatprep.mubr.msk.bf16.mxu1 %vm811_vm0, %v2895_v0  ;;  %v590_v12 = vshll.u32 %v341_v54, 16  ;;  %v596_v14 = vshll.u32 %v342_v60, 16 }
  0x3b   : > { %2514 = vmatprep.mubr.msk.bf16.mxu0 %vm811_vm0, %v2897_v1  ;;  %v589_v17 = vrot.slane %v587_v7, 4  ;;  %v600_v18 = vshrl.u32 %v342_v60, 16  ;;  %v2910_v19 = vcombine.low %v341_v54, %v342_v60  ;;  %v569_v20 = vor.u32 %v568_v58, %v565_v53  ;;  %v350_v7 = vld [vmem:[%s2778_s5 + $0x90] sm:$0xf] }
  0x3c   : > { %2515 = vmatmul.mubr.msk.bf16.gmra.mxu0 %vm811_vm0, %v2903_v10  ;;  %v592_v21 = vrot.slane %v590_v12, 5  ;;  %v598_v22 = vrot.slane %v596_v14, 5  ;;  %v579_v23 = vor.u32 %v578_v11, %v574_v5  ;;  %v582_v24 = vshll.u32 %v340_v8, 16 }
  0x3d   : > { %v602_v25 = vrot.slane %v600_v18, 4  ;;  %2553 = vmatmul.mubr.msk.bf16.gmra.mxu1 %vm811_vm0, %v2910_v19  ;;  %v570_v26 = vrot.slane %v569_v20, 4  ;;  %v606_v28 = vshll.u32 %v343_v9, 16  ;;  %v611_v2 = vshrl.u32 %v344_v15, 16 }
  0x3e   : > { %v580_v33 = vrot.slane %v579_v23, 4  ;;  %v584_v36 = vrot.slane %v582_v24, 5  ;;  %v593_v37 = vor.u32 %v592_v21, %v589_v17  ;;  %v614_v38 = vshll.u32 %v344_v15, 16  ;;  %v351_v23 = vld [vmem:[%s2778_s5 + $0x94] sm:$0xf] }
  0x3f   : > { %v575_v39 = vsel %vm2792_vm3, %v570_v26, %v574_v5  ;;  %v603_v40 = vor.u32 %v602_v25, %v598_v22  ;;  %v608_v42 = vrot.slane %v606_v28, 5  ;;  %v613_v43 = vrot.slane %v611_v2, 4 }
  0x40   : > { %v585_v45 = vsel %vm2792_vm3, %v580_v33, %v584_v36  ;;  %v594_v46 = vrot.slane %v593_v37, 4  ;;  %v616_v47 = vrot.slane %v614_v38, 5  ;;  %v620_v49 = vshll.u32 %v345_v30, 16  ;;  %v353_v38 = vld [vmem:[%s2778_s5 + $0x9c] sm:$0xf] }
  0x41   : > { %v2923_v51 = vcombine.low %v575_v39, %v585_v45  ;;  %v604_v52 = vrot.slane %v603_v40, 4  ;;  %v624_v53 = vshrl.u32 %v345_v30, 16  ;;  %v2925_v54 = vcombine.low %v344_v15, %v345_v30 }
  0x42   : > { %v599_v56 = vsel %vm2792_vm3, %v594_v46, %v598_v22  ;;  %v622_v58 = vrot.slane %v620_v49, 5  ;;  %v635_v59 = vshrl.u32 %v347_v44, 16  ;;  %v638_v60 = vshll.u32 %v347_v44, 16 }
  0x43   : > { %2518 = vmatprep.mubr.msk.bf16.mxu0 %vm811_vm0, %v2923_v51  ;;  %v609_v62 = vsel %vm2792_vm3, %v604_v52, %v608_v42  ;;  %v626_v63 = vrot.slane %v624_v53, 4  ;;  %2556 = vmatprep.mubr.msk.bf16.mxu1 %vm811_vm0, %v2925_v54  ;;  %v644_v4 = vshll.u32 %v348_v50, 16  ;;  %v648_v5 = vshrl.u32 %v348_v50, 16 }
  0x44   : > { %v2938_v8 = vcombine.low %v599_v56, %v609_v62  ;;  %v637_v9 = vrot.slane %v635_v59, 4  ;;  %v640_v11 = vrot.slane %v638_v60, 5  ;;  %v2940_v12 = vcombine.low %v347_v44, %v348_v50  ;;  %v354_v44 = vld [vmem:[%s2778_s5 + $0xa0] sm:$0xf]  ;;  %v352_v56 = vld [vmem:[%s2778_s5 + $0x98] sm:$0x1] }
  0x45   : > { %v646_v14 = vrot.slane %v644_v4, 5  ;;  %v650_v15 = vrot.slane %v648_v5, 4  ;;  %v617_v17 = vor.u32 %v616_v47, %v613_v43  ;;  %v627_v18 = vor.u32 %v626_v63, %v622_v58  ;;  %v356_v63 = vld [vmem:[%s2778_s5 + $0xa8] sm:$0xf] }
  0x46   : > { %2519 = vmatmul.mubr.msk.bf16.gmra.mxu0 %vm811_vm0, %v2938_v8  ;;  %2557 = vmatmul.mubr.msk.bf16.gmra.mxu1 %vm811_vm0, %v2940_v12  ;;  %v630_v20 = vshll.u32 %v346_v55, 16  ;;  %v641_v21 = vor.u32 %v640_v11, %v637_v9  ;;  %v654_v22 = vshll.u32 %v349_v61, 16  ;;  %v659_v24 = vshrl.u32 %v350_v7, 16 }
  0x47   : > { %v618_v25 = vrot.slane %v617_v17, 4  ;;  %v628_v26 = vrot.slane %v627_v18, 4  ;;  %v651_v28 = vor.u32 %v650_v15, %v646_v14  ;;  %v662_v30 = vshll.u32 %v350_v7, 16 }
  0x48   : > { %v632_v2 = vrot.slane %v630_v20, 5  ;;  %v642_v33 = vrot.slane %v641_v21, 4  ;;  %v656_v36 = vrot.slane %v654_v22, 5  ;;  %v661_v37 = vrot.slane %v659_v24, 4  ;;  %v357_v22 = vld [vmem:[%s2778_s5 + $0xac] sm:$0xf] }
  0x49   : > { %v623_v39 = vsel %vm2792_vm3, %v618_v25, %v622_v58  ;;  %v652_v40 = vrot.slane %v651_v28, 4  ;;  %v664_v42 = vrot.slane %v662_v30, 5  ;;  %v668_v43 = vshll.u32 %v351_v23, 16  ;;  %v355_v58 = vld [vmem:[%s2778_s5 + $0xa4] sm:$0x1] }
  0x4a   : > { %v633_v45 = vsel %vm2792_vm3, %v628_v26, %v632_v2  ;;  %v647_v46 = vsel %vm2792_vm3, %v642_v33, %v646_v14  ;;  %v672_v47 = vshrl.u32 %v351_v23, 16  ;;  %v2955_v49 = vcombine.low %v350_v7, %v351_v23 }
  0x4b   : > { %v2957_v50 = vcombine.low %v623_v39, %v633_v45  ;;  %v657_v52 = vsel %vm2792_vm3, %v652_v40, %v656_v36  ;;  %v670_v53 = vrot.slane %v668_v43, 5  ;;  %v683_v55 = vshrl.u32 %v353_v38, 16  ;;  %v360_v43 = vld [vmem:[%s2778_s5 + $0xb8] sm:$0xf] }
  0x4c   : > { %v2963_v59 = vcombine.low %v647_v46, %v657_v52  ;;  %v674_v60 = vrot.slane %v672_v47, 4  ;;  %2560 = vmatprep.mubr.msk.bf16.mxu1 %vm811_vm0, %v2955_v49  ;;  %v686_v61 = vshll.u32 %v353_v38, 16  ;;  %v692_v62 = vshll.u32 %v354_v44, 16 }
  0x4d   : > { %2522 = vmatprep.mubr.msk.bf16.mxu0 %vm811_vm0, %v2957_v50  ;;  %v685_v4 = vrot.slane %v683_v55, 4  ;;  %v696_v5 = vshrl.u32 %v354_v44, 16  ;;  %v2970_v7 = vcombine.low %v353_v38, %v354_v44  ;;  %v665_v9 = vor.u32 %v664_v42, %v661_v37  ;;  %v359_v37 = vld [vmem:[%s2778_s5 + $0xb4] sm:$0xf] }
  0x4e   : > { %2523 = vmatmul.mubr.msk.bf16.gmra.mxu0 %vm811_vm0, %v2963_v59  ;;  %v688_v11 = vrot.slane %v686_v61, 5  ;;  %v694_v14 = vrot.slane %v692_v62, 5  ;;  %v675_v15 = vor.u32 %v674_v60, %v670_v53  ;;  %v678_v17 = vshll.u32 %v352_v56, 16 }
  0x4f   : > { %v698_v18 = vrot.slane %v696_v5, 4  ;;  %2561 = vmatmul.mubr.msk.bf16.gmra.mxu1 %vm811_vm0, %v2970_v7  ;;  %v666_v20 = vrot.slane %v665_v9, 4  ;;  %v702_v21 = vshll.u32 %v355_v58, 16  ;;  %v707_v23 = vshrl.u32 %v356_v63, 16  ;;  %v358_v58 = vld [vmem:[%s2778_s5 + $0xb0] sm:$0x1] }
  0x50   : > { %v676_v24 = vrot.slane %v675_v15, 4  ;;  %v680_v25 = vrot.slane %v678_v17, 5  ;;  %v689_v26 = vor.u32 %v688_v11, %v685_v4  ;;  %v710_v28 = vshll.u32 %v356_v63, 16  ;;  %v361_v4 = vld [vmem:[%s2778_s5 + $0xbc] sm:$0x1] }
  0x51   : > { %v671_v30 = vsel %vm2792_vm3, %v666_v20, %v670_v53  ;;  %v699_v2 = vor.u32 %v698_v18, %v694_v14  ;;  %v704_v33 = vrot.slane %v702_v21, 5  ;;  %v709_v36 = vrot.slane %v707_v23, 4 }
  0x52   : > { %v681_v38 = vsel %vm2792_vm3, %v676_v24, %v680_v25  ;;  %v690_v39 = vrot.slane %v689_v26, 4  ;;  %v712_v40 = vrot.slane %v710_v28, 5  ;;  %v716_v42 = vshll.u32 %v357_v22, 16 }
  0x53   : > { %v2983_v44 = vcombine.low %v671_v30, %v681_v38  ;;  %v700_v45 = vrot.slane %v699_v2, 4  ;;  %v720_v46 = vshrl.u32 %v357_v22, 16  ;;  %v2985_v47 = vcombine.low %v356_v63, %v357_v22 }
  0x54   : > { %v695_v52 = vsel %vm2792_vm3, %v690_v39, %v694_v14  ;;  %v718_v53 = vrot.slane %v716_v42, 5  ;;  %v731_v55 = vshrl.u32 %v359_v37, 16  ;;  %v734_v56 = vshll.u32 %v359_v37, 16 }
  0x55   : > { %2526 = vmatprep.mubr.msk.bf16.mxu0 %vm811_vm0, %v2983_v44  ;;  %v705_v60 = vsel %vm2792_vm3, %v700_v45, %v704_v33  ;;  %v722_v61 = vrot.slane %v720_v46, 4  ;;  %2564 = vmatprep.mubr.msk.bf16.mxu1 %vm811_vm0, %v2985_v47  ;;  %v740_v62 = vshll.u32 %v360_v43, 16  ;;  %v744_v63 = vshrl.u32 %v360_v43, 16 }
  0x56   : > { %v2997_v5 = vcombine.low %v695_v52, %v705_v60  ;;  %v733_v9 = vrot.slane %v731_v55, 4  ;;  %v736_v11 = vrot.slane %v734_v56, 5  ;;  %v2999_v14 = vcombine.low %v359_v37, %v360_v43 }
  0x57   : > { %v742_v15 = vrot.slane %v740_v62, 5  ;;  %v746_v17 = vrot.slane %v744_v63, 4  ;;  %v713_v18 = vor.u32 %v712_v40, %v709_v36  ;;  %v723_v20 = vor.u32 %v722_v61, %v718_v53 }
  0x58   : > { %2527 = vmatmul.mubr.msk.bf16.gmra.mxu0 %vm811_vm0, %v2997_v5  ;;  %2565 = vmatmul.mubr.msk.bf16.gmra.mxu1 %vm811_vm0, %v2999_v14  ;;  %v726_v21 = vshll.u32 %v358_v58, 16  ;;  %v737_v22 = vor.u32 %v736_v11, %v733_v9  ;;  %v750_v23 = vshll.u32 %v361_v4, 16 }
  0x59   : > { %v714_v24 = vrot.slane %v713_v18, 4  ;;  %v724_v25 = vrot.slane %v723_v20, 4  ;;  %v747_v26 = vor.u32 %v746_v17, %v742_v15  ;;  %2604 = vmatprep.mubr.msk.bf16.mxu1 %vm811_vm0, %v2815_v3 }
  0x5a   : > { %v728_v28 = vrot.slane %v726_v21, 5  ;;  %v738_v30 = vrot.slane %v737_v22, 4  ;;  %v752_v2 = vrot.slane %v750_v23, 5 }
  0x5b   : > { %v719_v33 = vsel %vm2792_vm3, %v714_v24, %v718_v53  ;;  %v748_v36 = vrot.slane %v747_v26, 4 }
  0x5c   : > { %v729_v37 = vsel %vm2792_vm3, %v724_v25, %v728_v28  ;;  %v743_v38 = vsel %vm2792_vm3, %v738_v30, %v742_v15 }
  0x5d   : > { %v2176_v39 = vcombine.low %v719_v33, %v729_v37  ;;  %v753_v40 = vsel %vm2792_vm3, %v748_v36, %v752_v2 }
  0x5e   : > { %v2177_v42 = vcombine.low %v743_v38, %v753_v40 }
  0x5f   : > { %2530 = vmatprep.mubr.msk.bf16.mxu0 %vm811_vm0, %v2176_v39 }
  0x60   : > { %2531 = vmatmul.mubr.msk.bf16.gmra.mxu0 %vm811_vm0, %v2177_v42  ;;  %2605 = vmatmul.mubr.msk.bf16.vlgmr.msra.gmra.mxu1 %vm811_vm0, %v2837_v35 }
  0x61   : > { %2570 = vmatprep.mubr.msk.bf16.mxu0 %vm811_vm0, %v2788_v27  ;;  %2608 = vmatprep.mubr.msk.bf16.mxu1 %vm811_vm0, %v2843_v41  ;;  %v362_v27 = vld [vmem:[%s301_s9] sm:$0xf] }
  0x62   : > { %v1527_v3 = vshrl.u32 %v362_v27, 16 }
  0x64   : > { %v1529_v41 = vrot.slane %v1527_v3, 4 }
  0x68   : > { %2571 = vmatmul.mubr.msk.bf16.vlgmr.msra.gmra.mxu0 %vm811_vm0, %v2808_v57  ;;  %2609 = vmatmul.mubr.msk.bf16.gmra.mxu1 %vm811_vm0, %v2863_v13  ;;  %v363_v57 = vld [vmem:[%s301_s9 + $0x4] sm:$0xf] }
  0x69   : > { %2574 = vmatprep.mubr.msk.bf16.mxu0 %vm811_vm0, %v2819_v6  ;;  %2612 = vmatprep.mubr.msk.bf16.mxu1 %vm811_vm0, %v2878_v29  ;;  %v1530_v6 = vshll.u32 %v362_v27, 16  ;;  %v1540_v35 = vshrl.u32 %v363_v57, 16  ;;  %v364_v29 = vld [vmem:[%s301_s9 + $0x8] sm:$0x1] }
  0x70   : > { %2575 = vmatmul.mubr.msk.bf16.gmra.mxu0 %vm811_vm0, %v2835_v34  ;;  %2613 = vmatmul.mubr.msk.bf16.gmra.mxu1 %vm811_vm0, %v2897_v1  ;;  %v1536_v34 = vshll.u32 %v363_v57, 16  ;;  %v1546_v1 = vshll.u32 %v364_v29, 16 }
  0x71   : > { %2578 = vmatprep.mubr.msk.bf16.mxu0 %vm811_vm0, %v2850_v48  ;;  %2616 = vmatprep.mubr.msk.bf16.mxu1 %vm811_vm0, %v2903_v10  ;;  %v1532_v48 = vrot.slane %v1530_v6, 5 }
  0x72   : > { %v1538_v13 = vrot.slane %v1536_v34, 5 }
  0x78   : > { %2579 = vmatmul.mubr.msk.bf16.gmra.mxu0 %vm811_vm0, %v2865_v16  ;;  %2617 = vmatmul.mubr.msk.bf16.gmra.mxu1 %vm811_vm0, %v2923_v51  ;;  %v1542_v16 = vrot.slane %v1540_v35, 4  ;;  %v1548_v51 = vrot.slane %v1546_v1, 5 }
  0x79   : > { %2582 = vmatprep.mubr.msk.bf16.mxu0 %vm811_vm0, %v2880_v31  ;;  %2620 = vmatprep.mubr.msk.bf16.mxu1 %vm811_vm0, %v2938_v8  ;;  %v1533_v31 = vor.u32 %v1532_v48, %v1529_v41 }
  0x7b   : > { %v1534_v10 = vrot.slane %v1533_v31, 4 }
  0x80   : > { %2583 = vmatmul.mubr.msk.bf16.gmra.mxu0 %vm811_vm0, %v2895_v0  ;;  %2621 = vmatmul.mubr.msk.bf16.gmra.mxu1 %vm811_vm0, %v2957_v50  ;;  %v1543_v0 = vor.u32 %v1542_v16, %v1538_v13 }
  0x81   : > { %2586 = vmatprep.mubr.msk.bf16.mxu0 %vm811_vm0, %v2910_v19  ;;  %2624 = vmatprep.mubr.msk.bf16.mxu1 %vm811_vm0, %v2963_v59 }
  0x82   : > { %v1544_v19 = vrot.slane %v1543_v0, 4 }
  0x84   : > { %v1549_v8 = vsel %vm2792_vm3, %v1544_v19, %v1548_v51 }
  0x88   : > { %2587 = vmatmul.mubr.msk.bf16.gmra.mxu0 %vm811_vm0, %v2925_v54  ;;  %2625 = vmatmul.mubr.msk.bf16.gmra.mxu1 %vm811_vm0, %v2983_v44  ;;  %v1539_v54 = vsel %vm2792_vm3, %v1534_v10, %v1538_v13 }
  0x89   : > { %2590 = vmatprep.mubr.msk.bf16.mxu0 %vm811_vm0, %v2940_v12  ;;  %2628 = vmatprep.mubr.msk.bf16.mxu1 %vm811_vm0, %v2997_v5  ;;  %v2250_v12 = vcombine.low %v1539_v54, %v1549_v8 }
  0x90   : > { %2591 = vmatmul.mubr.msk.bf16.gmra.mxu0 %vm811_vm0, %v2955_v49  ;;  %2629 = vmatmul.mubr.msk.bf16.gmra.mxu1 %vm811_vm0, %v2176_v39  ;;  %v2230_v49 = vcombine.low %v362_v27, %v363_v57 }
  0x91   : > { %2594 = vmatprep.mubr.msk.bf16.mxu0 %vm811_vm0, %v2970_v7  ;;  %2632 = vmatprep.mubr.msk.bf16.mxu1 %vm811_vm0, %v2177_v42 }
  0x98   : > { %2595 = vmatmul.mubr.msk.bf16.gmra.mxu0 %vm811_vm0, %v2985_v47  ;;  %2633 = vmatmul.mubr.msk.bf16.gmra.mxu1 %vm811_vm0, %v2250_v12 }
  0x99   : > { %2598 = vmatprep.mubr.msk.bf16.mxu0 %vm811_vm0, %v2999_v14 }
  0xa0   : > { %2599 = vmatmul.mubr.msk.bf16.gmra.mxu0 %vm811_vm0, %v2230_v49 }
  0xda   : > { %v2538_v50 = vpop.f32.mrf.mxu1 }
  0xdc   : > { %v1189_v59 = vpop.f32.mrf.mxu1 }
  0xde   : > { %v3084_v7 = vpop.f32.mrf.mxu1 }
  0xe0   : > { %v3086_v43 = vpop.f32.mrf.mxu1 }
  0xe2   : > { %v2504_v32 = vpop.f32.mrf.mxu0  ;;  %v2542_v44 = vpop.f32.mrf.mxu1 }
  0xe3   : > { %v3088_v45 = vadd.f32 %v2538_v50, %v2504_v32 }
  0xe4   : > { %v894_v46 = vpop.f32.mrf.mxu0  ;;  %v1205_v47 = vpop.f32.mrf.mxu1 }
  0xe5   : > { %v3090_v52 = vadd.f32 %v1189_v59, %v894_v46 }
  0xe6   : > { %v3092_v53 = vpop.f32.mrf.mxu0  ;;  %v3094_v55 = vpop.f32.mrf.mxu1 }
  0xe8   : > { %v3096_v56 = vpop.f32.mrf.mxu0  ;;  %v3098_v58 = vpop.f32.mrf.mxu1 }
  0xea   : > { %v2508_v60 = vpop.f32.mrf.mxu0 }
  0xeb   : > { %v3100_v61 = vadd.f32 %v2542_v44, %v2508_v60  ;;  %v2546_v62 = vpop.f32.mrf.mxu1 }
  0xec   : > { %v910_v63 = vpop.f32.mrf.mxu0 }
  0xed   : > { %v3102_v4 = vadd.f32 %v1205_v47, %v910_v63  ;;  %v1221_v5 = vpop.f32.mrf.mxu1 }
  0xee   : > { %v3104_v9 = vpop.f32.mrf.mxu0 }
  0xef   : > { %v3106_v11 = vpop.f32.mrf.mxu1 }
  0xf0   : > { %v3108_v14 = vpop.f32.mrf.mxu0 }
  0xf1   : > { %v3110_v15 = vpop.f32.mrf.mxu1 }
  0xf4   : > { %v2512_v17 = vpop.f32.mrf.mxu0  ;;  %v2550_v18 = vpop.f32.mrf.mxu1 }
  0xf5   : > { %v3112_v20 = vadd.f32 %v2546_v62, %v2512_v17 }
  0xf6   : > { %v926_v21 = vpop.f32.mrf.mxu0  ;;  %v1237_v22 = vpop.f32.mrf.mxu1 }
  0xf7   : > { %v3114_v23 = vadd.f32 %v1221_v5, %v926_v21 }
  0xf8   : > { %v3116_v24 = vpop.f32.mrf.mxu0  ;;  %v3118_v25 = vpop.f32.mrf.mxu1 }
  0xfa   : > { %v3120_v26 = vpop.f32.mrf.mxu0  ;;  %v3122_v28 = vpop.f32.mrf.mxu1 }
  0xfc   : > { %v2516_v30 = vpop.f32.mrf.mxu0 }
  0xfd   : > { %v3124_v2 = vadd.f32 %v2550_v18, %v2516_v30  ;;  %v2554_v33 = vpop.f32.mrf.mxu1 }
  0xfe   : > { %v942_v36 = vpop.f32.mrf.mxu0 }
  0xff   : > { %v3126_v37 = vadd.f32 %v1237_v22, %v942_v36  ;;  %v1253_v38 = vpop.f32.mrf.mxu1 }
 0x100   : > { %v3128_v39 = vpop.f32.mrf.mxu0 }
 0x101   : > { %v3130_v40 = vpop.f32.mrf.mxu1 }
 0x102   : > { %v3132_v42 = vpop.f32.mrf.mxu0 }
 0x103   : > { %v3134_v27 = vpop.f32.mrf.mxu1 }
 0x106   : > { %v2520_v57 = vpop.f32.mrf.mxu0  ;;  %v2558_v3 = vpop.f32.mrf.mxu1 }
 0x107   : > { %v3136_v6 = vadd.f32 %v2554_v33, %v2520_v57 }
 0x108   : > { %v958_v34 = vpop.f32.mrf.mxu0  ;;  %v1269_v35 = vpop.f32.mrf.mxu1 }
 0x109   : > { %v3138_v41 = vadd.f32 %v1253_v38, %v958_v34 }
 0x10a   : > { %v3140_v48 = vpop.f32.mrf.mxu0  ;;  %v3142_v13 = vpop.f32.mrf.mxu1 }
 0x10c   : > { %v3144_v16 = vpop.f32.mrf.mxu0  ;;  %v3146_v29 = vpop.f32.mrf.mxu1 }
 0x10e   : > { %v2524_v31 = vpop.f32.mrf.mxu0 }
 0x10f   : > { %v3148_v0 = vadd.f32 %v2558_v3, %v2524_v31  ;;  %v2562_v1 = vpop.f32.mrf.mxu1 }
 0x110   : > { %v974_v10 = vpop.f32.mrf.mxu0 }
 0x111   : > { %v3150_v19 = vadd.f32 %v1269_v35, %v974_v10  ;;  %v1285_v51 = vpop.f32.mrf.mxu1 }
 0x112   : > { %v3152_v54 = vpop.f32.mrf.mxu0 }
 0x113   : > { %v3154_v8 = vpop.f32.mrf.mxu1 }
 0x114   : > { %v3156_v12 = vpop.f32.mrf.mxu0 }
 0x115   : > { %v3158_v49 = vpop.f32.mrf.mxu1 }
 0x118   : > { %v2528_v50 = vpop.f32.mrf.mxu0  ;;  %v2566_v59 = vpop.f32.mrf.mxu1 }
 0x119   : > { %v3160_v32 = vadd.f32 %v2562_v1, %v2528_v50  ;;  %v3185_v1 = vld [vmem:[%s3311_s3] ss:$0 sm:$0xff]  ;;  %v1201_v50 = vadd.f32 %v3084_v7, %v3092_v53 }
 0x11a   : > { %v990_v44 = vpop.f32.mrf.mxu0  ;;  %v1301_v46 = vpop.f32.mrf.mxu1 }
 0x11b   : > { %v3162_v47 = vadd.f32 %v1285_v51, %v990_v44 }
 0x11c   : > { %v3164_v60 = vpop.f32.mrf.mxu0  ;;  %v3166_v62 = vpop.f32.mrf.mxu1 }
 0x11d   : > { %3315 = vst [vmem:[#allocation2_spill] sm:$0xff] %v3166_v62 }
 0x11e   : > { %v3168_v63 = vpop.f32.mrf.mxu0  ;;  %v3170_v5 = vpop.f32.mrf.mxu1 }
 0x11f   : > { %3316 = vst [vmem:[#allocation3_spill] sm:$0xff] %v3170_v5 }
 0x120   : > { %v2532_v17 = vpop.f32.mrf.mxu0  ;;  %v2606_v18 = vpop.f32.mrf.mxu1 }
 0x121   : > { %v3172_v21 = vadd.f32 %v2566_v59, %v2532_v17 }
 0x122   : > { %v1006_v22 = vpop.f32.mrf.mxu0  ;;  %v1599_v30 = vpop.f32.mrf.mxu1 }
 0x123   : > { %3317 = vst [vmem:[#allocation4_spill] sm:$0xff] %v3172_v21  ;;  %v3174_v33 = vadd.f32 %v1301_v46, %v1006_v22 }
 0x124   : > { %v3176_v36 = vpop.f32.mrf.mxu0  ;;  %v2607_v38 = vpop.f32.mrf.mxu1 }
 0x125   : > { %3318 = vst [vmem:[#allocation5_spill] sm:$0xff] %v3174_v33 }
 0x126   : > { %v3178_v57 = vpop.f32.mrf.mxu0  ;;  %v1602_v3 = vpop.f32.mrf.mxu1 }
 0x127   : > { %3319 = vst [vmem:[#allocation6_spill] sm:$0xff] %v3178_v57 }
 0x128   : > { %v2572_v34 = vpop.f32.mrf.mxu0  ;;  %v2610_v35 = vpop.f32.mrf.mxu1 }
 0x129   : > { %v1496_v31 = vadd.f32 %v2572_v34, %v3088_v45  ;;  %v1193_v34 = vadd.f32 %v3086_v43, %v3096_v56 }
 0x12a   : > { %v1367_v10 = vpop.f32.mrf.mxu0  ;;  %v1615_v51 = vpop.f32.mrf.mxu1 }
 0x12b   : > { %v1728_v59 = vadd.f32 %v2606_v18, %v1496_v31  ;;  %v1494_v44 = vadd.f32 %v1367_v10, %v3090_v52 }
 0x12c   : > { %v2573_v46 = vpop.f32.mrf.mxu0  ;;  %v2611_v17 = vpop.f32.mrf.mxu1 }
 0x12d   : > { %v1767_v22 = vadd.f32 %v3185_v1, %v1728_v59  ;;  %v1726_v33 = vadd.f32 %v1599_v30, %v1494_v44  ;;  %v1497_v45 = vadd.f32 %v2573_v46, %v1201_v50  ;;  %v1217_v30 = vadd.f32 %v3094_v55, %v3104_v9 }
 0x12e   : > { %v1370_v5 = vpop.f32.mrf.mxu0  ;;  %v1618_v57 = vpop.f32.mrf.mxu1 }
 0x12f   : > { %v1729_v21 = vadd.f32 %v2607_v38, %v1497_v45  ;;  %v1831_v62 = vmul.f32 0.2, %v1767_v22  ;;  %v1765_v7 = vadd.f32 %v3185_v1, %v1726_v33  ;;  %v1495_v53 = vadd.f32 %v1370_v5, %v1193_v34 }
 0x130   : > { %v2576_v52 = vpop.f32.mrf.mxu0  ;;  %v2614_v18 = vpop.f32.mrf.mxu1  ;;  %vm1799_vm4 = vcmp.ge.f32.partialorder %v1767_v22, 0.0  ;;  %v1209_v38 = vadd.f32 %v3098_v58, %v3108_v14 }
 0x131   : > { %v1768_v31 = vadd.f32 %v3185_v1, %v1729_v21  ;;  %v1727_v43 = vadd.f32 %v1602_v3, %v1495_v53  ;;  %v1500_v56 = vadd.f32 %v2576_v52, %v3100_v61  ;;  %v1863_v59 = vsel %vm1799_vm4, %v1767_v22, %v1831_v62 }
 0x132   : > { %v1383_v10 = vpop.f32.mrf.mxu0  ;;  %v1631_v50 = vpop.f32.mrf.mxu1  ;;  %v1829_v44 = vmul.f32 0.2, %v1765_v7  ;;  %vm1797_vm6 = vcmp.ge.f32.partialorder %v1765_v7, 0.0 }
 0x133   : > { %vm1800_vm5 = vcmp.ge.f32.partialorder %v1768_v31, 0.0  ;;  %v1832_v33 = vmul.f32 0.2, %v1768_v31  ;;  %v1498_v5 = vadd.f32 %v1383_v10, %v3102_v4  ;;  %v1766_v21 = vadd.f32 %v3185_v1, %v1727_v43 }
 0x134   : > { %v1732_v46 = vadd.f32 %v2610_v35, %v1500_v56  ;;  %v2577_v45 = vpop.f32.mrf.mxu0  ;;  %v2615_v55 = vpop.f32.mrf.mxu1  ;;  %v1861_v53 = vsel %vm1797_vm6, %v1765_v7, %v1829_v44 }
 0x135   : > { %v1864_v61 = vsel %vm1800_vm5, %v1768_v31, %v1832_v33  ;;  %v1730_v58 = vadd.f32 %v1615_v51, %v1498_v5  ;;  %v1501_v9 = vadd.f32 %v2577_v45, %v1217_v30  ;;  %vm1798_vm7 = vcmp.ge.f32.partialorder %v1766_v21, 0.0 }
 0x136   : > { %v2345_v14 = vpack.c.bf16 %v1864_v61, %v1863_v59  ;;  %v1830_v4 = vmul.f32 0.2, %v1766_v21  ;;  %v1771_v62 = vadd.f32 %v3185_v1, %v1732_v46  ;;  %v1386_v3 = vpop.f32.mrf.mxu0  ;;  %v1634_v22 = vpop.f32.mrf.mxu1  ;;  %v1233_v33 = vadd.f32 %v3106_v11, %v3116_v24 }
 0x137   : > { %v1733_v35 = vadd.f32 %v2611_v17, %v1501_v9  ;;  %v1499_v34 = vadd.f32 %v1386_v3, %v1209_v38  ;;  %v1769_v43 = vadd.f32 %v3185_v1, %v1730_v58  ;;  %v1225_v59 = vadd.f32 %v3110_v15, %v3120_v26 }
 0x138   : > { %2417 = vst [vmem:[%s3208_s19 + $0x8] sm:$0xff] %v2345_v14   ;;  %v1862_v52 = vsel %vm1798_vm7, %v1766_v21, %v1830_v4  ;;  %v2580_v56 = vpop.f32.mrf.mxu0  ;;  %v2618_v10 = vpop.f32.mrf.mxu1  ;;  %v1835_v51 = vmul.f32 0.2, %v1771_v62  ;;  %vm1803_vm8 = vcmp.ge.f32.partialorder %v1771_v62, 0.0 }
 0x139   : > { %v2340_v31 = vpack.c.bf16 %v1862_v52, %v1861_v53  ;;  %v1772_v30 = vadd.f32 %v3185_v1, %v1733_v35  ;;  %v1731_v5 = vadd.f32 %v1618_v57, %v1499_v34  ;;  %v1504_v17 = vadd.f32 %v2580_v56, %v3112_v20 }
 0x13a   : > { %v1399_v38 = vpop.f32.mrf.mxu0  ;;  %v1647_v7 = vpop.f32.mrf.mxu1  ;;  %vm1801_vm10 = vcmp.ge.f32.partialorder %v1769_v43, 0.0  ;;  %v1833_v46 = vmul.f32 0.2, %v1769_v43  ;;  %v1867_v20 = vsel %vm1803_vm8, %v1771_v62, %v1835_v51  ;;  %v1249_v51 = vadd.f32 %v3118_v25, %v3128_v39 }
 0x13b   : > { %2341 = vst [vmem:[%s3208_s19] sm:$0xff] %v2340_v31   ;;  %vm1804_vm9 = vcmp.ge.f32.partialorder %v1772_v30, 0.0  ;;  %v1836_v44 = vmul.f32 0.2, %v1772_v30  ;;  %v1502_v21 = vadd.f32 %v1399_v38, %v3114_v23  ;;  %v1770_v45 = vadd.f32 %v3185_v1, %v1731_v5 }
 0x13c   : > { %v1736_v61 = vadd.f32 %v2614_v18, %v1504_v17  ;;  %v2581_v11 = vpop.f32.mrf.mxu0  ;;  %v2619_v24 = vpop.f32.mrf.mxu1  ;;  %v1865_v34 = vsel %vm1801_vm10, %v1769_v43, %v1833_v46  ;;  %v1241_v5 = vadd.f32 %v3122_v28, %v3132_v42 }
 0x13d   : > { %v1868_v57 = vsel %vm1804_vm9, %v1772_v30, %v1836_v44  ;;  %v1734_v58 = vadd.f32 %v1631_v50, %v1502_v21  ;;  %v1505_v9 = vadd.f32 %v2581_v11, %v1233_v33  ;;  %vm1802_vm11 = vcmp.ge.f32.partialorder %v1770_v45, 0.0 }
 0x13e   : > { %v2355_v14 = vpack.c.bf16 %v1868_v57, %v1867_v20  ;;  %v1834_v15 = vmul.f32 0.2, %v1770_v45  ;;  %v1775_v26 = vadd.f32 %v3185_v1, %v1736_v61  ;;  %v1402_v4 = vpop.f32.mrf.mxu0  ;;  %v1650_v23 = vpop.f32.mrf.mxu1 }
 0x13f   : > { %v1737_v3 = vadd.f32 %v2615_v55, %v1505_v9  ;;  %v1503_v35 = vadd.f32 %v1402_v4, %v1225_v59  ;;  %v1773_v53 = vadd.f32 %v3185_v1, %v1734_v58 }
 0x140   : > { %2419 = vst [vmem:[%s3208_s19 + $0x18] sm:$0xff] %v2355_v14   ;;  %v1866_v18 = vsel %vm1802_vm11, %v1770_v45, %v1834_v15  ;;  %v2584_v62 = vpop.f32.mrf.mxu0  ;;  %v2622_v52 = vpop.f32.mrf.mxu1  ;;  %v1839_v56 = vmul.f32 0.2, %v1775_v26  ;;  %vm1807_vm12 = vcmp.ge.f32.partialorder %v1775_v26, 0.0 }
 0x141   : > { %v2350_v50 = vpack.c.bf16 %v1866_v18, %v1865_v34  ;;  %v1776_v31 = vadd.f32 %v3185_v1, %v1737_v3  ;;  %v1735_v30 = vadd.f32 %v1634_v22, %v1503_v35  ;;  %v1508_v55 = vadd.f32 %v2584_v62, %v3124_v2 }
 0x142   : > { %v1415_v33 = vpop.f32.mrf.mxu0  ;;  %v1663_v43 = vpop.f32.mrf.mxu1  ;;  %vm1805_vm14 = vcmp.ge.f32.partialorder %v1773_v53, 0.0  ;;  %v1837_v59 = vmul.f32 0.2, %v1773_v53  ;;  %v1871_v2 = vsel %vm1807_vm12, %v1775_v26, %v1839_v56  ;;  %v1265_v3 = vadd.f32 %v3130_v40, %v3140_v48 }
 0x143   : > { %2418 = vst [vmem:[%s3208_s19 + $0x10] sm:$0xff] %v2350_v50   ;;  %vm1808_vm13 = vcmp.ge.f32.partialorder %v1776_v31, 0.0  ;;  %v1840_v17 = vmul.f32 0.2, %v1776_v31  ;;  %v1506_v38 = vadd.f32 %v1415_v33, %v3126_v37  ;;  %v1774_v44 = vadd.f32 %v3185_v1, %v1735_v30 }
 0x144   : > { %v1740_v21 = vadd.f32 %v2618_v10, %v1508_v55  ;;  %v2585_v25 = vpop.f32.mrf.mxu0  ;;  %v2623_v39 = vpop.f32.mrf.mxu1  ;;  %v1869_v58 = vsel %vm1805_vm14, %v1773_v53, %v1837_v59  ;;  %v1257_v53 = vadd.f32 %v3134_v27, %v3144_v16 }
 0x145   : > { %v1872_v22 = vsel %vm1808_vm13, %v1776_v31, %v1840_v17  ;;  %v1738_v46 = vadd.f32 %v1647_v7, %v1506_v38  ;;  %v1509_v45 = vadd.f32 %v2585_v25, %v1249_v51  ;;  %vm1806_vm15 = vcmp.ge.f32.partialorder %v1774_v44, 0.0 }
 0x146   : > { %v2365_v61 = vpack.c.bf16 %v1872_v22, %v1871_v2  ;;  %v1838_v28 = vmul.f32 0.2, %v1774_v44  ;;  %v1779_v42 = vadd.f32 %v3185_v1, %v1740_v21  ;;  %v1418_v11 = vpop.f32.mrf.mxu0  ;;  %v1666_v37 = vpop.f32.mrf.mxu1 }
 0x147   : > { %v1741_v20 = vadd.f32 %v2619_v24, %v1509_v45  ;;  %v1507_v57 = vadd.f32 %v1418_v11, %v1241_v5  ;;  %v1777_v9 = vadd.f32 %v3185_v1, %v1738_v46  ;;  %v1281_v46 = vadd.f32 %v3142_v13, %v3152_v54 }
 0x148   : > { %2421 = vst [vmem:[%s3208_s19 + $0x28] sm:$0xff] %v2365_v61   ;;  %v1870_v10 = vsel %vm1806_vm15, %v1774_v44, %v1838_v28  ;;  %v2588_v14 = vpop.f32.mrf.mxu0  ;;  %v2626_v15 = vpop.f32.mrf.mxu1  ;;  %v1843_v26 = vmul.f32 0.2, %v1779_v42  ;;  %vm1811_vm0 = vcmp.ge.f32.partialorder %v1779_v42, 0.0 }
 0x149   : > { %v2360_v7 = vpack.c.bf16 %v1870_v10, %v1869_v58  ;;  %v1780_v4 = vadd.f32 %v3185_v1, %v1741_v20  ;;  %v1739_v35 = vadd.f32 %v1650_v23, %v1507_v57  ;;  %v1512_v24 = vadd.f32 %v2588_v14, %v3136_v6 }
 0x14a   : > { %v1431_v34 = vpop.f32.mrf.mxu0  ;;  %v1679_v18 = vpop.f32.mrf.mxu1  ;;  %vm1809_vm2 = vcmp.ge.f32.partialorder %v1777_v9, 0.0  ;;  %v1841_v56 = vmul.f32 0.2, %v1777_v9  ;;  %v1875_v6 = vsel %vm1811_vm0, %v1779_v42, %v1843_v26  ;;  %v1273_v42 = vadd.f32 %v3146_v29, %v3156_v12 }
 0x14b   : > { %2420 = vst [vmem:[%s3208_s19 + $0x20] sm:$0xff] %v2360_v7   ;;  %vm1812_vm1 = vcmp.ge.f32.partialorder %v1780_v4, 0.0  ;;  %v1844_v62 = vmul.f32 0.2, %v1780_v4  ;;  %v1510_v50 = vadd.f32 %v1431_v34, %v3138_v41  ;;  %v1778_v31 = vadd.f32 %v3185_v1, %v1739_v35 }
 0x14c   : > { %v1744_v51 = vadd.f32 %v2622_v52, %v1512_v24  ;;  %v2589_v40 = vpop.f32.mrf.mxu0  ;;  %v2627_v48 = vpop.f32.mrf.mxu1  ;;  %v1873_v59 = vsel %vm1809_vm2, %v1777_v9, %v1841_v56 }
 0x14d   : > { %v1876_v23 = vsel %vm1812_vm1, %v1780_v4, %v1844_v62  ;;  %v1742_v30 = vadd.f32 %v1663_v43, %v1510_v50  ;;  %v1513_v55 = vadd.f32 %v2589_v40, %v1265_v3  ;;  %vm1810_vm3 = vcmp.ge.f32.partialorder %v1778_v31, 0.0 }
 0x14e   : > { %v2375_v33 = vpack.c.bf16 %v1876_v23, %v1875_v6  ;;  %v1842_v27 = vmul.f32 0.2, %v1778_v31  ;;  %v1783_v16 = vadd.f32 %v3185_v1, %v1744_v51  ;;  %v1434_v5 = vpop.f32.mrf.mxu0  ;;  %v1682_v41 = vpop.f32.mrf.mxu1  ;;  %v1297_v50 = vadd.f32 %v3154_v8, %v3164_v60 }
 0x14f   : > { %v1745_v17 = vadd.f32 %v2623_v39, %v1513_v55  ;;  %v1511_v38 = vadd.f32 %v1434_v5, %v1257_v53  ;;  %v1781_v44 = vadd.f32 %v3185_v1, %v1742_v30  ;;  %v1289_v40 = vadd.f32 %v3158_v49, %v3168_v63 }
 0x150   : > { %2423 = vst [vmem:[%s3208_s19 + $0x38] sm:$0xff] %v2375_v33   ;;  %v1874_v52 = vsel %vm1810_vm3, %v1778_v31, %v1842_v27  ;;  %v2592_v21 = vpop.f32.mrf.mxu0  ;;  %v2630_v25 = vpop.f32.mrf.mxu1  ;;  %v1847_v2 = vmul.f32 0.2, %v1783_v16  ;;  %vm1815_vm4 = vcmp.ge.f32.partialorder %v1783_v16, 0.0 }
 0x151   : > { %v2370_v43 = vpack.c.bf16 %v1874_v52, %v1873_v59  ;;  %v1784_v22 = vadd.f32 %v3185_v1, %v1745_v17  ;;  %v1743_v45 = vadd.f32 %v1666_v37, %v1511_v38  ;;  %v1516_v39 = vadd.f32 %v2592_v21, %v3148_v0 }
 0x152   : > { %v1447_v61 = vpop.f32.mrf.mxu0  ;;  %v1695_v28 = vpop.f32.mrf.mxu1  ;;  %vm1813_vm6 = vcmp.ge.f32.partialorder %v1781_v44, 0.0  ;;  %v1845_v57 = vmul.f32 0.2, %v1781_v44  ;;  %v1879_v37 = vsel %vm1815_vm4, %v1783_v16, %v1847_v2 }
 0x153   : > { %2422 = vst [vmem:[%s3208_s19 + $0x30] sm:$0xff] %v2370_v43   ;;  %vm1816_vm5 = vcmp.ge.f32.partialorder %v1784_v22, 0.0  ;;  %v1848_v11 = vmul.f32 0.2, %v1784_v22  ;;  %v1514_v20 = vadd.f32 %v1447_v61, %v3150_v19  ;;  %v1782_v58 = vadd.f32 %v3185_v1, %v1743_v45 }
 0x154   : > { %v1748_v13 = vadd.f32 %v2626_v15, %v1516_v39  ;;  %v2593_v54 = vpop.f32.mrf.mxu0  ;;  %v2631_v14 = vpop.f32.mrf.mxu1  ;;  %v1877_v3 = vsel %vm1813_vm6, %v1781_v44, %v1845_v57  ;;  %v3321_v39 = vld [vmem:[#allocation4_spill] sm:$0xff] }
 0x155   : > { %v1880_v10 = vsel %vm1816_vm5, %v1784_v22, %v1848_v11  ;;  %v1746_v0 = vadd.f32 %v1679_v18, %v1514_v20  ;;  %v1517_v9 = vadd.f32 %v2593_v54, %v1281_v46  ;;  %vm1814_vm7 = vcmp.ge.f32.partialorder %v1782_v58, 0.0  ;;  %v3320_v22 = vld [vmem:[#allocation2_spill] sm:$0xff]  ;;  %v3323_v11 = vld [vmem:[#allocation3_spill] sm:$0xff] }
 0x156   : > { %v2385_v7 = vpack.c.bf16 %v1880_v10, %v1879_v37  ;;  %v1846_v29 = vmul.f32 0.2, %v1782_v58  ;;  %v1787_v12 = vadd.f32 %v3185_v1, %v1748_v13  ;;  %v1450_v26 = vpop.f32.mrf.mxu0  ;;  %v1698_v62 = vpop.f32.mrf.mxu1  ;;  %v1313_v46 = vadd.f32 %v3320_v22, %v3176_v36 }
 0x157   : > { %v1749_v4 = vadd.f32 %v2627_v48, %v1517_v9  ;;  %v1515_v19 = vadd.f32 %v1450_v26, %v1273_v42  ;;  %v1785_v15 = vadd.f32 %v3185_v1, %v1746_v0  ;;  %v3322_v42 = vld [vmem:[#allocation6_spill] sm:$0xff] }
 0x158   : > { %2425 = vst [vmem:[%s3208_s19 + $0x48] sm:$0xff] %v2385_v7   ;;  %v1878_v35 = vsel %vm1814_vm7, %v1782_v58, %v1846_v29  ;;  %v2596_v24 = vpop.f32.mrf.mxu0  ;;  %v1851_v18 = vmul.f32 0.2, %v1787_v12  ;;  %vm1819_vm8 = vcmp.ge.f32.partialorder %v1787_v12, 0.0  ;;  %v2634_v16 = vpop.f32.mrf.mxu1  ;;  %v1305_v20 = vadd.f32 %v3323_v11, %v3322_v42  ;;  %v3324_v58 = vld [vmem:[#allocation5_spill] sm:$0xff] }
 0x159   : > { %v2380_v34 = vpack.c.bf16 %v1878_v35, %v1877_v3  ;;  %v1788_v53 = vadd.f32 %v3185_v1, %v1749_v4  ;;  %v1747_v56 = vadd.f32 %v1682_v41, %v1515_v19  ;;  %v1520_v31 = vadd.f32 %v2596_v24, %v3160_v32 }
 0x15a   : > { %v1463_v51 = vpop.f32.mrf.mxu0  ;;  %vm1817_vm10 = vcmp.ge.f32.partialorder %v1785_v15, 0.0  ;;  %v1849_v23 = vmul.f32 0.2, %v1785_v15  ;;  %v1883_v60 = vsel %vm1819_vm8, %v1787_v12, %v1851_v18  ;;  %v1711_v2 = vpop.f32.mrf.mxu1 }
 0x15b   : > { %2424 = vst [vmem:[%s3208_s19 + $0x40] sm:$0xff] %v2380_v34   ;;  %vm1820_vm9 = vcmp.ge.f32.partialorder %v1788_v53, 0.0  ;;  %v1852_v48 = vmul.f32 0.2, %v1788_v53  ;;  %v1518_v6 = vadd.f32 %v1463_v51, %v3162_v47  ;;  %v1786_v30 = vadd.f32 %v3185_v1, %v1747_v56 }
 0x15c   : > { %v1752_v55 = vadd.f32 %v2630_v25, %v1520_v31  ;;  %v2597_v8 = vpop.f32.mrf.mxu0  ;;  %v1881_v38 = vsel %vm1817_vm10, %v1785_v15, %v1849_v23 }
 0x15d   : > { %v1884_v33 = vsel %vm1820_vm9, %v1788_v53, %v1852_v48  ;;  %v1750_v27 = vadd.f32 %v1695_v28, %v1518_v6  ;;  %v1521_v32 = vadd.f32 %v2597_v8, %v1297_v50  ;;  %vm1818_vm11 = vcmp.ge.f32.partialorder %v1786_v30, 0.0 }
 0x15e   : > { %v2395_v5 = vpack.c.bf16 %v1884_v33, %v1883_v60  ;;  %v1850_v49 = vmul.f32 0.2, %v1786_v30  ;;  %v1791_v63 = vadd.f32 %v3185_v1, %v1752_v55  ;;  %v1466_v41 = vpop.f32.mrf.mxu0 }
 0x15f   : > { %v1753_v17 = vadd.f32 %v2631_v14, %v1521_v32  ;;  %v1519_v47 = vadd.f32 %v1466_v41, %v1289_v40  ;;  %v1789_v52 = vadd.f32 %v3185_v1, %v1750_v27  ;;  %v2635_v14 = vpop.f32.mrf.mxu1 }
 0x160   : > { %2427 = vst [vmem:[%s3208_s19 + $0x58] sm:$0xff] %v2395_v5   ;;  %v1882_v59 = vsel %vm1818_vm11, %v1786_v30, %v1850_v49  ;;  %v2600_v44 = vpop.f32.mrf.mxu0  ;;  %v1855_v25 = vmul.f32 0.2, %v1791_v63  ;;  %vm1823_vm12 = vcmp.ge.f32.partialorder %v1791_v63, 0.0 }
 0x161   : > { %v2390_v21 = vpack.c.bf16 %v1882_v59, %v1881_v38  ;;  %v1792_v43 = vadd.f32 %v3185_v1, %v1753_v17  ;;  %v1751_v45 = vadd.f32 %v1698_v62, %v1519_v47  ;;  %v1524_v61 = vadd.f32 %v2600_v44, %v3321_v39  ;;  %v1714_v62 = vpop.f32.mrf.mxu1 }
 0x162   : > { %v1479_v28 = vpop.f32.mrf.mxu0  ;;  %vm1821_vm14 = vcmp.ge.f32.partialorder %v1789_v52, 0.0  ;;  %v1853_v54 = vmul.f32 0.2, %v1789_v52  ;;  %v1887_v0 = vsel %vm1823_vm12, %v1791_v63, %v1855_v25 }
 0x163   : > { %2426 = vst [vmem:[%s3208_s19 + $0x50] sm:$0xff] %v2390_v21   ;;  %vm1824_vm13 = vcmp.ge.f32.partialorder %v1792_v43, 0.0  ;;  %v1856_v57 = vmul.f32 0.2, %v1792_v43  ;;  %v1522_v13 = vadd.f32 %v1479_v28, %v3324_v58  ;;  %v1790_v37 = vadd.f32 %v3185_v1, %v1751_v45 }
 0x164   : > { %v1756_v10 = vadd.f32 %v2634_v16, %v1524_v61  ;;  %v2601_v36 = vpop.f32.mrf.mxu0  ;;  %v1885_v15 = vsel %vm1821_vm14, %v1789_v52, %v1853_v54 }
 0x165   : > { %v1888_v9 = vsel %vm1824_vm13, %v1792_v43, %v1856_v57  ;;  %v1754_v7 = vadd.f32 %v1711_v2, %v1522_v13  ;;  %v1525_v29 = vadd.f32 %v2601_v36, %v1313_v46  ;;  %vm1822_vm15 = vcmp.ge.f32.partialorder %v1790_v37, 0.0 }
 0x166   : > { %v2405_v12 = vpack.c.bf16 %v1888_v9, %v1887_v0  ;;  %v1854_v26 = vmul.f32 0.2, %v1790_v37  ;;  %v1795_v4 = vadd.f32 %v3185_v1, %v1756_v10  ;;  %v1482_v19 = vpop.f32.mrf.mxu0 }
 0x167   : > { %v1757_v3 = vadd.f32 %v2635_v14, %v1525_v29  ;;  %v1523_v35 = vadd.f32 %v1482_v19, %v1305_v20  ;;  %v1793_v34 = vadd.f32 %v3185_v1, %v1754_v7 }
 0x168   : > { %2429 = vst [vmem:[%s3208_s19 + $0x68] sm:$0xff] %v2405_v12   ;;  %v1886_v24 = vsel %vm1822_vm15, %v1790_v37, %v1854_v26  ;;  %v1859_v53 = vmul.f32 0.2, %v1795_v4  ;;  %vm1827_vm0 = vcmp.ge.f32.partialorder %v1795_v4, 0.0 }
 0x169   : > { %v2400_v18 = vpack.c.bf16 %v1886_v24, %v1885_v15  ;;  %v1796_v50 = vadd.f32 %v3185_v1, %v1757_v3  ;;  %v1755_v56 = vadd.f32 %v1714_v62, %v1523_v35  ;;  %v1857_v51 = vmul.f32 0.2, %v1793_v34 }
 0x16a   : > { %v1891_v48 = vsel %vm1827_vm0, %v1795_v4, %v1859_v53  ;;  %vm1825_vm2 = vcmp.ge.f32.partialorder %v1793_v34, 0.0 }
 0x16b   : > { %2428 = vst [vmem:[%s3208_s19 + $0x60] sm:$0xff] %v2400_v18   ;;  %vm1828_vm1 = vcmp.ge.f32.partialorder %v1796_v50, 0.0  ;;  %v1860_v31 = vmul.f32 0.2, %v1796_v50  ;;  %v1794_v40 = vadd.f32 %v3185_v1, %v1755_v56  ;;  %v1889_v55 = vsel %vm1825_vm2, %v1793_v34, %v1857_v51 }
 0x16d   : > { %v1892_v6 = vsel %vm1828_vm1, %v1796_v50, %v1860_v31  ;;  %vm1826_vm3 = vcmp.ge.f32.partialorder %v1794_v40, 0.0  ;;  %v1858_v30 = vmul.f32 0.2, %v1794_v40 }
 0x16e   : > { %v2415_v23 = vpack.c.bf16 %v1892_v6, %v1891_v48 }
 0x16f   : > { %v1890_v8 = vsel %vm1826_vm3, %v1794_v40, %v1858_v30 }
 0x170   : > { %2431 = vst [vmem:[%s3208_s19 + $0x78] sm:$0xff] %v2415_v23   ;;  %v2410_v60 = vpack.c.bf16 %v1890_v8, %v1889_v55 }
 0x172   : > { %2430 = vst [vmem:[%s3208_s19 + $0x70] sm:$0xff] %v2410_v60  }
 0x173 PF: > { %s14_s17 = sadd.s32 1, %s2706_s17   ;;  %s3325_s15 = smov %s2702_s16 }
 0x174   : > { %p11_p6 = scmp.ge.s32.totalorder %s14_s17, 4   ;;  %s3326_s16 = smov %s3328_s18 }
 0x176   :  { %13 = sbr.rel (!%p11_p6) target bundleno = 2 (0x2), region = 72 }

// kernel: nlayer_discriminator_forward.6
= control target key start
LH: loop header
LB: loop body
LE: loop exit
PB: predicated region body
PF: predicated region fallthrough
CT: control target
= control target key end

     0   :  { %s2241_s21 = smov 0   ;;  %s2243_s22 = smov 0   ;;  %s2708_s0 = inlined_call_operand.vmem [shape: bf16[2,24,9,32], index: 0, kind: input, shape index: {}, may-alias: {0,1}]   ;;  %s2709_s1 = inlined_call_operand.vmem [shape: bf16[2,24,9,32], index: 1, kind: input, shape index: {}, may-alias: {0,1}]   ;;  %s2710_s2 = inlined_call_operand.vmem [shape: bf16[4,32,128], index: 2, kind: input, shape index: {}]   ;;  %s2711_s3 = inlined_call_operand.vmem [shape: f32[128,1], index: 3, kind: input, shape index: {}]   ;;  %s2712_s4 = inlined_call_operand.vmem [shape: bf16[256,128], index: 4, kind: output, shape index: {0}]   ;;  %s2713_s5 = inlined_call_operand.vmem [shape: f32[2,1,128], index: 5, kind: output, shape index: {1}]   ;;  %s2714_s6 = inlined_call_operand.vmem [shape: f32[2,1,128], index: 6, kind: output, shape index: {2}]  }
   0x1   :  { %s2245_s23 = smov 0  }
   0x2 LB: > { %s29_s24 = sadd.s32 1, %s2199_s22  ;;  %p1836_p0 = scmp.ge.s32.totalorder %s2203_s23, 1  ;;  %s2203_s23 = sphi %s2245_s23, %s17_s23   ;;  %s2199_s22 = sphi %s2243_s22, %s2718_s22   ;;  %s2195_s21 = sphi %s2241_s21, %s2717_s21  }
   0x3   : > { %p31_p1 = scmp.ge.s32.totalorder %s29_s24, 2  ;;  %p279_p2 = scmp.lt.s32.totalorder %s2203_s23, 3 }
   0x5   : > { %s2720_s24 = smov (%p31_p1, %s29_s24), 0  ;;  %p280_p3 = pnand %p1836_p0, %p279_p2 }
   0x6   : > { %p346_p4 = scmp.lt.s32.totalorder (!%p280_p3), %s2195_s21, 1  ;;  %s1839_s20 = sshll.u32 (!%p280_p3), %s2195_s21, 4 }
   0x7   : > { %283 = sbr.rel (%p280_p3) target bundleno = 321 (0x141), region = 36  ;;  %p378_p5 = scmp.lt.s32.totalorder (!%p280_p3), %s1839_s20, 31 }
   0xc   : > { %v2158_v0 = vld [vmem:[%s2710_s2 + $0x8] sm:$0xff]   ;;  %v2159_v1 = vld [vmem:[%s2710_s2 + $0x18] sm:$0xff]   ;;  %v2160_v2 = vld [vmem:[%s2710_s2] sm:$0xff]   ;;  %s2272_s7 = scalar_select %p346_p4, %s2195_s21, 1  ;;  %v2205_v5 = vmov 0   ;;  %vm701_vm0 = vcmask 261120  }
   0xd   : > { %2068 = vmatprep.subr.bf16.mxu1 %v2158_v0  ;;  %2048 = vmatprep.subr.bf16.mxu0 %v2159_v1  ;;  %v2161_v3 = vld [vmem:[%s2710_s2 + $0x10] sm:$0xff]   ;;  %v2281_v4 = vld [vmem:[%s2710_s2 + $0x28] sm:$0xff]   ;;  %v2165_v6 = vld [vmem:[%s2710_s2 + $0x38] sm:$0xff]   ;;  %vm433_vm1 = vsmask.f32 3328  ;;  %s2722_s20 = smov (!%p378_p5, %s1839_s20), 31 }
   0xe   : > { %2069 = vmatpush3.bf16.msra.mxu1 %v2158_v0  ;;  %2049 = vmatpush3.bf16.msra.mxu0 %v2159_v1  ;;  %s2128_s10 = smul.u32 192, %s2272_s7  ;;  %vm434_vm2 = vsmask.f32 7440  ;;  %v2171_v37 = vld [vmem:[%s2710_s2 + $0x30] sm:$0xff]   ;;  %v1361_v56 = vld [vmem:[%s2711_s3] sm:$0xff]  ;;  %s1840_s21 = sshll.u32 %s2722_s20, 2 }
   0xf   : > { %2070 = vmatprep.subr.bf16.mxu1 %v2160_v2  ;;  %2050 = vmatprep.subr.bf16.mxu0 %v2161_v3  ;;  %vm2320_vm3 = vmor %vm433_vm1, %vm434_vm2  ;;  %v1363_v62 = vld [vmem:[%s2711_s3 + $0x10] sm:$0xff]  ;;  %s2655_s27 = scalar_lea.vmem %s2712_s4, %s1840_s21  ;;  %s387_s30 = scalar_lea.vmem %s2713_s5, %s2272_s7 }
  0x10   : > { %2156 = vset.pattern.permute.xlu0 %v2205_v5  ;;  %s2288_s15 = scalar_lea.vmem %s2708_s0, %s2128_s10  ;;  %2157 = vset.pattern.permute.xlu1 %v2205_v5  ;;  %v1362_v5 = vld [vmem:[%s2711_s3 + $0x8] sm:$0xff]  ;;  %s1944_s14 = sadd.s32 128, %s2128_s10 }
  0x11   : > { %v395_v7 = vld [vmem:[%s2288_s15] sm:$0xf]  ;;  %v2295_v8 = vld [vmem:[%s2288_s15 + $0x8] sm:$0xf]  ;;  %v2298_v9 = vld [vmem:[%s2288_s15 + $0x10] sm:$0xf]  ;;  %1444 = vperm.xlu0 %2156, %v1361_v56   ;;  %1454 = vperm.xlu1 %2157, %v1363_v62   ;;  %s2509_s16 = scalar_lea.vmem %s2709_s1, %s1944_s14  ;;  %s392_s11 = scalar_lea.vmem %s2714_s6, %s2272_s7 }
  0x12   : > { %2071 = vmatpush3.bf16.msra.mxu1 %v2160_v2  ;;  %v437_v10 = vshrl.u32 %v395_v7, 16  ;;  %v440_v11 = vshll.u32 %v395_v7, 16  ;;  %v451_v12 = vshrl.u32 %v2295_v8, 16  ;;  %v454_v13 = vshll.u32 %v2295_v8, 16  ;;  %2051 = vmatpush3.bf16.msra.mxu0 %v2161_v3  ;;  %v2303_v14 = vld [vmem:[%s2288_s15 + $0x18] sm:$0xf] }
  0x13   : > { %2108 = vmatprep.subr.bf16.mxu1 %v2165_v6  ;;  %v1863_v15 = vcombine.low %v395_v7, %v2295_v8  ;;  %v1864_v16 = vcombine.low %v2298_v9, %v2303_v14  ;;  %v396_v17 = vld [vmem:[%s2288_s15 + $0x4] sm:$0x1]  ;;  %v398_v18 = vld [vmem:[%s2288_s15 + $0xc] sm:$0x1]  ;;  %v400_v19 = vld [vmem:[%s2288_s15 + $0x14] sm:$0x1]  ;;  %2088 = vmatprep.subr.bf16.mxu0 %v2281_v4 }
  0x14   : > { %v439_v20 = vrot.slane %v437_v10, 4  ;;  %v442_v21 = vrot.slane %v440_v11, 5  ;;  %v446_v22 = vshll.u32 %v396_v17, 16  ;;  %v453_v23 = vrot.slane %v451_v12, 4  ;;  %v402_v26 = vld [vmem:[%s2288_s15 + $0x1c] sm:$0x1] }
  0x15   : > { %2072 = vmatprep.mubr.msk.bf16.mxu1 %vm701_vm0, %v1863_v15  ;;  %v456_v24 = vrot.slane %v454_v13, 5  ;;  %v460_v25 = vshll.u32 %v398_v18, 16  ;;  %v465_v28 = vshrl.u32 %v2298_v9, 16  ;;  %v468_v29 = vshll.u32 %v2298_v9, 16  ;;  %v2318_v31 = vld [vmem:[%s2288_s15 + $0x20] sm:$0xf]  ;;  %1449 = vperm.xlu0 %2156, %v1362_v5  }
  0x16   : > { %2073 = vmatmul.mubr.msk.bf16.vlgmr.msra.gmra.mxu1 %vm701_vm0, %v1864_v16  ;;  %v443_v27 = vor.u32 %v442_v21, %v439_v20  ;;  %v474_v30 = vshll.u32 %v400_v19, 16  ;;  %v448_v33 = vrot.slane %v446_v22, 5  ;;  %v479_v36 = vshrl.u32 %v2303_v14, 16  ;;  %v404_v38 = vld [vmem:[%s2288_s15 + $0x24] sm:$0x1]  ;;  %v1364_v13 = vld [vmem:[%s2711_s3 + $0x18] sm:$0xff] }
  0x17   : > { %v457_v34 = vor.u32 %v456_v24, %v453_v23  ;;  %v462_v35 = vrot.slane %v460_v25, 5  ;;  %2109 = vmatpush3.bf16.msra.mxu1 %v2165_v6  ;;  %v467_v40 = vrot.slane %v465_v28, 4  ;;  %v470_v41 = vrot.slane %v468_v29, 5  ;;  %v2335_v50 = vld [vmem:[%s2288_s15 + $0x28] sm:$0xf]  ;;  %v2170_v24 = vld [vmem:[%s2710_s2 + $0x20] sm:$0xff]   ;;  %1459 = vperm.xlu1 %2157, %v1364_v13  }
  0x18   : > { %v444_v39 = vrot.slane %v443_v27, 4  ;;  %v481_v43 = vrot.slane %v479_v36, 4  ;;  %v482_v44 = vshll.u32 %v2303_v14, 16  ;;  %v488_v45 = vshll.u32 %v402_v26, 16  ;;  %2110 = vmatprep.subr.bf16.mxu1 %v2171_v37  ;;  %v2342_v55 = vld [vmem:[%s2288_s15 + $0x30] sm:$0xf] }
  0x19   : > { %v458_v42 = vrot.slane %v457_v34, 4  ;;  %v471_v47 = vor.u32 %v470_v41, %v467_v40  ;;  %v493_v48 = vshrl.u32 %v2318_v31, 16  ;;  %v496_v49 = vshll.u32 %v2318_v31, 16  ;;  %v2349_v61 = vld [vmem:[%s2288_s15 + $0x38] sm:$0xf]  ;;  %v1365_v29 = vld [vmem:[%s2711_s3 + $0x20] sm:$0xff] }
  0x1a   : > { %v449_v46 = vsel %vm2320_vm3, %v444_v39, %v448_v33  ;;  %v476_v52 = vrot.slane %v474_v30, 5  ;;  %v484_v53 = vrot.slane %v482_v44, 5  ;;  %v502_v54 = vshll.u32 %v404_v38, 16  ;;  %v406_v3 = vld [vmem:[%s2288_s15 + $0x2c] sm:$0x1]  ;;  %1464 = vperm.xlu0 %2156, %v1365_v29  }
  0x1b   : > { %v2339_v51 = vsel %vm2320_vm3, %v458_v42, %v462_v35  ;;  %2111 = vmatpush3.bf16.msra.mxu1 %v2171_v37  ;;  %v472_v57 = vrot.slane %v471_v47, 4  ;;  %v495_v58 = vrot.slane %v493_v48, 4  ;;  %v498_v59 = vrot.slane %v496_v49, 5  ;;  %v408_v12 = vld [vmem:[%s2288_s15 + $0x34] sm:$0x1] }
  0x1c   : > { %v1845_v60 = vcombine.low %v449_v46, %v2339_v51  ;;  %v485_v63 = vor.u32 %v484_v53, %v481_v43  ;;  %v490_v0 = vrot.slane %v488_v45, 5  ;;  %v507_v1 = vshrl.u32 %v2335_v50, 16  ;;  %v410_v19 = vld [vmem:[%s2288_s15 + $0x3c] sm:$0x1]  ;;  %v2395_v36 = vld [vmem:[%s2288_s15 + $0x40] sm:$0xf] }
  0x1d   : > { %v510_v2 = vshll.u32 %v2335_v50, 16  ;;  %v499_v6 = vor.u32 %v498_v59, %v495_v58  ;;  %v504_v7 = vrot.slane %v502_v54, 5  ;;  %v1865_v10 = vcombine.low %v2318_v31, %v2335_v50  ;;  %v2398_v37 = vld [vmem:[%s2288_s15 + $0x48] sm:$0xf]  ;;  %v2406_v46 = vld [vmem:[%s2288_s15 + $0x50] sm:$0xf] }
  0x1e   : > { %2052 = vmatprep.mubr.msk.bf16.mxu0 %vm701_vm0, %v1845_v60  ;;  %v521_v11 = vshrl.u32 %v2342_v55, 16  ;;  %v2370_v15 = vsel %vm2320_vm3, %v472_v57, %v476_v52  ;;  %v486_v16 = vrot.slane %v485_v63, 4  ;;  %v524_v17 = vshll.u32 %v2342_v55, 16  ;;  %v2413_v53 = vld [vmem:[%s2288_s15 + $0x58] sm:$0xf] }
  0x1f   : > { %v535_v18 = vshrl.u32 %v2349_v61, 16  ;;  %v500_v20 = vrot.slane %v499_v6, 4  ;;  %2076 = vmatprep.mubr.msk.bf16.mxu1 %vm701_vm0, %v1865_v10  ;;  %v538_v21 = vshll.u32 %v2349_v61, 16  ;;  %v1866_v22 = vcombine.low %v2342_v55, %v2349_v61  ;;  %v412_v63 = vld [vmem:[%s2288_s15 + $0x44] sm:$0x1] }
  0x20   : > { %v509_v23 = vrot.slane %v507_v1, 4  ;;  %v2384_v25 = vsel %vm2320_vm3, %v486_v16, %v490_v0  ;;  %v512_v26 = vrot.slane %v510_v2, 5  ;;  %v516_v27 = vshll.u32 %v406_v3, 16  ;;  %v414_v5 = vld [vmem:[%s2288_s15 + $0x4c] sm:$0x1] }
  0x21   : > { %v523_v28 = vrot.slane %v521_v11, 4  ;;  %v1846_v30 = vcombine.low %v2370_v15, %v2384_v25  ;;  %v1907_v33 = vcombine.low %v2339_v51, %v2370_v15  ;;  %2077 = vmatmul.mubr.msk.bf16.gmra.mxu1 %vm701_vm0, %v1866_v22  ;;  %v526_v34 = vrot.slane %v524_v17, 5  ;;  %v418_v22 = vld [vmem:[%s2288_s15 + $0x5c] sm:$0x1]  ;;  %v2448_v29 = vld [vmem:[%s2288_s15 + $0x60] sm:$0xf] }
  0x22   : > { %v530_v35 = vshll.u32 %v408_v12, 16  ;;  %v2402_v38 = vsel %vm2320_vm3, %v500_v20, %v504_v7  ;;  %v513_v39 = vor.u32 %v512_v26, %v509_v23  ;;  %v518_v40 = vrot.slane %v516_v27, 5  ;;  %v416_v12 = vld [vmem:[%s2288_s15 + $0x54] sm:$0x1] }
  0x23   : > { %v537_v41 = vrot.slane %v535_v18, 4  ;;  %2053 = vmatmul.mubr.msk.bf16.vlgmr.msra.gmra.mxu0 %vm701_vm0, %v1846_v30  ;;  %v527_v42 = vor.u32 %v526_v34, %v523_v28  ;;  %v540_v44 = vrot.slane %v538_v21, 5  ;;  %v544_v45 = vshll.u32 %v410_v19, 16 }
  0x24   : > { %v532_v43 = vrot.slane %v530_v35, 5  ;;  %2089 = vmatpush3.bf16.msra.mxu0 %v2281_v4  ;;  %v514_v47 = vrot.slane %v513_v39, 4  ;;  %v549_v48 = vshrl.u32 %v2395_v36, 16  ;;  %v552_v49 = vshll.u32 %v2395_v36, 16 }
  0x25   : > { %v563_v52 = vshrl.u32 %v2398_v37, 16  ;;  %v528_v54 = vrot.slane %v527_v42, 4  ;;  %v541_v56 = vor.u32 %v540_v44, %v537_v41  ;;  %v546_v57 = vrot.slane %v544_v45, 5  ;;  %2090 = vmatprep.subr.bf16.mxu0 %v2170_v24 }
  0x26   : > { %v566_v58 = vshll.u32 %v2398_v37, 16  ;;  %v2418_v4 = vsel %vm2320_vm3, %v514_v47, %v518_v40  ;;  %v1867_v59 = vcombine.low %v2395_v36, %v2398_v37  ;;  %v577_v60 = vshrl.u32 %v2406_v46, 16  ;;  %v2452_v40 = vld [vmem:[%s2288_s15 + $0x68] sm:$0xf] }
  0x27   : > { %v580_v62 = vshll.u32 %v2406_v46, 16  ;;  %v1847_v0 = vcombine.low %v2402_v38, %v2418_v4  ;;  %v2429_v1 = vsel %vm2320_vm3, %v528_v54, %v532_v43  ;;  %v542_v2 = vrot.slane %v541_v56, 4  ;;  %v2464_v54 = vld [vmem:[%s2288_s15 + $0x78] sm:$0xf] }
  0x28   : > { %v591_v3 = vshrl.u32 %v2413_v53, 16  ;;  %2080 = vmatprep.mubr.msk.bf16.mxu1 %vm701_vm0, %v1867_v59  ;;  %v594_v6 = vshll.u32 %v2413_v53, 16  ;;  %v1868_v7 = vcombine.low %v2406_v46, %v2413_v53  ;;  %v551_v10 = vrot.slane %v549_v48, 4  ;;  %2091 = vmatpush3.bf16.msra.mxu0 %v2170_v24 }
  0x29   : > { %v554_v11 = vrot.slane %v552_v49, 5  ;;  %2056 = vmatprep.mubr.msk.bf16.mxu0 %vm701_vm0, %v1847_v0  ;;  %v2441_v13 = vsel %vm2320_vm3, %v542_v2, %v546_v57  ;;  %v558_v16 = vshll.u32 %v412_v63, 16  ;;  %v565_v17 = vrot.slane %v563_v52, 4  ;;  %v2461_v52 = vld [vmem:[%s2288_s15 + $0x70] sm:$0xf] }
  0x2a   : > { %v568_v18 = vrot.slane %v566_v58, 5  ;;  %v1848_v19 = vcombine.low %v2429_v1, %v2441_v13  ;;  %2081 = vmatmul.mubr.msk.bf16.gmra.mxu1 %vm701_vm0, %v1868_v7  ;;  %v572_v21 = vshll.u32 %v414_v5, 16  ;;  %v579_v23 = vrot.slane %v577_v60, 4  ;;  %v420_v2 = vld [vmem:[%s2288_s15 + $0x64] sm:$0x1] }
  0x2b   : > { %v555_v20 = vor.u32 %v554_v11, %v551_v10  ;;  %v560_v24 = vrot.slane %v558_v16, 5  ;;  %v582_v27 = vrot.slane %v580_v62, 5  ;;  %v586_v28 = vshll.u32 %v416_v12, 16  ;;  %v422_v10 = vld [vmem:[%s2288_s15 + $0x6c] sm:$0x1] }
  0x2c   : > { %v569_v26 = vor.u32 %v568_v18, %v565_v17  ;;  %2057 = vmatmul.mubr.msk.bf16.gmra.mxu0 %vm701_vm0, %v1848_v19  ;;  %v574_v34 = vrot.slane %v572_v21, 5  ;;  %v593_v35 = vrot.slane %v591_v3, 4  ;;  %v596_v39 = vrot.slane %v594_v6, 5  ;;  %v424_v18 = vld [vmem:[%s2288_s15 + $0x74] sm:$0x1] }
  0x2d   : > { %v556_v30 = vrot.slane %v555_v20, 4  ;;  %v583_v42 = vor.u32 %v582_v27, %v579_v23  ;;  %v588_v43 = vrot.slane %v586_v28, 5  ;;  %v600_v44 = vshll.u32 %v418_v22, 16 }
  0x2e   : > { %v570_v41 = vrot.slane %v569_v26, 4  ;;  %v597_v47 = vor.u32 %v596_v39, %v593_v35  ;;  %v605_v48 = vshrl.u32 %v2448_v29, 16  ;;  %v608_v49 = vshll.u32 %v2448_v29, 16  ;;  %v426_v26 = vld [vmem:[%s2288_s15 + $0x7c] sm:$0x1] }
  0x2f   : > { %v2456_v45 = vsel %vm2320_vm3, %v556_v30, %v560_v24  ;;  %v584_v57 = vrot.slane %v583_v42, 4  ;;  %v602_v58 = vrot.slane %v600_v44, 5  ;;  %v619_v59 = vshrl.u32 %v2452_v40, 16 }
  0x30   : > { %v2468_v56 = vsel %vm2320_vm3, %v570_v41, %v574_v34  ;;  %v598_v62 = vrot.slane %v597_v47, 4  ;;  %v622_v63 = vshll.u32 %v2452_v40, 16  ;;  %v1869_v0 = vcombine.low %v2448_v29, %v2452_v40 }
  0x31   : > { %v1849_v60 = vcombine.low %v2456_v45, %v2468_v56  ;;  %v2479_v3 = vsel %vm2320_vm3, %v584_v57, %v588_v43  ;;  %v633_v5 = vshrl.u32 %v2461_v52, 16  ;;  %v636_v6 = vshll.u32 %v2461_v52, 16 }
  0x32   : > { %v647_v7 = vshrl.u32 %v2464_v54, 16  ;;  %v2488_v11 = vsel %vm2320_vm3, %v598_v62, %v602_v58  ;;  %2084 = vmatprep.mubr.msk.bf16.mxu1 %vm701_vm0, %v1869_v0  ;;  %v650_v12 = vshll.u32 %v2464_v54, 16  ;;  %v1870_v16 = vcombine.low %v2461_v52, %v2464_v54 }
  0x33   : > { %2060 = vmatprep.mubr.msk.bf16.mxu0 %vm701_vm0, %v1849_v60  ;;  %v607_v17 = vrot.slane %v605_v48, 4  ;;  %v1850_v19 = vcombine.low %v2479_v3, %v2488_v11  ;;  %v610_v20 = vrot.slane %v608_v49, 5  ;;  %v614_v21 = vshll.u32 %v420_v2, 16  ;;  %v2522_v2 = vld [vmem:[%s2509_s16] sm:$0xf] }
  0x34   : > { %v621_v22 = vrot.slane %v619_v59, 4  ;;  %2085 = vmatmul.mubr.msk.bf16.gmra.mxu1 %vm701_vm0, %v1870_v16  ;;  %v624_v23 = vrot.slane %v622_v63, 5  ;;  %v628_v24 = vshll.u32 %v422_v10, 16  ;;  %v635_v27 = vrot.slane %v633_v5, 4  ;;  %v1367_v5 = vld [vmem:[%s2711_s3 + $0x30] sm:$0xff] }
  0x35   : > { %v638_v28 = vrot.slane %v636_v6, 5  ;;  %2061 = vmatmul.mubr.msk.bf16.gmra.mxu0 %vm701_vm0, %v1850_v19  ;;  %v611_v30 = vor.u32 %v610_v20, %v607_v17  ;;  %v616_v34 = vrot.slane %v614_v21, 5  ;;  %v642_v35 = vshll.u32 %v424_v18, 16  ;;  %2112 = vmatprep.mubr.msk.bf16.mxu1 %vm701_vm0, %v1907_v33 }
  0x36   : > { %v649_v39 = vrot.slane %v647_v7, 4  ;;  %v625_v41 = vor.u32 %v624_v23, %v621_v22  ;;  %v630_v42 = vrot.slane %v628_v24, 5  ;;  %v652_v44 = vrot.slane %v650_v12, 5  ;;  %v1368_v12 = vld [vmem:[%s2711_s3 + $0x38] sm:$0xff]  ;;  %v1370_v23 = vld [vmem:[%s2711_s3 + $0x48] sm:$0xff] }
  0x37   : > { %v639_v43 = vor.u32 %v638_v28, %v635_v27  ;;  %v612_v47 = vrot.slane %v611_v30, 4  ;;  %v644_v48 = vrot.slane %v642_v35, 5  ;;  %v656_v49 = vshll.u32 %v426_v26, 16  ;;  %v428_v24 = vld [vmem:[%s2509_s16 + $0x4] sm:$0x1]  ;;  %v1371_v26 = vld [vmem:[%s2711_s3 + $0x50] sm:$0xff] }
  0x38   : > { %v1908_v57 = vcombine.low %v2384_v25, %v2402_v38  ;;  %v626_v58 = vrot.slane %v625_v41, 4  ;;  %v653_v15 = vor.u32 %v652_v44, %v649_v39  ;;  %v1909_v60 = vcombine.low %v2418_v4, %v2429_v1  ;;  %v1366_v38 = vld [vmem:[%s2711_s3 + $0x28] sm:$0xff]  ;;  %v1372_v30 = vld [vmem:[%s2711_s3 + $0x58] sm:$0xff] }
  0x39   : > { %v640_v51 = vrot.slane %v639_v43, 4  ;;  %v617_v33 = vsel %vm2320_vm3, %v612_v47, %v616_v34  ;;  %v658_v59 = vrot.slane %v656_v49, 5  ;;  %v1885_v1 = vcombine.low %v2295_v8, %v2298_v9  ;;  %v1369_v8 = vld [vmem:[%s2711_s3 + $0x40] sm:$0xff]  ;;  %v1374_v41 = vld [vmem:[%s2711_s3 + $0x68] sm:$0xff]  ;;  %v1376_v49 = vld [vmem:[%s2711_s3 + $0x78] sm:$0xff] }
  0x3a   : > { %v631_v62 = vsel %vm2320_vm3, %v626_v58, %v630_v42  ;;  %v654_v0 = vrot.slane %v653_v15, 4  ;;  %v1161_v7 = vshrl.u32 %v2522_v2, 16  ;;  %v1164_v10 = vshll.u32 %v2522_v2, 16  ;;  %v1375_v42 = vld [vmem:[%s2711_s3 + $0x70] sm:$0xff] }
  0x3b   : > { %v645_v63 = vsel %vm2320_vm3, %v640_v51, %v644_v48  ;;  %v1851_v25 = vcombine.low %v617_v33, %v631_v62  ;;  %v1431_v16 = vmul.f32 0.0, %v1366_v38  ;;  %v1432_v17 = vmul.f32 0.0, %v1367_v5 }
  0x3c   : > { %v659_v4 = vsel %vm2320_vm3, %v654_v0, %v658_v59  ;;  %2113 = vmatmul.mubr.msk.bf16.vlgmr.msra.gmra.mxu1 %vm701_vm0, %v1908_v57  ;;  %v1910_v9 = vcombine.low %v2441_v13, %v2456_v45  ;;  %v1433_v18 = vmul.f32 0.0, %v1368_v12  ;;  %v1911_v19 = vcombine.low %v2468_v56, %v2479_v3 }
  0x3d   : > { %2064 = vmatprep.mubr.msk.bf16.mxu0 %vm701_vm0, %v1851_v25  ;;  %v1852_v6 = vcombine.low %v645_v63, %v659_v4  ;;  %2116 = vmatprep.mubr.msk.bf16.mxu1 %vm701_vm0, %v1909_v60  ;;  %v1163_v20 = vrot.slane %v1161_v7, 4  ;;  %v1166_v21 = vrot.slane %v1164_v10, 5  ;;  %v1434_v22 = vmul.f32 0.0, %v1369_v8 }
  0x3e   : > { %1469 = vperm.xlu1 %2157, %v1431_v16   ;;  %1474 = vperm.xlu0 %2156, %v1432_v17   ;;  %v1886_v13 = vcombine.low %v2303_v14, %v2318_v31  ;;  %v1887_v45 = vcombine.low %v2335_v50, %v2342_v55  ;;  %v1435_v56 = vmul.f32 0.0, %v1370_v23  ;;  %v1170_v27 = vshll.u32 %v428_v24, 16  ;;  %v1373_v14 = vld [vmem:[%s2711_s3 + $0x60] sm:$0xff] }
  0x3f   : > { %2065 = vmatmul.mubr.msk.bf16.gmra.mxu0 %vm701_vm0, %v1852_v6  ;;  %v1167_v3 = vor.u32 %v1166_v21, %v1163_v20  ;;  %v1436_v28 = vmul.f32 0.0, %v1371_v26  ;;  %v1912_v31 = vcombine.low %v2488_v11, %v617_v33  ;;  %v1437_v50 = vmul.f32 0.0, %v1372_v30 }
  0x40   : > { %2092 = vmatprep.mubr.msk.bf16.mxu0 %vm701_vm0, %v1885_v1  ;;  %v1913_v55 = vcombine.low %v631_v62, %v645_v63  ;;  %v1172_v35 = vrot.slane %v1170_v27, 5  ;;  %v1438_v39 = vmul.f32 0.0, %v1373_v14  ;;  %v1888_v43 = vcombine.low %v2349_v61, %v2395_v36 }
  0x41   : > { %v1168_v34 = vrot.slane %v1167_v3, 4  ;;  %v1889_v11 = vcombine.low %v2398_v37, %v2406_v46  ;;  %v1439_v44 = vmul.f32 0.0, %v1374_v41  ;;  %v1440_v48 = vmul.f32 0.0, %v1375_v42 }
  0x42   : > { %1479 = vperm.xlu1 %2157, %v1433_v18   ;;  %1484 = vperm.xlu0 %2156, %v1434_v22   ;;  %v1441_v36 = vmul.f32 0.0, %v1376_v49  ;;  %v1890_v37 = vcombine.low %v2413_v53, %v2448_v29  ;;  %v1891_v32 = vcombine.low %v2452_v40, %v2461_v52  ;;  %v1892_v46 = vcombine.low %v2464_v54, %v2522_v2 }
  0x43   : > { %v1173_v47 = vsel %vm2320_vm3, %v1168_v34, %v1172_v35 }
  0x44   : > { %2117 = vmatmul.mubr.msk.bf16.gmra.mxu1 %vm701_vm0, %v1910_v9  ;;  %v1914_v61 = vcombine.low %v659_v4, %v1173_v47 }
  0x45   : > { %2120 = vmatprep.mubr.msk.bf16.mxu1 %vm701_vm0, %v1911_v19 }
  0x46   : > { %1489 = vperm.xlu1 %2157, %v1435_v56   ;;  %1494 = vperm.xlu0 %2156, %v1436_v28  }
  0x47   : > { %2093 = vmatmul.mubr.msk.bf16.vlgmr.msra.gmra.mxu0 %vm701_vm0, %v1886_v13 }
  0x48   : > { %2096 = vmatprep.mubr.msk.bf16.mxu0 %vm701_vm0, %v1887_v45 }
  0x4a   : > { %1499 = vperm.xlu1 %2157, %v1437_v50   ;;  %1504 = vperm.xlu0 %2156, %v1438_v39  }
  0x4c   : > { %2121 = vmatmul.mubr.msk.bf16.gmra.mxu1 %vm701_vm0, %v1912_v31 }
  0x4d   : > { %2124 = vmatprep.mubr.msk.bf16.mxu1 %vm701_vm0, %v1913_v55 }
  0x4e   : > { %1509 = vperm.xlu1 %2157, %v1439_v44   ;;  %1514 = vperm.xlu0 %2156, %v1440_v48  }
  0x4f   : > { %2097 = vmatmul.mubr.msk.bf16.gmra.mxu0 %vm701_vm0, %v1888_v43 }
  0x50   : > { %2100 = vmatprep.mubr.msk.bf16.mxu0 %vm701_vm0, %v1889_v11 }
  0x52   : > { %1519 = vperm.xlu1 %2157, %v1441_v36  }
  0x54   : > { %2125 = vmatmul.mubr.msk.bf16.gmra.mxu1 %vm701_vm0, %v1914_v61 }
  0x57   : > { %2101 = vmatmul.mubr.msk.bf16.gmra.mxu0 %vm701_vm0, %v1890_v37 }
  0x58   : > { %2104 = vmatprep.mubr.msk.bf16.mxu0 %vm701_vm0, %v1891_v32 }
  0x5f   : > { %2105 = vmatmul.mubr.msk.bf16.gmra.mxu0 %vm701_vm0, %v1892_v46 }
  0x8c   : > { %v1445_v18 = vpop.permute.xlu0 %1444  ;;  %v1455_v19 = vpop.permute.xlu1 %1454 }
  0x90   : > { %v1450_v26 = vpop.permute.xlu0 %1449 }
  0x92   : > { %v1460_v45 = vpop.permute.xlu1 %1459 }
  0x95   : > { %v1465_v55 = vpop.permute.xlu0 %1464 }
  0xb9   : > { %v2645_v39 = vpop.permute.xlu1 %1469 }
  0xd6   : > { %v2074_v57 = vpop.f32.mrf.mxu1 }
  0xd8   : > { %v933_v58 = vpop.f32.mrf.mxu1 }
  0xda   : > { %v2075_v51 = vpop.f32.mrf.mxu1 }
  0xdc   : > { %v936_v15 = vpop.f32.mrf.mxu1 }
  0xe1   : > { %v2078_v53 = vpop.f32.mrf.mxu1 }
  0xe3   : > { %v2054_v29 = vpop.f32.mrf.mxu0  ;;  %v2602_v33 = vpop.f32.mrf.mxu1 }
  0xe4   : > { %v942_v27 = vadd.f32 %v2074_v57, %v2054_v29 }
  0xe5   : > { %v760_v59 = vpop.f32.mrf.mxu0  ;;  %v2604_v40 = vpop.f32.mrf.mxu1 }
  0xe6   : > { %v934_v14 = vadd.f32 %v933_v58, %v760_v59  ;;  %v1475_v58 = vpop.permute.xlu0 %1474 }
  0xe7   : > { %v2055_v52 = vpop.f32.mrf.mxu0  ;;  %v2606_v60 = vpop.f32.mrf.mxu1 }
  0xe8   : > { %v945_v35 = vadd.f32 %v2075_v51, %v2055_v52  ;;  %v1480_v51 = vpop.permute.xlu1 %1479 }
  0xe9   : > { %v763_v62 = vpop.f32.mrf.mxu0 }
  0xea   : > { %v2608_v63 = vpop.f32.mrf.mxu1  ;;  %v937_v11 = vadd.f32 %v936_v15, %v763_v62 }
  0xec   : > { %v2058_v54 = vpop.f32.mrf.mxu0  ;;  %v2610_v0 = vpop.f32.mrf.mxu1 }
  0xed   : > { %v958_v32 = vadd.f32 %v2078_v53, %v2058_v54 }
  0xee   : > { %v776_v2 = vpop.f32.mrf.mxu0  ;;  %v2612_v25 = vpop.f32.mrf.mxu1 }
  0xef   : > { %v950_v15 = vadd.f32 %v2602_v33, %v776_v2 }
  0xf0   : > { %v2614_v38 = vpop.f32.mrf.mxu0  ;;  %v2616_v5 = vpop.f32.mrf.mxu1 }
  0xf2   : > { %v2618_v4 = vpop.f32.mrf.mxu0 }
  0xf4   : > { %v2620_v1 = vpop.f32.mrf.mxu1 }
  0xf5   : > { %v2622_v6 = vpop.f32.mrf.mxu0 }
  0xf6   : > { %v2624_v7 = vpop.f32.mrf.mxu1 }
  0xf7   : > { %v2626_v10 = vpop.f32.mrf.mxu0 }
  0xf8   : > { %v2628_v12 = vpop.f32.mrf.mxu1 }
  0xf9   : > { %v2630_v16 = vpop.f32.mrf.mxu0 }
  0xfa   : > { %v2632_v17 = vpop.f32.mrf.mxu1 }
  0xfb   : > { %v2634_v8 = vpop.f32.mrf.mxu0 }
  0xfc   : > { %v2114_v9 = vpop.f32.mrf.mxu1 }
  0xfe   : > { %v1258_v20 = vpop.f32.mrf.mxu1 }
  0xff   : > { %v2636_v21 = vpop.f32.mrf.mxu0 }
 0x100   : > { %v2115_v22 = vpop.f32.mrf.mxu1 }
 0x101   : > { %v2638_v23 = vpop.f32.mrf.mxu0 }
 0x102   : > { %v1261_v24 = vpop.f32.mrf.mxu1 }
 0x103   : > { %v2640_v13 = vpop.f32.mrf.mxu0 }
 0x104   : > { %v2118_v56 = vpop.f32.mrf.mxu1 }
 0x105   : > { %v2643_v3 = vpop.f32.mrf.mxu0 }
 0x106   : > { %v1274_v28 = vpop.f32.mrf.mxu1 }
 0x107   : > { %v2094_v30 = vpop.f32.mrf.mxu0 }
 0x108   : > { %v1146_v31 = vadd.f32 %v2094_v30, %v942_v27  ;;  %v2119_v50 = vpop.f32.mrf.mxu1 }
 0x109   : > { %v1081_v34 = vpop.f32.mrf.mxu0 }
 0x10a   : > { %v1144_v41 = vadd.f32 %v1081_v34, %v934_v14  ;;  %v1277_v42 = vpop.f32.mrf.mxu1  ;;  %v1323_v44 = vadd.f32 %v2114_v9, %v1146_v31 }
 0x10b   : > { %v2095_v43 = vpop.f32.mrf.mxu0 }
 0x10c   : > { %v1321_v47 = vadd.f32 %v1258_v20, %v1144_v41  ;;  %v1147_v48 = vadd.f32 %v2095_v43, %v945_v35  ;;  %v2647_v49 = vpop.f32.mrf.mxu1  ;;  %v1524_v29 = vmul.f32 %v1455_v19, %v1323_v44  ;;  %v961_v20 = vadd.f32 %v2604_v40, %v2614_v38  ;;  %v2662_v41 = vpop.permute.xlu1 %1489 }
 0x10d   : > { %v1084_v61 = vpop.f32.mrf.mxu0 }
 0x10e   : > { %v1324_v36 = vadd.f32 %v2115_v22, %v1147_v48  ;;  %v1145_v37 = vadd.f32 %v1084_v61, %v937_v11  ;;  %v2649_v57 = vpop.f32.mrf.mxu1  ;;  %v1522_v59 = vmul.f32 %v1445_v18, %v1321_v47  ;;  %v953_v18 = vadd.f32 %v2606_v60, %v2618_v4 }
 0x10f   : > { %v2098_v46 = vpop.f32.mrf.mxu0  ;;  %v1562_v40 = vmul.f32 %v1524_v29, %v1524_v29  ;;  %v974_v4 = vadd.f32 %v2608_v63, %v2622_v6  ;;  %v977_v6 = vadd.f32 %v2612_v25, %v2630_v16 }
 0x110   : > { %v1525_v52 = vmul.f32 %v1460_v45, %v1324_v36  ;;  %v1322_v27 = vadd.f32 %v1261_v24, %v1145_v37  ;;  %v1150_v62 = vadd.f32 %v2098_v46, %v958_v32  ;;  %v2123_v33 = vpop.f32.mrf.mxu1  ;;  %v1560_v2 = vmul.f32 %v1522_v59, %v1522_v59 }
 0x111   : > { %v1097_v9 = vpop.f32.mrf.mxu0  ;;  %v966_v37 = vadd.f32 %v2610_v0, %v2626_v10 }
 0x112   : > { %v1969_v53 = vpack.c.bf16 %v1525_v52, %v1524_v29  ;;  %v1523_v54 = vmul.f32 %v1450_v26, %v1322_v27  ;;  %v1148_v19 = vadd.f32 %v1097_v9, %v950_v15  ;;  %v1327_v14 = vadd.f32 %v2118_v56, %v1150_v62  ;;  %v1485_v26 = vpop.permute.xlu0 %1484  ;;  %v1293_v48 = vpop.f32.mrf.mxu1 }
 0x113   : > { %v2099_v22 = vpop.f32.mrf.mxu0  ;;  %v1563_v61 = vmul.f32 %v1525_v52, %v1525_v52 }
 0x114   : > { %2001 = vst [vmem:[%s2655_s27 + $0x8] sm:$0xff] %v1969_v53   ;;  %v1538_v24 = vadd.f32 %v1523_v54, %v1522_v59  ;;  %v1561_v45 = vmul.f32 %v1523_v54, %v1523_v54  ;;  %v1964_v30 = vpack.c.bf16 %v1523_v54, %v1522_v59  ;;  %v1325_v31 = vadd.f32 %v1274_v28, %v1148_v19  ;;  %v2126_v0 = vpop.f32.mrf.mxu1 }
 0x115   : > { %v1151_v34 = vadd.f32 %v2099_v22, %v961_v20  ;;  %v1100_v35 = vpop.f32.mrf.mxu0  ;;  %v1528_v32 = vmul.f32 %v1475_v58, %v1327_v14  ;;  %v1500_v58 = vpop.permute.xlu1 %1499  ;;  %v990_v22 = vadd.f32 %v2620_v1, %v2636_v21 }
 0x116   : > { %v1539_v38 = vadd.f32 %v1538_v24, %v1524_v29  ;;  %v1576_v43 = vadd.f32 %v1561_v45, %v1560_v2  ;;  %1965 = vst [vmem:[%s2655_s27] sm:$0xff] %v1964_v30   ;;  %v1149_v60 = vadd.f32 %v1100_v35, %v953_v18  ;;  %v1526_v11 = vmul.f32 %v1465_v55, %v1325_v31  ;;  %v1495_v10 = vpop.permute.xlu0 %1494  ;;  %v1306_v45 = vpop.f32.mrf.mxu1 }
 0x117   : > { %v1328_v44 = vadd.f32 %v2119_v50, %v1151_v34  ;;  %v2102_v47 = vpop.f32.mrf.mxu0  ;;  %v969_v50 = vadd.f32 %v2616_v5, %v2634_v8  ;;  %v1566_v18 = vmul.f32 %v1528_v32, %v1528_v32 }
 0x118   : > { %v1577_v56 = vadd.f32 %v1576_v43, %v1562_v40  ;;  %v1540_v28 = vadd.f32 %v1539_v38, %v1525_v52  ;;  %v1326_v36 = vadd.f32 %v1277_v42, %v1149_v60  ;;  %v1154_v29 = vadd.f32 %v2102_v47, %v974_v4 }
 0x119   : > { %v1529_v46 = vmul.f32 %v1480_v51, %v1328_v44  ;;  %v1113_v59 = vpop.f32.mrf.mxu0  ;;  %v1564_v15 = vmul.f32 %v1526_v11, %v1526_v11  ;;  %v1510_v4 = vpop.permute.xlu1 %1509  ;;  %v985_v44 = vadd.f32 %v2632_v17, %v2643_v3 }
 0x11a   : > { %v1541_v27 = vadd.f32 %v1540_v28, %v1526_v11  ;;  %v1578_v62 = vadd.f32 %v1577_v56, %v1563_v61  ;;  %v1527_v63 = vmul.f32 %v2645_v39, %v1326_v36  ;;  %v1152_v42 = vadd.f32 %v1113_v59, %v966_v37  ;;  %v1505_v60 = vpop.permute.xlu0 %1504 }
 0x11b   : > { %v1979_v55 = vpack.c.bf16 %v1529_v46, %v1528_v32  ;;  %v2103_v52 = vpop.f32.mrf.mxu0  ;;  %v1331_v39 = vadd.f32 %v2647_v49, %v1154_v29  ;;  %v1567_v14 = vmul.f32 %v1529_v46, %v1529_v46 }
 0x11c   : > { %v1579_v51 = vadd.f32 %v1578_v62, %v1564_v15  ;;  %v1542_v9 = vadd.f32 %v1541_v27, %v1527_v63  ;;  %v1565_v53 = vmul.f32 %v1527_v63, %v1527_v63  ;;  %v1974_v54 = vpack.c.bf16 %v1527_v63, %v1526_v11 }
 0x11d   : > { %2003 = vst [vmem:[%s2655_s27 + $0x18] sm:$0xff] %v1979_v55   ;;  %v1329_v20 = vadd.f32 %v2649_v57, %v1152_v42  ;;  %v1155_v25 = vadd.f32 %v2103_v52, %v977_v6  ;;  %v1116_v16 = vpop.f32.mrf.mxu0  ;;  %v982_v57 = vadd.f32 %v2624_v7, %v2638_v23  ;;  %v1532_v35 = vmul.f32 %v1495_v10, %v1331_v39  ;;  %v2127_v7 = vpop.f32.mrf.mxu1 }
 0x11e   : > { %v1543_v5 = vadd.f32 %v1542_v9, %v1528_v32  ;;  %v1580_v8 = vadd.f32 %v1579_v51, %v1565_v53  ;;  %2002 = vst [vmem:[%s2655_s27 + $0x10] sm:$0xff] %v1974_v54   ;;  %v1153_v19 = vadd.f32 %v1116_v16, %v969_v50  ;;  %v1515_v15 = vpop.permute.xlu0 %1514  ;;  %v1520_v62 = vpop.permute.xlu1 %1519 }
 0x11f   : > { %v1530_v2 = vmul.f32 %v1485_v26, %v1329_v20  ;;  %v1332_v24 = vadd.f32 %v2123_v33, %v1155_v25  ;;  %v2106_v30 = vpop.f32.mrf.mxu0  ;;  %v993_v26 = vadd.f32 %v2628_v12, %v2640_v13  ;;  %v1570_v29 = vmul.f32 %v1532_v35, %v1532_v35  ;;  %v1309_v3 = vpop.f32.mrf.mxu1 }
 0x120   : > { %v1581_v31 = vadd.f32 %v1580_v8, %v1566_v18  ;;  %v1544_v34 = vadd.f32 %v1543_v5, %v1529_v46  ;;  %v1330_v49 = vadd.f32 %v1293_v48, %v1153_v19  ;;  %v1158_v38 = vadd.f32 %v2106_v30, %v990_v22 }
 0x121   : > { %v1533_v40 = vmul.f32 %v1500_v58, %v1332_v24  ;;  %v1129_v43 = vpop.f32.mrf.mxu0  ;;  %v1568_v1 = vmul.f32 %v1530_v2, %v1530_v2 }
 0x122   : > { %v1545_v11 = vadd.f32 %v1544_v34, %v1530_v2  ;;  %v1582_v21 = vadd.f32 %v1581_v31, %v1567_v14  ;;  %v1531_v33 = vmul.f32 %v2662_v41, %v1330_v49  ;;  %v1156_v23 = vadd.f32 %v1129_v43, %v982_v57 }
 0x123   : > { %v1989_v47 = vpack.c.bf16 %v1533_v40, %v1532_v35  ;;  %v2107_v48 = vpop.f32.mrf.mxu0  ;;  %v1335_v37 = vadd.f32 %v2126_v0, %v1158_v38  ;;  %v1571_v63 = vmul.f32 %v1533_v40, %v1533_v40 }
 0x124   : > { %v1583_v61 = vadd.f32 %v1582_v21, %v1568_v1  ;;  %v1546_v56 = vadd.f32 %v1545_v11, %v1531_v33  ;;  %v1569_v28 = vmul.f32 %v1531_v33, %v1531_v33  ;;  %v1984_v36 = vpack.c.bf16 %v1531_v33, %v1530_v2 }
 0x125   : > { %2005 = vst [vmem:[%s2655_s27 + $0x28] sm:$0xff] %v1989_v47   ;;  %v1333_v32 = vadd.f32 %v1306_v45, %v1156_v23  ;;  %v1159_v46 = vadd.f32 %v2107_v48, %v993_v26  ;;  %v1132_v41 = vpop.f32.mrf.mxu0  ;;  %v1536_v42 = vmul.f32 %v1515_v15, %v1335_v37 }
 0x126   : > { %v1547_v59 = vadd.f32 %v1546_v56, %v1532_v35  ;;  %v1584_v12 = vadd.f32 %v1583_v61, %v1569_v28  ;;  %2004 = vst [vmem:[%s2655_s27 + $0x20] sm:$0xff] %v1984_v36   ;;  %v1157_v13 = vadd.f32 %v1132_v41, %v985_v44 }
 0x127   : > { %v1534_v17 = vmul.f32 %v1505_v60, %v1333_v32  ;;  %v1336_v27 = vadd.f32 %v2127_v7, %v1159_v46  ;;  %v1574_v25 = vmul.f32 %v1536_v42, %v1536_v42 }
 0x128   : > { %v1585_v6 = vadd.f32 %v1584_v12, %v1570_v29  ;;  %v1548_v50 = vadd.f32 %v1547_v59, %v1533_v40  ;;  %v1334_v55 = vadd.f32 %v1309_v3, %v1157_v13 }
 0x129   : > { %v1537_v52 = vmul.f32 %v1520_v62, %v1336_v27  ;;  %v1572_v10 = vmul.f32 %v1534_v17, %v1534_v17 }
 0x12a   : > { %v1549_v0 = vadd.f32 %v1548_v50, %v1534_v17  ;;  %v1586_v58 = vadd.f32 %v1585_v6, %v1571_v63  ;;  %v1535_v51 = vmul.f32 %v1510_v4, %v1334_v55 }
 0x12b   : > { %v1999_v9 = vpack.c.bf16 %v1537_v52, %v1536_v42  ;;  %v1575_v5 = vmul.f32 %v1537_v52, %v1537_v52 }
 0x12c   : > { %v1587_v53 = vadd.f32 %v1586_v58, %v1572_v10  ;;  %v1550_v54 = vadd.f32 %v1549_v0, %v1535_v51  ;;  %v1573_v39 = vmul.f32 %v1535_v51, %v1535_v51  ;;  %v1994_v20 = vpack.c.bf16 %v1535_v51, %v1534_v17 }
 0x12d   : > { %2007 = vst [vmem:[%s2655_s27 + $0x38] sm:$0xff] %v1999_v9  }
 0x12e   : > { %v1551_v16 = vadd.f32 %v1550_v54, %v1536_v42  ;;  %v1588_v18 = vadd.f32 %v1587_v53, %v1573_v39  ;;  %2006 = vst [vmem:[%s2655_s27 + $0x30] sm:$0xff] %v1994_v20  }
 0x130   : > { %v1552_v8 = vadd.f32 %v1551_v16, %v1537_v52  ;;  %v1589_v19 = vadd.f32 %v1588_v18, %v1574_v25 }
 0x132   : > { %v1553_v22 = vrot.slane %v1552_v8, 4  ;;  %v1590_v2 = vadd.f32 %v1589_v19, %v1575_v5 }
 0x134   : > { %v1554_v24 = vadd.f32 %v1553_v22, %v1552_v8  ;;  %v1591_v45 = vrot.slane %v1590_v2, 4 }
 0x136   : > { %v1555_v30 = vrot.slane %v1554_v24, 2  ;;  %v1592_v14 = vadd.f32 %v1591_v45, %v1590_v2 }
 0x138   : > { %v1556_v31 = vadd.f32 %v1555_v30, %v1554_v24  ;;  %v1593_v34 = vrot.slane %v1592_v14, 2 }
 0x13a   : > { %v1557_v49 = vrot.slane %v1556_v31, 1  ;;  %v1594_v57 = vadd.f32 %v1593_v34, %v1592_v14 }
 0x13c   : > { %v1558_v35 = vadd.f32 %v1557_v49, %v1556_v31  ;;  %v1595_v40 = vrot.slane %v1594_v57, 1 }
 0x13e   : > { %1559 = vst [vmem:[%s387_s30] sm:$0x1] %v1558_v35  ;;  %v1596_v38 = vadd.f32 %v1595_v40, %v1594_v57 }
 0x140   : > { %1597 = vst [vmem:[%s392_s11] sm:$0x1] %v1596_v38 }
 0x141 PF: > { %s17_s23 = sadd.s32 1, %s2203_s23   ;;  %s2717_s21 = smov %s2199_s22 }
 0x142   : > { %p14_p6 = scmp.ge.s32.totalorder %s17_s23, 4   ;;  %s2718_s22 = smov %s2720_s24 }
 0x144   :  { %16 = sbr.rel (!%p14_p6) target bundleno = 2 (0x2), region = 96 }

// kernel: nlayer_discriminator_forward.7
= control target key start
LH: loop header
LB: loop body
LE: loop exit
PB: predicated region body
PF: predicated region fallthrough
CT: control target
= control target key end

     0   :  { %s2357_s21 = smov 0   ;;  %s2359_s22 = smov 0   ;;  %s2865_s0 = inlined_call_operand.vmem [shape: bf16[2,24,9,64], index: 0, kind: input, shape index: {}, may-alias: {0,1}]   ;;  %s2866_s1 = inlined_call_operand.vmem [shape: bf16[2,24,9,64], index: 1, kind: input, shape index: {}, may-alias: {0,1}]   ;;  %s2867_s2 = inlined_call_operand.vmem [shape: bf16[4,64,128], index: 2, kind: input, shape index: {}]   ;;  %s2868_s3 = inlined_call_operand.vmem [shape: f32[128,1], index: 3, kind: input, shape index: {}]   ;;  %s2869_s4 = inlined_call_operand.vmem [shape: bf16[256,128], index: 4, kind: output, shape index: {0}]   ;;  %s2870_s5 = inlined_call_operand.vmem [shape: f32[2,1,128], index: 5, kind: output, shape index: {1}]   ;;  %s2871_s6 = inlined_call_operand.vmem [shape: f32[2,1,128], index: 6, kind: output, shape index: {2}]  }
   0x1   :  { %s2361_s23 = smov 0  }
   0x2 LB: > { %s29_s24 = sadd.s32 1, %s2315_s22  ;;  %p1900_p0 = scmp.ge.s32.totalorder %s2319_s23, 1  ;;  %s2319_s23 = sphi %s2361_s23, %s17_s23   ;;  %s2315_s22 = sphi %s2359_s22, %s2875_s22   ;;  %s2311_s21 = sphi %s2357_s21, %s2874_s21  }
   0x3   : > { %p31_p1 = scmp.ge.s32.totalorder %s29_s24, 2  ;;  %p279_p2 = scmp.lt.s32.totalorder %s2319_s23, 3 }
   0x5   : > { %s2877_s24 = smov (%p31_p1, %s29_s24), 0  ;;  %p280_p3 = pnand %p1900_p0, %p279_p2 }
   0x6   : > { %p346_p4 = scmp.lt.s32.totalorder (!%p280_p3), %s2311_s21, 1  ;;  %s1903_s19 = sshll.u32 (!%p280_p3), %s2311_s21, 4 }
   0x7   : > { %283 = sbr.rel (%p280_p3) target bundleno = 323 (0x143), region = 36  ;;  %p378_p5 = scmp.lt.s32.totalorder (!%p280_p3), %s1903_s19, 31 }
   0xc   : > { %v2266_v0 = vld [vmem:[%s2867_s2 + $0x38] sm:$0xff]   ;;  %v2268_v2 = vld [vmem:[%s2867_s2 + $0x30] sm:$0xff]   ;;  %s2388_s7 = scalar_select %p346_p4, %s2311_s21, 1  ;;  %v2270_v4 = vld [vmem:[%s2867_s2 + $0x28] sm:$0xff]   ;;  %v2321_v6 = vmov 0   ;;  %vm721_vm0 = vcmask 523264  }
   0xd   : > { %v2267_v1 = vld [vmem:[%s2867_s2 + $0x18] sm:$0xff]   ;;  %2140 = vmatprep.subr.bf16.mxu0 %v2266_v0  ;;  %v2269_v3 = vld [vmem:[%s2867_s2 + $0x10] sm:$0xff]   ;;  %v2271_v5 = vld [vmem:[%s2867_s2 + $0x8] sm:$0xff]   ;;  %2264 = vset.pattern.permute.xlu0 %v2321_v6  ;;  %vm437_vm1 = vsmask.f32 3328  ;;  %s2879_s19 = smov (!%p378_p5, %s1903_s19), 31 }
   0xe   : > { %2164 = vmatprep.subr.bf16.mxu1 %v2267_v1  ;;  %2141 = vmatpush3.bf16.msra.mxu0 %v2266_v0  ;;  %s2236_s12 = smul.u32 192, %s2388_s7  ;;  %v2272_v7 = vld [vmem:[%s2867_s2 + $0x20] sm:$0xff]   ;;  %vm438_vm2 = vsmask.f32 7440  ;;  %v2439_v30 = vld [vmem:[%s2867_s2 + $0x58] sm:$0xff]   ;;  %v2281_v56 = vld [vmem:[%s2867_s2 + $0x70] sm:$0xff]   ;;  %s387_s29 = scalar_lea.vmem %s2870_s5, %s2388_s7 }
   0xf   : > { %2165 = vmatpush3.bf16.msra.mxu1 %v2267_v1  ;;  %2142 = vmatprep.subr.bf16.mxu0 %v2268_v2  ;;  %v2273_v10 = vld [vmem:[%s2867_s2] sm:$0xff]   ;;  %vm2442_vm3 = vmor %vm437_vm1, %vm438_vm2  ;;  %v2277_v41 = vld [vmem:[%s2867_s2 + $0x78] sm:$0xff]   ;;  %s1904_s21 = sshll.u32 %s2879_s19, 2  ;;  %s392_s8 = scalar_lea.vmem %s2871_s6, %s2388_s7 }
  0x10   : > { %2166 = vmatprep.subr.bf16.mxu1 %v2269_v3  ;;  %s2405_s17 = scalar_lea.vmem %s2865_s0, %s2236_s12  ;;  %2265 = vset.pattern.permute.xlu1 %v2321_v6  ;;  %s2813_s26 = scalar_lea.vmem %s2869_s4, %s1904_s21 }
  0x11   : > { %v395_v8 = vld [vmem:[%s2405_s17] sm:$0xf]  ;;  %v2412_v9 = vld [vmem:[%s2405_s17 + $0x8] sm:$0xf]  ;;  %v396_v16 = vld [vmem:[%s2405_s17 + $0x4] sm:$0x1] }
  0x12   : > { %2143 = vmatpush3.bf16.msra.mxu0 %v2268_v2  ;;  %v441_v11 = vshrl.u32 %v395_v8, 16  ;;  %v444_v12 = vshll.u32 %v395_v8, 16  ;;  %v455_v13 = vshrl.u32 %v2412_v9, 16  ;;  %v458_v14 = vshll.u32 %v2412_v9, 16  ;;  %v398_v17 = vld [vmem:[%s2405_s17 + $0xc] sm:$0x1] }
  0x13   : > { %2167 = vmatpush3.bf16.msra.mxu1 %v2269_v3  ;;  %2144 = vmatprep.subr.bf16.mxu0 %v2270_v4  ;;  %v1933_v15 = vcombine.low %v395_v8, %v2412_v9  ;;  %v2423_v18 = vld [vmem:[%s2405_s17 + $0x10] sm:$0xf]  ;;  %v400_v21 = vld [vmem:[%s2405_s17 + $0x14] sm:$0x1]  ;;  %v2427_v22 = vld [vmem:[%s2405_s17 + $0x18] sm:$0xf] }
  0x14   : > { %2168 = vmatprep.subr.bf16.mxu1 %v2271_v5  ;;  %v443_v19 = vrot.slane %v441_v11, 4  ;;  %v446_v20 = vrot.slane %v444_v12, 5  ;;  %v1934_v23 = vcombine.low %v2423_v18, %v2427_v22  ;;  %v402_v24 = vld [vmem:[%s2405_s17 + $0x1c] sm:$0x1]  ;;  %v2434_v25 = vld [vmem:[%s2405_s17 + $0x20] sm:$0xf] }
  0x15   : > { %2172 = vmatprep.mubr.msk.bf16.mxu1 %vm721_vm0, %v1933_v15  ;;  %v450_v27 = vshll.u32 %v396_v16, 16  ;;  %v457_v28 = vrot.slane %v455_v13, 4  ;;  %v460_v29 = vrot.slane %v458_v14, 5  ;;  %v404_v31 = vld [vmem:[%s2405_s17 + $0x24] sm:$0x1]  ;;  %v464_v33 = vshll.u32 %v398_v17, 16 }
  0x16   : > { %2145 = vmatpush3.bf16.msra.mxu0 %v2270_v4  ;;  %v447_v26 = vor.u32 %v446_v20, %v443_v19  ;;  %v469_v34 = vshrl.u32 %v2423_v18, 16  ;;  %v472_v35 = vshll.u32 %v2423_v18, 16  ;;  %v478_v36 = vshll.u32 %v400_v21, 16  ;;  %v2457_v50 = vld [vmem:[%s2405_s17 + $0x28] sm:$0xf] }
  0x17   : > { %2169 = vmatpush3.bf16.msra.mxu1 %v2271_v5  ;;  %2146 = vmatprep.subr.bf16.mxu0 %v2272_v7  ;;  %v452_v38 = vrot.slane %v450_v27, 5  ;;  %v461_v39 = vor.u32 %v460_v29, %v457_v28  ;;  %v483_v40 = vshrl.u32 %v2427_v22, 16  ;;  %v466_v42 = vrot.slane %v464_v33, 5  ;;  %v406_v55 = vld [vmem:[%s2405_s17 + $0x2c] sm:$0x1] }
  0x18   : > { %2170 = vmatprep.subr.bf16.mxu1 %v2273_v10  ;;  %v448_v37 = vrot.slane %v447_v26, 4  ;;  %v471_v43 = vrot.slane %v469_v34, 4  ;;  %v474_v44 = vrot.slane %v472_v35, 5  ;;  %v480_v45 = vrot.slane %v478_v36, 5  ;;  %v2472_v61 = vld [vmem:[%s2405_s17 + $0x30] sm:$0xf] }
  0x19   : > { %v462_v47 = vrot.slane %v461_v39, 4  ;;  %v485_v48 = vrot.slane %v483_v40, 4  ;;  %v486_v49 = vshll.u32 %v2427_v22, 16  ;;  %v492_v52 = vshll.u32 %v402_v24, 16  ;;  %v2475_v1 = vld [vmem:[%s2405_s17 + $0x38] sm:$0xf] }
  0x1a   : > { %2147 = vmatpush3.bf16.msra.mxu0 %v2272_v7  ;;  %v453_v46 = vsel %vm2442_vm3, %v448_v37, %v452_v38  ;;  %v475_v51 = vor.u32 %v474_v44, %v471_v43  ;;  %v497_v53 = vshrl.u32 %v2434_v25, 16  ;;  %v500_v54 = vshll.u32 %v2434_v25, 16  ;;  %v408_v11 = vld [vmem:[%s2405_s17 + $0x34] sm:$0x1]  ;;  %v2285_v12 = vld [vmem:[%s2867_s2 + $0x68] sm:$0xff]   ;;  %v2289_v38 = vld [vmem:[%s2867_s2 + $0x60] sm:$0xff]  }
  0x1b   : > { %2171 = vmatpush3.bf16.msra.mxu1 %v2273_v10  ;;  %2188 = vmatprep.subr.bf16.mxu0 %v2439_v30  ;;  %v2467_v57 = vsel %vm2442_vm3, %v462_v47, %v466_v42  ;;  %v488_v58 = vrot.slane %v486_v49, 5  ;;  %v506_v59 = vshll.u32 %v404_v31, 16  ;;  %v511_v60 = vshrl.u32 %v2457_v50, 16  ;;  %v410_v28 = vld [vmem:[%s2405_s17 + $0x3c] sm:$0x1]  ;;  %v2280_v35 = vld [vmem:[%s2867_s2 + $0x50] sm:$0xff]  }
  0x1c   : > { %2212 = vmatprep.subr.bf16.mxu1 %v2277_v41  ;;  %v476_v62 = vrot.slane %v475_v51, 4  ;;  %v499_v63 = vrot.slane %v497_v53, 4  ;;  %v502_v0 = vrot.slane %v500_v54, 5  ;;  %v494_v3 = vrot.slane %v492_v52, 5  ;;  %v2501_v29 = vld [vmem:[%s2405_s17 + $0x40] sm:$0xf] }
  0x1d   : > { %v489_v2 = vor.u32 %v488_v58, %v485_v48  ;;  %v1913_v4 = vcombine.low %v453_v46, %v2467_v57  ;;  %v514_v5 = vshll.u32 %v2457_v50, 16  ;;  %v508_v7 = vrot.slane %v506_v59, 5  ;;  %v2513_v37 = vld [vmem:[%s2405_s17 + $0x48] sm:$0xf]  ;;  %v412_v43 = vld [vmem:[%s2405_s17 + $0x44] sm:$0x1] }
  0x1e   : > { %2173 = vmatmul.mubr.msk.bf16.vlgmr.msra.gmra.mxu1 %vm721_vm0, %v1934_v23  ;;  %v503_v6 = vor.u32 %v502_v0, %v499_v63  ;;  %v1935_v8 = vcombine.low %v2434_v25, %v2457_v50  ;;  %v513_v10 = vrot.slane %v511_v60, 4  ;;  %v2487_v13 = vsel %vm2442_vm3, %v476_v62, %v480_v45  ;;  %v414_v48 = vld [vmem:[%s2405_s17 + $0x4c] sm:$0x1]  ;;  %v1425_v51 = vld [vmem:[%s2868_s3] sm:$0xff]  ;;  %v2545_v62 = vld [vmem:[%s2405_s17 + $0x50] sm:$0xf] }
  0x1f   : > { %2213 = vmatpush3.bf16.msra.mxu1 %v2277_v41  ;;  %v490_v14 = vrot.slane %v489_v2, 4  ;;  %2148 = vmatprep.mubr.msk.bf16.mxu0 %vm721_vm0, %v1913_v4  ;;  %v516_v15 = vrot.slane %v514_v5, 5  ;;  %v520_v16 = vshll.u32 %v406_v55, 16  ;;  %v525_v19 = vshrl.u32 %v2472_v61, 16  ;;  %v2530_v49 = vld [vmem:[%s2867_s2 + $0x48] sm:$0xff]   ;;  %v1427_v4 = vld [vmem:[%s2868_s3 + $0x10] sm:$0xff] }
  0x20   : > { %2214 = vmatprep.subr.bf16.mxu1 %v2281_v56  ;;  %v504_v17 = vrot.slane %v503_v6, 4  ;;  %2176 = vmatprep.mubr.msk.bf16.mxu1 %vm721_vm0, %v1935_v8  ;;  %v528_v20 = vshll.u32 %v2472_v61, 16  ;;  %v539_v21 = vshrl.u32 %v2475_v1, 16  ;;  %v542_v27 = vshll.u32 %v2475_v1, 16 }
  0x21   : > { %v2496_v23 = vsel %vm2442_vm3, %v490_v14, %v494_v3  ;;  %v517_v24 = vor.u32 %v516_v15, %v513_v10  ;;  %v522_v26 = vrot.slane %v520_v16, 5  ;;  %v1989_v33 = vcombine.low %v2467_v57, %v2487_v13  ;;  %1508 = vperm.xlu0 %2264, %v1425_v51   ;;  %1518 = vperm.xlu1 %2265, %v1427_v4   ;;  %v1426_v15 = vld [vmem:[%s2868_s3 + $0x8] sm:$0xff] }
  0x22   : > { %v1914_v31 = vcombine.low %v2487_v13, %v2496_v23  ;;  %v1936_v34 = vcombine.low %v2472_v61, %v2475_v1  ;;  %v527_v36 = vrot.slane %v525_v19, 4  ;;  %v2520_v39 = vsel %vm2442_vm3, %v504_v17, %v508_v7 }
  0x23   : > { %2215 = vmatpush3.bf16.msra.mxu1 %v2281_v56  ;;  %v518_v40 = vrot.slane %v517_v24, 4  ;;  %v530_v41 = vrot.slane %v528_v20, 5  ;;  %v534_v42 = vshll.u32 %v408_v11, 16  ;;  %v541_v44 = vrot.slane %v539_v21, 4  ;;  %v416_v21 = vld [vmem:[%s2405_s17 + $0x54] sm:$0x1] }
  0x24   : > { %2216 = vmatprep.subr.bf16.mxu1 %v2285_v12  ;;  %2149 = vmatmul.mubr.msk.bf16.vlgmr.msra.gmra.mxu0 %vm721_vm0, %v1914_v31  ;;  %v544_v45 = vrot.slane %v542_v27, 5  ;;  %v548_v46 = vshll.u32 %v410_v28, 16  ;;  %v553_v47 = vshrl.u32 %v2501_v29, 16  ;;  %v556_v55 = vshll.u32 %v2501_v29, 16  ;;  %v2288_v24 = vld [vmem:[%s2867_s2 + $0x40] sm:$0xff]  }
  0x25   : > { %2189 = vmatpush3.bf16.msra.mxu0 %v2439_v30  ;;  %v2538_v52 = vsel %vm2442_vm3, %v518_v40, %v522_v26  ;;  %v531_v53 = vor.u32 %v530_v41, %v527_v36  ;;  %v536_v54 = vrot.slane %v534_v42, 5  ;;  %v567_v60 = vshrl.u32 %v2513_v37, 16  ;;  %v2548_v30 = vld [vmem:[%s2405_s17 + $0x58] sm:$0xf]  ;;  %1513 = vperm.xlu0 %2264, %v1426_v15  }
  0x26   : > { %2177 = vmatmul.mubr.msk.bf16.gmra.mxu1 %vm721_vm0, %v1936_v34  ;;  %v1915_v56 = vcombine.low %v2520_v39, %v2538_v52  ;;  %2190 = vmatprep.subr.bf16.mxu0 %v2280_v35  ;;  %v545_v58 = vor.u32 %v544_v45, %v541_v44  ;;  %v550_v59 = vrot.slane %v548_v46, 5  ;;  %v570_v0 = vshll.u32 %v2513_v37, 16  ;;  %v418_v34 = vld [vmem:[%s2405_s17 + $0x5c] sm:$0x1]  ;;  %v2615_v15 = vld [vmem:[%s2405_s17 + $0x78] sm:$0xf] }
  0x27   : > { %2217 = vmatpush3.bf16.msra.mxu1 %v2285_v12  ;;  %v532_v63 = vrot.slane %v531_v53, 4  ;;  %v1937_v2 = vcombine.low %v2501_v29, %v2513_v37  ;;  %v555_v3 = vrot.slane %v553_v47, 4  ;;  %v558_v6 = vrot.slane %v556_v55, 5  ;;  %v420_v47 = vld [vmem:[%s2405_s17 + $0x64] sm:$0x1] }
  0x28   : > { %2218 = vmatprep.subr.bf16.mxu1 %v2289_v38  ;;  %2152 = vmatprep.mubr.msk.bf16.mxu0 %vm721_vm0, %v1915_v56  ;;  %v546_v5 = vrot.slane %v545_v58, 4  ;;  %v562_v7 = vshll.u32 %v412_v43, 16  ;;  %v569_v8 = vrot.slane %v567_v60, 4  ;;  %v572_v11 = vrot.slane %v570_v0, 5  ;;  %v422_v60 = vld [vmem:[%s2405_s17 + $0x6c] sm:$0x1] }
  0x29   : > { %v2559_v10 = vsel %vm2442_vm3, %v532_v63, %v536_v54  ;;  %2191 = vmatpush3.bf16.msra.mxu0 %v2280_v35  ;;  %2180 = vmatprep.mubr.msk.bf16.mxu1 %vm721_vm0, %v1937_v2  ;;  %v576_v12 = vshll.u32 %v414_v48, 16  ;;  %v581_v14 = vshrl.u32 %v2545_v62, 16  ;;  %v559_v17 = vor.u32 %v558_v6, %v555_v3  ;;  %v2581_v35 = vld [vmem:[%s2405_s17 + $0x60] sm:$0xf]  ;;  %v2605_v63 = vld [vmem:[%s2405_s17 + $0x70] sm:$0xf] }
  0x2a   : > { %v2568_v16 = vsel %vm2442_vm3, %v546_v5, %v550_v59  ;;  %v564_v19 = vrot.slane %v562_v7, 5  ;;  %v584_v20 = vshll.u32 %v2545_v62, 16  ;;  %2192 = vmatprep.subr.bf16.mxu0 %v2530_v49  ;;  %v573_v27 = vor.u32 %v572_v11, %v569_v8 }
  0x2b   : > { %2219 = vmatpush3.bf16.msra.mxu1 %v2289_v38  ;;  %v1916_v26 = vcombine.low %v2559_v10, %v2568_v16  ;;  %v578_v28 = vrot.slane %v576_v12, 5  ;;  %v595_v31 = vshrl.u32 %v2548_v30, 16  ;;  %v560_v36 = vrot.slane %v559_v17, 4  ;;  %v2587_v38 = vld [vmem:[%s2405_s17 + $0x68] sm:$0xf] }
  0x2c   : > { %v598_v40 = vshll.u32 %v2548_v30, 16  ;;  %v1938_v41 = vcombine.low %v2545_v62, %v2548_v30  ;;  %v583_v42 = vrot.slane %v581_v14, 4  ;;  %v574_v43 = vrot.slane %v573_v27, 4 }
  0x2d   : > { %2153 = vmatmul.mubr.msk.bf16.gmra.mxu0 %vm721_vm0, %v1916_v26  ;;  %v586_v44 = vrot.slane %v584_v20, 5  ;;  %v590_v45 = vshll.u32 %v416_v21, 16  ;;  %v597_v46 = vrot.slane %v595_v31, 4  ;;  %v2593_v48 = vsel %vm2442_vm3, %v560_v36, %v564_v19 }
  0x2e   : > { %2181 = vmatmul.mubr.msk.bf16.gmra.mxu1 %vm721_vm0, %v1938_v41  ;;  %v600_v51 = vrot.slane %v598_v40, 5  ;;  %v604_v53 = vshll.u32 %v418_v34, 16  ;;  %2193 = vmatpush3.bf16.msra.mxu0 %v2530_v49  ;;  %v609_v54 = vshrl.u32 %v2581_v35, 16  ;;  %v2600_v55 = vsel %vm2442_vm3, %v574_v43, %v578_v28  ;;  %v424_v34 = vld [vmem:[%s2405_s17 + $0x74] sm:$0x1] }
  0x2f   : > { %v587_v56 = vor.u32 %v586_v44, %v583_v42  ;;  %v592_v58 = vrot.slane %v590_v45, 5  ;;  %v612_v59 = vshll.u32 %v2581_v35, 16  ;;  %2194 = vmatprep.subr.bf16.mxu0 %v2288_v24  ;;  %v1917_v0 = vcombine.low %v2593_v48, %v2600_v55  ;;  %v426_v42 = vld [vmem:[%s2405_s17 + $0x7c] sm:$0x1]  ;;  %s2028_s17 = sadd.s32 128, %s2236_s12 }
  0x30   : > { %v601_v2 = vor.u32 %v600_v51, %v597_v46  ;;  %v606_v49 = vrot.slane %v604_v53, 5  ;;  %v623_v3 = vshrl.u32 %v2587_v38, 16  ;;  %v626_v5 = vshll.u32 %v2587_v38, 16  ;;  %s2657_s12 = scalar_lea.vmem %s2866_s1, %s2028_s17 }
  0x31   : > { %v588_v4 = vrot.slane %v587_v56, 4  ;;  %v1939_v6 = vcombine.low %v2581_v35, %v2587_v38  ;;  %v611_v7 = vrot.slane %v609_v54, 4  ;;  %2156 = vmatprep.mubr.msk.bf16.mxu0 %vm721_vm0, %v1917_v0  ;;  %v614_v11 = vrot.slane %v612_v59, 5 }
  0x32   : > { %v602_v8 = vrot.slane %v601_v2, 4  ;;  %v618_v12 = vshll.u32 %v420_v47, 16  ;;  %v625_v14 = vrot.slane %v623_v3, 4  ;;  %2195 = vmatpush3.bf16.msra.mxu0 %v2288_v24  ;;  %v628_v19 = vrot.slane %v626_v5, 5 }
  0x33   : > { %v2619_v17 = vsel %vm2442_vm3, %v588_v4, %v592_v58  ;;  %2184 = vmatprep.mubr.msk.bf16.mxu1 %vm721_vm0, %v1939_v6  ;;  %v632_v20 = vshll.u32 %v422_v60, 16  ;;  %v637_v21 = vshrl.u32 %v2605_v63, 16  ;;  %v615_v27 = vor.u32 %v614_v11, %v611_v7  ;;  %v1428_v6 = vld [vmem:[%s2868_s3 + $0x18] sm:$0xff]  ;;  %v1430_v11 = vld [vmem:[%s2868_s3 + $0x28] sm:$0xff] }
  0x34   : > { %v2625_v26 = vsel %vm2442_vm3, %v602_v8, %v606_v49  ;;  %v620_v28 = vrot.slane %v618_v12, 5  ;;  %v640_v31 = vshll.u32 %v2605_v63, 16  ;;  %v629_v36 = vor.u32 %v628_v19, %v625_v14  ;;  %v1429_v8 = vld [vmem:[%s2868_s3 + $0x20] sm:$0xff] }
  0x35   : > { %v1918_v24 = vcombine.low %v2619_v17, %v2625_v26  ;;  %v634_v40 = vrot.slane %v632_v20, 5  ;;  %v651_v41 = vshrl.u32 %v2615_v15, 16  ;;  %v616_v43 = vrot.slane %v615_v27, 4  ;;  %v2684_v12 = vld [vmem:[%s2657_s12] sm:$0xf] }
  0x36   : > { %v654_v44 = vshll.u32 %v2615_v15, 16  ;;  %v1940_v45 = vcombine.low %v2605_v63, %v2615_v15  ;;  %v639_v46 = vrot.slane %v637_v21, 4  ;;  %v630_v47 = vrot.slane %v629_v36, 4  ;;  %v1432_v21 = vld [vmem:[%s2868_s3 + $0x38] sm:$0xff] }
  0x37   : > { %2157 = vmatmul.mubr.msk.bf16.gmra.mxu0 %vm721_vm0, %v1918_v24  ;;  %v642_v51 = vrot.slane %v640_v31, 5  ;;  %v646_v53 = vshll.u32 %v424_v34, 16  ;;  %v653_v54 = vrot.slane %v651_v41, 4  ;;  %v2639_v56 = vsel %vm2442_vm3, %v616_v43, %v620_v28  ;;  %v1433_v28 = vld [vmem:[%s2868_s3 + $0x40] sm:$0xff] }
  0x38   : > { %2185 = vmatmul.mubr.msk.bf16.gmra.mxu1 %vm721_vm0, %v1940_v45  ;;  %v656_v58 = vrot.slane %v654_v44, 5  ;;  %v660_v59 = vshll.u32 %v426_v42, 16  ;;  %v2646_v60 = vsel %vm2442_vm3, %v630_v47, %v634_v40  ;;  %v1990_v57 = vcombine.low %v2496_v23, %v2520_v39  ;;  %v1434_v42 = vld [vmem:[%s2868_s3 + $0x48] sm:$0xff]  ;;  %v428_v44 = vld [vmem:[%s2657_s12 + $0x4] sm:$0x1] }
  0x39   : > { %v643_v0 = vor.u32 %v642_v51, %v639_v46  ;;  %v648_v2 = vrot.slane %v646_v53, 5  ;;  %2220 = vmatprep.mubr.msk.bf16.mxu1 %vm721_vm0, %v1989_v33  ;;  %v1919_v49 = vcombine.low %v2639_v56, %v2646_v60  ;;  %v1991_v7 = vcombine.low %v2538_v52, %v2559_v10  ;;  %v1431_v10 = vld [vmem:[%s2868_s3 + $0x30] sm:$0xff] }
  0x3a   : > { %v657_v3 = vor.u32 %v656_v58, %v653_v54  ;;  %v662_v4 = vrot.slane %v660_v59, 5  ;;  %v1961_v39 = vcombine.low %v2412_v9, %v2423_v18  ;;  %v1493_v14 = vmul.f32 0.0, %v1428_v6  ;;  %v1438_v58 = vld [vmem:[%s2868_s3 + $0x68] sm:$0xff] }
  0x3b   : > { %v644_v5 = vrot.slane %v643_v0, 4  ;;  %2160 = vmatprep.mubr.msk.bf16.mxu0 %vm721_vm0, %v1919_v49  ;;  %v1494_v19 = vmul.f32 0.0, %v1429_v8  ;;  %v1495_v20 = vmul.f32 0.0, %v1430_v11  ;;  %v1209_v9 = vshrl.u32 %v2684_v12, 16 }
  0x3c   : > { %v658_v13 = vrot.slane %v657_v3, 4  ;;  %1523 = vperm.xlu1 %2265, %v1493_v14   ;;  %v1212_v18 = vshll.u32 %v2684_v12, 16  ;;  %v1496_v27 = vmul.f32 0.0, %v1431_v10  ;;  %v1992_v31 = vcombine.low %v2568_v16, %v2593_v48  ;;  %v1435_v48 = vld [vmem:[%s2868_s3 + $0x50] sm:$0xff] }
  0x3d   : > { %v2667_v33 = vsel %vm2442_vm3, %v644_v5, %v648_v2  ;;  %1528 = vperm.xlu0 %2264, %v1494_v19   ;;  %v1497_v34 = vmul.f32 0.0, %v1432_v21  ;;  %v1962_v24 = vcombine.low %v2427_v22, %v2434_v25  ;;  %v1993_v36 = vcombine.low %v2600_v55, %v2619_v17  ;;  %v1437_v17 = vld [vmem:[%s2868_s3 + $0x60] sm:$0xff] }
  0x3e   : > { %v2679_v23 = vsel %vm2442_vm3, %v658_v13, %v662_v4  ;;  %v1211_v40 = vrot.slane %v1209_v9, 4  ;;  %v1214_v41 = vrot.slane %v1212_v18, 5  ;;  %v1963_v43 = vcombine.low %v2457_v50, %v2472_v61  ;;  %v1436_v50 = vld [vmem:[%s2868_s3 + $0x58] sm:$0xff] }
  0x3f   : > { %v1920_v52 = vcombine.low %v2667_v33, %v2679_v23  ;;  %v1498_v16 = vmul.f32 0.0, %v1433_v28  ;;  %v1499_v22 = vmul.f32 0.0, %v1434_v42  ;;  %v1218_v55 = vshll.u32 %v428_v44, 16 }
  0x40   : > { %2221 = vmatmul.mubr.msk.bf16.vlgmr.msra.gmra.mxu1 %vm721_vm0, %v1990_v57  ;;  %1533 = vperm.xlu1 %2265, %v1495_v20   ;;  %v1215_v25 = vor.u32 %v1214_v41, %v1211_v40  ;;  %v1500_v61 = vmul.f32 0.0, %v1435_v48  ;;  %v1994_v45 = vcombine.low %v2625_v26, %v2639_v56  ;;  %v1501_v46 = vmul.f32 0.0, %v1436_v50  ;;  %v1439_v26 = vld [vmem:[%s2868_s3 + $0x70] sm:$0xff] }
  0x41   : > { %2161 = vmatmul.mubr.msk.bf16.gmra.mxu0 %vm721_vm0, %v1920_v52  ;;  %2224 = vmatprep.mubr.msk.bf16.mxu1 %vm721_vm0, %v1991_v7  ;;  %v1964_v47 = vcombine.low %v2475_v1, %v2501_v29  ;;  %v1995_v51 = vcombine.low %v2646_v60, %v2667_v33  ;;  %v1220_v54 = vrot.slane %v1218_v55, 5  ;;  %v1965_v59 = vcombine.low %v2513_v37, %v2545_v62  ;;  %v1440_v37 = vld [vmem:[%s2868_s3 + $0x78] sm:$0xff] }
  0x42   : > { %2196 = vmatprep.mubr.msk.bf16.mxu0 %vm721_vm0, %v1961_v39  ;;  %1538 = vperm.xlu0 %2264, %v1496_v27   ;;  %v1216_v53 = vrot.slane %v1215_v25, 4  ;;  %v1502_v0 = vmul.f32 0.0, %v1437_v17  ;;  %v1503_v1 = vmul.f32 0.0, %v1438_v58  ;;  %v1504_v62 = vmul.f32 0.0, %v1439_v26 }
  0x43   : > { %v1505_v60 = vmul.f32 0.0, %v1440_v37  ;;  %v1966_v2 = vcombine.low %v2548_v30, %v2581_v35  ;;  %v1967_v49 = vcombine.low %v2587_v38, %v2605_v63  ;;  %v1968_v32 = vcombine.low %v2615_v15, %v2684_v12 }
  0x44   : > { %1543 = vperm.xlu1 %2265, %v1497_v34   ;;  %v1221_v29 = vsel %vm2442_vm3, %v1216_v53, %v1220_v54 }
  0x45   : > { %v1996_v56 = vcombine.low %v2679_v23, %v1221_v29 }
  0x46   : > { %1548 = vperm.xlu0 %2264, %v1498_v16  }
  0x48   : > { %2225 = vmatmul.mubr.msk.bf16.gmra.mxu1 %vm721_vm0, %v1992_v31  ;;  %1553 = vperm.xlu1 %2265, %v1499_v22  }
  0x49   : > { %2197 = vmatmul.mubr.msk.bf16.vlgmr.msra.gmra.mxu0 %vm721_vm0, %v1962_v24  ;;  %2228 = vmatprep.mubr.msk.bf16.mxu1 %vm721_vm0, %v1993_v36 }
  0x4a   : > { %2200 = vmatprep.mubr.msk.bf16.mxu0 %vm721_vm0, %v1963_v43  ;;  %1558 = vperm.xlu0 %2264, %v1500_v61  }
  0x4c   : > { %1563 = vperm.xlu1 %2265, %v1501_v46  }
  0x4e   : > { %1568 = vperm.xlu0 %2264, %v1502_v0  }
  0x50   : > { %2229 = vmatmul.mubr.msk.bf16.gmra.mxu1 %vm721_vm0, %v1994_v45  ;;  %1573 = vperm.xlu1 %2265, %v1503_v1  }
  0x51   : > { %2201 = vmatmul.mubr.msk.bf16.gmra.mxu0 %vm721_vm0, %v1964_v47  ;;  %2232 = vmatprep.mubr.msk.bf16.mxu1 %vm721_vm0, %v1995_v51 }
  0x52   : > { %2204 = vmatprep.mubr.msk.bf16.mxu0 %vm721_vm0, %v1965_v59  ;;  %1578 = vperm.xlu0 %2264, %v1504_v62  }
  0x54   : > { %1583 = vperm.xlu1 %2265, %v1505_v60  }
  0x58   : > { %2233 = vmatmul.mubr.msk.bf16.gmra.mxu1 %vm721_vm0, %v1996_v56 }
  0x59   : > { %2205 = vmatmul.mubr.msk.bf16.gmra.mxu0 %vm721_vm0, %v1966_v2 }
  0x5a   : > { %2208 = vmatprep.mubr.msk.bf16.mxu0 %vm721_vm0, %v1967_v49 }
  0x61   : > { %2209 = vmatmul.mubr.msk.bf16.gmra.mxu0 %vm721_vm0, %v1968_v32 }
  0x9c   : > { %v1509_v31 = vpop.permute.xlu0 %1508  ;;  %v1519_v34 = vpop.permute.xlu1 %1518 }
  0xa0   : > { %v1514_v43 = vpop.permute.xlu0 %1513 }
  0xb7   : > { %v1524_v16 = vpop.permute.xlu1 %1523 }
  0xb8   : > { %v1529_v46 = vpop.permute.xlu0 %1528 }
  0xbb   : > { %v2805_v53 = vpop.permute.xlu1 %1533 }
  0xbd   : > { %v1539_v32 = vpop.permute.xlu0 %1538 }
  0xde   : > { %v2174_v3 = vpop.f32.mrf.mxu1 }
  0xe0   : > { %v965_v4 = vpop.f32.mrf.mxu1 }
  0xe2   : > { %v2175_v5 = vpop.f32.mrf.mxu1 }
  0xe4   : > { %v968_v30 = vpop.f32.mrf.mxu1  ;;  %v2150_v35 = vpop.f32.mrf.mxu0 }
  0xe5   : > { %v974_v25 = vadd.f32 %v2174_v3, %v2150_v35 }
  0xe6   : > { %v2178_v6 = vpop.f32.mrf.mxu1  ;;  %v780_v38 = vpop.f32.mrf.mxu0 }
  0xe7   : > { %v966_v61 = vadd.f32 %v965_v4, %v780_v38  ;;  %v1544_v4 = vpop.permute.xlu1 %1543 }
  0xe8   : > { %v2762_v63 = vpop.f32.mrf.mxu1  ;;  %v2151_v57 = vpop.f32.mrf.mxu0 }
  0xe9   : > { %v977_v51 = vadd.f32 %v2175_v5, %v2151_v57 }
  0xea   : > { %v2764_v13 = vpop.f32.mrf.mxu1  ;;  %v783_v33 = vpop.f32.mrf.mxu0 }
  0xeb   : > { %v969_v0 = vadd.f32 %v968_v30, %v783_v33 }
  0xec   : > { %v2766_v7 = vpop.f32.mrf.mxu1 }
  0xed   : > { %v2154_v8 = vpop.f32.mrf.mxu0 }
  0xee   : > { %v2768_v11 = vpop.f32.mrf.mxu1  ;;  %v990_v49 = vadd.f32 %v2178_v6, %v2154_v8 }
  0xef   : > { %v796_v15 = vpop.f32.mrf.mxu0 }
  0xf0   : > { %v2770_v23 = vpop.f32.mrf.mxu1  ;;  %v982_v30 = vadd.f32 %v2762_v63, %v796_v15 }
  0xf1   : > { %v2772_v39 = vpop.f32.mrf.mxu0 }
  0xf2   : > { %v2774_v12 = vpop.f32.mrf.mxu1  ;;  %v993_v8 = vadd.f32 %v2764_v13, %v2772_v39 }
  0xf3   : > { %v2776_v14 = vpop.f32.mrf.mxu0 }
  0xf4   : > { %v2778_v52 = vpop.f32.mrf.mxu1 }
  0xf7   : > { %v2780_v10 = vpop.f32.mrf.mxu0 }
  0xf8   : > { %v2782_v19 = vpop.f32.mrf.mxu1 }
  0xf9   : > { %v2784_v20 = vpop.f32.mrf.mxu0 }
  0xfa   : > { %v2786_v9 = vpop.f32.mrf.mxu1 }
  0xfb   : > { %v2788_v18 = vpop.f32.mrf.mxu0 }
  0xfc   : > { %v2790_v21 = vpop.f32.mrf.mxu1 }
  0xfd   : > { %v2792_v27 = vpop.f32.mrf.mxu0 }
  0xfe   : > { %v2794_v28 = vpop.f32.mrf.mxu1 }
 0x100   : > { %v2222_v24 = vpop.f32.mrf.mxu1 }
 0x101   : > { %v2796_v36 = vpop.f32.mrf.mxu0 }
 0x102   : > { %v1322_v40 = vpop.f32.mrf.mxu1 }
 0x103   : > { %v2798_v41 = vpop.f32.mrf.mxu0 }
 0x104   : > { %v2223_v42 = vpop.f32.mrf.mxu1 }
 0x105   : > { %v2800_v44 = vpop.f32.mrf.mxu0 }
 0x106   : > { %v1325_v48 = vpop.f32.mrf.mxu1 }
 0x107   : > { %v2803_v22 = vpop.f32.mrf.mxu0 }
 0x108   : > { %v2226_v55 = vpop.f32.mrf.mxu1 }
 0x109   : > { %v2198_v50 = vpop.f32.mrf.mxu0 }
 0x10a   : > { %v1194_v17 = vadd.f32 %v2198_v50, %v974_v25  ;;  %v1338_v45 = vpop.f32.mrf.mxu1 }
 0x10b   : > { %v1129_v47 = vpop.f32.mrf.mxu0 }
 0x10c   : > { %v1192_v54 = vadd.f32 %v1129_v47, %v966_v61  ;;  %v2227_v58 = vpop.f32.mrf.mxu1  ;;  %v1387_v26 = vadd.f32 %v2222_v24, %v1194_v17 }
 0x10d   : > { %v2199_v59 = vpop.f32.mrf.mxu0 }
 0x10e   : > { %v1385_v1 = vadd.f32 %v1322_v40, %v1192_v54  ;;  %v1195_v29 = vadd.f32 %v2199_v59, %v977_v51  ;;  %v1341_v37 = vpop.f32.mrf.mxu1  ;;  %v1588_v5 = vmul.f32 %v1519_v34, %v1387_v26  ;;  %v2820_v54 = vpop.permute.xlu1 %1553 }
 0x10f   : > { %v1132_v62 = vpop.f32.mrf.mxu0 }
 0x110   : > { %v1388_v56 = vadd.f32 %v2223_v42, %v1195_v29  ;;  %v1193_v60 = vadd.f32 %v1132_v62, %v969_v0  ;;  %v2807_v2 = vpop.f32.mrf.mxu1  ;;  %v1586_v35 = vmul.f32 %v1509_v31, %v1385_v1  ;;  %v985_v31 = vadd.f32 %v2766_v7, %v2776_v14 }
 0x111   : > { %v2202_v3 = vpop.f32.mrf.mxu0  ;;  %v1626_v13 = vmul.f32 %v1588_v5, %v1588_v5  ;;  %v1006_v14 = vadd.f32 %v2768_v11, %v2780_v10  ;;  %v1009_v10 = vadd.f32 %v2774_v12, %v2788_v18 }
 0x112   : > { %v1589_v38 = vmul.f32 %v1524_v16, %v1388_v56  ;;  %v1386_v57 = vadd.f32 %v1325_v48, %v1193_v60  ;;  %v1354_v25 = vpop.f32.mrf.mxu1  ;;  %v1198_v33 = vadd.f32 %v2202_v3, %v990_v49  ;;  %v1624_v15 = vmul.f32 %v1586_v35, %v1586_v35 }
 0x113   : > { %v1145_v24 = vpop.f32.mrf.mxu0  ;;  %v998_v60 = vadd.f32 %v2770_v23, %v2784_v20 }
 0x114   : > { %v2053_v40 = vpack.c.bf16 %v1589_v38, %v1588_v5  ;;  %v1587_v6 = vmul.f32 %v1514_v43, %v1386_v57  ;;  %v1196_v34 = vadd.f32 %v1145_v24, %v982_v30  ;;  %v2231_v63 = vpop.f32.mrf.mxu1  ;;  %v1391_v61 = vadd.f32 %v2226_v55, %v1198_v33  ;;  %v1549_v43 = vpop.permute.xlu0 %1548 }
 0x115   : > { %v2203_v42 = vpop.f32.mrf.mxu0  ;;  %v1627_v62 = vmul.f32 %v1589_v38, %v1589_v38 }
 0x116   : > { %2085 = vst [vmem:[%s2813_s26 + $0x8] sm:$0xff] %v2053_v40   ;;  %v1602_v16 = vadd.f32 %v1587_v6, %v1586_v35  ;;  %v1625_v48 = vmul.f32 %v1587_v6, %v1587_v6  ;;  %v2048_v50 = vpack.c.bf16 %v1587_v6, %v1586_v35  ;;  %v1389_v17 = vadd.f32 %v1338_v45, %v1196_v34  ;;  %v1357_v29 = vpop.f32.mrf.mxu1 }
 0x117   : > { %v1199_v47 = vadd.f32 %v2203_v42, %v993_v8  ;;  %v1148_v51 = vpop.f32.mrf.mxu0  ;;  %v1592_v49 = vmul.f32 %v1539_v32, %v1391_v61  ;;  %v1564_v32 = vpop.permute.xlu1 %1563  ;;  %v1022_v42 = vadd.f32 %v2782_v19, %v2796_v36 }
 0x118   : > { %v1603_v39 = vadd.f32 %v1602_v16, %v1588_v5  ;;  %v1640_v59 = vadd.f32 %v1625_v48, %v1624_v15  ;;  %2049 = vst [vmem:[%s2813_s26] sm:$0xff] %v2048_v50   ;;  %v1197_v7 = vadd.f32 %v1148_v51, %v985_v31  ;;  %v1590_v0 = vmul.f32 %v1529_v46, %v1389_v17  ;;  %v2234_v23 = vpop.f32.mrf.mxu1  ;;  %v1559_v20 = vpop.permute.xlu0 %1558 }
 0x119   : > { %v1392_v26 = vadd.f32 %v2227_v58, %v1199_v47  ;;  %v2206_v1 = vpop.f32.mrf.mxu0  ;;  %v1001_v46 = vadd.f32 %v2778_v52, %v2792_v27  ;;  %v1630_v18 = vmul.f32 %v1592_v49, %v1592_v49 }
 0x11a   : > { %v1641_v55 = vadd.f32 %v1640_v59, %v1626_v13  ;;  %v1604_v45 = vadd.f32 %v1603_v39, %v1589_v38  ;;  %v1390_v56 = vadd.f32 %v1341_v37, %v1197_v7  ;;  %v1202_v5 = vadd.f32 %v2206_v1, %v1006_v14  ;;  %v1370_v50 = vpop.f32.mrf.mxu1 }
 0x11b   : > { %v1593_v3 = vmul.f32 %v1544_v4, %v1392_v26  ;;  %v1161_v35 = vpop.f32.mrf.mxu0  ;;  %v1628_v30 = vmul.f32 %v1590_v0, %v1590_v0  ;;  %v1574_v14 = vpop.permute.xlu1 %1573  ;;  %v1017_v26 = vadd.f32 %v2794_v28, %v2803_v22 }
 0x11c   : > { %v1605_v57 = vadd.f32 %v1604_v45, %v1590_v0  ;;  %v1642_v33 = vadd.f32 %v1641_v55, %v1627_v62  ;;  %v1591_v11 = vmul.f32 %v2805_v53, %v1390_v56  ;;  %v1200_v37 = vadd.f32 %v1161_v35, %v998_v60  ;;  %v1569_v7 = vpop.permute.xlu0 %1568 }
 0x11d   : > { %v2063_v58 = vpack.c.bf16 %v1593_v3, %v1592_v49  ;;  %v2207_v38 = vpop.f32.mrf.mxu0  ;;  %v1395_v53 = vadd.f32 %v2807_v2, %v1202_v5  ;;  %v1631_v61 = vmul.f32 %v1593_v3, %v1593_v3  ;;  %v1014_v2 = vadd.f32 %v2786_v9, %v2798_v41  ;;  %v2235_v41 = vpop.f32.mrf.mxu1 }
 0x11e   : > { %v1643_v4 = vadd.f32 %v1642_v33, %v1628_v30  ;;  %v1606_v24 = vadd.f32 %v1605_v57, %v1591_v11  ;;  %v1629_v40 = vmul.f32 %v1591_v11, %v1591_v11  ;;  %v2058_v6 = vpack.c.bf16 %v1591_v11, %v1590_v0 }
 0x11f   : > { %2087 = vst [vmem:[%s2813_s26 + $0x18] sm:$0xff] %v2063_v58   ;;  %v1393_v8 = vadd.f32 %v1354_v25, %v1200_v37  ;;  %v1203_v31 = vadd.f32 %v2207_v38, %v1009_v10  ;;  %v1164_v12 = vpop.f32.mrf.mxu0  ;;  %v1596_v25 = vmul.f32 %v1559_v20, %v1395_v53  ;;  %v1373_v57 = vpop.f32.mrf.mxu1 }
 0x120   : > { %v1607_v34 = vadd.f32 %v1606_v24, %v1592_v49  ;;  %v1644_v52 = vadd.f32 %v1643_v4, %v1629_v40  ;;  %2086 = vst [vmem:[%s2813_s26 + $0x10] sm:$0xff] %v2058_v6   ;;  %v1201_v27 = vadd.f32 %v1164_v12, %v1001_v46  ;;  %v1579_v30 = vpop.permute.xlu0 %1578  ;;  %v1584_v33 = vpop.permute.xlu1 %1583 }
 0x121   : > { %v1594_v15 = vmul.f32 %v1549_v43, %v1393_v8  ;;  %v1396_v16 = vadd.f32 %v2231_v63, %v1203_v31  ;;  %v2210_v48 = vpop.f32.mrf.mxu0  ;;  %v1025_v43 = vadd.f32 %v2790_v21, %v2800_v44  ;;  %v1634_v5 = vmul.f32 %v1596_v25, %v1596_v25 }
 0x122   : > { %v1645_v17 = vadd.f32 %v1644_v52, %v1630_v18  ;;  %v1608_v47 = vadd.f32 %v1607_v34, %v1593_v3  ;;  %v1394_v51 = vadd.f32 %v1357_v29, %v1201_v27  ;;  %v1206_v39 = vadd.f32 %v2210_v48, %v1022_v42 }
 0x123   : > { %v1597_v13 = vmul.f32 %v1564_v32, %v1396_v16  ;;  %v1177_v59 = vpop.f32.mrf.mxu0  ;;  %v1632_v19 = vmul.f32 %v1594_v15, %v1594_v15 }
 0x124   : > { %v1609_v0 = vadd.f32 %v1608_v47, %v1594_v15  ;;  %v1646_v36 = vadd.f32 %v1645_v17, %v1631_v61  ;;  %v1595_v63 = vmul.f32 %v2820_v54, %v1394_v51  ;;  %v1204_v9 = vadd.f32 %v1177_v59, %v1014_v2 }
 0x125   : > { %v2073_v1 = vpack.c.bf16 %v1597_v13, %v1596_v25  ;;  %v2211_v29 = vpop.f32.mrf.mxu0  ;;  %v1399_v60 = vadd.f32 %v2234_v23, %v1206_v39  ;;  %v1635_v11 = vmul.f32 %v1597_v13, %v1597_v13 }
 0x126   : > { %v1647_v62 = vadd.f32 %v1646_v36, %v1632_v19  ;;  %v1610_v55 = vadd.f32 %v1609_v0, %v1595_v63  ;;  %v1633_v45 = vmul.f32 %v1595_v63, %v1595_v63  ;;  %v2068_v56 = vpack.c.bf16 %v1595_v63, %v1594_v15 }
 0x127   : > { %2089 = vst [vmem:[%s2813_s26 + $0x28] sm:$0xff] %v2073_v1   ;;  %v1397_v49 = vadd.f32 %v1370_v50, %v1204_v9  ;;  %v1207_v3 = vadd.f32 %v2211_v29, %v1025_v43  ;;  %v1180_v54 = vpop.f32.mrf.mxu0  ;;  %v1600_v37 = vmul.f32 %v1579_v30, %v1399_v60 }
 0x128   : > { %v1611_v35 = vadd.f32 %v1610_v55, %v1596_v25  ;;  %v1648_v21 = vadd.f32 %v1647_v62, %v1633_v45  ;;  %2088 = vst [vmem:[%s2813_s26 + $0x20] sm:$0xff] %v2068_v56   ;;  %v1205_v44 = vadd.f32 %v1180_v54, %v1017_v26 }
 0x129   : > { %v1598_v28 = vmul.f32 %v1569_v7, %v1397_v49  ;;  %v1400_v22 = vadd.f32 %v2235_v41, %v1207_v3  ;;  %v1638_v31 = vmul.f32 %v1600_v37, %v1600_v37 }
 0x12a   : > { %v1649_v10 = vadd.f32 %v1648_v21, %v1634_v5  ;;  %v1612_v46 = vadd.f32 %v1611_v35, %v1597_v13  ;;  %v1398_v58 = vadd.f32 %v1373_v57, %v1205_v44 }
 0x12b   : > { %v1601_v38 = vmul.f32 %v1584_v33, %v1400_v22  ;;  %v1636_v20 = vmul.f32 %v1598_v28, %v1598_v28 }
 0x12c   : > { %v1613_v23 = vadd.f32 %v1612_v46, %v1598_v28  ;;  %v1650_v32 = vadd.f32 %v1649_v10, %v1635_v11  ;;  %v1599_v4 = vmul.f32 %v1574_v14, %v1398_v58 }
 0x12d   : > { %v2083_v24 = vpack.c.bf16 %v1601_v38, %v1600_v37  ;;  %v1639_v34 = vmul.f32 %v1601_v38, %v1601_v38 }
 0x12e   : > { %v1651_v40 = vadd.f32 %v1650_v32, %v1636_v20  ;;  %v1614_v6 = vadd.f32 %v1613_v23, %v1599_v4  ;;  %v1637_v53 = vmul.f32 %v1599_v4, %v1599_v4  ;;  %v2078_v8 = vpack.c.bf16 %v1599_v4, %v1598_v28 }
 0x12f   : > { %2091 = vst [vmem:[%s2813_s26 + $0x38] sm:$0xff] %v2083_v24  }
 0x130   : > { %v1615_v12 = vadd.f32 %v1614_v6, %v1600_v37  ;;  %v1652_v18 = vadd.f32 %v1651_v40, %v1637_v53  ;;  %2090 = vst [vmem:[%s2813_s26 + $0x30] sm:$0xff] %v2078_v8  }
 0x132   : > { %v1616_v52 = vadd.f32 %v1615_v12, %v1601_v38  ;;  %v1653_v27 = vadd.f32 %v1652_v18, %v1638_v31 }
 0x134   : > { %v1617_v42 = vrot.slane %v1616_v52, 4  ;;  %v1654_v15 = vadd.f32 %v1653_v27, %v1639_v34 }
 0x136   : > { %v1618_v16 = vadd.f32 %v1617_v42, %v1616_v52  ;;  %v1655_v48 = vrot.slane %v1654_v15, 4 }
 0x138   : > { %v1619_v50 = vrot.slane %v1618_v16, 2  ;;  %v1656_v61 = vadd.f32 %v1655_v48, %v1654_v15 }
 0x13a   : > { %v1620_v17 = vadd.f32 %v1619_v50, %v1618_v16  ;;  %v1657_v47 = vrot.slane %v1656_v61, 2 }
 0x13c   : > { %v1621_v51 = vrot.slane %v1620_v17, 1  ;;  %v1658_v2 = vadd.f32 %v1657_v47, %v1656_v61 }
 0x13e   : > { %v1622_v25 = vadd.f32 %v1621_v51, %v1620_v17  ;;  %v1659_v13 = vrot.slane %v1658_v2, 1 }
 0x140   : > { %1623 = vst [vmem:[%s387_s29] sm:$0x1] %v1622_v25  ;;  %v1660_v39 = vadd.f32 %v1659_v13, %v1658_v2 }
 0x142   : > { %1661 = vst [vmem:[%s392_s8] sm:$0x1] %v1660_v39 }
 0x143 PF: > { %s17_s23 = sadd.s32 1, %s2319_s23   ;;  %s2874_s21 = smov %s2315_s22 }
 0x144   : > { %p14_p6 = scmp.ge.s32.totalorder %s17_s23, 4   ;;  %s2875_s22 = smov %s2877_s24 }
 0x146   :  { %16 = sbr.rel (!%p14_p6) target bundleno = 2 (0x2), region = 96 }

// kernel: nlayer_discriminator_forward.8
= control target key start
LH: loop header
LB: loop body
LE: loop exit
PB: predicated region body
PF: predicated region fallthrough
CT: control target
= control target key end

     0   :  { %s4942_s21 = smov 0   ;;  %s4944_s22 = smov 0   ;;  %s6700_s0 = inlined_call_operand.vmem [shape: bf16[2,24,11,32], index: 0, kind: input, shape index: {}, may-alias: {0,1}]   ;;  %s6701_s1 = inlined_call_operand.vmem [shape: bf16[2,24,11,32], index: 1, kind: input, shape index: {}, may-alias: {0,1}]   ;;  %s6702_s2 = inlined_call_operand.vmem [shape: bf16[16,32,128], index: 2, kind: input, shape index: {}]   ;;  %s6703_s3 = inlined_call_operand.vmem [shape: f32[128,1], index: 3, kind: input, shape index: {}]   ;;  %s6704_s4 = inlined_call_operand.vmem [shape: bf16[256,128], index: 4, kind: output, shape index: {0}]   ;;  %s6705_s5 = inlined_call_operand.vmem [shape: f32[2,1,128], index: 5, kind: output, shape index: {1}]   ;;  %s6706_s6 = inlined_call_operand.vmem [shape: f32[2,1,128], index: 6, kind: output, shape index: {2}]  }
   0x1   :  { %s4946_s23 = smov 0  }
   0x2 LB: > { %s29_s24 = sadd.s32 1, %s4900_s22  ;;  %p3923_p0 = scmp.ge.s32.totalorder %s4904_s23, 1  ;;  %s4904_s23 = sphi %s4946_s23, %s17_s23   ;;  %s4900_s22 = sphi %s4944_s22, %s6998_s22   ;;  %s4896_s21 = sphi %s4942_s21, %s6997_s21  }
   0x3   : > { %p31_p1 = scmp.ge.s32.totalorder %s29_s24, 2  ;;  %p279_p2 = scmp.lt.s32.totalorder %s4904_s23, 3 }
   0x5   : > { %s7000_s24 = smov (%p31_p1, %s29_s24), 0  ;;  %p280_p3 = pnand %p3923_p0, %p279_p2 }
   0x7   : > { %283 = sbr.rel (%p280_p3) target bundleno = 544 (0x220), region = 36 }
   0xc   : > { %v4832_v0 = vld [vmem:[%s6702_s2 + $0x8] sm:$0xff]   ;;  %p346_p4 = scmp.lt.s32.totalorder %s4896_s21, 1  ;;  %v4833_v1 = vld [vmem:[%s6702_s2 + $0x18] sm:$0xff]   ;;  %v4834_v2 = vld [vmem:[%s6702_s2] sm:$0xff]   ;;  %vm705_vm0 = vcmask 261120   ;;  %vm1016_vm4 = vcmask 1042432  }
   0xd   : > { %4502 = vmatprep.subr.bf16.mxu1 %v4832_v0  ;;  %4482 = vmatprep.subr.bf16.mxu0 %v4833_v1  ;;  %v4835_v3 = vld [vmem:[%s6702_s2 + $0x10] sm:$0xff]   ;;  %v4982_v4 = vld [vmem:[%s6702_s2 + $0x28] sm:$0xff]   ;;  %v4839_v5 = vld [vmem:[%s6702_s2 + $0x38] sm:$0xff]   ;;  %vm437_vm1 = vsmask.f32 3328  ;;  %vm1017_vm5 = vcmask 1046532  }
   0xe   : > { %s4973_s7 = scalar_select %p346_p4, %s4896_s21, 1  ;;  %4503 = vmatpush3.bf16.msra.mxu1 %v4832_v0  ;;  %4483 = vmatpush3.bf16.msra.mxu0 %v4833_v1  ;;  %vm438_vm2 = vsmask.f32 7440  ;;  %v4845_v34 = vld [vmem:[%s6702_s2 + $0x30] sm:$0xff]   ;;  %vm1261_vm6 = vsmask.f32 2304  ;;  %vm5444_vm9 = vmor %vm1016_vm4, %vm1017_vm5 }
   0xf   : > { %4504 = vmatprep.subr.bf16.mxu1 %v4834_v2  ;;  %4484 = vmatprep.subr.bf16.mxu0 %v4835_v3  ;;  %vm5054_vm3 = vmor %vm437_vm1, %vm438_vm2  ;;  %vm1262_vm7 = vsmask.f32 6416  ;;  %s3926_s12 = sshll.u32 %s4896_s21, 4 }
  0x10   : > { %s4802_s10 = smul.u32 192, %s4973_s7  ;;  %vm5414_vm8 = vmor %vm1261_vm6, %vm1262_vm7  ;;  %p6582_p5 = scmp.lt.s32.totalorder %s3926_s12, 31 }
  0x11   : > { %s392_s25 = scalar_lea.vmem %s6706_s6, %s4973_s7 }
  0x12   : > { %s4989_s15 = scalar_lea.vmem %s6700_s0, %s4802_s10  ;;  %4505 = vmatpush3.bf16.msra.mxu1 %v4834_v2  ;;  %4485 = vmatpush3.bf16.msra.mxu0 %v4835_v3  ;;  %s4258_s17 = sadd.s32 128, %s4802_s10 }
  0x13   : > { %v4995_v6 = vld [vmem:[%s4989_s15] sm:$0xf]  ;;  %v4998_v7 = vld [vmem:[%s4989_s15 + $0x8] sm:$0xf]  ;;  %v5005_v11 = vld [vmem:[%s4989_s15 + $0x10] sm:$0xf]  ;;  %4542 = vmatprep.subr.bf16.mxu1 %v4839_v5  ;;  %4522 = vmatprep.subr.bf16.mxu0 %v4982_v4  ;;  %s5763_s19 = scalar_lea.vmem %s6701_s1, %s4258_s17 }
  0x14   : > { %v441_v8 = vshrl.u32 %v4995_v6, 16  ;;  %v444_v9 = vshll.u32 %v4995_v6, 16  ;;  %v3950_v10 = vcombine.low %v4995_v6, %v4998_v7  ;;  %v5008_v12 = vld [vmem:[%s4989_s15 + $0x18] sm:$0xf]  ;;  %v5015_v14 = vld [vmem:[%s4989_s15 + $0x4] sm:$0x3] }
  0x15   : > { %v5012_v13 = vcombine.low %v5005_v11, %v5008_v12  ;;  %v5018_v15 = vld [vmem:[%s4989_s15 + $0xc] sm:$0x3]  ;;  %v5028_v20 = vld [vmem:[%s4989_s15 + $0x14] sm:$0x3]  ;;  %v450_v25 = vshll.u32 %v5015_v14, 16  ;;  %v455_v26 = vshrl.u32 %v4998_v7, 16 }
  0x16   : > { %4506 = vmatprep.mubr.msk.bf16.mxu1 %vm705_vm0, %v3950_v10  ;;  %v5030_v21 = vrot.slane %v441_v8, 5  ;;  %v5032_v22 = vrot.slane %v444_v9, 6  ;;  %v443_v23 = vrot.slane %v441_v8, 4  ;;  %v446_v24 = vrot.slane %v444_v9, 5  ;;  %v5041_v29 = vld [vmem:[%s4989_s15 + $0x1c] sm:$0x3] }
  0x17   : > { %6791 = vst [vmem:[#allocation2_spill] sm:$0xff] %v5012_v13  ;;  %4507 = vmatmul.mubr.msk.bf16.vlgmr.msra.gmra.mxu1 %vm705_vm0, %v5012_v13  ;;  %v458_v27 = vshll.u32 %v4998_v7, 16  ;;  %v464_v28 = vshll.u32 %v5018_v15, 16  ;;  %v469_v31 = vshrl.u32 %v5005_v11, 16  ;;  %v472_v32 = vshll.u32 %v5005_v11, 16  ;;  %v5089_v9 = vld [vmem:[%s6702_s2 + $0x58] sm:$0xff]  }
  0x18   : > { %4543 = vmatpush3.bf16.msra.mxu1 %v4839_v5  ;;  %v447_v30 = vor.u32 %v446_v24, %v443_v23  ;;  %v478_v33 = vshll.u32 %v5028_v20, 16  ;;  %v5050_v35 = vld [vmem:[%s4989_s15 + $0x20] sm:$0xf]  ;;  %v452_v37 = vrot.slane %v450_v25, 5  ;;  %v457_v38 = vrot.slane %v455_v26, 4  ;;  %s7002_s12 = smov (!%p6582_p5, %s3926_s12), 31 }
  0x19   : > { %v460_v39 = vrot.slane %v458_v27, 5  ;;  %v466_v40 = vrot.slane %v464_v28, 5  ;;  %v471_v42 = vrot.slane %v469_v31, 4  ;;  %v474_v43 = vrot.slane %v472_v32, 5  ;;  %4544 = vmatprep.subr.bf16.mxu1 %v4845_v34  ;;  %v5059_v45 = vld [vmem:[%s4989_s15 + $0x24] sm:$0x3] }
  0x1a   : > { %v448_v41 = vrot.slane %v447_v30, 4  ;;  %v480_v44 = vrot.slane %v478_v33, 5  ;;  %v483_v47 = vshrl.u32 %v5008_v12, 16  ;;  %v486_v48 = vshll.u32 %v5008_v12, 16  ;;  %v5198_v16 = vld [vmem:[%s4989_s15 + $0x58] sm:$0xf] }
  0x1b   : > { %v461_v46 = vor.u32 %v460_v39, %v457_v38  ;;  %v492_v49 = vshll.u32 %v5041_v29, 16  ;;  %v475_v51 = vor.u32 %v474_v43, %v471_v42  ;;  %v6710_v52 = vshrl.u32 %v5050_v35, 16  ;;  %v5108_v42 = vld [vmem:[%s4989_s15 + $0x28] sm:$0xf]  ;;  %6800 = vst [vmem:[#allocation9_spill] sm:$0xff] %v5198_v16  ;;  %s3927_s21 = sshll.u32 %s7002_s12, 2 }
  0x1c   : > { %4545 = vmatpush3.bf16.msra.mxu1 %v4845_v34  ;;  %v453_v50 = vsel %vm5054_vm3, %v448_v41, %v452_v37  ;;  %v6708_v53 = vshll.u32 %v5050_v35, 16  ;;  %v485_v55 = vrot.slane %v483_v47, 4  ;;  %v488_v56 = vrot.slane %v486_v48, 5  ;;  %s6643_s17 = scalar_lea.vmem %s6704_s4, %s3927_s21 }
  0x1d   : > { %v462_v54 = vrot.slane %v461_v46, 4  ;;  %v494_v57 = vrot.slane %v492_v49, 5  ;;  %v476_v58 = vrot.slane %v475_v51, 4  ;;  %v499_v59 = vrot.slane %v6710_v52, 4  ;;  %4582 = vmatprep.subr.bf16.mxu1 %v5089_v9 }
  0x1e   : > { %v502_v60 = vrot.slane %v6708_v53, 5  ;;  %v6707_v61 = vshll.u32 %v5059_v45, 16  ;;  %v489_v63 = vor.u32 %v488_v56, %v485_v55  ;;  %v1268_v23 = vshrl.u32 %v5015_v14, 16 }
  0x1f   : > { %v5075_v62 = vsel %vm5054_vm3, %v462_v54, %v466_v40  ;;  %v5081_v2 = vsel %vm5054_vm3, %v476_v58, %v480_v44  ;;  %v5092_v24 = vrot.slane %v450_v25, 6  ;;  %v5094_v30 = vrot.slane %v455_v26, 5  ;;  %v5126_v54 = vld [vmem:[%s4989_s15 + $0x30] sm:$0xf]  ;;  %v5201_v58 = vld [vmem:[%s4989_s15 + $0x44] sm:$0x3] }
  0x20   : > { %6794 = vst [vmem:[#allocation3_spill] sm:$0xff] %v5075_v62  ;;  %6795 = vst [vmem:[#allocation4_spill] sm:$0xff] %v5081_v2  ;;  %v503_v3 = vor.u32 %v502_v60, %v499_v59  ;;  %v508_v5 = vrot.slane %v6707_v61, 5  ;;  %v3932_v8 = vcombine.low %v453_v50, %v5075_v62  ;;  %v490_v10 = vrot.slane %v489_v63, 4  ;;  %v5151_v60 = vld [vmem:[%s4989_s15 + $0x38] sm:$0xf] }
  0x21   : > { %v5097_v37 = vrot.slane %v458_v27, 6  ;;  %v1278_v38 = vshrl.u32 %v5018_v15, 16  ;;  %v5100_v39 = vrot.slane %v464_v28, 6  ;;  %v5105_v41 = vrot.slane %v1268_v23, 5  ;;  %v4844_v27 = vld [vmem:[%s6702_s2 + $0x20] sm:$0xff]   ;;  %v5171_v23 = vld [vmem:[%s6702_s2 + $0x48] sm:$0xff]  }
  0x22   : > { %v504_v34 = vrot.slane %v503_v3, 4  ;;  %4486 = vmatprep.mubr.msk.bf16.mxu0 %vm705_vm0, %v3932_v8  ;;  %v495_v40 = vsel %vm5054_vm3, %v490_v10, %v494_v57  ;;  %v1284_v25 = vrot.slane %v469_v31, 5  ;;  %v1285_v26 = vrot.slane %v472_v32, 6  ;;  %v5154_v63 = vld [vmem:[%s4989_s15 + $0x34] sm:$0x3] }
  0x23   : > { %v5118_v43 = vcombine.low %v5081_v2, %v495_v40  ;;  %v5120_v44 = vrot.slane %v1278_v38, 5  ;;  %v1288_v46 = vshrl.u32 %v5028_v20, 16  ;;  %v5123_v32 = vrot.slane %v478_v33, 6  ;;  %v5138_v33 = vld [vmem:[%s4989_s15 + $0x2c] sm:$0x3] }
  0x24   : > { %v5115_v28 = vsel %vm5054_vm3, %v504_v34, %v508_v5  ;;  %v1286_v31 = vor.u32 %v1285_v26, %v1284_v25  ;;  %v1294_v50 = vrot.slane %v483_v47, 5  ;;  %v1295_v51 = vrot.slane %v486_v48, 6  ;;  %v5166_v10 = vld [vmem:[%s4989_s15 + $0x3c] sm:$0x3]  ;;  %v5181_v26 = vld [vmem:[%s4989_s15 + $0x40] sm:$0xf] }
  0x25   : > { %6796 = vst [vmem:[#allocation5_spill] sm:$0xff] %v5118_v43  ;;  %v5128_v55 = vrot.slane %v1288_v46, 5  ;;  %v1298_v56 = vshrl.u32 %v5041_v29, 16  ;;  %v5131_v57 = vrot.slane %v492_v49, 6  ;;  %4487 = vmatmul.mubr.msk.bf16.vlgmr.msra.gmra.mxu0 %vm705_vm0, %v5118_v43  ;;  %v5143_v48 = vcombine.low %v495_v40, %v5115_v28  ;;  %v5232_v46 = vld [vmem:[%s4989_s15 + $0x4c] sm:$0x3] }
  0x26   : > { %v5140_v59 = vrot.slane %v1286_v31, 4  ;;  %v1296_v47 = vor.u32 %v1295_v51, %v1294_v50  ;;  %4523 = vmatpush3.bf16.msra.mxu0 %v4982_v4  ;;  %v5148_v49 = vcombine.low %v5050_v35, %v5108_v42  ;;  %v5162_v8 = vcombine.low %v5126_v54, %v5151_v60 }
  0x27   : > { %6797 = vst [vmem:[#allocation6_spill] sm:$0xff] %v5143_v48  ;;  %v5158_v5 = vrot.slane %v1298_v56, 5  ;;  %v6709_v4 = vshrl.u32 %v5108_v42, 16  ;;  %4524 = vmatprep.subr.bf16.mxu0 %v4844_v27  ;;  %v6711_v38 = vshll.u32 %v5108_v42, 16  ;;  %v6712_v40 = vshll.u32 %v5138_v33, 16 }
  0x28   : > { %6798 = vst [vmem:[#allocation7_spill] sm:$0xff] %v5148_v49  ;;  %6799 = vst [vmem:[#allocation8_spill] sm:$0xff] %v5162_v8  ;;  %v5173_v34 = vrot.slane %v1296_v47, 4  ;;  %4510 = vmatprep.mubr.msk.bf16.mxu1 %vm705_vm0, %v5148_v49  ;;  %v6713_v25 = vshrl.u32 %v5126_v54, 16  ;;  %v6714_v50 = vshll.u32 %v5126_v54, 16  ;;  %v6715_v51 = vshll.u32 %v5154_v63, 16 }
  0x29   : > { %4511 = vmatmul.mubr.msk.bf16.gmra.mxu1 %vm705_vm0, %v5162_v8  ;;  %v513_v31 = vrot.slane %v6709_v4, 4  ;;  %v5192_v56 = vld [vmem:[%s4989_s15 + $0x48] sm:$0xf]  ;;  %v5195_v47 = vld [vmem:[%s4989_s15 + $0x50] sm:$0xf]  ;;  %v516_v61 = vrot.slane %v6711_v38, 5 }
  0x2a   : > { %v522_v53 = vrot.slane %v6712_v40, 5  ;;  %v527_v4 = vrot.slane %v6713_v25, 4  ;;  %v6716_v52 = vshrl.u32 %v5151_v60, 16  ;;  %4525 = vmatpush3.bf16.msra.mxu0 %v4844_v27  ;;  %v530_v17 = vrot.slane %v6714_v50, 5 }
  0x2b   : > { %v536_v19 = vrot.slane %v6715_v51, 5  ;;  %v6717_v1 = vshll.u32 %v5151_v60, 16  ;;  %v6719_v38 = vshll.u32 %v5166_v10, 16  ;;  %4562 = vmatprep.subr.bf16.mxu0 %v5171_v23  ;;  %v517_v40 = vor.u32 %v516_v61, %v513_v31 }
  0x2c   : > { %v541_v25 = vrot.slane %v6716_v52, 4  ;;  %v5221_v27 = vcombine.low %v5181_v26, %v5192_v56  ;;  %v5225_v50 = vcombine.low %v5195_v47, %v5198_v16  ;;  %v531_v51 = vor.u32 %v530_v17, %v527_v4  ;;  %v5241_v4 = vld [vmem:[%s4989_s15 + $0x54] sm:$0x3] }
  0x2d   : > { %v544_v18 = vrot.slane %v6717_v1, 5  ;;  %v550_v0 = vrot.slane %v6719_v38, 5  ;;  %v6724_v61 = vshrl.u32 %v5181_v26, 16  ;;  %v518_v31 = vrot.slane %v517_v40, 4 }
  0x2e   : > { %6801 = vst [vmem:[#allocation10_spill] sm:$0xff] %v5221_v27  ;;  %6802 = vst [vmem:[#allocation11_spill] sm:$0xff] %v5225_v50  ;;  %4514 = vmatprep.mubr.msk.bf16.mxu1 %vm705_vm0, %v5221_v27  ;;  %v6723_v52 = vshll.u32 %v5181_v26, 16  ;;  %v532_v1 = vrot.slane %v531_v51, 4  ;;  %v6725_v40 = vshll.u32 %v5192_v56, 16  ;;  %v6804_v49 = vshll.u32 %v5201_v58, 16 }
  0x2f   : > { %v545_v8 = vor.u32 %v544_v18, %v541_v25  ;;  %v555_v38 = vrot.slane %v6724_v61, 4  ;;  %v5248_v27 = vsel %vm5054_vm3, %v518_v31, %v522_v53  ;;  %v6805_v13 = vshrl.u32 %v5192_v56, 16 }
  0x30   : > { %6803 = vst [vmem:[#allocation12_spill] sm:$0xff] %v5248_v27  ;;  %v558_v3 = vrot.slane %v6723_v52, 5  ;;  %v564_v17 = vrot.slane %v6804_v49, 5  ;;  %v5258_v18 = vcombine.low %v5115_v28, %v5248_v27  ;;  %v5262_v25 = vsel %vm5054_vm3, %v532_v1, %v536_v19  ;;  %v5269_v49 = vld [vmem:[%s4989_s15 + $0x5c] sm:$0x3] }
  0x31   : > { %v569_v51 = vrot.slane %v6805_v13, 4  ;;  %6807 = vst [vmem:[#allocation14_spill] sm:$0xff] %v5262_v25  ;;  %v546_v53 = vrot.slane %v545_v8, 4  ;;  %4515 = vmatmul.mubr.msk.bf16.gmra.mxu1 %vm705_vm0, %v5225_v50  ;;  %v572_v31 = vrot.slane %v6725_v40, 5  ;;  %6808 = vst [vmem:[#allocation15_spill] sm:$0xff] %v5269_v49  ;;  %v6731_v28 = vshll.u32 %v5232_v46, 16 }
  0x32   : > { %6806 = vst [vmem:[#allocation13_spill] sm:$0xff] %v5258_v18  ;;  %v559_v13 = vor.u32 %v558_v3, %v555_v38  ;;  %v5275_v19 = vld [vmem:[%s4989_s15 + $0x60] sm:$0xf]  ;;  %4490 = vmatprep.mubr.msk.bf16.mxu0 %vm705_vm0, %v5258_v18  ;;  %v5286_v38 = vld [vmem:[%s4989_s15 + $0x68] sm:$0xf]  ;;  %v6812_v18 = vshrl.u32 %v5195_v47, 16 }
  0x33   : > { %6809 = vst [vmem:[#allocation16_spill] sm:$0xff] %v5275_v19  ;;  %v5281_v1 = vsel %vm5054_vm3, %v546_v53, %v550_v0  ;;  %v573_v8 = vor.u32 %v572_v31, %v569_v51  ;;  %v578_v50 = vrot.slane %v6731_v28, 5  ;;  %v5297_v51 = vld [vmem:[%s4989_s15 + $0x70] sm:$0xf]  ;;  %v5300_v53 = vld [vmem:[%s4989_s15 + $0x78] sm:$0xf] }
  0x34   : > { %6810 = vst [vmem:[#allocation17_spill] sm:$0xff] %v5281_v1  ;;  %v5290_v61 = vcombine.low %v5262_v25, %v5281_v1  ;;  %v560_v52 = vrot.slane %v559_v13, 4  ;;  %v583_v0 = vrot.slane %v6812_v18, 4  ;;  %v6813_v3 = vshll.u32 %v5195_v47, 16 }
  0x35   : > { %v574_v31 = vrot.slane %v573_v8, 4  ;;  %v6814_v43 = vshll.u32 %v5241_v4, 16  ;;  %v6815_v13 = vshrl.u32 %v5198_v16, 16  ;;  %v6737_v28 = vshll.u32 %v5198_v16, 16  ;;  %v5370_v16 = vld [vmem:[%s4989_s15 + $0x7c] sm:$0x3] }
  0x36   : > { %6811 = vst [vmem:[#allocation18_spill] sm:$0xff] %v5290_v61  ;;  %v586_v40 = vrot.slane %v6813_v3, 5  ;;  %4491 = vmatmul.mubr.msk.bf16.gmra.mxu0 %vm705_vm0, %v5290_v61  ;;  %v5312_v18 = vsel %vm5054_vm3, %v560_v52, %v564_v17  ;;  %v5318_v3 = vcombine.low %v5275_v19, %v5286_v38  ;;  %v5329_v62 = vcombine.low %v5297_v51, %v5300_v53  ;;  %v5332_v52 = vld [vmem:[%s4989_s15 + $0x6c] sm:$0x3] }
  0x37   : > { %v592_v48 = vrot.slane %v6814_v43, 5  ;;  %v597_v2 = vrot.slane %v6815_v13, 4  ;;  %6816 = vst [vmem:[#allocation19_spill] sm:$0xff] %v5312_v18  ;;  %v5321_v43 = vld [vmem:[%s4989_s15 + $0x64] sm:$0x3]  ;;  %v5325_v13 = vsel %vm5054_vm3, %v574_v31, %v578_v50  ;;  %6821 = vst [vmem:[#allocation24_spill] sm:$0xff] %v5332_v52 }
  0x38   : > { %6817 = vst [vmem:[#allocation20_spill] sm:$0xff] %v5318_v3  ;;  %6818 = vst [vmem:[#allocation21_spill] sm:$0xff] %v5321_v43  ;;  %v587_v61 = vor.u32 %v586_v40, %v583_v0  ;;  %v6741_v17 = vshrl.u32 %v5275_v19, 16  ;;  %v5337_v8 = vcombine.low %v5312_v18, %v5325_v13  ;;  %v600_v1 = vrot.slane %v6737_v28, 5  ;;  %4518 = vmatprep.mubr.msk.bf16.mxu1 %vm705_vm0, %v5318_v3  ;;  %v5347_v0 = vld [vmem:[%s4989_s15 + $0x74] sm:$0x3] }
  0x39   : > { %6819 = vst [vmem:[#allocation22_spill] sm:$0xff] %v5325_v13  ;;  %6820 = vst [vmem:[#allocation23_spill] sm:$0xff] %v5329_v62  ;;  %v6823_v27 = vshll.u32 %v5269_v49, 16  ;;  %v6747_v40 = vshll.u32 %v5275_v19, 16  ;;  %4519 = vmatmul.mubr.msk.bf16.gmra.mxu1 %vm705_vm0, %v5329_v62  ;;  %v6751_v28 = vshll.u32 %v5321_v43, 16  ;;  %v6754_v62 = vshll.u32 %v5332_v52, 16 }
  0x3a   : > { %6822 = vst [vmem:[#allocation25_spill] sm:$0xff] %v5337_v8  ;;  %v588_v31 = vrot.slane %v587_v61, 4  ;;  %v611_v13 = vrot.slane %v6741_v17, 4  ;;  %4494 = vmatprep.mubr.msk.bf16.mxu0 %vm705_vm0, %v5337_v8  ;;  %v6756_v61 = vshll.u32 %v5286_v38, 16  ;;  %v6824_v25 = vshrl.u32 %v5286_v38, 16 }
  0x3b   : > { %v606_v50 = vrot.slane %v6823_v27, 5  ;;  %v601_v27 = vor.u32 %v600_v1, %v597_v2  ;;  %v614_v3 = vrot.slane %v6747_v40, 5  ;;  %v620_v18 = vrot.slane %v6751_v28, 5 }
  0x3c   : > { %v5363_v17 = vsel %vm5054_vm3, %v588_v31, %v592_v48  ;;  %v625_v49 = vrot.slane %v6824_v25, 4  ;;  %v6755_v2 = vshrl.u32 %v5297_v51, 16  ;;  %v628_v8 = vrot.slane %v6756_v61, 5 }
  0x3d   : > { %v602_v1 = vrot.slane %v601_v27, 4  ;;  %v615_v40 = vor.u32 %v614_v3, %v611_v13  ;;  %v634_v19 = vrot.slane %v6754_v62, 5  ;;  %v6763_v31 = vshll.u32 %v5297_v51, 16 }
  0x3e   : > { %v639_v48 = vrot.slane %v6755_v2, 4  ;;  %v6759_v28 = vshll.u32 %v5347_v0, 16  ;;  %v6760_v25 = vshrl.u32 %v5300_v53, 16  ;;  %v629_v13 = vor.u32 %v628_v8, %v625_v49 }
  0x3f   : > { %v5384_v43 = vsel %vm5054_vm3, %v602_v1, %v606_v50  ;;  %v616_v3 = vrot.slane %v615_v40, 4  ;;  %v6762_v27 = vshll.u32 %v5300_v53, 16  ;;  %v642_v2 = vrot.slane %v6763_v31, 5 }
  0x40   : > { %v5389_v62 = vcombine.low %v5363_v17, %v5384_v43  ;;  %v648_v61 = vrot.slane %v6759_v28, 5  ;;  %v653_v52 = vrot.slane %v6760_v25, 4  ;;  %v630_v49 = vrot.slane %v629_v13, 4 }
  0x41   : > { %v5399_v50 = vsel %vm5054_vm3, %v616_v3, %v620_v18  ;;  %v656_v8 = vrot.slane %v6762_v27, 5  ;;  %v6761_v40 = vshll.u32 %v5370_v16, 16  ;;  %v643_v1 = vor.u32 %v642_v2, %v639_v48 }
  0x42   : > { %6825 = vst [vmem:[#allocation26_spill] sm:$0xff] %v5389_v62  ;;  %4495 = vmatmul.mubr.msk.bf16.gmra.mxu0 %vm705_vm0, %v5389_v62  ;;  %v1266_v28 = vor.u32 %v5032_v22, %v5030_v21  ;;  %v5410_v25 = vsel %vm5054_vm3, %v630_v49, %v634_v19  ;;  %v1272_v2 = vor.u32 %v5092_v24, %v5105_v41  ;;  %v1328_v27 = vshrl.u32 %v5154_v63, 16 }
  0x43   : > { %v657_v18 = vor.u32 %v656_v8, %v653_v52  ;;  %v662_v3 = vrot.slane %v6761_v40, 5  ;;  %v5422_v48 = vcombine.low %v5399_v50, %v5410_v25  ;;  %v644_v21 = vrot.slane %v643_v1, 4 }
  0x44   : > { %v1267_v22 = vrot.slane %v1266_v28, 4  ;;  %v1276_v19 = vor.u32 %v5097_v37, %v5094_v30  ;;  %v1282_v49 = vor.u32 %v5100_v39, %v5120_v44  ;;  %v6829_v8 = vor.u32 %v5123_v32, %v5128_v55 }
  0x45   : > { %6828 = vst [vmem:[#allocation27_spill] sm:$0xff] %v5422_v48  ;;  %v658_v52 = vrot.slane %v657_v18, 4  ;;  %v6830_v41 = vor.u32 %v5131_v57, %v5158_v5  ;;  %4498 = vmatprep.mubr.msk.bf16.mxu0 %vm705_vm0, %v5422_v48  ;;  %v5452_v37 = vsel %vm5054_vm3, %v644_v21, %v648_v61  ;;  %v1021_v57 = vrot.slane %v5015_v14, 5  ;;  %v6869_v48 = vld [vmem:[#allocation9_spill] sm:$0xff] }
  0x46   : > { %v5434_v24 = vsel %vm5414_vm8, %v5140_v59, %v6829_v8  ;;  %v1273_v39 = vsel %vm5414_vm8, %v1267_v22, %v1272_v2  ;;  %v1277_v44 = vrot.slane %v1276_v19, 4  ;;  %v3969_v59 = vrot.slane %v4998_v7, 9 }
  0x47   : > { %v1303_v28 = vsel %vm5414_vm8, %v5173_v34, %v6830_v41  ;;  %v5461_v55 = vsel %vm5054_vm3, %v658_v52, %v662_v3  ;;  %v1025_v5 = vrot.slane %v5018_v15, 5  ;;  %v6835_v1 = vrot.slane %v5028_v20, 5 }
  0x48   : > { %v5457_v32 = vcombine.low %v5434_v24, %v1303_v28  ;;  %v5468_v34 = vcombine.low %v5452_v37, %v5461_v55  ;;  %v5472_v61 = vsel %vm5414_vm8, %v1277_v44, %v1282_v49  ;;  %v6836_v18 = vrot.slane %v5005_v11, 9 }
  0x49   : > { %v6837_v14 = vrot.slane %v5041_v29, 5  ;;  %v6838_v15 = vrot.slane %v5008_v12, 9  ;;  %v4010_v21 = vcombine.low %v1273_v39, %v5472_v61  ;;  %v6839_v22 = vrot.slane %v4995_v6, 9  ;;  %v4851_v39 = vld [vmem:[%s6702_s2 + $0x50] sm:$0xff]  }
  0x4a   : > { %6833 = vst [vmem:[#allocation28_spill] sm:$0xff] %v5457_v32  ;;  %6834 = vst [vmem:[#allocation29_spill] sm:$0xff] %v5468_v34  ;;  %v5480_v3 = vsel %vm5444_vm9, %v6836_v18, %v6835_v1  ;;  %v5497_v19 = vsel %vm5444_vm9, %v3969_v59, %v1025_v5  ;;  %4499 = vmatmul.mubr.msk.bf16.gmra.mxu0 %vm705_vm0, %v5468_v34  ;;  %v6841_v52 = vshrl.u32 %v5050_v35, 16  ;;  %v6842_v6 = vshll.u32 %v5050_v35, 16 }
  0x4b   : > { %v5488_v2 = vsel %vm5444_vm9, %v6838_v15, %v6837_v14  ;;  %v1022_v20 = vsel %vm5444_vm9, %v6839_v22, %v1021_v57  ;;  %v1308_v41 = vshrl.u32 %v5059_v45, 16  ;;  %4546 = vmatprep.mubr.msk.bf16.mxu1 %vm705_vm0, %v4010_v21  ;;  %v6843_v44 = vshll.u32 %v5059_v45, 16 }
  0x4c   : > { %v5501_v29 = vcombine.low %v5480_v3, %v5488_v2  ;;  %v3988_v12 = vcombine.low %v1022_v20, %v5497_v19  ;;  %v1304_v49 = vrot.slane %v6841_v52, 5  ;;  %v1305_v8 = vrot.slane %v6842_v6, 6  ;;  %4547 = vmatmul.mubr.msk.bf16.vlgmr.msra.gmra.mxu1 %vm705_vm0, %v5457_v32 }
  0x4d   : > { %v1311_v57 = vrot.slane %v6843_v44, 6  ;;  %v6844_v59 = vshrl.u32 %v5108_v42, 16  ;;  %v6845_v1 = vshll.u32 %v5108_v42, 16  ;;  %v1318_v14 = vshrl.u32 %v5138_v33, 16  ;;  %4583 = vmatpush3.bf16.msra.mxu1 %v5089_v9  ;;  %v5540_v9 = vld [vmem:[%s6702_s2 + $0x78] sm:$0xff]  }
  0x4e   : > { %6840 = vst [vmem:[#allocation30_spill] sm:$0xff] %v5501_v29  ;;  %4526 = vmatprep.mubr.msk.bf16.mxu0 %vm705_vm0, %v3988_v12  ;;  %v1306_v15 = vor.u32 %v1305_v8, %v1304_v49  ;;  %v1310_v22 = vrot.slane %v1308_v41, 5  ;;  %v6846_v21 = vshll.u32 %v5138_v33, 16  ;;  %v6847_v52 = vshrl.u32 %v5126_v54, 16  ;;  %4584 = vmatprep.subr.bf16.mxu1 %v4851_v39 }
  0x4f   : > { %v1314_v5 = vrot.slane %v6844_v59, 5  ;;  %v1315_v18 = vrot.slane %v6845_v1, 6  ;;  %v1320_v59 = vrot.slane %v1318_v14, 5  ;;  %v6848_v1 = vshll.u32 %v5126_v54, 16 }
  0x50   : > { %v1321_v20 = vrot.slane %v6846_v21, 6  ;;  %v1324_v6 = vrot.slane %v6847_v52, 5  ;;  %v1307_v31 = vrot.slane %v1306_v15, 4  ;;  %v1312_v32 = vor.u32 %v1311_v57, %v1310_v22 }
  0x51   : > { %v1316_v44 = vor.u32 %v1315_v18, %v1314_v5  ;;  %v1325_v40 = vrot.slane %v6848_v1, 6  ;;  %v6849_v12 = vshll.u32 %v5154_v63, 16  ;;  %v6850_v8 = vshrl.u32 %v5151_v60, 16  ;;  %4585 = vmatpush3.bf16.msra.mxu1 %v4851_v39 }
  0x52   : > { %v1322_v18 = vor.u32 %v1321_v20, %v1320_v59  ;;  %v1330_v21 = vrot.slane %v1328_v27, 5  ;;  %v1313_v15 = vsel %vm5414_vm8, %v1307_v31, %v1312_v32  ;;  %v6851_v57 = vshll.u32 %v5151_v60, 16  ;;  %4527 = vmatmul.mubr.msk.bf16.vlgmr.msra.gmra.mxu0 %vm705_vm0, %v5501_v29  ;;  %4622 = vmatprep.subr.bf16.mxu1 %v5540_v9 }
  0x53   : > { %v1331_v49 = vrot.slane %v6849_v12, 6  ;;  %v1334_v41 = vrot.slane %v6850_v8, 5  ;;  %v1317_v5 = vrot.slane %v1316_v44, 4  ;;  %v1326_v14 = vor.u32 %v1325_v40, %v1324_v6  ;;  %v4850_v8 = vld [vmem:[%s6702_s2 + $0x40] sm:$0xff]   ;;  %4563 = vmatpush3.bf16.msra.mxu0 %v5171_v23  ;;  %v5580_v23 = vld [vmem:[%s6702_s2 + $0x68] sm:$0xff]  }
  0x54   : > { %v1335_v22 = vrot.slane %v6851_v57, 6  ;;  %v1338_v52 = vshrl.u32 %v5166_v10, 16  ;;  %v6852_v1 = vshll.u32 %v5166_v10, 16  ;;  %v5556_v27 = vcombine.low %v1303_v28, %v1313_v15  ;;  %4564 = vmatprep.subr.bf16.mxu0 %v4850_v8 }
  0x55   : > { %v5554_v20 = vsel %vm5414_vm8, %v1317_v5, %v1322_v18  ;;  %v1327_v40 = vrot.slane %v1326_v14, 4  ;;  %v1332_v31 = vor.u32 %v1331_v49, %v1330_v21  ;;  %v3972_v59 = vrot.slane %v5050_v35, 9 }
  0x56   : > { %v1341_v12 = vrot.slane %v6852_v1, 6  ;;  %6853 = vst [vmem:[#allocation31_spill] sm:$0xff] %v5556_v27  ;;  %v5561_v32 = vcombine.low %v1313_v15, %v5554_v20  ;;  %v1336_v6 = vor.u32 %v1335_v22, %v1334_v41  ;;  %v1340_v44 = vrot.slane %v1338_v52, 5 }
  0x57   : > { %v5568_v28 = vsel %vm5414_vm8, %v1327_v40, %v1332_v31  ;;  %v1037_v39 = vrot.slane %v5059_v45, 5  ;;  %v3973_v49 = vrot.slane %v5108_v42, 9  ;;  %v1041_v5 = vrot.slane %v5138_v33, 5  ;;  %4565 = vmatpush3.bf16.msra.mxu0 %v4850_v8 }
  0x58   : > { %6854 = vst [vmem:[#allocation32_spill] sm:$0xff] %v5561_v32  ;;  %4550 = vmatprep.mubr.msk.bf16.mxu1 %vm705_vm0, %v5561_v32  ;;  %v1337_v41 = vrot.slane %v1336_v6, 4  ;;  %v1342_v18 = vor.u32 %v1341_v12, %v1340_v44  ;;  %v3974_v14 = vrot.slane %v5126_v54, 9  ;;  %v1045_v21 = vrot.slane %v5154_v63, 5  ;;  %4602 = vmatprep.subr.bf16.mxu0 %v5580_v23 }
  0x59   : > { %v1038_v45 = vsel %vm5444_vm9, %v3972_v59, %v1037_v39  ;;  %v5586_v33 = vsel %vm5444_vm9, %v3973_v49, %v1041_v5  ;;  %v3975_v15 = vrot.slane %v5151_v60, 9  ;;  %v1049_v57 = vrot.slane %v5166_v10, 5 }
  0x5a   : > { %v5592_v63 = vsel %vm5414_vm8, %v1337_v41, %v1342_v18  ;;  %v5595_v22 = vcombine.low %v1038_v45, %v5586_v33  ;;  %v5598_v52 = vcombine.low %v5488_v2, %v1038_v45  ;;  %v5602_v1 = vsel %vm5444_vm9, %v3974_v14, %v1045_v21 }
  0x5b   : > { %v5606_v12 = vcombine.low %v5568_v28, %v5592_v63  ;;  %v5610_v10 = vsel %vm5444_vm9, %v3975_v15, %v1049_v57  ;;  %v6859_v40 = vshrl.u32 %v5181_v26, 16  ;;  %v6860_v6 = vshll.u32 %v5181_v26, 16 }
  0x5c   : > { %6855 = vst [vmem:[#allocation33_spill] sm:$0xff] %v5595_v22  ;;  %6856 = vst [vmem:[#allocation34_spill] sm:$0xff] %v5598_v52  ;;  %4530 = vmatprep.mubr.msk.bf16.mxu0 %vm705_vm0, %v5595_v22  ;;  %v5620_v2 = vcombine.low %v5602_v1, %v5610_v10  ;;  %v1348_v59 = vshrl.u32 %v5201_v58, 16  ;;  %v6862_v39 = vshll.u32 %v5201_v58, 16  ;;  %v6863_v5 = vshrl.u32 %v5192_v56, 16 }
  0x5d   : > { %6857 = vst [vmem:[#allocation35_spill] sm:$0xff] %v5606_v12  ;;  %6858 = vst [vmem:[#allocation36_spill] sm:$0xff] %v5610_v10  ;;  %v1344_v31 = vrot.slane %v6859_v40, 5  ;;  %v1345_v44 = vrot.slane %v6860_v6, 6  ;;  %4551 = vmatmul.mubr.msk.bf16.gmra.mxu1 %vm705_vm0, %v5606_v12  ;;  %v6864_v18 = vshll.u32 %v5192_v56, 16  ;;  %v1358_v21 = vshrl.u32 %v5232_v46, 16 }
  0x5e   : > { %6861 = vst [vmem:[#allocation37_spill] sm:$0xff] %v5620_v2  ;;  %v1351_v49 = vrot.slane %v6862_v39, 6  ;;  %v1354_v41 = vrot.slane %v6863_v5, 5  ;;  %v6865_v45 = vshll.u32 %v5232_v46, 16  ;;  %4531 = vmatmul.mubr.msk.bf16.gmra.mxu0 %vm705_vm0, %v5620_v2  ;;  %v1350_v57 = vrot.slane %v1348_v59, 5 }
  0x5f   : > { %v1346_v8 = vor.u32 %v1345_v44, %v1344_v31  ;;  %v1355_v14 = vrot.slane %v6864_v18, 6  ;;  %v6866_v40 = vshrl.u32 %v5195_v47, 16  ;;  %v6867_v39 = vshll.u32 %v5195_v47, 16 }
  0x60   : > { %v1361_v15 = vrot.slane %v6865_v45, 6  ;;  %v1368_v31 = vshrl.u32 %v5241_v4, 16  ;;  %v1360_v18 = vrot.slane %v1358_v21, 5  ;;  %v6868_v22 = vshll.u32 %v5241_v4, 16 }
  0x61   : > { %v1364_v6 = vrot.slane %v6866_v40, 5  ;;  %v1365_v5 = vrot.slane %v6867_v39, 6  ;;  %v1347_v44 = vrot.slane %v1346_v8, 4  ;;  %v1356_v12 = vor.u32 %v1355_v14, %v1354_v41  ;;  %v6872_v39 = vld [vmem:[#allocation15_spill] sm:$0xff] }
  0x62   : > { %v1371_v32 = vrot.slane %v6868_v22, 6  ;;  %v1352_v29 = vor.u32 %v1351_v49, %v1350_v57  ;;  %v1370_v34 = vrot.slane %v1368_v31, 5  ;;  %v6870_v2 = vshrl.u32 %v6869_v48, 16 }
  0x63   : > { %v1366_v45 = vor.u32 %v1365_v5, %v1364_v6  ;;  %v1357_v62 = vrot.slane %v1356_v12, 4  ;;  %v1362_v10 = vor.u32 %v1361_v15, %v1360_v18  ;;  %v6871_v40 = vshll.u32 %v6869_v48, 16  ;;  %v6879_v18 = vld [vmem:[#allocation16_spill] sm:$0xff] }
  0x64   : > { %v1374_v59 = vrot.slane %v6870_v2, 5  ;;  %v1378_v27 = vshrl.u32 %v6872_v39, 16  ;;  %v5651_v41 = vsel %vm5414_vm8, %v1347_v44, %v1352_v29  ;;  %v1372_v14 = vor.u32 %v1371_v32, %v1370_v34 }
  0x65   : > { %v1375_v52 = vrot.slane %v6871_v40, 6  ;;  %v1367_v8 = vrot.slane %v1366_v45, 4  ;;  %v6873_v22 = vshll.u32 %v6872_v39, 16  ;;  %v5657_v21 = vsel %vm5414_vm8, %v1357_v62, %v1362_v10 }
  0x66   : > { %6874 = vst [vmem:[#allocation9_spill] sm:$0xff] %v5657_v21  ;;  %v1380_v2 = vrot.slane %v1378_v27, 5  ;;  %v3976_v15 = vrot.slane %v5181_v26, 9  ;;  %v5662_v57 = vcombine.low %v5651_v41, %v5657_v21  ;;  %v1053_v34 = vrot.slane %v5201_v58, 5 }
  0x67   : > { %v1381_v49 = vrot.slane %v6873_v22, 6  ;;  %v1376_v12 = vor.u32 %v1375_v52, %v1374_v59  ;;  %v5666_v29 = vsel %vm5414_vm8, %v1367_v8, %v1372_v14  ;;  %v3977_v32 = vrot.slane %v5192_v56, 9 }
  0x68   : > { %6875 = vst [vmem:[#allocation15_spill] sm:$0xff] %v5662_v57  ;;  %6876 = vst [vmem:[#allocation38_spill] sm:$0xff] %v5666_v29  ;;  %v1057_v62 = vrot.slane %v5232_v46, 5  ;;  %v3978_v27 = vrot.slane %v5195_v47, 9  ;;  %4554 = vmatprep.mubr.msk.bf16.mxu1 %vm705_vm0, %v5662_v57  ;;  %v5676_v52 = vsel %vm5444_vm9, %v3976_v15, %v1053_v34  ;;  %v1061_v10 = vrot.slane %v5241_v4, 5 }
  0x69   : > { %v1377_v6 = vrot.slane %v1376_v12, 4  ;;  %v1382_v5 = vor.u32 %v1381_v49, %v1380_v2  ;;  %v3979_v31 = vrot.slane %v6869_v48, 9  ;;  %v1065_v58 = vrot.slane %v6872_v39, 5  ;;  %v6887_v2 = vld [vmem:[#allocation21_spill] sm:$0xff] }
  0x6a   : > { %v5687_v46 = vsel %vm5444_vm9, %v3977_v32, %v1057_v62  ;;  %v6880_v45 = vshrl.u32 %v6879_v18, 16  ;;  %v6881_v40 = vshll.u32 %v6879_v18, 16  ;;  %v5703_v14 = vsel %vm5444_vm9, %v3978_v27, %v1061_v10  ;;  %v6891_v10 = vld [vmem:[#allocation24_spill] sm:$0xff] }
  0x6b   : > { %v5683_v44 = vsel %vm5414_vm8, %v1377_v6, %v1382_v5  ;;  %6878 = vst [vmem:[#allocation40_spill] sm:$0xff] %v5687_v46  ;;  %v5699_v39 = vcombine.low %v5676_v52, %v5687_v46  ;;  %6884 = vst [vmem:[#allocation42_spill] sm:$0xff] %v5703_v14  ;;  %v5707_v22 = vsel %vm5444_vm9, %v3979_v31, %v1065_v58  ;;  %v1388_v15 = vshrl.u32 %v6887_v2, 16 }
  0x6c   : > { %6877 = vst [vmem:[#allocation39_spill] sm:$0xff] %v5683_v44  ;;  %v1384_v59 = vrot.slane %v6880_v45, 5  ;;  %v1385_v8 = vrot.slane %v6881_v40, 6  ;;  %v5695_v4 = vcombine.low %v5666_v29, %v5683_v44  ;;  %6885 = vst [vmem:[#allocation43_spill] sm:$0xff] %v5707_v22  ;;  %v5711_v49 = vcombine.low %v5703_v14, %v5707_v22 }
  0x6d   : > { %6883 = vst [vmem:[#allocation41_spill] sm:$0xff] %v5699_v39  ;;  %v6888_v34 = vshll.u32 %v6887_v2, 16  ;;  %4534 = vmatprep.mubr.msk.bf16.mxu0 %vm705_vm0, %v5699_v39  ;;  %v6889_v6 = vshrl.u32 %v5286_v38, 16  ;;  %v6890_v62 = vshll.u32 %v5286_v38, 16  ;;  %v1398_v31 = vshrl.u32 %v6891_v10, 16 }
  0x6e   : > { %6882 = vst [vmem:[#allocation16_spill] sm:$0xff] %v5695_v4  ;;  %6886 = vst [vmem:[#allocation44_spill] sm:$0xff] %v5711_v49  ;;  %v1386_v12 = vor.u32 %v1385_v8, %v1384_v59  ;;  %4555 = vmatmul.mubr.msk.bf16.gmra.mxu1 %vm705_vm0, %v5695_v4  ;;  %v6892_v58 = vshll.u32 %v6891_v10, 16  ;;  %4535 = vmatmul.mubr.msk.bf16.gmra.mxu0 %vm705_vm0, %v5711_v49  ;;  %v1390_v40 = vrot.slane %v1388_v15, 5  ;;  %v6893_v8 = vshrl.u32 %v5297_v51, 16 }
  0x6f   : > { %v1391_v32 = vrot.slane %v6888_v34, 6  ;;  %v1394_v5 = vrot.slane %v6889_v6, 5  ;;  %v1395_v27 = vrot.slane %v6890_v62, 6  ;;  %v6894_v4 = vshll.u32 %v5297_v51, 16 }
  0x70   : > { %v1401_v45 = vrot.slane %v6892_v58, 6  ;;  %v1387_v59 = vrot.slane %v1386_v12, 4  ;;  %v1404_v34 = vrot.slane %v6893_v8, 5  ;;  %v1400_v57 = vrot.slane %v1398_v31, 5 }
  0x71   : > { %v1405_v6 = vrot.slane %v6894_v4, 6  ;;  %v1396_v39 = vor.u32 %v1395_v27, %v1394_v5  ;;  %v1408_v62 = vshrl.u32 %v5347_v0, 16  ;;  %v6895_v22 = vshll.u32 %v5347_v0, 16 }
  0x72   : > { %v1392_v58 = vor.u32 %v1391_v32, %v1390_v40  ;;  %v6896_v49 = vshrl.u32 %v5300_v53, 16  ;;  %v6897_v15 = vshll.u32 %v5300_v53, 16  ;;  %v1402_v8 = vor.u32 %v1401_v45, %v1400_v57 }
  0x73   : > { %v1411_v44 = vrot.slane %v6895_v22, 6  ;;  %v1406_v46 = vor.u32 %v1405_v6, %v1404_v34  ;;  %v1397_v21 = vrot.slane %v1396_v39, 4  ;;  %v1410_v29 = vrot.slane %v1408_v62, 5 }
  0x74   : > { %v1414_v12 = vrot.slane %v6896_v49, 5  ;;  %v1415_v14 = vrot.slane %v6897_v15, 6  ;;  %v1418_v4 = vshrl.u32 %v5370_v16, 16  ;;  %v5745_v5 = vsel %vm5414_vm8, %v1387_v59, %v1392_v58  ;;  %v6899_v15 = vld [vmem:[#allocation14_spill] sm:$0xff] }
  0x75   : > { %v1407_v22 = vrot.slane %v1406_v46, 4  ;;  %v6898_v27 = vshll.u32 %v5370_v16, 16  ;;  %v5751_v49 = vsel %vm5414_vm8, %v1397_v21, %v1402_v8  ;;  %v1412_v39 = vor.u32 %v1411_v44, %v1410_v29  ;;  %v6900_v8 = vld [vmem:[#allocation12_spill] sm:$0xff] }
  0x76   : > { %v1416_v32 = vor.u32 %v1415_v14, %v1414_v12  ;;  %v1420_v57 = vrot.slane %v1418_v4, 5  ;;  %v3980_v45 = vrot.slane %v6879_v18, 9  ;;  %v5756_v40 = vcombine.low %v5745_v5, %v5751_v49 }
  0x77   : > { %v1421_v31 = vrot.slane %v6898_v27, 6  ;;  %v1069_v59 = vrot.slane %v6887_v2, 5  ;;  %v3981_v46 = vrot.slane %v5286_v38, 9  ;;  %v5767_v21 = vsel %vm5414_vm8, %v1407_v22, %v1412_v39  ;;  %v5793_v22 = vld [vmem:[%s5763_s19] sm:$0xf] }
  0x78   : > { %v1417_v34 = vrot.slane %v1416_v32, 4  ;;  %v1073_v44 = vrot.slane %v6891_v10, 5  ;;  %v3982_v14 = vrot.slane %v5297_v51, 9  ;;  %4558 = vmatprep.mubr.msk.bf16.mxu1 %vm705_vm0, %v5756_v40  ;;  %v1077_v6 = vrot.slane %v5347_v0, 5 }
  0x79   : > { %v1422_v29 = vor.u32 %v1421_v31, %v1420_v57  ;;  %v5775_v2 = vsel %vm5444_vm9, %v3980_v45, %v1069_v59  ;;  %v3983_v62 = vrot.slane %v5300_v53, 9  ;;  %v1081_v58 = vrot.slane %v5370_v16, 5  ;;  %v428_v31 = vld [vmem:[%s5763_s19 + $0x4] sm:$0x3]  ;;  %v6902_v57 = vld [vmem:[#allocation19_spill] sm:$0xff]  ;;  %v6903_v45 = vld [vmem:[#allocation17_spill] sm:$0xff] }
  0x7a   : > { %v5786_v10 = vsel %vm5444_vm9, %v3981_v46, %v1073_v44  ;;  %v5790_v4 = vcombine.low %v6900_v8, %v6899_v15  ;;  %v5805_v32 = vsel %vm5444_vm9, %v3982_v14, %v1077_v6  ;;  %v6904_v59 = vld [vmem:[#allocation22_spill] sm:$0xff]  ;;  %v1767_v44 = vshrl.u32 %v5793_v22, 16  ;;  %v6906_v14 = vld [vmem:[#allocation3_spill] sm:$0xff]  ;;  %v6907_v6 = vld [vmem:[#allocation4_spill] sm:$0xff] }
  0x7b   : > { %v5782_v12 = vsel %vm5414_vm8, %v1417_v34, %v1422_v29  ;;  %v5801_v16 = vcombine.low %v5775_v2, %v5786_v10  ;;  %v5809_v27 = vsel %vm5444_vm9, %v3983_v62, %v1081_v58  ;;  %v5818_v34 = vcombine.low %v6903_v45, %v6902_v57 }
  0x7c   : > { %6901 = vst [vmem:[#allocation21_spill] sm:$0xff] %v5790_v4  ;;  %v5797_v0 = vcombine.low %v5767_v21, %v5782_v12  ;;  %v5814_v39 = vcombine.low %v5805_v32, %v5809_v27  ;;  %v5826_v46 = vcombine.low %v6904_v59, %v5363_v17  ;;  %v5830_v29 = vcombine.low %v5384_v43, %v5399_v50 }
  0x7d   : > { %4538 = vmatprep.mubr.msk.bf16.mxu0 %vm705_vm0, %v5801_v16  ;;  %v6908_v62 = vcombine.low %v6906_v14, %v6907_v6  ;;  %v5841_v58 = vcombine.low %v5410_v25, %v5452_v37  ;;  %v1770_v17 = vshll.u32 %v5793_v22, 16  ;;  %v1776_v15 = vshll.u32 %v428_v31, 16 }
  0x7e   : > { %4559 = vmatmul.mubr.msk.bf16.gmra.mxu1 %vm705_vm0, %v5797_v0  ;;  %6905 = vst [vmem:[#allocation24_spill] sm:$0xff] %v5826_v46  ;;  %4539 = vmatmul.mubr.msk.bf16.gmra.mxu0 %vm705_vm0, %v5814_v39  ;;  %v6909_v43 = vcombine.low %v4998_v7, %v5005_v11  ;;  %v1769_v50 = vrot.slane %v1767_v44, 4  ;;  %v5850_v8 = vcombine.low %v5286_v38, %v5297_v51 }
  0x7f   : > { %4586 = vmatprep.mubr.msk.bf16.mxu1 %vm705_vm0, %v6908_v62  ;;  %v5854_v57 = vcombine.low %v5300_v53, %v5793_v22  ;;  %v1772_v37 = vrot.slane %v1770_v17, 5  ;;  %v5862_v11 = vcombine.low %v5554_v20, %v5568_v28  ;;  %v5866_v38 = vcombine.low %v5592_v63, %v5651_v41  ;;  %v4881_v53 = vld [vmem:[%s4989_s15 + $0x18] sm:$0xf]  ;;  %v5881_v20 = vld [vmem:[%s5763_s19 + $0x8] sm:$0xf] }
  0x80   : > { %4566 = vmatprep.mubr.msk.bf16.mxu0 %vm705_vm0, %v6909_v43  ;;  %v5870_v51 = vcombine.low %v5586_v33, %v5602_v1  ;;  %v5874_v45 = vcombine.low %v4881_v53, %v5050_v35  ;;  %v5878_v59 = vcombine.low %v5108_v42, %v5126_v54  ;;  %v1778_v6 = vrot.slane %v1776_v15, 5  ;;  %v5888_v1 = vld [vmem:[%s5763_s19 + $0xc] sm:$0x3]  ;;  %v4859_v42 = vld [vmem:[%s6702_s2 + $0x60] sm:$0xff]  }
  0x81   : > { %v1773_v14 = vor.u32 %v1772_v37, %v1769_v50  ;;  %v5885_v28 = vcombine.low %v5151_v60, %v5181_v26  ;;  %v2111_v63 = vrot.slane %v1767_v44, 5  ;;  %v2112_v41 = vrot.slane %v1770_v17, 6  ;;  %v6913_v50 = vld [vmem:[#allocation6_spill] sm:$0xff]  ;;  %v4861_v60 = vld [vmem:[%s6702_s2 + $0x70] sm:$0xff]  }
  0x82   : > { %6910 = vst [vmem:[#allocation14_spill] sm:$0xff] %v5874_v45  ;;  %6911 = vst [vmem:[#allocation12_spill] sm:$0xff] %v5878_v59  ;;  %v2115_v33 = vshrl.u32 %v428_v31, 16  ;;  %v5892_v35 = vcombine.low %v5192_v56, %v5195_v47  ;;  %v2118_v62 = vrot.slane %v1776_v15, 6  ;;  %v4072_v43 = vrot.slane %v5793_v22, 9 }
  0x83   : > { %v1774_v54 = vrot.slane %v1773_v14, 4  ;;  %v2113_v26 = vor.u32 %v2112_v41, %v2111_v63  ;;  %v1946_v56 = vrot.slane %v428_v31, 5  ;;  %v2421_v47 = vshrl.u32 %v5881_v20, 16  ;;  %v5925_v31 = vld [vmem:[%s6702_s2 + $0x98] sm:$0xff]   ;;  %v5932_v41 = vld [vmem:[%s5763_s19 + $0x10] sm:$0xf] }
  0x84   : > { %6912 = vst [vmem:[#allocation19_spill] sm:$0xff] %v5892_v35  ;;  %v2117_v44 = vrot.slane %v2115_v33, 5  ;;  %v2424_v15 = vshll.u32 %v5881_v20, 16  ;;  %v2430_v37 = vshll.u32 %v5888_v1, 16  ;;  %v2713_v53 = vshrl.u32 %v5888_v1, 16 }
  0x85   : > { %v5909_v17 = vsel %vm5054_vm3, %v1774_v54, %v1778_v6  ;;  %v2114_v14 = vrot.slane %v2113_v26, 4  ;;  %v5929_v63 = vsel %vm5444_vm9, %v4072_v43, %v1946_v56  ;;  %v2423_v33 = vrot.slane %v2421_v47, 4  ;;  %v432_v43 = vld [vmem:[%s5763_s19 + $0x14] sm:$0x3]  ;;  %s387_s19 = scalar_lea.vmem %s6705_s5, %s4973_s7 }
  0x86   : > { %4587 = vmatmul.mubr.msk.bf16.vlgmr.msra.gmra.mxu1 %vm705_vm0, %v6913_v50  ;;  %4567 = vmatmul.mubr.msk.bf16.vlgmr.msra.gmra.mxu0 %vm705_vm0, %v5874_v45  ;;  %v2119_v6 = vor.u32 %v2118_v62, %v2117_v44  ;;  %v2426_v54 = vrot.slane %v2424_v15, 5  ;;  %v2432_v62 = vrot.slane %v2430_v37, 5  ;;  %v2709_v44 = vrot.slane %v2421_v47, 5 }
  0x87   : > { %4623 = vmatpush3.bf16.msra.mxu1 %v5540_v9  ;;  %4603 = vmatpush3.bf16.msra.mxu0 %v5580_v23  ;;  %v5920_v9 = vcombine.low %v5461_v55, %v5909_v17  ;;  %v5939_v55 = vld [vmem:[%s6702_s2 + $0x88] sm:$0xff]   ;;  %v5943_v23 = vcombine.low %v5809_v27, %v5929_v63  ;;  %v2710_v56 = vrot.slane %v2424_v15, 6  ;;  %v2716_v25 = vrot.slane %v2430_v37, 6 }
  0x88   : > { %4590 = vmatprep.mubr.msk.bf16.mxu1 %vm705_vm0, %v5790_v4  ;;  %4570 = vmatprep.mubr.msk.bf16.mxu0 %vm705_vm0, %v5878_v59  ;;  %v5948_v26 = vsel %vm5414_vm8, %v2114_v14, %v2119_v6  ;;  %v2427_v27 = vor.u32 %v2426_v54, %v2423_v33  ;;  %v2991_v59 = vshrl.u32 %v5932_v41, 16  ;;  %v2715_v45 = vrot.slane %v2713_v53, 5 }
  0x89   : > { %4604 = vmatprep.subr.bf16.mxu0 %v4859_v42  ;;  %4624 = vmatprep.subr.bf16.mxu1 %v4861_v60  ;;  %v5953_v7 = vcombine.low %v5782_v12, %v5948_v26  ;;  %v2711_v4 = vor.u32 %v2710_v56, %v2709_v44  ;;  %v2994_v14 = vshll.u32 %v5932_v41, 16  ;;  %v3000_v47 = vshll.u32 %v432_v43, 16 }
  0x8a   : > { %v2428_v15 = vrot.slane %v2427_v27, 4  ;;  %v3283_v6 = vshrl.u32 %v432_v43, 16  ;;  %v4147_v12 = vrot.slane %v5881_v20, 9  ;;  %v2717_v33 = vor.u32 %v2716_v25, %v2715_v45 }
  0x8b   : > { %4625 = vmatpush3.bf16.msra.mxu1 %v4861_v60  ;;  %4605 = vmatpush3.bf16.msra.mxu0 %v4859_v42  ;;  %v3279_v60 = vrot.slane %v2991_v59, 5  ;;  %v2712_v37 = vrot.slane %v2711_v4, 4  ;;  %v3280_v42 = vrot.slane %v2994_v14, 6  ;;  %v3286_v54 = vrot.slane %v3000_v47, 6 }
  0x8c   : > { %4662 = vmatprep.subr.bf16.mxu1 %v5925_v31  ;;  %4642 = vmatprep.subr.bf16.mxu0 %v5939_v55  ;;  %v5968_v53 = vsel %vm5054_vm3, %v2428_v15, %v2432_v62  ;;  %v3285_v44 = vrot.slane %v3283_v6, 5  ;;  %v2572_v56 = vrot.slane %v5888_v1, 5  ;;  %v4208_v27 = vrot.slane %v5932_v41, 9 }
  0x8d   : > { %v5978_v25 = vsel %vm5414_vm8, %v2712_v37, %v2717_v33  ;;  %v3281_v45 = vor.u32 %v3280_v42, %v3279_v60  ;;  %v5994_v60 = vcombine.low %v6869_v48, %v6879_v18  ;;  %v2993_v33 = vrot.slane %v2991_v59, 4 }
  0x8e   : > { %4591 = vmatmul.mubr.msk.bf16.gmra.mxu1 %vm705_vm0, %v5818_v34  ;;  %4571 = vmatmul.mubr.msk.bf16.gmra.mxu0 %vm705_vm0, %v5885_v28  ;;  %v4167_v62 = vcombine.low %v5948_v26, %v5978_v25  ;;  %v3287_v15 = vor.u32 %v3286_v54, %v3285_v44  ;;  %v5984_v1 = vsel %vm5444_vm9, %v4147_v12, %v2572_v56  ;;  %v2996_v42 = vrot.slane %v2994_v14, 5  ;;  %v6916_v54 = vld [vmem:[#allocation31_spill] sm:$0xff]  ;;  %v4866_v44 = vld [vmem:[%s6702_s2 + $0x90] sm:$0xff]   ;;  %v6917_v56 = vld [vmem:[#allocation34_spill] sm:$0xff] }
  0x8f   : > { %4594 = vmatprep.mubr.msk.bf16.mxu1 %vm705_vm0, %v5826_v46  ;;  %4574 = vmatprep.mubr.msk.bf16.mxu0 %vm705_vm0, %v5892_v35  ;;  %v3142_v46 = vrot.slane %v432_v43, 5  ;;  %v3282_v6 = vrot.slane %v3281_v45, 4  ;;  %v4152_v35 = vcombine.low %v5929_v63, %v5984_v1  ;;  %v3002_v30 = vrot.slane %v3000_v47, 5  ;;  %v4865_v47 = vld [vmem:[%s6702_s2 + $0x80] sm:$0xff]  }
  0x90   : > { %v2997_v48 = vor.u32 %v2996_v42, %v2993_v33  ;;  %v4182_v59 = vcombine.low %v5881_v20, %v5932_v41  ;;  %v6914_v14 = vcombine.low %v5472_v61, %v5434_v24  ;;  %v6915_v36 = vcombine.low %v5497_v19, %v5480_v3  ;;  %v4868_v24 = vld [vmem:[%s6702_s2 + $0xb8] sm:$0xff]   ;;  %v4867_v61 = vld [vmem:[%s6702_s2 + $0xa8] sm:$0xff]   ;;  %v6918_v3 = vld [vmem:[#allocation36_spill] sm:$0xff] }
  0x91   : > { %v5990_v4 = vsel %vm5444_vm9, %v4208_v27, %v3142_v46  ;;  %v6000_v37 = vsel %vm5414_vm8, %v3282_v6, %v3287_v15  ;;  %v6055_v19 = vcombine.low %v6918_v3, %v5676_v52  ;;  %v6921_v45 = vld [vmem:[#allocation42_spill] sm:$0xff]  ;;  %v6922_v15 = vld [vmem:[#allocation40_spill] sm:$0xff]  ;;  %v6923_v52 = vld [vmem:[#allocation39_spill] sm:$0xff] }
  0x92   : > { %v4213_v43 = vcombine.low %v5984_v1, %v5990_v4  ;;  %v4228_v12 = vcombine.low %v5978_v25, %v6000_v37  ;;  %v2998_v13 = vrot.slane %v2997_v48, 4  ;;  %v6063_v6 = vcombine.low %v6922_v15, %v6921_v45  ;;  %v6924_v42 = vld [vmem:[#allocation43_spill] sm:$0xff]  ;;  %v6937_v45 = vld [vmem:[#allocation29_spill] sm:$0xff]  ;;  %v4878_v63 = vld [vmem:[%s6702_s2 + $0xe0] sm:$0xff]  }
  0x93   : > { %v6075_v33 = vcombine.low %v6923_v52, %v5745_v5  ;;  %v6079_v48 = vcombine.low %v6924_v42, %v5775_v2  ;;  %v6925_v5 = vld [vmem:[#allocation5_spill] sm:$0xff]  ;;  %v6934_v3 = vld [vmem:[#allocation11_spill] sm:$0xff]  ;;  %v4906_v52 = vmov 0   ;;  %v3448_v42 = vld [vmem:[%s6703_s3] sm:$0xff] }
  0x94   : > { %v3003_v18 = vsel %vm5054_vm3, %v2998_v13, %v3002_v30  ;;  %v6083_v30 = vcombine.low %v5751_v49, %v5767_v21  ;;  %v6087_v13 = vcombine.low %v5786_v10, %v5805_v32  ;;  %v6926_v49 = vld [vmem:[#allocation2_spill] sm:$0xff]  ;;  %v6927_v2 = vld [vmem:[#allocation13_spill] sm:$0xff]  ;;  %v4870_v10 = vld [vmem:[%s6702_s2 + $0xb0] sm:$0xff]   ;;  %4830 = vset.pattern.permute.xlu0 %v4906_v52  ;;  %4831 = vset.pattern.permute.xlu1 %v4906_v52 }
  0x95   : > { %v6015_v46 = vcombine.low %v5968_v53, %v3003_v18  ;;  %v4869_v21 = vld [vmem:[%s6702_s2 + $0xa0] sm:$0xff]   ;;  %v6928_v32 = vld [vmem:[#allocation7_spill] sm:$0xff]  ;;  %3531 = vperm.xlu0 %4830, %v3448_v42   ;;  %v6944_v52 = vld [vmem:[#allocation33_spill] sm:$0xff] }
  0x96   : > { %4595 = vmatmul.mubr.msk.bf16.gmra.mxu1 %vm705_vm0, %v5830_v29  ;;  %4575 = vmatmul.mubr.msk.bf16.gmra.mxu0 %vm705_vm0, %v5994_v60  ;;  %v6929_v18 = vld [vmem:[#allocation18_spill] sm:$0xff]  ;;  %v6938_v15 = vld [vmem:[#allocation23_spill] sm:$0xff] }
  0x97   : > { %4598 = vmatprep.mubr.msk.bf16.mxu1 %vm705_vm0, %v5841_v58  ;;  %4578 = vmatprep.mubr.msk.bf16.mxu0 %vm705_vm0, %v5850_v8 }
  0x9e   : > { %4599 = vmatmul.mubr.msk.bf16.gmra.mxu1 %vm705_vm0, %v5920_v9  ;;  %4579 = vmatmul.mubr.msk.bf16.gmra.mxu0 %vm705_vm0, %v5854_v57 }
  0x9f   : > { %4626 = vmatprep.mubr.msk.bf16.mxu1 %vm705_vm0, %v6914_v14  ;;  %4606 = vmatprep.mubr.msk.bf16.mxu0 %vm705_vm0, %v6915_v36  ;;  %v4873_v14 = vld [vmem:[%s6702_s2 + $0xd8] sm:$0xff]   ;;  %v6930_v36 = vld [vmem:[#allocation8_spill] sm:$0xff] }
  0xa6   : > { %4627 = vmatmul.mubr.msk.bf16.vlgmr.msra.gmra.mxu1 %vm705_vm0, %v6916_v54  ;;  %4607 = vmatmul.mubr.msk.bf16.vlgmr.msra.gmra.mxu0 %vm705_vm0, %v6917_v56 }
  0xa7   : > { %4663 = vmatpush3.bf16.msra.mxu1 %v5925_v31  ;;  %4643 = vmatpush3.bf16.msra.mxu0 %v5939_v55  ;;  %v6919_v31 = vld [vmem:[#allocation38_spill] sm:$0xff]  ;;  %v6920_v55 = vld [vmem:[#allocation9_spill] sm:$0xff] }
  0xa8   : > { %4630 = vmatprep.mubr.msk.bf16.mxu1 %vm705_vm0, %v5862_v11  ;;  %4610 = vmatprep.mubr.msk.bf16.mxu0 %vm705_vm0, %v5870_v51  ;;  %v6059_v27 = vcombine.low %v6920_v55, %v6919_v31  ;;  %v6935_v31 = vld [vmem:[#allocation27_spill] sm:$0xff]  ;;  %v6936_v55 = vld [vmem:[#allocation20_spill] sm:$0xff] }
  0xa9   : > { %4644 = vmatprep.subr.bf16.mxu0 %v4865_v47  ;;  %4664 = vmatprep.subr.bf16.mxu1 %v4866_v44 }
  0xab   : > { %4665 = vmatpush3.bf16.msra.mxu1 %v4866_v44  ;;  %4645 = vmatpush3.bf16.msra.mxu0 %v4865_v47  ;;  %v4872_v47 = vld [vmem:[%s6702_s2 + $0xc8] sm:$0xff]   ;;  %v6931_v44 = vld [vmem:[#allocation25_spill] sm:$0xff] }
  0xac   : > { %4702 = vmatprep.subr.bf16.mxu1 %v4868_v24  ;;  %4682 = vmatprep.subr.bf16.mxu0 %v4867_v61 }
  0xae   : > { %4631 = vmatmul.mubr.msk.bf16.gmra.mxu1 %vm705_vm0, %v5866_v38  ;;  %4611 = vmatmul.mubr.msk.bf16.gmra.mxu0 %vm705_vm0, %v6055_v19 }
  0xaf   : > { %4634 = vmatprep.mubr.msk.bf16.mxu1 %vm705_vm0, %v6059_v27  ;;  %4614 = vmatprep.mubr.msk.bf16.mxu0 %vm705_vm0, %v6063_v6 }
  0xb6   : > { %4635 = vmatmul.mubr.msk.bf16.gmra.mxu1 %vm705_vm0, %v6075_v33  ;;  %4615 = vmatmul.mubr.msk.bf16.gmra.mxu0 %vm705_vm0, %v6079_v48 }
  0xb7   : > { %4638 = vmatprep.mubr.msk.bf16.mxu1 %vm705_vm0, %v6083_v30  ;;  %4618 = vmatprep.mubr.msk.bf16.mxu0 %vm705_vm0, %v6087_v13 }
  0xbe   : > { %4639 = vmatmul.mubr.msk.bf16.gmra.mxu1 %vm705_vm0, %v5953_v7  ;;  %4619 = vmatmul.mubr.msk.bf16.gmra.mxu0 %vm705_vm0, %v5943_v23 }
  0xbf   : > { %4666 = vmatprep.mubr.msk.bf16.mxu1 %vm705_vm0, %v6925_v5  ;;  %4646 = vmatprep.mubr.msk.bf16.mxu0 %vm705_vm0, %v6926_v49  ;;  %v3450_v5 = vld [vmem:[%s6703_s3 + $0x10] sm:$0xff]  ;;  %v3449_v49 = vld [vmem:[%s6703_s3 + $0x8] sm:$0xff] }
  0xc0   : > { %3541 = vperm.xlu1 %4831, %v3450_v5   ;;  %3536 = vperm.xlu0 %4830, %v3449_v49   ;;  %v6945_v49 = vld [vmem:[#allocation35_spill] sm:$0xff] }
  0xc6   : > { %4667 = vmatmul.mubr.msk.bf16.vlgmr.msra.gmra.mxu1 %vm705_vm0, %v6927_v2  ;;  %4647 = vmatmul.mubr.msk.bf16.vlgmr.msra.gmra.mxu0 %vm705_vm0, %v6928_v32  ;;  %v3452_v2 = vld [vmem:[%s6703_s3 + $0x20] sm:$0xff]  ;;  %v6941_v32 = vld [vmem:[#allocation28_spill] sm:$0xff] }
  0xc7   : > { %4703 = vmatpush3.bf16.msra.mxu1 %v4868_v24  ;;  %4683 = vmatpush3.bf16.msra.mxu0 %v4867_v61  ;;  %v6932_v24 = vld [vmem:[#allocation10_spill] sm:$0xff] }
  0xc8   : > { %4670 = vmatprep.mubr.msk.bf16.mxu1 %vm705_vm0, %v6929_v18  ;;  %4650 = vmatprep.mubr.msk.bf16.mxu0 %vm705_vm0, %v6930_v36  ;;  %v6933_v61 = vld [vmem:[#allocation26_spill] sm:$0xff]  ;;  %v3517_v18 = vmul.f32 0.0, %v3452_v2  ;;  %v6946_v2 = vld [vmem:[#allocation37_spill] sm:$0xff] }
  0xc9   : > { %4684 = vmatprep.subr.bf16.mxu0 %v4869_v21  ;;  %4704 = vmatprep.subr.bf16.mxu1 %v4870_v10  ;;  %v6942_v36 = vld [vmem:[#allocation30_spill] sm:$0xff] }
  0xca   : > { %3551 = vperm.xlu0 %4830, %v3517_v18  }
  0xcb   : > { %4705 = vmatpush3.bf16.msra.mxu1 %v4870_v10  ;;  %4685 = vmatpush3.bf16.msra.mxu0 %v4869_v21  ;;  %v6939_v21 = vcombine.low %v5909_v17, %v5968_v53  ;;  %v6940_v10 = vcombine.low %v5793_v22, %v5881_v20  ;;  %v3451_v17 = vld [vmem:[%s6703_s3 + $0x18] sm:$0xff]  ;;  %v3453_v53 = vld [vmem:[%s6703_s3 + $0x28] sm:$0xff]  ;;  %v3454_v22 = vld [vmem:[%s6703_s3 + $0x30] sm:$0xff] }
  0xcc   : > { %4742 = vmatprep.subr.bf16.mxu1 %v4873_v14  ;;  %4722 = vmatprep.subr.bf16.mxu0 %v4872_v47 }
  0xcd   : > { %3546 = vperm.xlu1 %4831, %v3451_v17  }
  0xce   : > { %4671 = vmatmul.mubr.msk.bf16.gmra.mxu1 %vm705_vm0, %v6931_v44  ;;  %4651 = vmatmul.mubr.msk.bf16.gmra.mxu0 %vm705_vm0, %v6932_v24  ;;  %v3518_v44 = vmul.f32 0.0, %v3453_v53  ;;  %v3519_v24 = vmul.f32 0.0, %v3454_v22  ;;  %v6947_v53 = vld [vmem:[#allocation15_spill] sm:$0xff]  ;;  %v3459_v22 = vld [vmem:[%s6703_s3 + $0x58] sm:$0xff] }
  0xcf   : > { %4674 = vmatprep.mubr.msk.bf16.mxu1 %vm705_vm0, %v6933_v61  ;;  %4654 = vmatprep.mubr.msk.bf16.mxu0 %vm705_vm0, %v6934_v3  ;;  %v4874_v61 = vld [vmem:[%s6702_s2 + $0xc0] sm:$0xff]  }
  0xd0   : > { %3561 = vperm.xlu0 %4830, %v3519_v24   ;;  %v6948_v24 = vld [vmem:[#allocation41_spill] sm:$0xff] }
  0xd1   : > { %3556 = vperm.xlu1 %4831, %v3518_v44   ;;  %v3460_v44 = vld [vmem:[%s6703_s3 + $0x60] sm:$0xff] }
  0xd6   : > { %4675 = vmatmul.mubr.msk.bf16.gmra.mxu1 %vm705_vm0, %v6935_v31  ;;  %4655 = vmatmul.mubr.msk.bf16.gmra.mxu0 %vm705_vm0, %v6936_v55  ;;  %v6943_v31 = vld [vmem:[#allocation32_spill] sm:$0xff] }
  0xd7   : > { %4678 = vmatprep.mubr.msk.bf16.mxu1 %vm705_vm0, %v6937_v45  ;;  %4658 = vmatprep.mubr.msk.bf16.mxu0 %vm705_vm0, %v6938_v15  ;;  %v4508_v3 = vpop.f32.mrf.mxu1  ;;  %v4875_v55 = vld [vmem:[%s6702_s2 + $0xd0] sm:$0xff]   ;;  %v3455_v45 = vld [vmem:[%s6703_s3 + $0x38] sm:$0xff]  ;;  %v3456_v15 = vld [vmem:[%s6703_s3 + $0x40] sm:$0xff] }
  0xd8   : > { %v3520_v42 = vmul.f32 0.0, %v3455_v45  ;;  %v3521_v5 = vmul.f32 0.0, %v3456_v15  ;;  %v3525_v45 = vmul.f32 0.0, %v3460_v44 }
  0xda   : > { %3566 = vperm.xlu1 %4831, %v3520_v42   ;;  %3571 = vperm.xlu0 %4830, %v3521_v5   ;;  %v3461_v5 = vld [vmem:[%s6703_s3 + $0x68] sm:$0xff] }
  0xde   : > { %4679 = vmatmul.mubr.msk.bf16.gmra.mxu1 %vm705_vm0, %v6939_v21  ;;  %4659 = vmatmul.mubr.msk.bf16.gmra.mxu0 %vm705_vm0, %v6940_v10  ;;  %v6195_v21 = vld [vmem:[%s6702_s2 + $0xf8] sm:$0xff]   ;;  %v937_v10 = vpop.f32.mrf.mxu1 }
  0xdf   : > { %4706 = vmatprep.mubr.msk.bf16.mxu1 %vm705_vm0, %v6941_v32  ;;  %4686 = vmatprep.mubr.msk.bf16.mxu0 %vm705_vm0, %v6942_v36  ;;  %v3458_v32 = vld [vmem:[%s6703_s3 + $0x50] sm:$0xff] }
  0xe0   : > { %v3523_v36 = vmul.f32 0.0, %v3458_v32  ;;  %v4509_v17 = vpop.f32.mrf.mxu1 }
  0xe2   : > { %3581 = vperm.xlu0 %4830, %v3523_v36  }
  0xe5   : > { %v4488_v15 = vpop.f32.mrf.mxu0 }
  0xe6   : > { %4707 = vmatmul.mubr.msk.bf16.vlgmr.msra.gmra.mxu1 %vm705_vm0, %v6943_v31  ;;  %4687 = vmatmul.mubr.msk.bf16.vlgmr.msra.gmra.mxu0 %vm705_vm0, %v6944_v52  ;;  %v3524_v31 = vmul.f32 0.0, %v3459_v22  ;;  %v940_v52 = vpop.f32.mrf.mxu1  ;;  %v6226_v42 = vadd.f32 %v4508_v3, %v4488_v15  ;;  %v3463_v22 = vld [vmem:[%s6703_s3 + $0x78] sm:$0xff] }
  0xe7   : > { %4743 = vmatpush3.bf16.msra.mxu1 %v4873_v14  ;;  %4723 = vmatpush3.bf16.msra.mxu0 %v4872_v47  ;;  %v6202_v14 = vld [vmem:[%s6702_s2 + $0xe8] sm:$0xff]  }
  0xe8   : > { %4710 = vmatprep.mubr.msk.bf16.mxu1 %vm705_vm0, %v6945_v49  ;;  %4690 = vmatprep.mubr.msk.bf16.mxu0 %vm705_vm0, %v6946_v2  ;;  %v3457_v47 = vld [vmem:[%s6703_s3 + $0x48] sm:$0xff]  ;;  %v3462_v49 = vld [vmem:[%s6703_s3 + $0x70] sm:$0xff]  ;;  %v764_v2 = vpop.f32.mrf.mxu0 }
  0xe9   : > { %4724 = vmatprep.subr.bf16.mxu0 %v4874_v61  ;;  %4744 = vmatprep.subr.bf16.mxu1 %v4875_v55  ;;  %v3522_v18 = vmul.f32 0.0, %v3457_v47  ;;  %v3526_v47 = vmul.f32 0.0, %v3461_v5  ;;  %v6234_v32 = vadd.f32 %v937_v10, %v764_v2  ;;  %v6953_v5 = vld [vmem:[#allocation12_spill] sm:$0xff] }
  0xea   : > { %3591 = vperm.xlu0 %4830, %v3525_v45   ;;  %v4489_v36 = vpop.f32.mrf.mxu0 }
  0xeb   : > { %4745 = vmatpush3.bf16.msra.mxu1 %v4875_v55  ;;  %4725 = vmatpush3.bf16.msra.mxu0 %v4874_v61  ;;  %v6949_v61 = vld [vmem:[#allocation16_spill] sm:$0xff]  ;;  %v6238_v3 = vadd.f32 %v4509_v17, %v4489_v36 }
  0xec   : > { %4782 = vmatprep.subr.bf16.mxu1 %v6195_v21  ;;  %4762 = vmatprep.subr.bf16.mxu0 %v6202_v14  ;;  %v6950_v55 = vld [vmem:[#allocation44_spill] sm:$0xff]  ;;  %v767_v10 = vpop.f32.mrf.mxu0 }
  0xed   : > { %3576 = vperm.xlu1 %4831, %v3522_v18   ;;  %v3527_v18 = vmul.f32 0.0, %v3462_v49 }
  0xee   : > { %4711 = vmatmul.mubr.msk.bf16.gmra.mxu1 %vm705_vm0, %v6947_v53  ;;  %4691 = vmatmul.mubr.msk.bf16.gmra.mxu0 %vm705_vm0, %v6948_v24  ;;  %v4512_v53 = vpop.f32.mrf.mxu1  ;;  %v3528_v24 = vmul.f32 0.0, %v3463_v22 }
  0xef   : > { %4714 = vmatprep.mubr.msk.bf16.mxu1 %vm705_vm0, %v6949_v61  ;;  %4694 = vmatprep.mubr.msk.bf16.mxu0 %vm705_vm0, %v6950_v55 }
  0xf0   : > { %v953_v44 = vpop.f32.mrf.mxu1  ;;  %3601 = vperm.xlu0 %4830, %v3527_v18  }
  0xf1   : > { %3586 = vperm.xlu1 %4831, %v3524_v31  }
  0xf2   : > { %v4513_v17 = vpop.f32.mrf.mxu1 }
  0xf4   : > { %v956_v61 = vpop.f32.mrf.mxu1 }
  0xf5   : > { %3596 = vperm.xlu1 %4831, %v3526_v47  }
  0xf6   : > { %4715 = vmatmul.mubr.msk.bf16.gmra.mxu1 %vm705_vm0, %v5756_v40  ;;  %4695 = vmatmul.mubr.msk.bf16.gmra.mxu0 %vm705_vm0, %v5801_v16  ;;  %v6249_v40 = vadd.f32 %v940_v52, %v767_v10  ;;  %v4516_v31 = vpop.f32.mrf.mxu1  ;;  %v6951_v16 = vld [vmem:[#allocation14_spill] sm:$0xff]  ;;  %v4492_v55 = vpop.f32.mrf.mxu0 }
  0xf7   : > { %4718 = vmatprep.mubr.msk.bf16.mxu1 %vm705_vm0, %v5797_v0  ;;  %4698 = vmatprep.mubr.msk.bf16.mxu0 %vm705_vm0, %v5814_v39  ;;  %v6263_v45 = vadd.f32 %v4512_v53, %v4492_v55  ;;  %v6954_v53 = vld [vmem:[#allocation24_spill] sm:$0xff] }
  0xf8   : > { %v969_v0 = vpop.f32.mrf.mxu1  ;;  %v780_v26 = vpop.f32.mrf.mxu0 }
  0xf9   : > { %3606 = vperm.xlu1 %4831, %v3528_v24   ;;  %v6265_v52 = vadd.f32 %v953_v44, %v780_v26 }
  0xfa   : > { %v4517_v39 = vpop.f32.mrf.mxu1 }
  0xfc   : > { %v972_v15 = vpop.f32.mrf.mxu1 }
  0xfe   : > { %4719 = vmatmul.mubr.msk.bf16.gmra.mxu1 %vm705_vm0, %v4167_v62  ;;  %4699 = vmatmul.mubr.msk.bf16.gmra.mxu0 %vm705_vm0, %v4152_v35  ;;  %v6952_v35 = vld [vmem:[#allocation21_spill] sm:$0xff]  ;;  %v4879_v62 = vld [vmem:[%s6702_s2 + $0xf0] sm:$0xff]   ;;  %v4520_v2 = vpop.f32.mrf.mxu1 }
  0xff   : > { %4746 = vmatprep.mubr.msk.bf16.mxu1 %vm705_vm0, %v6913_v50  ;;  %4726 = vmatprep.mubr.msk.bf16.mxu0 %vm705_vm0, %v6951_v16  ;;  %v4493_v50 = vpop.f32.mrf.mxu0 }
 0x100   : > { %v6278_v49 = vadd.f32 %v4513_v17, %v4493_v50  ;;  %v985_v36 = vpop.f32.mrf.mxu1 }
 0x101   : > { %v783_v47 = vpop.f32.mrf.mxu0 }
 0x102   : > { %v6285_v18 = vadd.f32 %v956_v61, %v783_v47 }
 0x106   : > { %4747 = vmatmul.mubr.msk.bf16.vlgmr.msra.gmra.mxu1 %vm705_vm0, %v6952_v35  ;;  %4727 = vmatmul.mubr.msk.bf16.vlgmr.msra.gmra.mxu0 %vm705_vm0, %v6953_v5 }
 0x107   : > { %4783 = vmatpush3.bf16.msra.mxu1 %v6195_v21  ;;  %4763 = vmatpush3.bf16.msra.mxu0 %v6202_v14  ;;  %v4496_v21 = vpop.f32.mrf.mxu0  ;;  %v6955_v14 = vld [vmem:[#allocation19_spill] sm:$0xff] }
 0x108   : > { %4750 = vmatprep.mubr.msk.bf16.mxu1 %vm705_vm0, %v5818_v34  ;;  %4730 = vmatprep.mubr.msk.bf16.mxu0 %vm705_vm0, %v5885_v28  ;;  %v6289_v22 = vadd.f32 %v4516_v31, %v4496_v21  ;;  %v4521_v28 = vpop.f32.mrf.mxu1 }
 0x109   : > { %4764 = vmatprep.subr.bf16.mxu0 %v4878_v63  ;;  %4784 = vmatprep.subr.bf16.mxu1 %v4879_v62  ;;  %v796_v34 = vpop.f32.mrf.mxu0 }
 0x10a   : > { %v6297_v10 = vadd.f32 %v969_v0, %v796_v34  ;;  %v988_v61 = vpop.f32.mrf.mxu1 }
 0x10b   : > { %4785 = vmatpush3.bf16.msra.mxu1 %v4879_v62  ;;  %4765 = vmatpush3.bf16.msra.mxu0 %v4878_v63  ;;  %v4497_v44 = vpop.f32.mrf.mxu0 }
 0x10c   : > { %v6299_v24 = vadd.f32 %v4517_v39, %v4497_v44 }
 0x10d   : > { %v799_v17 = vpop.f32.mrf.mxu0 }
 0x10e   : > { %4751 = vmatmul.mubr.msk.bf16.gmra.mxu1 %vm705_vm0, %v6954_v53  ;;  %4731 = vmatmul.mubr.msk.bf16.gmra.mxu0 %vm705_vm0, %v6955_v14  ;;  %v6301_v31 = vadd.f32 %v972_v15, %v799_v17 }
 0x10f   : > { %4754 = vmatprep.mubr.msk.bf16.mxu1 %vm705_vm0, %v5830_v29  ;;  %4734 = vmatprep.mubr.msk.bf16.mxu0 %vm705_vm0, %v5994_v60  ;;  %v4500_v16 = vpop.f32.mrf.mxu0  ;;  %v4548_v60 = vpop.f32.mrf.mxu1 }
 0x110   : > { %v6305_v55 = vadd.f32 %v4520_v2, %v4500_v16 }
 0x111   : > { %v812_v29 = vpop.f32.mrf.mxu0  ;;  %v1523_v15 = vpop.f32.mrf.mxu1 }
 0x112   : > { %v6313_v0 = vadd.f32 %v985_v36, %v812_v29 }
 0x113   : > { %v4501_v39 = vpop.f32.mrf.mxu0  ;;  %v4549_v35 = vpop.f32.mrf.mxu1 }
 0x114   : > { %v6315_v26 = vadd.f32 %v4521_v28, %v4501_v39 }
 0x115   : > { %v1526_v62 = vpop.f32.mrf.mxu1 }
 0x116   : > { %4755 = vmatmul.mubr.msk.bf16.gmra.mxu1 %vm705_vm0, %v5841_v58  ;;  %4735 = vmatmul.mubr.msk.bf16.gmra.mxu0 %vm705_vm0, %v5850_v8  ;;  %v815_v58 = vpop.f32.mrf.mxu0 }
 0x117   : > { %4758 = vmatprep.mubr.msk.bf16.mxu1 %vm705_vm0, %v5920_v9  ;;  %4738 = vmatprep.mubr.msk.bf16.mxu0 %vm705_vm0, %v5854_v57  ;;  %v6317_v63 = vadd.f32 %v988_v61, %v815_v58 }
 0x118   : > { %v4528_v50 = vpop.f32.mrf.mxu0 }
 0x119   : > { %v1247_v8 = vadd.f32 %v4528_v50, %v6226_v42 }
 0x11a   : > { %v1182_v57 = vpop.f32.mrf.mxu0 }
 0x11b   : > { %v1245_v9 = vadd.f32 %v1182_v57, %v6234_v32  ;;  %v6331_v5 = vadd.f32 %v4548_v60, %v1247_v8 }
 0x11d   : > { %v6334_v2 = vadd.f32 %v1523_v15, %v1245_v9  ;;  %v4552_v41 = vpop.f32.mrf.mxu1 }
 0x11e   : > { %4759 = vmatmul.mubr.msk.bf16.gmra.mxu1 %vm705_vm0, %v6015_v46  ;;  %4739 = vmatmul.mubr.msk.bf16.gmra.mxu0 %vm705_vm0, %v4182_v59  ;;  %v4529_v46 = vpop.f32.mrf.mxu0 }
 0x11f   : > { %4786 = vmatprep.mubr.msk.bf16.mxu1 %vm705_vm0, %v6916_v54  ;;  %4766 = vmatprep.mubr.msk.bf16.mxu0 %vm705_vm0, %v6917_v56  ;;  %v1248_v42 = vadd.f32 %v4529_v46, %v6238_v3  ;;  %v1539_v56 = vpop.f32.mrf.mxu1 }
 0x120   : > { %v1185_v20 = vpop.f32.mrf.mxu0 }
 0x121   : > { %v1246_v59 = vadd.f32 %v1185_v20, %v6249_v40  ;;  %v6337_v47 = vadd.f32 %v4549_v35, %v1248_v42 }
 0x122   : > { %v4532_v54 = vpop.f32.mrf.mxu0 }
 0x123   : > { %v1251_v32 = vadd.f32 %v4532_v54, %v6263_v45  ;;  %v6342_v36 = vadd.f32 %v1526_v62, %v1246_v59 }
 0x124   : > { %v1198_v3 = vpop.f32.mrf.mxu0 }
 0x125   : > { %v1249_v40 = vadd.f32 %v1198_v3, %v6265_v52  ;;  %v6351_v21 = vadd.f32 %v4552_v41, %v1251_v32 }
 0x126   : > { %4787 = vmatmul.mubr.msk.bf16.vlgmr.msra.gmra.mxu1 %vm705_vm0, %v5862_v11  ;;  %4767 = vmatmul.mubr.msk.bf16.vlgmr.msra.gmra.mxu0 %vm705_vm0, %v5870_v51  ;;  %v4553_v11 = vpop.f32.mrf.mxu1  ;;  %v4533_v53 = vpop.f32.mrf.mxu0 }
 0x127   : > { %4790 = vmatprep.mubr.msk.bf16.mxu1 %vm705_vm0, %v5866_v38  ;;  %4770 = vmatprep.mubr.msk.bf16.mxu0 %vm705_vm0, %v6055_v19  ;;  %v1252_v45 = vadd.f32 %v4533_v53, %v6278_v49  ;;  %v6354_v14 = vadd.f32 %v1539_v56, %v1249_v40 }
 0x128   : > { %v1201_v34 = vpop.f32.mrf.mxu0  ;;  %v1542_v38 = vpop.f32.mrf.mxu1 }
 0x129   : > { %v1250_v51 = vadd.f32 %v1201_v34, %v6285_v18  ;;  %v6357_v28 = vadd.f32 %v4553_v11, %v1252_v45 }
 0x12b   : > { %v6361_v19 = vadd.f32 %v1542_v38, %v1250_v51 }
 0x12e   : > { %4791 = vmatmul.mubr.msk.bf16.gmra.mxu1 %vm705_vm0, %v6059_v27  ;;  %4771 = vmatmul.mubr.msk.bf16.gmra.mxu0 %vm705_vm0, %v6063_v6  ;;  %v4556_v52 = vpop.f32.mrf.mxu1  ;;  %v4536_v49 = vpop.f32.mrf.mxu0 }
 0x12f   : > { %4794 = vmatprep.mubr.msk.bf16.mxu1 %vm705_vm0, %v6075_v33  ;;  %4774 = vmatprep.mubr.msk.bf16.mxu0 %vm705_vm0, %v6079_v48  ;;  %v1255_v44 = vadd.f32 %v4536_v49, %v6289_v22 }
 0x130   : > { %v1555_v18 = vpop.f32.mrf.mxu1  ;;  %v1214_v17 = vpop.f32.mrf.mxu0 }
 0x131   : > { %v1253_v61 = vadd.f32 %v1214_v17, %v6297_v10  ;;  %v6371_v27 = vadd.f32 %v4556_v52, %v1255_v44 }
 0x132   : > { %v4557_v6 = vpop.f32.mrf.mxu1  ;;  %v4537_v16 = vpop.f32.mrf.mxu0 }
 0x133   : > { %v1256_v33 = vadd.f32 %v4537_v16, %v6299_v24  ;;  %v6380_v48 = vadd.f32 %v1555_v18, %v1253_v61 }
 0x134   : > { %v1217_v22 = vpop.f32.mrf.mxu0 }
 0x135   : > { %v1254_v10 = vadd.f32 %v1217_v22, %v6301_v31  ;;  %v6385_v29 = vadd.f32 %v4557_v6, %v1256_v33 }
 0x136   : > { %4795 = vmatmul.mubr.msk.bf16.gmra.mxu1 %vm705_vm0, %v6083_v30  ;;  %4775 = vmatmul.mubr.msk.bf16.gmra.mxu0 %vm705_vm0, %v6087_v13  ;;  %v1558_v30 = vpop.f32.mrf.mxu1 }
 0x137   : > { %4798 = vmatprep.mubr.msk.bf16.mxu1 %vm705_vm0, %v5953_v7  ;;  %4778 = vmatprep.mubr.msk.bf16.mxu0 %vm705_vm0, %v5943_v23  ;;  %v6387_v60 = vadd.f32 %v1558_v30, %v1254_v10 }
 0x13e   : > { %v4560_v39 = vpop.f32.mrf.mxu1  ;;  %4799 = vmatmul.mubr.msk.bf16.gmra.mxu1 %vm705_vm0, %v4228_v12  ;;  %v4540_v7 = vpop.f32.mrf.mxu0  ;;  %4779 = vmatmul.mubr.msk.bf16.gmra.mxu0 %vm705_vm0, %v4213_v43 }
 0x13f   : > { %v1259_v13 = vadd.f32 %v4540_v7, %v6305_v55 }
 0x140   : > { %v1571_v23 = vpop.f32.mrf.mxu1  ;;  %v1230_v24 = vpop.f32.mrf.mxu0 }
 0x141   : > { %v1257_v15 = vadd.f32 %v1230_v24, %v6313_v0  ;;  %v1600_v58 = vadd.f32 %v4560_v39, %v1259_v13 }
 0x142   : > { %v4561_v31 = vpop.f32.mrf.mxu1  ;;  %v4541_v35 = vpop.f32.mrf.mxu0 }
 0x143   : > { %v1260_v25 = vadd.f32 %v4541_v35, %v6315_v26  ;;  %v1598_v37 = vadd.f32 %v1571_v23, %v1257_v15 }
 0x144   : > { %v1574_v50 = vpop.f32.mrf.mxu1  ;;  %v1233_v12 = vpop.f32.mrf.mxu0 }
 0x145   : > { %v1258_v57 = vadd.f32 %v1233_v12, %v6317_v63  ;;  %v1601_v4 = vadd.f32 %v4561_v31, %v1260_v25 }
 0x146   : > { %v4588_v8 = vpop.f32.mrf.mxu1  ;;  %v4568_v1 = vpop.f32.mrf.mxu0 }
 0x147   : > { %v1752_v9 = vadd.f32 %v4568_v1, %v6331_v5  ;;  %v1599_v55 = vadd.f32 %v1574_v50, %v1258_v57 }
 0x148   : > { %v1864_v43 = vpop.f32.mrf.mxu1  ;;  %v1687_v62 = vpop.f32.mrf.mxu0 }
 0x149   : > { %v1750_v0 = vadd.f32 %v1687_v62, %v6334_v2  ;;  %v1929_v42 = vadd.f32 %v4588_v8, %v1752_v9 }
 0x14a   : > { %v4589_v46 = vpop.f32.mrf.mxu1  ;;  %v4569_v20 = vpop.f32.mrf.mxu0 }
 0x14b   : > { %v1753_v26 = vadd.f32 %v4569_v20, %v6337_v47  ;;  %v1927_v59 = vadd.f32 %v1864_v43, %v1750_v0 }
 0x14c   : > { %v1867_v41 = vpop.f32.mrf.mxu1  ;;  %v1690_v54 = vpop.f32.mrf.mxu0 }
 0x14d   : > { %v1751_v63 = vadd.f32 %v1690_v54, %v6342_v36  ;;  %v1930_v32 = vadd.f32 %v4589_v46, %v1753_v26 }
 0x14e   : > { %v4592_v56 = vpop.f32.mrf.mxu1  ;;  %v4572_v3 = vpop.f32.mrf.mxu0 }
 0x14f   : > { %v1756_v5 = vadd.f32 %v4572_v3, %v6351_v21  ;;  %v1928_v11 = vadd.f32 %v1867_v41, %v1751_v63 }
 0x150   : > { %v1880_v40 = vpop.f32.mrf.mxu1  ;;  %v1703_v53 = vpop.f32.mrf.mxu0 }
 0x151   : > { %v1754_v2 = vadd.f32 %v1703_v53, %v6354_v14  ;;  %v1933_v34 = vadd.f32 %v4592_v56, %v1756_v5 }
 0x152   : > { %v4593_v45 = vpop.f32.mrf.mxu1  ;;  %v4573_v51 = vpop.f32.mrf.mxu0 }
 0x153   : > { %v1757_v47 = vadd.f32 %v4573_v51, %v6357_v28  ;;  %v1931_v52 = vadd.f32 %v1880_v40, %v1754_v2 }
 0x154   : > { %v1883_v38 = vpop.f32.mrf.mxu1  ;;  %v1706_v49 = vpop.f32.mrf.mxu0 }
 0x155   : > { %v1755_v36 = vadd.f32 %v1706_v49, %v6361_v19  ;;  %v1934_v44 = vadd.f32 %v4593_v45, %v1757_v47 }
 0x156   : > { %v4596_v18 = vpop.f32.mrf.mxu1  ;;  %v4576_v17 = vpop.f32.mrf.mxu0 }
 0x157   : > { %v1760_v21 = vadd.f32 %v4576_v17, %v6371_v27  ;;  %v1932_v6 = vadd.f32 %v1883_v38, %v1755_v36 }
 0x158   : > { %v1896_v61 = vpop.f32.mrf.mxu1  ;;  %v1719_v16 = vpop.f32.mrf.mxu0 }
 0x159   : > { %v1758_v14 = vadd.f32 %v1719_v16, %v6380_v48  ;;  %v1937_v22 = vadd.f32 %v4596_v18, %v1760_v21 }
 0x15a   : > { %v4597_v33 = vpop.f32.mrf.mxu1  ;;  %v4577_v10 = vpop.f32.mrf.mxu0 }
 0x15b   : > { %v1761_v28 = vadd.f32 %v4577_v10, %v6385_v29  ;;  %v1935_v39 = vadd.f32 %v1896_v61, %v1758_v14 }
 0x15c   : > { %v1899_v30 = vpop.f32.mrf.mxu1  ;;  %v1722_v7 = vpop.f32.mrf.mxu0 }
 0x15d   : > { %v1759_v19 = vadd.f32 %v1722_v7, %v6387_v60  ;;  %v1938_v13 = vadd.f32 %v4597_v33, %v1761_v28 }
 0x15e   : > { %v4600_v23 = vpop.f32.mrf.mxu1  ;;  %v4580_v24 = vpop.f32.mrf.mxu0 }
 0x15f   : > { %v1764_v15 = vadd.f32 %v4580_v24, %v1600_v58  ;;  %v1936_v27 = vadd.f32 %v1899_v30, %v1759_v19 }
 0x160   : > { %v1912_v31 = vpop.f32.mrf.mxu1  ;;  %v1735_v35 = vpop.f32.mrf.mxu0 }
 0x161   : > { %v1762_v25 = vadd.f32 %v1735_v35, %v1598_v37  ;;  %v1941_v12 = vadd.f32 %v4600_v23, %v1764_v15 }
 0x162   : > { %v4601_v50 = vpop.f32.mrf.mxu1  ;;  %v4581_v48 = vpop.f32.mrf.mxu0 }
 0x163   : > { %v1765_v57 = vadd.f32 %v4581_v48, %v1601_v4  ;;  %v1939_v1 = vadd.f32 %v1912_v31, %v1762_v25 }
 0x164   : > { %v1915_v8 = vpop.f32.mrf.mxu1  ;;  %v1738_v43 = vpop.f32.mrf.mxu0 }
 0x165   : > { %v1763_v9 = vadd.f32 %v1738_v43, %v1599_v55  ;;  %v1942_v62 = vadd.f32 %v4601_v50, %v1765_v57 }
 0x166   : > { %v4628_v29 = vpop.f32.mrf.mxu1  ;;  %v4608_v46 = vpop.f32.mrf.mxu0 }
 0x167   : > { %v2097_v60 = vadd.f32 %v4608_v46, %v1929_v42  ;;  %v1940_v20 = vadd.f32 %v1915_v8, %v1763_v9 }
 0x168   : > { %v2205_v0 = vpop.f32.mrf.mxu1  ;;  %v2032_v41 = vpop.f32.mrf.mxu0 }
 0x169   : > { %v2095_v58 = vadd.f32 %v2032_v41, %v1927_v59  ;;  %v2270_v54 = vadd.f32 %v4628_v29, %v2097_v60 }
 0x16a   : > { %v4629_v26 = vpop.f32.mrf.mxu1  ;;  %v4609_v56 = vpop.f32.mrf.mxu0 }
 0x16b   : > { %v2098_v37 = vadd.f32 %v4609_v56, %v1930_v32  ;;  %v2268_v3 = vadd.f32 %v2205_v0, %v2095_v58 }
 0x16c   : > { %v2208_v63 = vpop.f32.mrf.mxu1  ;;  %v2035_v40 = vpop.f32.mrf.mxu0 }
 0x16d   : > { %v2096_v4 = vadd.f32 %v2035_v40, %v1928_v11  ;;  %v2271_v53 = vadd.f32 %v4629_v26, %v2098_v37 }
 0x16e   : > { %v4632_v5 = vpop.f32.mrf.mxu1  ;;  %v4612_v45 = vpop.f32.mrf.mxu0 }
 0x16f   : > { %v2101_v55 = vadd.f32 %v4612_v45, %v1933_v34  ;;  %v2269_v51 = vadd.f32 %v2208_v63, %v2096_v4 }
 0x170   : > { %v2221_v2 = vpop.f32.mrf.mxu1  ;;  %v2048_v38 = vpop.f32.mrf.mxu0 }
 0x171   : > { %v2099_v42 = vadd.f32 %v2048_v38, %v1931_v52  ;;  %v2274_v49 = vadd.f32 %v4632_v5, %v2101_v55 }
 0x172   : > { %v4633_v47 = vpop.f32.mrf.mxu1  ;;  %v4613_v18 = vpop.f32.mrf.mxu0 }
 0x173   : > { %v2102_v59 = vadd.f32 %v4613_v18, %v1934_v44  ;;  %v2272_v17 = vadd.f32 %v2221_v2, %v2099_v42 }
 0x174   : > { %v2224_v36 = vpop.f32.mrf.mxu1  ;;  %v2051_v61 = vpop.f32.mrf.mxu0 }
 0x175   : > { %v2100_v32 = vadd.f32 %v2051_v61, %v1932_v6  ;;  %v2275_v16 = vadd.f32 %v4633_v47, %v2102_v59 }
 0x176   : > { %v4636_v21 = vpop.f32.mrf.mxu1  ;;  %v4616_v33 = vpop.f32.mrf.mxu0 }
 0x177   : > { %v2105_v11 = vadd.f32 %v4616_v33, %v1937_v22  ;;  %v2273_v10 = vadd.f32 %v2224_v36, %v2100_v32 }
 0x178   : > { %v2237_v14 = vpop.f32.mrf.mxu1  ;;  %v2064_v30 = vpop.f32.mrf.mxu0 }
 0x179   : > { %v2103_v34 = vadd.f32 %v2064_v30, %v1935_v39  ;;  %v2278_v7 = vadd.f32 %v4636_v21, %v2105_v11 }
 0x17a   : > { %v4637_v28 = vpop.f32.mrf.mxu1  ;;  %v4617_v23 = vpop.f32.mrf.mxu0 }
 0x17b   : > { %v2106_v52 = vadd.f32 %v4617_v23, %v1938_v13  ;;  %v2276_v24 = vadd.f32 %v2237_v14, %v2103_v34 }
 0x17c   : > { %v2240_v19 = vpop.f32.mrf.mxu1  ;;  %v2067_v31 = vpop.f32.mrf.mxu0 }
 0x17d   : > { %v2104_v44 = vadd.f32 %v2067_v31, %v1936_v27  ;;  %v2279_v35 = vadd.f32 %v4637_v28, %v2106_v52 }
 0x17e   : > { %v4640_v15 = vpop.f32.mrf.mxu1  ;;  %v4620_v50 = vpop.f32.mrf.mxu0 }
 0x17f   : > { %v2109_v6 = vadd.f32 %v4620_v50, %v1941_v12  ;;  %v2277_v48 = vadd.f32 %v2240_v19, %v2104_v44 }
 0x180   : > { %v2253_v25 = vpop.f32.mrf.mxu1  ;;  %v2080_v8 = vpop.f32.mrf.mxu0 }
 0x181   : > { %v2107_v22 = vadd.f32 %v2080_v8, %v1939_v1  ;;  %v2282_v43 = vadd.f32 %v4640_v15, %v2109_v6 }
 0x182   : > { %v4641_v57 = vpop.f32.mrf.mxu1  ;;  %v4621_v29 = vpop.f32.mrf.mxu0 }
 0x183   : > { %v2110_v39 = vadd.f32 %v4621_v29, %v1942_v62  ;;  %v2280_v46 = vadd.f32 %v2253_v25, %v2107_v22 }
 0x184   : > { %v2256_v9 = vpop.f32.mrf.mxu1  ;;  %v2083_v0 = vpop.f32.mrf.mxu0 }
 0x185   : > { %v2108_v13 = vadd.f32 %v2083_v0, %v1940_v20  ;;  %v2283_v41 = vadd.f32 %v4641_v57, %v2110_v39 }
 0x186   : > { %v4668_v60 = vpop.f32.mrf.mxu1  ;;  %v4648_v26 = vpop.f32.mrf.mxu0 }
 0x187   : > { %v2406_v27 = vadd.f32 %v4648_v26, %v2270_v54  ;;  %v2281_v56 = vadd.f32 %v2256_v9, %v2108_v13 }
 0x188   : > { %v2490_v58 = vpop.f32.mrf.mxu1  ;;  %v2341_v63 = vpop.f32.mrf.mxu0 }
 0x189   : > { %v2404_v12 = vadd.f32 %v2341_v63, %v2268_v3  ;;  %v6413_v40 = vadd.f32 %v4668_v60, %v2406_v27 }
 0x18a   : > { %v4669_v37 = vpop.f32.mrf.mxu1  ;;  %v4649_v5 = vpop.f32.mrf.mxu0 }
 0x18b   : > { %v2407_v4 = vadd.f32 %v4649_v5, %v2271_v53  ;;  %v6415_v45 = vadd.f32 %v2490_v58, %v2404_v12 }
 0x18c   : > { %v2493_v1 = vpop.f32.mrf.mxu1  ;;  %v2344_v62 = vpop.f32.mrf.mxu0 }
 0x18d   : > { %v2405_v55 = vadd.f32 %v2344_v62, %v2269_v51  ;;  %v6417_v38 = vadd.f32 %v4669_v37, %v2407_v4 }
 0x18e   : > { %v4672_v2 = vpop.f32.mrf.mxu1  ;;  %v4652_v20 = vpop.f32.mrf.mxu0 }
 0x18f   : > { %v2410_v42 = vadd.f32 %v4652_v20, %v2274_v49  ;;  %v6419_v54 = vadd.f32 %v2493_v1, %v2405_v55 }
 0x190   : > { %v2506_v47 = vpop.f32.mrf.mxu1  ;;  %v2357_v18 = vpop.f32.mrf.mxu0 }
 0x191   : > { %v2408_v3 = vadd.f32 %v2357_v18, %v2272_v17  ;;  %v6421_v59 = vadd.f32 %v4672_v2, %v2410_v42 }
 0x192   : > { %v4673_v36 = vpop.f32.mrf.mxu1  ;;  %v4653_v61 = vpop.f32.mrf.mxu0 }
 0x193   : > { %v2411_v53 = vadd.f32 %v4653_v61, %v2275_v16  ;;  %v6423_v32 = vadd.f32 %v2506_v47, %v2408_v3 }
 0x194   : > { %v2509_v21 = vpop.f32.mrf.mxu1  ;;  %v2360_v33 = vpop.f32.mrf.mxu0 }
 0x195   : > { %v2409_v51 = vadd.f32 %v2360_v33, %v2273_v10  ;;  %v6425_v11 = vadd.f32 %v4673_v36, %v2411_v53 }
 0x196   : > { %v4676_v14 = vpop.f32.mrf.mxu1  ;;  %v4656_v30 = vpop.f32.mrf.mxu0 }
 0x197   : > { %v2414_v49 = vadd.f32 %v4656_v30, %v2278_v7  ;;  %v6427_v34 = vadd.f32 %v2509_v21, %v2409_v51 }
 0x198   : > { %v2522_v28 = vpop.f32.mrf.mxu1  ;;  %v2373_v23 = vpop.f32.mrf.mxu0 }
 0x199   : > { %v2412_v17 = vadd.f32 %v2373_v23, %v2276_v24  ;;  %v6429_v52 = vadd.f32 %v4676_v14, %v2414_v49 }
 0x19a   : > { %v4677_v19 = vpop.f32.mrf.mxu1  ;;  %v4657_v31 = vpop.f32.mrf.mxu0 }
 0x19b   : > { %v2415_v16 = vadd.f32 %v4657_v31, %v2279_v35  ;;  %v6431_v44 = vadd.f32 %v2522_v28, %v2412_v17 }
 0x19c   : > { %v2525_v15 = vpop.f32.mrf.mxu1  ;;  %v2376_v50 = vpop.f32.mrf.mxu0 }
 0x19d   : > { %v2413_v10 = vadd.f32 %v2376_v50, %v2277_v48  ;;  %v6433_v6 = vadd.f32 %v4677_v19, %v2415_v16 }
 0x19e   : > { %v4680_v25 = vpop.f32.mrf.mxu1  ;;  %v4660_v8 = vpop.f32.mrf.mxu0 }
 0x19f   : > { %v2418_v7 = vadd.f32 %v4660_v8, %v2282_v43  ;;  %v6435_v22 = vadd.f32 %v2525_v15, %v2413_v10 }
 0x1a0   : > { %v2538_v57 = vpop.f32.mrf.mxu1  ;;  %v2389_v29 = vpop.f32.mrf.mxu0 }
 0x1a1   : > { %v2416_v24 = vadd.f32 %v2389_v29, %v2280_v46  ;;  %v6437_v39 = vadd.f32 %v4680_v25, %v2418_v7 }
 0x1a2   : > { %v4681_v9 = vpop.f32.mrf.mxu1  ;;  %v4661_v0 = vpop.f32.mrf.mxu0 }
 0x1a3   : > { %v2419_v35 = vadd.f32 %v4661_v0, %v2283_v41  ;;  %v6439_v13 = vadd.f32 %v2538_v57, %v2416_v24 }
 0x1a4   : > { %v2541_v60 = vpop.f32.mrf.mxu1  ;;  %v2392_v26 = vpop.f32.mrf.mxu0 }
 0x1a5   : > { %v2417_v48 = vadd.f32 %v2392_v26, %v2281_v56  ;;  %v6443_v27 = vadd.f32 %v4681_v9, %v2419_v35 }
 0x1a6   : > { %v6441_v58 = vpop.f32.mrf.mxu1  ;;  %v4688_v63 = vpop.f32.mrf.mxu0 }
 0x1a7   : > { %v6447_v37 = vadd.f32 %v2541_v60, %v2417_v48 }
 0x1a8   : > { %v6445_v43 = vpop.f32.mrf.mxu1  ;;  %v2630_v12 = vpop.f32.mrf.mxu0 }
 0x1a9   : > { %6956 = vst [vmem:[#allocation17_spill] sm:$0xff] %v6447_v37 }
 0x1aa   : > { %v6449_v46 = vpop.f32.mrf.mxu1  ;;  %v4689_v5 = vpop.f32.mrf.mxu0 }
 0x1ac   : > { %v6451_v1 = vpop.f32.mrf.mxu1  ;;  %v2633_v41 = vpop.f32.mrf.mxu0 }
 0x1ae   : > { %v6453_v4 = vpop.f32.mrf.mxu1  ;;  %v6455_v62 = vpop.f32.mrf.mxu0 }
 0x1b0   : > { %v6457_v2 = vpop.f32.mrf.mxu1  ;;  %v6459_v56 = vpop.f32.mrf.mxu0 }
 0x1b2   : > { %v6461_v55 = vpop.f32.mrf.mxu1  ;;  %v6463_v20 = vpop.f32.mrf.mxu0 }
 0x1b4   : > { %v6465_v47 = vpop.f32.mrf.mxu1  ;;  %v6467_v42 = vpop.f32.mrf.mxu0 }
 0x1b6   : > { %v6469_v18 = vpop.f32.mrf.mxu1  ;;  %v6471_v36 = vpop.f32.mrf.mxu0 }
 0x1b8   : > { %v6473_v3 = vpop.f32.mrf.mxu1  ;;  %v6475_v61 = vpop.f32.mrf.mxu0 }
 0x1ba   : > { %v6477_v21 = vpop.f32.mrf.mxu1  ;;  %v6479_v53 = vpop.f32.mrf.mxu0 }
 0x1bc   : > { %v6481_v33 = vpop.f32.mrf.mxu1  ;;  %v6483_v14 = vpop.f32.mrf.mxu0 }
 0x1be   : > { %v6485_v51 = vpop.f32.mrf.mxu1  ;;  %v6487_v30 = vpop.f32.mrf.mxu0 }
 0x1c0   : > { %v6489_v28 = vpop.f32.mrf.mxu1  ;;  %v6491_v49 = vpop.f32.mrf.mxu0 }
 0x1c1   : > { %6957 = vst [vmem:[#allocation22_spill] sm:$0xff] %v6489_v28 }
 0x1c2   : > { %v6493_v23 = vpop.f32.mrf.mxu1  ;;  %v6495_v19 = vpop.f32.mrf.mxu0 }
 0x1c3   : > { %6958 = vst [vmem:[#allocation3_spill] sm:$0xff] %v6493_v23 }
 0x1c4   : > { %v6497_v17 = vpop.f32.mrf.mxu1  ;;  %v6499_v31 = vpop.f32.mrf.mxu0 }
 0x1c5   : > { %6959 = vst [vmem:[#allocation4_spill] sm:$0xff] %v6497_v17  ;;  %6960 = vst [vmem:[#allocation6_spill] sm:$0xff] %v6499_v31 }
 0x1c6   : > { %v4748_v15 = vpop.f32.mrf.mxu1  ;;  %v4728_v16 = vpop.f32.mrf.mxu0 }
 0x1c8   : > { %v3060_v50 = vpop.f32.mrf.mxu1  ;;  %v2911_v25 = vpop.f32.mrf.mxu0 }
 0x1ca   : > { %v6501_v10 = vpop.f32.mrf.mxu1  ;;  %v4729_v8 = vpop.f32.mrf.mxu0 }
 0x1cc   : > { %v6503_v57 = vpop.f32.mrf.mxu1  ;;  %v2914_v7 = vpop.f32.mrf.mxu0 }
 0x1ce   : > { %v6505_v29 = vpop.f32.mrf.mxu1  ;;  %v6507_v9 = vpop.f32.mrf.mxu0 }
 0x1cf   : > { %6961 = vst [vmem:[#allocation31_spill] sm:$0xff] %v6505_v29 }
 0x1d0   : > { %v6509_v24 = vpop.f32.mrf.mxu1  ;;  %v6511_v0 = vpop.f32.mrf.mxu0 }
 0x1d1   : > { %6962 = vst [vmem:[#allocation34_spill] sm:$0xff] %v6509_v24 }
 0x1d2   : > { %v6513_v60 = vpop.f32.mrf.mxu1  ;;  %v6515_v35 = vpop.f32.mrf.mxu0 }
 0x1d3   : > { %6963 = vst [vmem:[#allocation36_spill] sm:$0xff] %v6513_v60  ;;  %6964 = vst [vmem:[#allocation38_spill] sm:$0xff] %v6515_v35  ;;  %v2695_v60 = vadd.f32 %v4688_v63, %v6413_v40  ;;  %v6536_v35 = vpop.permute.xlu0 %3531  ;;  %v2694_v63 = vadd.f32 %v2633_v41, %v6419_v54 }
 0x1d4   : > { %v6517_v26 = vpop.f32.mrf.mxu1  ;;  %v6519_v48 = vpop.f32.mrf.mxu0  ;;  %6973 = vst [vmem:[#allocation7_spill] sm:$0xff] %v6536_v35 }
 0x1d5   : > { %6965 = vst [vmem:[#allocation9_spill] sm:$0xff] %v6517_v26 }
 0x1d6   : > { %v6521_v17 = vpop.f32.mrf.mxu1  ;;  %v6523_v23 = vpop.f32.mrf.mxu0 }
 0x1d7   : > { %6966 = vst [vmem:[#allocation42_spill] sm:$0xff] %v6521_v17  ;;  %6967 = vst [vmem:[#allocation40_spill] sm:$0xff] %v6523_v23  ;;  %v2693_v17 = vadd.f32 %v2630_v12, %v6415_v45  ;;  %v6541_v23 = vpop.permute.xlu1 %3541  ;;  %v6557_v12 = vpop.permute.xlu0 %3536 }
 0x1d8   : > { %v6525_v28 = vpop.f32.mrf.mxu1  ;;  %v6527_v29 = vpop.f32.mrf.mxu0 }
 0x1d9   : > { %6968 = vst [vmem:[#allocation39_spill] sm:$0xff] %v6525_v28  ;;  %6969 = vst [vmem:[#allocation43_spill] sm:$0xff] %v6527_v29 }
 0x1da   : > { %v6529_v31 = vpop.f32.mrf.mxu1  ;;  %v6531_v24 = vpop.f32.mrf.mxu0 }
 0x1db   : > { %6970 = vst [vmem:[#allocation5_spill] sm:$0xff] %v6529_v31  ;;  %6971 = vst [vmem:[#allocation2_spill] sm:$0xff] %v6531_v24  ;;  %v2696_v31 = vadd.f32 %v4689_v5, %v6417_v38  ;;  %v2840_v24 = vadd.f32 %v6441_v58, %v2695_v60  ;;  %v2699_v38 = vadd.f32 %v6455_v62, %v6421_v59  ;;  %v6565_v54 = vpop.permute.xlu1 %3546 }
 0x1dc   : > { %v6534_v37 = vpop.f32.mrf.mxu1  ;;  %v6538_v26 = vpop.f32.mrf.mxu0  ;;  %v2698_v59 = vadd.f32 %v6467_v42, %v6427_v34 }
 0x1dd   : > { %6972 = vst [vmem:[#allocation13_spill] sm:$0xff] %v6534_v37  ;;  %6974 = vst [vmem:[#allocation18_spill] sm:$0xff] %v6538_v26  ;;  %v2976_v35 = vadd.f32 %v4728_v16, %v2840_v24  ;;  %v2838_v26 = vadd.f32 %v6445_v43, %v2693_v17  ;;  %v2841_v5 = vadd.f32 %v6449_v46, %v2696_v31 }
 0x1de   : > { %v6543_v28 = vpop.f32.mrf.mxu1  ;;  %v6545_v29 = vpop.f32.mrf.mxu0  ;;  %v2697_v43 = vadd.f32 %v6459_v56, %v6423_v32  ;;  %v2700_v17 = vadd.f32 %v6463_v20, %v6425_v11  ;;  %v2839_v16 = vadd.f32 %v6451_v1, %v2694_v63  ;;  %v2703_v46 = vadd.f32 %v6471_v36, %v6429_v52 }
 0x1df   : > { %6975 = vst [vmem:[#allocation8_spill] sm:$0xff] %v6543_v28  ;;  %v2974_v58 = vadd.f32 %v2911_v25, %v2838_v26  ;;  %v2977_v62 = vadd.f32 %v4729_v8, %v2841_v5  ;;  %v3125_v25 = vadd.f32 %v4748_v15, %v2976_v35  ;;  %v2701_v32 = vadd.f32 %v6475_v61, %v6431_v44  ;;  %v6979_v5 = vld [vmem:[#allocation38_spill] sm:$0xff] }
 0x1e0   : > { %v6549_v40 = vpop.f32.mrf.mxu1  ;;  %v6552_v37 = vpop.f32.mrf.mxu0  ;;  %v2704_v11 = vadd.f32 %v6479_v53, %v6433_v6  ;;  %v2975_v56 = vadd.f32 %v2914_v7, %v2839_v16  ;;  %v2844_v34 = vadd.f32 %v6453_v4, %v2699_v38  ;;  %v2702_v36 = vadd.f32 %v6483_v14, %v6435_v22 }
 0x1e1   : > { %v3123_v42 = vadd.f32 %v3060_v50, %v2974_v58  ;;  %v2707_v15 = vadd.f32 %v6487_v30, %v6437_v39  ;;  %v2842_v44 = vadd.f32 %v6457_v2, %v2697_v43  ;;  %v2845_v61 = vadd.f32 %v6461_v55, %v2700_v17  ;;  %v6597_v6 = vpop.permute.xlu0 %3551  ;;  %v6601_v7 = vpop.permute.xlu1 %3556 }
 0x1e2   : > { %v6555_v45 = vpop.f32.mrf.mxu1  ;;  %v6559_v28 = vpop.f32.mrf.mxu0  ;;  %v2843_v8 = vadd.f32 %v6465_v47, %v2698_v59  ;;  %v2848_v4 = vadd.f32 %v6469_v18, %v2703_v46  ;;  %v3126_v22 = vadd.f32 %v6501_v10, %v2977_v62  ;;  %v2705_v39 = vadd.f32 %v6491_v49, %v6439_v13  ;;  %v6981_v46 = vld [vmem:[#allocation22_spill] sm:$0xff] }
 0x1e3   : > { %v2980_v2 = vadd.f32 %v6507_v9, %v2844_v34  ;;  %v2846_v55 = vadd.f32 %v6473_v3, %v2701_v32  ;;  %v2849_v47 = vadd.f32 %v6477_v21, %v2704_v11  ;;  %v3124_v63 = vadd.f32 %v6503_v57, %v2975_v56  ;;  %v6977_v9 = vld [vmem:[#allocation17_spill] sm:$0xff]  ;;  %v6978_v21 = vld [vmem:[#allocation6_spill] sm:$0xff]  ;;  %v6983_v11 = vld [vmem:[#allocation7_spill] sm:$0xff] }
 0x1e4   : > { %v6567_v41 = vpop.f32.mrf.mxu1  ;;  %v6574_v24 = vpop.f32.mrf.mxu0  ;;  %v2708_v10 = vadd.f32 %v6495_v19, %v6443_v27  ;;  %v2978_v38 = vadd.f32 %v6511_v0, %v2842_v44  ;;  %v2847_v13 = vadd.f32 %v6481_v33, %v2702_v36  ;;  %v6621_v49 = vadd.f32 %v6485_v51, %v2707_v15  ;;  %v6980_v27 = vld [vmem:[#allocation40_spill] sm:$0xff]  ;;  %v6982_v51 = vld [vmem:[#allocation31_spill] sm:$0xff]  ;;  %v6986_v44 = vld [vmem:[#allocation34_spill] sm:$0xff] }
 0x1e5   : > { %v2706_v58 = vadd.f32 %v6978_v21, %v6977_v9  ;;  %v2981_v43 = vadd.f32 %v6979_v5, %v2845_v61  ;;  %v2979_v59 = vadd.f32 %v6519_v48, %v2843_v8  ;;  %v2984_v19 = vadd.f32 %v6980_v27, %v2848_v4  ;;  %v3562_v0 = vpop.permute.xlu0 %3561 }
 0x1e6   : > { %v4788_v31 = vpop.f32.mrf.mxu1  ;;  %v4768_v1 = vpop.f32.mrf.mxu0  ;;  %v6630_v33 = vadd.f32 %v6981_v46, %v2705_v39  ;;  %v3129_v62 = vadd.f32 %v6982_v51, %v2980_v2  ;;  %v6989_v39 = vld [vmem:[#allocation2_spill] sm:$0xff] }
 0x1e7   : > { %v3265_v20 = vadd.f32 %v4768_v1, %v3125_v25  ;;  %v3567_v25 = vpop.permute.xlu1 %3566  ;;  %v2985_v2 = vadd.f32 %v6989_v39, %v2849_v47 }
 0x1e8   : > { %v3345_v52 = vpop.f32.mrf.mxu1  ;;  %v3200_v53 = vpop.f32.mrf.mxu0 }
 0x1e9   : > { %v3263_v60 = vadd.f32 %v3200_v53, %v3123_v42  ;;  %v3410_v14 = vadd.f32 %v4788_v31, %v3265_v20  ;;  %v6984_v20 = vld [vmem:[#allocation43_spill] sm:$0xff]  ;;  %v6987_v53 = vld [vmem:[#allocation4_spill] sm:$0xff]  ;;  %v3572_v21 = vpop.permute.xlu0 %3571 }
 0x1ea   : > { %v4789_v50 = vpop.f32.mrf.mxu1  ;;  %v4769_v18 = vpop.f32.mrf.mxu0  ;;  %v2982_v48 = vadd.f32 %v6984_v20, %v2846_v55  ;;  %v6985_v42 = vld [vmem:[#allocation3_spill] sm:$0xff]  ;;  %v6647_v8 = vadd.f32 %v6987_v53, %v2706_v58 }
 0x1eb   : > { %v3408_v30 = vadd.f32 %v3345_v52, %v3263_v60  ;;  %v3266_v26 = vadd.f32 %v4769_v18, %v3126_v22  ;;  %v3611_v32 = vmul.f32 %v6541_v23, %v3410_v14  ;;  %v6638_v36 = vadd.f32 %v6985_v42, %v2708_v10  ;;  %v6988_v60 = vld [vmem:[#allocation36_spill] sm:$0xff]  ;;  %v6990_v14 = vld [vmem:[#allocation9_spill] sm:$0xff] }
 0x1ec   : > { %v3348_v35 = vpop.f32.mrf.mxu1  ;;  %v3203_v3 = vpop.f32.mrf.mxu0  ;;  %v3127_v23 = vadd.f32 %v6986_v44, %v2978_v38  ;;  %v3130_v22 = vadd.f32 %v6988_v60, %v2981_v43 }
 0x1ed   : > { %v3411_v17 = vadd.f32 %v4789_v50, %v3266_v26  ;;  %v3264_v57 = vadd.f32 %v3203_v3, %v3124_v63  ;;  %v3609_v1 = vmul.f32 %v6983_v11, %v3408_v30  ;;  %v3128_v30 = vadd.f32 %v6990_v14, %v2979_v59 }
 0x1ee   : > { %v4792_v16 = vpop.f32.mrf.mxu1  ;;  %v4772_v31 = vpop.f32.mrf.mxu0  ;;  %v3649_v27 = vmul.f32 %v3611_v32, %v3611_v32 }
 0x1ef   : > { %v3612_v56 = vmul.f32 %v6565_v54, %v3411_v17  ;;  %v3409_v34 = vadd.f32 %v3348_v35, %v3264_v57  ;;  %v3269_v15 = vadd.f32 %v4772_v31, %v3129_v62  ;;  %v6991_v35 = vld [vmem:[#allocation42_spill] sm:$0xff]  ;;  %v3647_v63 = vmul.f32 %v3609_v1, %v3609_v1  ;;  %v6992_v17 = vld [vmem:[#allocation39_spill] sm:$0xff]  ;;  %v6656_v57 = vpop.permute.xlu1 %3576 }
 0x1f0   : > { %v3361_v52 = vpop.f32.mrf.mxu1  ;;  %v3216_v61 = vpop.f32.mrf.mxu0  ;;  %v3133_v26 = vadd.f32 %v6991_v35, %v2984_v19  ;;  %v3131_v47 = vadd.f32 %v6992_v17, %v2982_v48  ;;  %v6993_v62 = vld [vmem:[#allocation18_spill] sm:$0xff] }
 0x1f1   : > { %v4283_v54 = vpack.c.bf16 %v3612_v56, %v3611_v32  ;;  %v3610_v4 = vmul.f32 %v6557_v12, %v3409_v34  ;;  %v3267_v55 = vadd.f32 %v3216_v61, %v3127_v23  ;;  %v3414_v12 = vadd.f32 %v4792_v16, %v3269_v15  ;;  %v6994_v16 = vld [vmem:[#allocation5_spill] sm:$0xff] }
 0x1f2   : > { %v4793_v50 = vpop.f32.mrf.mxu1  ;;  %v4773_v18 = vpop.f32.mrf.mxu0  ;;  %v2983_v31 = vadd.f32 %v6993_v62, %v2847_v13  ;;  %v3650_v20 = vmul.f32 %v3612_v56, %v3612_v56 }
 0x1f3   : > { %4315 = vst [vmem:[%s6643_s17 + $0x8] sm:$0xff] %v4283_v54   ;;  %v3625_v10 = vadd.f32 %v3610_v4, %v3609_v1  ;;  %v3648_v38 = vmul.f32 %v3610_v4, %v3610_v4  ;;  %v4278_v3 = vpack.c.bf16 %v3610_v4, %v3609_v1  ;;  %v3412_v58 = vadd.f32 %v3361_v52, %v3267_v55 }
 0x1f4   : > { %v3364_v9 = vpop.f32.mrf.mxu1  ;;  %v3270_v5 = vadd.f32 %v4773_v18, %v3130_v22  ;;  %v3219_v43 = vpop.f32.mrf.mxu0  ;;  %v3134_v52 = vadd.f32 %v6994_v16, %v2985_v2  ;;  %v3615_v23 = vmul.f32 %v3562_v0, %v3414_v12  ;;  %v2986_v22 = vadd.f32 %v6552_v37, %v6630_v33  ;;  %v6995_v18 = vld [vmem:[#allocation13_spill] sm:$0xff] }
 0x1f5   : > { %v3626_v59 = vadd.f32 %v3625_v10, %v3611_v32  ;;  %v3663_v46 = vadd.f32 %v3648_v38, %v3647_v63  ;;  %4279 = vst [vmem:[%s6643_s17] sm:$0xff] %v4278_v3   ;;  %v3268_v51 = vadd.f32 %v3219_v43, %v3128_v30  ;;  %v3613_v11 = vmul.f32 %v6597_v6, %v3412_v58  ;;  %v6996_v38 = vld [vmem:[#allocation8_spill] sm:$0xff] }
 0x1f6   : > { %v4796_v19 = vpop.f32.mrf.mxu1  ;;  %v3415_v1 = vadd.f32 %v4793_v50, %v3270_v5  ;;  %v4776_v34 = vpop.f32.mrf.mxu0  ;;  %v2988_v32 = vadd.f32 %v6545_v29, %v6621_v49  ;;  %v3132_v29 = vadd.f32 %v6995_v18, %v2983_v31  ;;  %v3653_v33 = vmul.f32 %v3615_v23, %v3615_v23 }
 0x1f7   : > { %v3664_v42 = vadd.f32 %v3663_v46, %v3649_v27  ;;  %v3627_v15 = vadd.f32 %v3626_v59, %v3612_v56  ;;  %v3413_v48 = vadd.f32 %v3364_v9, %v3268_v51  ;;  %v3273_v53 = vadd.f32 %v4776_v34, %v3133_v26  ;;  %v3582_v56 = vpop.permute.xlu0 %3581  ;;  %v3587_v49 = vpop.permute.xlu1 %3586 }
 0x1f8   : > { %v3377_v44 = vpop.f32.mrf.mxu1  ;;  %v3616_v61 = vmul.f32 %v3567_v25, %v3415_v1  ;;  %v3232_v54 = vpop.f32.mrf.mxu0  ;;  %v3651_v13 = vmul.f32 %v3613_v11, %v3613_v11  ;;  %v3137_v37 = vadd.f32 %v6996_v38, %v2988_v32  ;;  %v2989_v5 = vadd.f32 %v6559_v28, %v6638_v36 }
 0x1f9   : > { %v3628_v4 = vadd.f32 %v3627_v15, %v3613_v11  ;;  %v3665_v6 = vadd.f32 %v3664_v42, %v3650_v20  ;;  %v3614_v50 = vmul.f32 %v6601_v7, %v3413_v48  ;;  %v3271_v2 = vadd.f32 %v3232_v54, %v3131_v47 }
 0x1fa   : > { %v4797_v60 = vpop.f32.mrf.mxu1  ;;  %v4293_v39 = vpack.c.bf16 %v3616_v61, %v3615_v23  ;;  %v4777_v55 = vpop.f32.mrf.mxu0  ;;  %v3418_v26 = vadd.f32 %v4796_v19, %v3273_v53  ;;  %v2987_v43 = vadd.f32 %v6574_v24, %v6647_v8  ;;  %v3654_v59 = vmul.f32 %v3616_v61, %v3616_v61 }
 0x1fb   : > { %v3666_v0 = vadd.f32 %v3665_v6, %v3651_v13  ;;  %v3629_v25 = vadd.f32 %v3628_v4, %v3614_v50  ;;  %v3652_v14 = vmul.f32 %v3614_v50, %v3614_v50  ;;  %v4288_v30 = vpack.c.bf16 %v3614_v50, %v3613_v11  ;;  %v3597_v28 = vpop.permute.xlu1 %3596 }
 0x1fc   : > { %v3380_v35 = vpop.f32.mrf.mxu1  ;;  %4317 = vst [vmem:[%s6643_s17 + $0x18] sm:$0xff] %v4293_v39   ;;  %v3416_v7 = vadd.f32 %v3377_v44, %v3271_v2  ;;  %v3274_v63 = vadd.f32 %v4777_v55, %v3134_v52  ;;  %v3235_v10 = vpop.f32.mrf.mxu0  ;;  %v3619_v31 = vmul.f32 %v3582_v56, %v3418_v26  ;;  %v3135_v34 = vadd.f32 %v6549_v40, %v2986_v22 }
 0x1fd   : > { %v3630_v3 = vadd.f32 %v3629_v25, %v3615_v23  ;;  %v3667_v9 = vadd.f32 %v3666_v0, %v3652_v14  ;;  %4316 = vst [vmem:[%s6643_s17 + $0x10] sm:$0xff] %v4288_v30   ;;  %v3272_v58 = vadd.f32 %v3235_v10, %v3132_v29  ;;  %v3592_v52 = vpop.permute.xlu0 %3591  ;;  %v3138_v48 = vadd.f32 %v6555_v45, %v2989_v5 }
 0x1fe   : > { %v4800_v12 = vpop.f32.mrf.mxu1  ;;  %v3617_v17 = vmul.f32 %v3572_v21, %v3416_v7  ;;  %v3419_v47 = vadd.f32 %v4797_v60, %v3274_v63  ;;  %v4780_v27 = vpop.f32.mrf.mxu0  ;;  %v3136_v32 = vadd.f32 %v6567_v41, %v2987_v43  ;;  %v3657_v50 = vmul.f32 %v3619_v31, %v3619_v31 }
 0x1ff   : > { %v3668_v46 = vadd.f32 %v3667_v9, %v3653_v33  ;;  %v3631_v19 = vadd.f32 %v3630_v3, %v3616_v61  ;;  %v3417_v51 = vadd.f32 %v3380_v35, %v3272_v58  ;;  %v3277_v1 = vadd.f32 %v4780_v27, %v3137_v37  ;;  %v3607_v55 = vpop.permute.xlu1 %3606 }
 0x200   : > { %v3393_v62 = vpop.f32.mrf.mxu1  ;;  %v3620_v11 = vmul.f32 %v3587_v49, %v3419_v47  ;;  %v3248_v16 = vpop.f32.mrf.mxu0  ;;  %v3655_v20 = vmul.f32 %v3617_v17, %v3617_v17 }
 0x201   : > { %v3632_v36 = vadd.f32 %v3631_v19, %v3617_v17  ;;  %v3669_v24 = vadd.f32 %v3668_v46, %v3654_v59  ;;  %v3618_v8 = vmul.f32 %v6656_v57, %v3417_v51  ;;  %v3275_v15 = vadd.f32 %v3248_v16, %v3135_v34  ;;  %v3602_v2 = vpop.permute.xlu0 %3601 }
 0x202   : > { %v4303_v21 = vpack.c.bf16 %v3620_v11, %v3619_v31  ;;  %v4801_v42 = vpop.f32.mrf.mxu1  ;;  %v4781_v44 = vpop.f32.mrf.mxu0  ;;  %v3422_v54 = vadd.f32 %v4800_v12, %v3277_v1  ;;  %v3658_v41 = vmul.f32 %v3620_v11, %v3620_v11 }
 0x203   : > { %v3670_v23 = vadd.f32 %v3669_v24, %v3655_v20  ;;  %v3633_v40 = vadd.f32 %v3632_v36, %v3618_v8  ;;  %v3656_v61 = vmul.f32 %v3618_v8, %v3618_v8  ;;  %v4298_v53 = vpack.c.bf16 %v3618_v8, %v3617_v17 }
 0x204   : > { %4319 = vst [vmem:[%s6643_s17 + $0x28] sm:$0xff] %v4303_v21   ;;  %v3420_v4 = vadd.f32 %v3393_v62, %v3275_v15  ;;  %v3278_v13 = vadd.f32 %v4781_v44, %v3138_v48  ;;  %v3251_v6 = vpop.f32.mrf.mxu0  ;;  %v3396_v39 = vpop.f32.mrf.mxu1  ;;  %v3623_v0 = vmul.f32 %v3602_v2, %v3422_v54 }
 0x205   : > { %v3634_v57 = vadd.f32 %v3633_v40, %v3619_v31  ;;  %v3671_v60 = vadd.f32 %v3670_v23, %v3656_v61  ;;  %4318 = vst [vmem:[%s6643_s17 + $0x20] sm:$0xff] %v4298_v53   ;;  %v3276_v22 = vadd.f32 %v3251_v6, %v3136_v32 }
 0x206   : > { %v3621_v56 = vmul.f32 %v3592_v52, %v3420_v4  ;;  %v3423_v45 = vadd.f32 %v4801_v42, %v3278_v13  ;;  %v3661_v33 = vmul.f32 %v3623_v0, %v3623_v0 }
 0x207   : > { %v3672_v18 = vadd.f32 %v3671_v60, %v3657_v50  ;;  %v3635_v29 = vadd.f32 %v3634_v57, %v3620_v11  ;;  %v3421_v49 = vadd.f32 %v3396_v39, %v3276_v22 }
 0x208   : > { %v3624_v25 = vmul.f32 %v3607_v55, %v3423_v45  ;;  %v3659_v30 = vmul.f32 %v3621_v56, %v3621_v56 }
 0x209   : > { %v3636_v14 = vadd.f32 %v3635_v29, %v3621_v56  ;;  %v3673_v35 = vadd.f32 %v3672_v18, %v3658_v41  ;;  %v3622_v26 = vmul.f32 %v3597_v28, %v3421_v49 }
 0x20a   : > { %v4313_v7 = vpack.c.bf16 %v3624_v25, %v3623_v0  ;;  %v3662_v12 = vmul.f32 %v3624_v25, %v3624_v25 }
 0x20b   : > { %v3674_v63 = vadd.f32 %v3673_v35, %v3659_v30  ;;  %v3637_v10 = vadd.f32 %v3636_v14, %v3622_v26  ;;  %v3660_v38 = vmul.f32 %v3622_v26, %v3622_v26  ;;  %v4308_v37 = vpack.c.bf16 %v3622_v26, %v3621_v56 }
 0x20c   : > { %4321 = vst [vmem:[%s6643_s17 + $0x38] sm:$0xff] %v4313_v7  }
 0x20d   : > { %v3638_v3 = vadd.f32 %v3637_v10, %v3623_v0  ;;  %v3675_v9 = vadd.f32 %v3674_v63, %v3660_v38  ;;  %4320 = vst [vmem:[%s6643_s17 + $0x30] sm:$0xff] %v4308_v37  }
 0x20f   : > { %v3639_v58 = vadd.f32 %v3638_v3, %v3624_v25  ;;  %v3676_v5 = vadd.f32 %v3675_v9, %v3661_v33 }
 0x211   : > { %v3640_v43 = vrot.slane %v3639_v58, 4  ;;  %v3677_v17 = vadd.f32 %v3676_v5, %v3662_v12 }
 0x213   : > { %v3641_v47 = vadd.f32 %v3640_v43, %v3639_v58  ;;  %v3678_v27 = vrot.slane %v3677_v17, 4 }
 0x215   : > { %v3642_v59 = vrot.slane %v3641_v47, 2  ;;  %v3679_v46 = vadd.f32 %v3678_v27, %v3677_v17 }
 0x217   : > { %v3643_v19 = vadd.f32 %v3642_v59, %v3641_v47  ;;  %v3680_v51 = vrot.slane %v3679_v46, 2 }
 0x219   : > { %v3644_v62 = vrot.slane %v3643_v19, 1  ;;  %v3681_v31 = vadd.f32 %v3680_v51, %v3679_v46 }
 0x21b   : > { %v3645_v11 = vadd.f32 %v3644_v62, %v3643_v19  ;;  %v3682_v1 = vrot.slane %v3681_v31, 1 }
 0x21d   : > { %3646 = vst [vmem:[%s387_s19] sm:$0x1] %v3645_v11  ;;  %v3683_v34 = vadd.f32 %v3682_v1, %v3681_v31 }
 0x21f   : > { %3684 = vst [vmem:[%s392_s25] sm:$0x1] %v3683_v34 }
 0x220 PF: > { %s17_s23 = sadd.s32 1, %s4904_s23   ;;  %s6997_s21 = smov %s4900_s22 }
 0x221   : > { %p14_p6 = scmp.ge.s32.totalorder %s17_s23, 4   ;;  %s6998_s22 = smov %s7000_s24 }
 0x223   :  { %16 = sbr.rel (!%p14_p6) target bundleno = 2 (0x2), region = 108 }

// kernel: nlayer_discriminator_forward.9
= control target key start
LH: loop header
LB: loop body
LE: loop exit
PB: predicated region body
PF: predicated region fallthrough
CT: control target
= control target key end

     0   :  { %s4891_s15 = smov 0   ;;  %s4893_s16 = smov 0   ;;  %s6635_s0 = inlined_call_operand.vmem [shape: bf16[2,24,11,64], index: 0, kind: input, shape index: {}, may-alias: {0,1}]   ;;  %s6636_s1 = inlined_call_operand.vmem [shape: bf16[2,24,11,64], index: 1, kind: input, shape index: {}, may-alias: {0,1}]   ;;  %s6637_s2 = inlined_call_operand.vmem [shape: bf16[16,64,128], index: 2, kind: input, shape index: {}]   ;;  %s6638_s3 = inlined_call_operand.vmem [shape: f32[1,128], index: 3, kind: input, shape index: {}]   ;;  %s6639_s4 = inlined_call_operand.vmem [shape: f32[256,128], index: 4, kind: output, shape index: {}]  }
   0x1   :  { %s4895_s17 = smov 0  }
   0x2 LB: > { %s26_s18 = sadd.s32 1, %s4860_s16  ;;  %p3740_p0 = scmp.ge.s32.totalorder %s4864_s17, 1  ;;  %s4864_s17 = sphi %s4895_s17, %s14_s17   ;;  %s4860_s16 = sphi %s4893_s16, %s6912_s16   ;;  %s4856_s15 = sphi %s4891_s15, %s6911_s15  }
   0x3   : > { %p28_p1 = scmp.ge.s32.totalorder %s26_s18, 2  ;;  %p220_p2 = scmp.lt.s32.totalorder %s4864_s17, 3 }
   0x5   : > { %s6914_s18 = smov (%p28_p1, %s26_s18), 0  ;;  %p221_p3 = pnand %p3740_p0, %p220_p2 }
   0x7   : > { %224 = sbr.rel (%p221_p3) target bundleno = 524 (0x20c), region = 36 }
   0xc   : > { %v4756_v0 = vld [vmem:[%s6637_s2 + $0x38] sm:$0xff]   ;;  %p275_p4 = scmp.lt.s32.totalorder %s4856_s15, 1  ;;  %v4758_v2 = vld [vmem:[%s6637_s2 + $0x30] sm:$0xff]   ;;  %v4760_v4 = vld [vmem:[%s6637_s2 + $0x28] sm:$0xff]   ;;  %vm644_vm0 = vcmask 523264   ;;  %vm967_vm4 = vcmask 1042432  }
   0xd   : > { %v4757_v1 = vld [vmem:[%s6637_s2 + $0x18] sm:$0xff]   ;;  %4345 = vmatprep.subr.bf16.mxu0 %v4756_v0  ;;  %v4759_v3 = vld [vmem:[%s6637_s2 + $0x10] sm:$0xff]   ;;  %v4761_v5 = vld [vmem:[%s6637_s2 + $0x8] sm:$0xff]   ;;  %vm360_vm1 = vsmask.f32 3328  ;;  %vm968_vm5 = vcmask 1046532  }
   0xe   : > { %s4922_s25 = scalar_select %p275_p4, %s4856_s15, 1  ;;  %4369 = vmatprep.subr.bf16.mxu1 %v4757_v1  ;;  %4346 = vmatpush3.bf16.msra.mxu0 %v4756_v0  ;;  %v4762_v6 = vld [vmem:[%s6637_s2 + $0x20] sm:$0xff]   ;;  %v4970_v17 = vld [vmem:[%s6637_s2 + $0x58] sm:$0xff]   ;;  %vm361_vm2 = vsmask.f32 7440  ;;  %vm5395_vm8 = vmor %vm967_vm4, %vm968_vm5 }
   0xf   : > { %4370 = vmatpush3.bf16.msra.mxu1 %v4757_v1  ;;  %4347 = vmatprep.subr.bf16.mxu0 %v4758_v2  ;;  %v4763_v9 = vld [vmem:[%s6637_s2] sm:$0xff]   ;;  %v4767_v39 = vld [vmem:[%s6637_s2 + $0x78] sm:$0xff]   ;;  %vm5011_vm3 = vmor %vm360_vm1, %vm361_vm2  ;;  %vm1228_vm6 = vsmask.f32 2304  ;;  %vm1229_vm7 = vsmask.f32 6416 }
  0x10   : > { %s4729_s30 = smul.u32 192, %s4922_s25  ;;  %4371 = vmatprep.subr.bf16.mxu1 %v4759_v3  ;;  %vm5405_vm9 = vmor %vm1228_vm6, %vm1229_vm7  ;;  %s3743_s29 = sshll.u32 %s4856_s15, 4 }
  0x11   : > { %p307_p5 = scmp.lt.s32.totalorder %s3743_s29, 31 }
  0x12   : > { %s4939_s9 = scalar_lea.vmem %s6635_s0, %s4729_s30  ;;  %4348 = vmatpush3.bf16.msra.mxu0 %v4758_v2  ;;  %v4771_v2 = vld [vmem:[%s6637_s2 + $0x70] sm:$0xff]   ;;  %s4152_s12 = sadd.s32 128, %s4729_s30 }
  0x13   : > { %4372 = vmatpush3.bf16.msra.mxu1 %v4759_v3  ;;  %4349 = vmatprep.subr.bf16.mxu0 %v4760_v4  ;;  %v4945_v7 = vld [vmem:[%s4939_s9] sm:$0xf]  ;;  %v4948_v8 = vld [vmem:[%s4939_s9 + $0x8] sm:$0xf]  ;;  %v4958_v13 = vld [vmem:[%s4939_s9 + $0x4] sm:$0x3]  ;;  %s5754_s13 = scalar_lea.vmem %s6636_s1, %s4152_s12 }
  0x14   : > { %4373 = vmatprep.subr.bf16.mxu1 %v4761_v5  ;;  %v364_v10 = vshrl.u32 %v4945_v7, 16  ;;  %v367_v11 = vshll.u32 %v4945_v7, 16  ;;  %v3773_v12 = vcombine.low %v4945_v7, %v4948_v8  ;;  %v4962_v15 = vld [vmem:[%s4939_s9 + $0xc] sm:$0x3]  ;;  %v4965_v16 = vld [vmem:[%s4939_s9 + $0x10] sm:$0xf] }
  0x15   : > { %v4978_v20 = vld [vmem:[%s4939_s9 + $0x18] sm:$0xf]  ;;  %v4981_v21 = vld [vmem:[%s4939_s9 + $0x20] sm:$0xf]  ;;  %v4986_v23 = vld [vmem:[%s4939_s9 + $0x14] sm:$0x3] }
  0x16   : > { %4350 = vmatpush3.bf16.msra.mxu0 %v4760_v4  ;;  %4377 = vmatprep.mubr.msk.bf16.mxu1 %vm644_vm0, %v3773_v12  ;;  %v4973_v18 = vrot.slane %v364_v10, 5  ;;  %v4975_v19 = vrot.slane %v367_v11, 6  ;;  %v4990_v24 = vcombine.low %v4965_v16, %v4978_v20  ;;  %v4994_v25 = vcombine.low %v4978_v20, %v4981_v21  ;;  %v4997_v26 = vld [vmem:[%s4939_s9 + $0x1c] sm:$0x3]  ;;  %v5021_v49 = vld [vmem:[%s4939_s9 + $0x24] sm:$0x3] }
  0x17   : > { %4374 = vmatpush3.bf16.msra.mxu1 %v4761_v5  ;;  %4351 = vmatprep.subr.bf16.mxu0 %v4762_v6  ;;  %v366_v27 = vrot.slane %v364_v10, 4  ;;  %v369_v28 = vrot.slane %v367_v11, 5  ;;  %v373_v29 = vshll.u32 %v4958_v13, 16  ;;  %v378_v30 = vshrl.u32 %v4948_v8, 16  ;;  %s6916_s29 = smov (!%p307_p5, %s3743_s29), 31 }
  0x18   : > { %6721 = vst [vmem:[#allocation2_spill] sm:$0xff] %v4990_v24  ;;  %6722 = vst [vmem:[#allocation3_spill] sm:$0xff] %v4994_v25  ;;  %4375 = vmatprep.subr.bf16.mxu1 %v4763_v9  ;;  %v381_v31 = vshll.u32 %v4948_v8, 16  ;;  %v387_v32 = vshll.u32 %v4962_v15, 16  ;;  %v392_v33 = vshrl.u32 %v4965_v16, 16  ;;  %v395_v34 = vshll.u32 %v4965_v16, 16 }
  0x19   : > { %v370_v35 = vor.u32 %v369_v28, %v366_v27  ;;  %v375_v36 = vrot.slane %v373_v29, 5  ;;  %v380_v37 = vrot.slane %v378_v30, 4  ;;  %v401_v38 = vshll.u32 %v4986_v23, 16  ;;  %s3744_s15 = sshll.u32 %s6916_s29, 3 }
  0x1a   : > { %4352 = vmatpush3.bf16.msra.mxu0 %v4762_v6  ;;  %v383_v41 = vrot.slane %v381_v31, 5  ;;  %v389_v42 = vrot.slane %v387_v32, 5  ;;  %v394_v43 = vrot.slane %v392_v33, 4  ;;  %v397_v44 = vrot.slane %v395_v34, 5  ;;  %s6546_s10 = scalar_lea.vmem %s6639_s4, %s3744_s15 }
  0x1b   : > { %4376 = vmatpush3.bf16.msra.mxu1 %v4763_v9  ;;  %4393 = vmatprep.subr.bf16.mxu0 %v4970_v17  ;;  %v371_v45 = vrot.slane %v370_v35, 4  ;;  %v403_v46 = vrot.slane %v401_v38, 5  ;;  %v406_v47 = vshrl.u32 %v4978_v20, 16  ;;  %v409_v48 = vshll.u32 %v4978_v20, 16 }
  0x1c   : > { %4417 = vmatprep.subr.bf16.mxu1 %v4767_v39  ;;  %v384_v50 = vor.u32 %v383_v41, %v380_v37  ;;  %v398_v51 = vor.u32 %v397_v44, %v394_v43  ;;  %v415_v52 = vshll.u32 %v4997_v26, 16  ;;  %v6647_v53 = vshrl.u32 %v4981_v21, 16  ;;  %v5071_v44 = vld [vmem:[%s4939_s9 + $0x28] sm:$0xf] }
  0x1d   : > { %v376_v54 = vsel %vm5011_vm3, %v371_v45, %v375_v36  ;;  %v408_v55 = vrot.slane %v406_v47, 4  ;;  %v411_v56 = vrot.slane %v409_v48, 5  ;;  %v6644_v57 = vshll.u32 %v4981_v21, 16  ;;  %v5074_v45 = vld [vmem:[%s4939_s9 + $0x2c] sm:$0x3] }
  0x1e   : > { %4378 = vmatmul.mubr.msk.bf16.vlgmr.msra.gmra.mxu1 %vm644_vm0, %v4990_v24  ;;  %v385_v58 = vrot.slane %v384_v50, 4  ;;  %v399_v59 = vrot.slane %v398_v51, 4  ;;  %v417_v60 = vrot.slane %v415_v52, 5  ;;  %v422_v61 = vrot.slane %v6647_v53, 4 }
  0x1f   : > { %4418 = vmatpush3.bf16.msra.mxu1 %v4767_v39  ;;  %v412_v62 = vor.u32 %v411_v56, %v408_v55  ;;  %v425_v63 = vrot.slane %v6644_v57, 5  ;;  %v6640_v0 = vshll.u32 %v5021_v49, 16  ;;  %v1235_v6 = vshrl.u32 %v4958_v13, 16 }
  0x20   : > { %v5041_v3 = vsel %vm5011_vm3, %v385_v58, %v389_v42  ;;  %v5045_v4 = vsel %vm5011_vm3, %v399_v59, %v403_v46  ;;  %4419 = vmatprep.subr.bf16.mxu1 %v4771_v2  ;;  %v5054_v28 = vrot.slane %v373_v29, 6  ;;  %v5056_v35 = vrot.slane %v378_v30, 5  ;;  %v4770_v46 = vld [vmem:[%s6637_s2 + $0x50] sm:$0xff]  }
  0x21   : > { %6725 = vst [vmem:[#allocation4_spill] sm:$0xff] %v5041_v3  ;;  %6726 = vst [vmem:[#allocation5_spill] sm:$0xff] %v5045_v4  ;;  %v413_v9 = vrot.slane %v412_v62, 4  ;;  %v426_v10 = vor.u32 %v425_v63, %v422_v61  ;;  %v431_v11 = vrot.slane %v6640_v0, 5  ;;  %v3753_v12 = vcombine.low %v376_v54, %v5041_v3  ;;  %v5093_v54 = vld [vmem:[%s4939_s9 + $0x30] sm:$0xf] }
  0x22   : > { %v5052_v27 = vrot.slane %v1235_v6, 5  ;;  %v5058_v36 = vrot.slane %v381_v31, 6  ;;  %v1245_v41 = vshrl.u32 %v4962_v15, 16  ;;  %v5064_v42 = vrot.slane %v387_v32, 6  ;;  %v4775_v32 = vld [vmem:[%s6637_s2 + $0x68] sm:$0xff]  }
  0x23   : > { %4420 = vmatpush3.bf16.msra.mxu1 %v4771_v2  ;;  %v418_v37 = vsel %vm5011_vm3, %v413_v9, %v417_v60  ;;  %v427_v39 = vrot.slane %v426_v10, 4  ;;  %4353 = vmatprep.mubr.msk.bf16.mxu0 %vm644_vm0, %v3753_v12  ;;  %v1251_v29 = vrot.slane %v392_v33, 5  ;;  %v1252_v30 = vrot.slane %v395_v34, 6  ;;  %v5101_v60 = vld [vmem:[%s4939_s9 + $0x38] sm:$0xf]  ;;  %v4774_v10 = vld [vmem:[%s6637_s2 + $0x48] sm:$0xff]  }
  0x24   : > { %v5067_v43 = vcombine.low %v5045_v4, %v418_v37  ;;  %v1255_v31 = vshrl.u32 %v4986_v23, 16  ;;  %v5086_v33 = vrot.slane %v1245_v41, 5  ;;  %v5090_v34 = vrot.slane %v401_v38, 6  ;;  %4421 = vmatprep.subr.bf16.mxu1 %v4775_v32  ;;  %v4779_v38 = vld [vmem:[%s6637_s2 + $0x60] sm:$0xff]   ;;  %v5119_v63 = vld [vmem:[%s4939_s9 + $0x34] sm:$0x3] }
  0x25   : > { %v5084_v50 = vsel %vm5011_vm3, %v427_v39, %v431_v11  ;;  %v1261_v51 = vrot.slane %v406_v47, 5  ;;  %v1253_v55 = vor.u32 %v1252_v30, %v1251_v29  ;;  %v1262_v58 = vrot.slane %v409_v48, 6  ;;  %v5143_v41 = vld [vmem:[%s4939_s9 + $0x40] sm:$0xf]  ;;  %v5148_v29 = vld [vmem:[%s6637_s2 + $0xb8] sm:$0xff]  }
  0x26   : > { %6727 = vst [vmem:[#allocation6_spill] sm:$0xff] %v5067_v43  ;;  %v5095_v56 = vrot.slane %v1255_v31, 5  ;;  %v1265_v59 = vshrl.u32 %v4997_v26, 16  ;;  %4354 = vmatmul.mubr.msk.bf16.vlgmr.msra.gmra.mxu0 %vm644_vm0, %v5067_v43  ;;  %v5106_v47 = vrot.slane %v415_v52, 6  ;;  %v5111_v48 = vcombine.low %v418_v37, %v5084_v50  ;;  %v5239_v43 = vld [vmem:[%s4939_s9 + $0x5c] sm:$0x3] }
  0x27   : > { %4394 = vmatpush3.bf16.msra.mxu0 %v4970_v17  ;;  %v5116_v62 = vcombine.low %v4981_v21, %v5071_v44  ;;  %4422 = vmatpush3.bf16.msra.mxu1 %v4775_v32  ;;  %v5121_v2 = vrot.slane %v1253_v55, 4  ;;  %v1263_v6 = vor.u32 %v1262_v58, %v1261_v51  ;;  %v5128_v17 = vld [vmem:[%s4939_s9 + $0x3c] sm:$0x3]  ;;  %v6641_v11 = vshrl.u32 %v5071_v44, 16  ;;  %v5157_v55 = vld [vmem:[%s4939_s9 + $0x48] sm:$0xf] }
  0x28   : > { %6728 = vst [vmem:[#allocation7_spill] sm:$0xff] %v5111_v48  ;;  %v5125_v9 = vrot.slane %v1265_v59, 5  ;;  %4395 = vmatprep.subr.bf16.mxu0 %v4770_v46  ;;  %4423 = vmatprep.subr.bf16.mxu1 %v4779_v38  ;;  %v6642_v12 = vshll.u32 %v5071_v44, 16  ;;  %v6643_v37 = vshll.u32 %v5074_v45, 16  ;;  %v5140_v39 = vcombine.low %v5093_v54, %v5101_v60  ;;  %v5160_v58 = vld [vmem:[%s4939_s9 + $0x44] sm:$0x3] }
  0x29   : > { %6729 = vst [vmem:[#allocation8_spill] sm:$0xff] %v5116_v62  ;;  %4381 = vmatprep.mubr.msk.bf16.mxu1 %vm644_vm0, %v5116_v62  ;;  %v5150_v30 = vrot.slane %v1263_v6, 4  ;;  %v6645_v32 = vshrl.u32 %v5093_v54, 16  ;;  %v6646_v51 = vshll.u32 %v5093_v54, 16  ;;  %v436_v59 = vrot.slane %v6641_v11, 4  ;;  %6738 = vst [vmem:[#allocation15_spill] sm:$0xff] %v5239_v43 }
  0x2a   : > { %6730 = vst [vmem:[#allocation9_spill] sm:$0xff] %v5140_v39  ;;  %v439_v61 = vrot.slane %v6642_v12, 5  ;;  %v445_v6 = vrot.slane %v6643_v37, 5  ;;  %4382 = vmatmul.mubr.msk.bf16.gmra.mxu1 %vm644_vm0, %v5140_v39  ;;  %v6648_v22 = vshll.u32 %v5119_v63, 16  ;;  %v6649_v11 = vshrl.u32 %v5101_v60, 16  ;;  %v4778_v37 = vld [vmem:[%s6637_s2 + $0x40] sm:$0xff]  }
  0x2b   : > { %4396 = vmatpush3.bf16.msra.mxu0 %v4770_v46  ;;  %v450_v5 = vrot.slane %v6645_v32, 4  ;;  %v453_v0 = vrot.slane %v6646_v51, 5  ;;  %v6650_v12 = vshll.u32 %v5101_v60, 16  ;;  %4424 = vmatpush3.bf16.msra.mxu1 %v4779_v38  ;;  %v6652_v32 = vshll.u32 %v5128_v17, 16  ;;  %v5209_v39 = vld [vmem:[%s4939_s9 + $0x58] sm:$0xf] }
  0x2c   : > { %4397 = vmatprep.subr.bf16.mxu0 %v4774_v10  ;;  %v440_v57 = vor.u32 %v439_v61, %v436_v59  ;;  %v459_v46 = vrot.slane %v6648_v22, 5  ;;  %v5185_v51 = vcombine.low %v5143_v41, %v5157_v55  ;;  %4465 = vmatprep.subr.bf16.mxu1 %v5148_v29  ;;  %v464_v1 = vrot.slane %v6649_v11, 4  ;;  %v5193_v61 = vld [vmem:[%s4939_s9 + $0x4c] sm:$0x3]  ;;  %v5203_v11 = vld [vmem:[%s4939_s9 + $0x50] sm:$0xf] }
  0x2d   : > { %v454_v53 = vor.u32 %v453_v0, %v450_v5  ;;  %v467_v38 = vrot.slane %v6650_v12, 5  ;;  %v6653_v59 = vshrl.u32 %v5143_v41, 16  ;;  %v473_v31 = vrot.slane %v6652_v32, 5  ;;  %6732 = vst [vmem:[#allocation11_spill] sm:$0xff] %v5209_v39  ;;  %v5212_v32 = vld [vmem:[%s4939_s9 + $0x54] sm:$0x3] }
  0x2e   : > { %6731 = vst [vmem:[#allocation10_spill] sm:$0xff] %v5185_v51  ;;  %v441_v22 = vrot.slane %v440_v57, 4  ;;  %4385 = vmatprep.mubr.msk.bf16.mxu1 %vm644_vm0, %v5185_v51  ;;  %v6657_v0 = vshll.u32 %v5143_v41, 16  ;;  %v5217_v5 = vld [vmem:[%s6637_s2 + $0x98] sm:$0xff]   ;;  %v6663_v24 = vshll.u32 %v5193_v61, 16  ;;  %v6743_v25 = vshll.u32 %v5212_v32, 16 }
  0x2f   : > { %4398 = vmatpush3.bf16.msra.mxu0 %v4774_v10  ;;  %v455_v52 = vrot.slane %v454_v53, 4  ;;  %v468_v12 = vor.u32 %v467_v38, %v464_v1  ;;  %v478_v14 = vrot.slane %v6653_v59, 4  ;;  %v6734_v10 = vshll.u32 %v5160_v58, 16  ;;  %v5313_v3 = vld [vmem:[%s4939_s9 + $0x78] sm:$0xf] }
  0x30   : > { %4399 = vmatprep.subr.bf16.mxu0 %v4778_v37  ;;  %v5221_v53 = vsel %vm5011_vm3, %v441_v22, %v445_v6  ;;  %v481_v1 = vrot.slane %v6657_v0, 5  ;;  %v6659_v59 = vshll.u32 %v5157_v55, 16  ;;  %v6737_v22 = vshrl.u32 %v5157_v55, 16 }
  0x31   : > { %6733 = vst [vmem:[#allocation12_spill] sm:$0xff] %v5221_v53  ;;  %v487_v38 = vrot.slane %v6734_v10, 5  ;;  %v5230_v57 = vcombine.low %v5084_v50, %v5221_v53  ;;  %v5234_v51 = vsel %vm5011_vm3, %v455_v52, %v459_v46  ;;  %v469_v62 = vrot.slane %v468_v12, 4  ;;  %v5249_v52 = vld [vmem:[%s4939_s9 + $0x60] sm:$0xf] }
  0x32   : > { %6736 = vst [vmem:[#allocation14_spill] sm:$0xff] %v5234_v51  ;;  %v492_v6 = vrot.slane %v6737_v22, 4  ;;  %v482_v0 = vor.u32 %v481_v1, %v478_v14  ;;  %v495_v10 = vrot.slane %v6659_v59, 5  ;;  %v5246_v50 = vcombine.low %v5203_v11, %v5209_v39 }
  0x33   : > { %6735 = vst [vmem:[#allocation13_spill] sm:$0xff] %v5230_v57  ;;  %4400 = vmatpush3.bf16.msra.mxu0 %v4778_v37  ;;  %4357 = vmatprep.mubr.msk.bf16.mxu0 %vm644_vm0, %v5230_v57  ;;  %v5255_v14 = vsel %vm5011_vm3, %v469_v62, %v473_v31  ;;  %v6664_v12 = vshrl.u32 %v5203_v11, 16  ;;  %v6665_v46 = vshll.u32 %v5203_v11, 16  ;;  %v501_v57 = vrot.slane %v6663_v24, 5  ;;  %v5270_v62 = vld [vmem:[%s4939_s9 + $0x68] sm:$0xf] }
  0x34   : > { %6739 = vst [vmem:[#allocation16_spill] sm:$0xff] %v5246_v50  ;;  %6740 = vst [vmem:[#allocation17_spill] sm:$0xff] %v5255_v14  ;;  %4441 = vmatprep.subr.bf16.mxu0 %v5217_v5  ;;  %v5263_v22 = vcombine.low %v5234_v51, %v5255_v14  ;;  %v483_v37 = vrot.slane %v482_v0, 4  ;;  %v496_v59 = vor.u32 %v495_v10, %v492_v6  ;;  %4386 = vmatmul.mubr.msk.bf16.gmra.mxu1 %vm644_vm0, %v5246_v50  ;;  %v5273_v31 = vld [vmem:[%s4939_s9 + $0x64] sm:$0x3] }
  0x35   : > { %6742 = vst [vmem:[#allocation19_spill] sm:$0xff] %v5270_v62  ;;  %v506_v1 = vrot.slane %v6664_v12, 4  ;;  %v509_v48 = vrot.slane %v6665_v46, 5  ;;  %v515_v0 = vrot.slane %v6743_v25, 5  ;;  %v6669_v6 = vshrl.u32 %v5209_v39, 16 }
  0x36   : > { %6741 = vst [vmem:[#allocation18_spill] sm:$0xff] %v5263_v22  ;;  %4358 = vmatmul.mubr.msk.bf16.gmra.mxu0 %vm644_vm0, %v5263_v22  ;;  %v5286_v10 = vsel %vm5011_vm3, %v483_v37, %v487_v38  ;;  %v497_v24 = vrot.slane %v496_v59, 4  ;;  %v6673_v12 = vshll.u32 %v5209_v39, 16  ;;  %v6672_v46 = vshll.u32 %v5239_v43, 16  ;;  %v5291_v50 = vld [vmem:[%s4939_s9 + $0x6c] sm:$0x3] }
  0x37   : > { %6744 = vst [vmem:[#allocation20_spill] sm:$0xff] %v5286_v10  ;;  %6745 = vst [vmem:[#allocation21_spill] sm:$0xff] %v5291_v50  ;;  %v510_v25 = vor.u32 %v509_v48, %v506_v1  ;;  %v520_v4 = vrot.slane %v6669_v6, 4  ;;  %v5297_v22 = vcombine.low %v5249_v52, %v5270_v62  ;;  %v5310_v6 = vld [vmem:[%s4939_s9 + $0x70] sm:$0xf]  ;;  %v6750_v53 = vshll.u32 %v5249_v52, 16 }
  0x38   : > { %v5302_v59 = vsel %vm5011_vm3, %v497_v24, %v501_v57  ;;  %v523_v37 = vrot.slane %v6673_v12, 5  ;;  %v529_v48 = vrot.slane %v6672_v46, 5  ;;  %v5316_v14 = vld [vmem:[%s4939_s9 + $0x74] sm:$0x3]  ;;  %v6749_v57 = vshrl.u32 %v5249_v52, 16 }
  0x39   : > { %6746 = vst [vmem:[#allocation22_spill] sm:$0xff] %v5297_v22  ;;  %6747 = vst [vmem:[#allocation23_spill] sm:$0xff] %v5302_v59  ;;  %v5320_v38 = vcombine.low %v5286_v10, %v5302_v59  ;;  %v511_v24 = vrot.slane %v510_v25, 4  ;;  %4389 = vmatprep.mubr.msk.bf16.mxu1 %vm644_vm0, %v5297_v22  ;;  %v6684_v12 = vshll.u32 %v5273_v31, 16  ;;  %v537_v51 = vrot.slane %v6750_v53, 5 }
  0x3a   : > { %v534_v46 = vrot.slane %v6749_v57, 4  ;;  %v524_v1 = vor.u32 %v523_v37, %v520_v4  ;;  %v6685_v43 = vshrl.u32 %v5270_v62, 16  ;;  %v6686_v22 = vshll.u32 %v5291_v50, 16  ;;  %v5349_v10 = vld [vmem:[%s4939_s9 + $0x7c] sm:$0x3] }
  0x3b   : > { %6748 = vst [vmem:[#allocation24_spill] sm:$0xff] %v5320_v38  ;;  %4361 = vmatprep.mubr.msk.bf16.mxu0 %vm644_vm0, %v5320_v38  ;;  %v5335_v25 = vsel %vm5011_vm3, %v511_v24, %v515_v0  ;;  %v543_v57 = vrot.slane %v6684_v12, 5  ;;  %v5342_v4 = vcombine.low %v5310_v6, %v5313_v3  ;;  %v6752_v38 = vshll.u32 %v5270_v62, 16 }
  0x3c   : > { %v525_v53 = vrot.slane %v524_v1, 4  ;;  %v538_v37 = vor.u32 %v537_v51, %v534_v46  ;;  %v548_v39 = vrot.slane %v6685_v43, 4  ;;  %v557_v0 = vrot.slane %v6686_v22, 5 }
  0x3d   : > { %6751 = vst [vmem:[#allocation25_spill] sm:$0xff] %v5342_v4  ;;  %v551_v59 = vrot.slane %v6752_v38, 5  ;;  %4390 = vmatmul.mubr.msk.bf16.gmra.mxu1 %vm644_vm0, %v5342_v4  ;;  %v6692_v24 = vshrl.u32 %v5310_v6, 16  ;;  %v6697_v12 = vshll.u32 %v5310_v6, 16  ;;  %v6693_v51 = vshll.u32 %v5316_v14, 16 }
  0x3e   : > { %v5360_v46 = vsel %vm5011_vm3, %v525_v53, %v529_v48  ;;  %v539_v1 = vrot.slane %v538_v37, 4  ;;  %v6695_v43 = vshrl.u32 %v5313_v3, 16  ;;  %v6694_v53 = vshll.u32 %v5313_v3, 16 }
  0x3f   : > { %v552_v38 = vor.u32 %v551_v59, %v548_v39  ;;  %v5365_v22 = vcombine.low %v5335_v25, %v5360_v46  ;;  %v562_v4 = vrot.slane %v6692_v24, 4  ;;  %v565_v50 = vrot.slane %v6697_v12, 5 }
  0x40   : > { %v571_v62 = vrot.slane %v6693_v51, 5  ;;  %v5375_v48 = vsel %vm5011_vm3, %v539_v1, %v543_v57  ;;  %v576_v59 = vrot.slane %v6695_v43, 4  ;;  %v6696_v24 = vshll.u32 %v5349_v10, 16 }
  0x41   : > { %6753 = vst [vmem:[#allocation26_spill] sm:$0xff] %v5365_v22  ;;  %v553_v39 = vrot.slane %v552_v38, 4  ;;  %4362 = vmatmul.mubr.msk.bf16.gmra.mxu0 %vm644_vm0, %v5365_v22  ;;  %v566_v37 = vor.u32 %v565_v50, %v562_v4  ;;  %v579_v57 = vrot.slane %v6694_v53, 5  ;;  %v1233_v1 = vor.u32 %v4975_v19, %v4973_v18 }
  0x42   : > { %v1239_v38 = vor.u32 %v5054_v28, %v5052_v27  ;;  %v1243_v18 = vor.u32 %v5058_v36, %v5056_v35  ;;  %v1249_v28 = vor.u32 %v5064_v42, %v5086_v33  ;;  %v972_v43 = vrot.slane %v4958_v13, 5 }
  0x43   : > { %v5385_v51 = vsel %vm5011_vm3, %v553_v39, %v557_v0  ;;  %v567_v0 = vrot.slane %v566_v37, 4  ;;  %v585_v39 = vrot.slane %v6696_v24, 5  ;;  %v580_v19 = vor.u32 %v579_v57, %v576_v59 }
  0x44   : > { %v5401_v4 = vcombine.low %v5375_v48, %v5385_v51  ;;  %v1234_v27 = vrot.slane %v1233_v1, 4  ;;  %v1244_v24 = vrot.slane %v1243_v18, 4  ;;  %v3794_v12 = vrot.slane %v4948_v8, 9 }
  0x45   : > { %v5418_v37 = vsel %vm5011_vm3, %v567_v0, %v571_v62  ;;  %v976_v22 = vrot.slane %v4962_v15, 5  ;;  %v581_v35 = vrot.slane %v580_v19, 4  ;;  %v6759_v42 = vrot.slane %v4945_v7, 9 }
  0x46   : > { %6756 = vst [vmem:[#allocation27_spill] sm:$0xff] %v5401_v4  ;;  %4365 = vmatprep.mubr.msk.bf16.mxu0 %vm644_vm0, %v5401_v4  ;;  %v1240_v36 = vsel %vm5405_vm9, %v1234_v27, %v1239_v38  ;;  %v6760_v33 = vor.u32 %v5090_v34, %v5095_v56  ;;  %v5438_v15 = vsel %vm5405_vm9, %v1244_v24, %v1249_v28  ;;  %v3795_v34 = vrot.slane %v4965_v16, 9  ;;  %v6819_v4 = vld [vmem:[#allocation12_spill] sm:$0xff] }
  0x47   : > { %v973_v13 = vsel %vm5395_vm8, %v6759_v42, %v972_v43  ;;  %v5442_v59 = vsel %vm5395_vm8, %v3794_v12, %v976_v22  ;;  %v6761_v7 = vor.u32 %v5106_v47, %v5125_v9  ;;  %v5453_v56 = vsel %vm5011_vm3, %v581_v35, %v585_v39  ;;  %v4783_v47 = vld [vmem:[%s6637_s2 + $0xb0] sm:$0xff]  }
  0x48   : > { %v5434_v62 = vsel %vm5405_vm9, %v5121_v2, %v6760_v33  ;;  %v3845_v2 = vcombine.low %v1240_v36, %v5438_v15  ;;  %v3817_v24 = vcombine.low %v973_v13, %v5442_v59  ;;  %v5465_v9 = vcombine.low %v5418_v37, %v5453_v56 }
  0x49   : > { %v1270_v43 = vsel %vm5405_vm9, %v5150_v30, %v6761_v7  ;;  %v6764_v30 = vrot.slane %v4986_v23, 5  ;;  %v3796_v57 = vrot.slane %v4978_v20, 9  ;;  %v6765_v1 = vshrl.u32 %v4981_v21, 16 }
  0x4a   : > { %v5458_v12 = vcombine.low %v5434_v62, %v1270_v43  ;;  %6763 = vst [vmem:[#allocation29_spill] sm:$0xff] %v5465_v9  ;;  %4425 = vmatprep.mubr.msk.bf16.mxu1 %vm644_vm0, %v3845_v2  ;;  %v6766_v0 = vshll.u32 %v4981_v21, 16  ;;  %v1275_v18 = vshrl.u32 %v5021_v49, 16  ;;  %v6767_v19 = vshll.u32 %v5021_v49, 16  ;;  %4366 = vmatmul.mubr.msk.bf16.gmra.mxu0 %vm644_vm0, %v5465_v9  ;;  %v6818_v9 = vld [vmem:[#allocation14_spill] sm:$0xff] }
  0x4b   : > { %v5471_v22 = vsel %vm5395_vm8, %v3795_v34, %v6764_v30  ;;  %v1271_v38 = vrot.slane %v6765_v1, 5  ;;  %v6768_v23 = vshrl.u32 %v5071_v44, 16  ;;  %v6769_v20 = vrot.slane %v4997_v26, 5  ;;  %4401 = vmatprep.mubr.msk.bf16.mxu0 %vm644_vm0, %v3817_v24  ;;  %v4785_v24 = vld [vmem:[%s6637_s2 + $0xa8] sm:$0xff]  }
  0x4c   : > { %6762 = vst [vmem:[#allocation28_spill] sm:$0xff] %v5458_v12  ;;  %v1272_v39 = vrot.slane %v6766_v0, 6  ;;  %v1278_v27 = vrot.slane %v6767_v19, 6  ;;  %4426 = vmatmul.mubr.msk.bf16.vlgmr.msra.gmra.mxu1 %vm644_vm0, %v5458_v12  ;;  %v6770_v36 = vshll.u32 %v5071_v44, 16  ;;  %v1285_v13 = vshrl.u32 %v5074_v45, 16 }
  0x4d   : > { %v1281_v28 = vrot.slane %v6768_v23, 5  ;;  %v985_v35 = vsel %vm5395_vm8, %v3796_v57, %v6769_v20  ;;  %v6771_v33 = vshll.u32 %v5074_v45, 16  ;;  %4466 = vmatpush3.bf16.msra.mxu1 %v5148_v29  ;;  %v1277_v26 = vrot.slane %v1275_v18, 5 }
  0x4e   : > { %v1282_v42 = vrot.slane %v6770_v36, 6  ;;  %v5499_v34 = vcombine.low %v5471_v22, %v985_v35  ;;  %v1273_v2 = vor.u32 %v1272_v39, %v1271_v38  ;;  %v3797_v30 = vrot.slane %v4981_v21, 9  ;;  %4467 = vmatprep.subr.bf16.mxu1 %v4783_v47 }
  0x4f   : > { %v1288_v7 = vrot.slane %v6771_v33, 6  ;;  %v1287_v1 = vrot.slane %v1285_v13, 5  ;;  %v988_v0 = vrot.slane %v5021_v49, 5  ;;  %v3798_v19 = vrot.slane %v5071_v44, 9  ;;  %v4782_v13 = vld [vmem:[%s6637_s2 + $0x90] sm:$0xff]  }
  0x50   : > { %6772 = vst [vmem:[#allocation30_spill] sm:$0xff] %v5499_v34  ;;  %v1283_v57 = vor.u32 %v1282_v42, %v1281_v28  ;;  %v1274_v23 = vrot.slane %v1273_v2, 4  ;;  %v1279_v20 = vor.u32 %v1278_v27, %v1277_v26  ;;  %v992_v36 = vrot.slane %v5074_v45, 5 }
  0x51   : > { %v6773_v29 = vshrl.u32 %v5093_v54, 16  ;;  %v1289_v21 = vor.u32 %v1288_v7, %v1287_v1  ;;  %v989_v18 = vsel %vm5395_vm8, %v3797_v30, %v988_v0  ;;  %v6774_v49 = vshll.u32 %v5093_v54, 16  ;;  %4468 = vmatpush3.bf16.msra.mxu1 %v4783_v47 }
  0x52   : > { %v1284_v39 = vrot.slane %v1283_v57, 4  ;;  %v1280_v28 = vsel %vm5405_vm9, %v1274_v23, %v1279_v20  ;;  %v5519_v42 = vsel %vm5395_vm8, %v3798_v19, %v992_v36  ;;  %v5521_v27 = vcombine.low %v985_v35, %v989_v18  ;;  %4469 = vmatprep.subr.bf16.mxu1 %v4785_v24  ;;  %4402 = vmatmul.mubr.msk.bf16.vlgmr.msra.gmra.mxu0 %vm644_vm0, %v5499_v34 }
  0x53   : > { %v1291_v38 = vrot.slane %v6773_v29, 5  ;;  %v1292_v44 = vrot.slane %v6774_v49, 6  ;;  %v1295_v45 = vshrl.u32 %v5119_v63, 16  ;;  %v5531_v7 = vcombine.low %v1270_v43, %v1280_v28  ;;  %v4787_v43 = vld [vmem:[%s6637_s2 + $0xa0] sm:$0xff]   ;;  %4442 = vmatpush3.bf16.msra.mxu0 %v5217_v5 }
  0x54   : > { %v5529_v33 = vsel %vm5405_vm9, %v1284_v39, %v1289_v21  ;;  %v5534_v2 = vcombine.low %v989_v18, %v5519_v42  ;;  %v6777_v57 = vshll.u32 %v5119_v63, 16  ;;  %v6778_v47 = vshrl.u32 %v5101_v60, 16  ;;  %4443 = vmatprep.subr.bf16.mxu0 %v4782_v13 }
  0x55   : > { %v1293_v26 = vor.u32 %v1292_v44, %v1291_v38  ;;  %v5537_v35 = vcombine.low %v1280_v28, %v5529_v33  ;;  %v1297_v30 = vrot.slane %v1295_v45, 5  ;;  %v6779_v23 = vshll.u32 %v5101_v60, 16  ;;  %v4784_v44 = vld [vmem:[%s6637_s2 + $0x88] sm:$0xff]   ;;  %4470 = vmatpush3.bf16.msra.mxu1 %v4785_v24 }
  0x56   : > { %6775 = vst [vmem:[#allocation31_spill] sm:$0xff] %v5534_v2  ;;  %v1298_v1 = vrot.slane %v6777_v57, 6  ;;  %v1301_v0 = vrot.slane %v6778_v47, 5  ;;  %v1305_v36 = vshrl.u32 %v5128_v17, 16  ;;  %v6780_v29 = vshll.u32 %v5128_v17, 16  ;;  %4405 = vmatprep.mubr.msk.bf16.mxu0 %vm644_vm0, %v5534_v2  ;;  %4471 = vmatprep.subr.bf16.mxu1 %v4787_v43 }
  0x57   : > { %6776 = vst [vmem:[#allocation32_spill] sm:$0xff] %v5537_v35  ;;  %v1294_v19 = vrot.slane %v1293_v26, 4  ;;  %v1302_v20 = vrot.slane %v6779_v23, 6  ;;  %4429 = vmatprep.mubr.msk.bf16.mxu1 %vm644_vm0, %v5537_v35  ;;  %v3799_v21 = vrot.slane %v5093_v54, 9  ;;  %v996_v18 = vrot.slane %v5119_v63, 5  ;;  %v5570_v54 = vld [vmem:[%s6637_s2 + $0xf8] sm:$0xff]   ;;  %4444 = vmatpush3.bf16.msra.mxu0 %v4782_v13 }
  0x58   : > { %v1308_v38 = vrot.slane %v6780_v29, 6  ;;  %v1299_v39 = vor.u32 %v1298_v1, %v1297_v30  ;;  %v3800_v49 = vrot.slane %v5101_v60, 9  ;;  %v1307_v45 = vrot.slane %v1305_v36, 5  ;;  %4445 = vmatprep.subr.bf16.mxu0 %v4784_v44  ;;  %v4786_v13 = vld [vmem:[%s6637_s2 + $0x80] sm:$0xff]  }
  0x59   : > { %v1303_v28 = vor.u32 %v1302_v20, %v1301_v0  ;;  %v1000_v5 = vrot.slane %v5128_v17, 5  ;;  %v6781_v26 = vshrl.u32 %v5143_v41, 16  ;;  %v5578_v63 = vsel %vm5395_vm8, %v3799_v21, %v996_v18  ;;  %4472 = vmatpush3.bf16.msra.mxu1 %v4787_v43 }
  0x5a   : > { %v5574_v60 = vsel %vm5405_vm9, %v1294_v19, %v1299_v39  ;;  %v6782_v57 = vshll.u32 %v5143_v41, 16  ;;  %v1315_v17 = vshrl.u32 %v5160_v58, 16  ;;  %v1309_v0 = vor.u32 %v1308_v38, %v1307_v45  ;;  %4513 = vmatprep.subr.bf16.mxu1 %v5570_v54 }
  0x5b   : > { %v1311_v30 = vrot.slane %v6781_v26, 5  ;;  %v1304_v47 = vrot.slane %v1303_v28, 4  ;;  %v5585_v23 = vsel %vm5395_vm8, %v3800_v49, %v1000_v5  ;;  %v6783_v20 = vshll.u32 %v5160_v58, 16  ;;  %4446 = vmatpush3.bf16.msra.mxu0 %v4784_v44 }
  0x5c   : > { %v1312_v1 = vrot.slane %v6782_v57, 6  ;;  %v5591_v36 = vcombine.low %v5578_v63, %v5585_v23  ;;  %v1317_v39 = vrot.slane %v1315_v17, 5  ;;  %v6785_v21 = vshrl.u32 %v5157_v55, 16  ;;  %4447 = vmatprep.subr.bf16.mxu0 %v4786_v13 }
  0x5d   : > { %v1318_v19 = vrot.slane %v6783_v20, 6  ;;  %v5597_v38 = vsel %vm5405_vm9, %v1304_v47, %v1309_v0  ;;  %v6786_v18 = vshll.u32 %v5157_v55, 16  ;;  %v1325_v28 = vshrl.u32 %v5193_v61, 16 }
  0x5e   : > { %6784 = vst [vmem:[#allocation33_spill] sm:$0xff] %v5591_v36  ;;  %v1313_v29 = vor.u32 %v1312_v1, %v1311_v30  ;;  %v1321_v24 = vrot.slane %v6785_v21, 5  ;;  %v6787_v45 = vshll.u32 %v5193_v61, 16  ;;  %v5609_v26 = vcombine.low %v5574_v60, %v5597_v38  ;;  %4406 = vmatmul.mubr.msk.bf16.gmra.mxu0 %vm644_vm0, %v5591_v36 }
  0x5f   : > { %v1322_v49 = vrot.slane %v6786_v18, 6  ;;  %v1319_v57 = vor.u32 %v1318_v19, %v1317_v39  ;;  %v3801_v1 = vrot.slane %v5143_v41, 9  ;;  %v1327_v47 = vrot.slane %v1325_v28, 5  ;;  %4448 = vmatpush3.bf16.msra.mxu0 %v4786_v13 }
  0x60   : > { %v1328_v5 = vrot.slane %v6787_v45, 6  ;;  %6788 = vst [vmem:[#allocation34_spill] sm:$0xff] %v5609_v26  ;;  %v1314_v30 = vrot.slane %v1313_v29, 4  ;;  %v1004_v0 = vrot.slane %v5160_v58, 5  ;;  %v3802_v20 = vrot.slane %v5157_v55, 9  ;;  %4430 = vmatmul.mubr.msk.bf16.gmra.mxu1 %vm644_vm0, %v5609_v26  ;;  %v5631_v58 = vld [vmem:[%s6637_s2 + $0xd8] sm:$0xff]  }
  0x61   : > { %v1323_v17 = vor.u32 %v1322_v49, %v1321_v24  ;;  %v1008_v43 = vrot.slane %v5193_v61, 5  ;;  %v6789_v29 = vshrl.u32 %v5203_v11, 16  ;;  %v6790_v21 = vshll.u32 %v5203_v11, 16  ;;  %4489 = vmatprep.subr.bf16.mxu0 %v5631_v58 }
  0x62   : > { %v5621_v19 = vsel %vm5405_vm9, %v1314_v30, %v1319_v57  ;;  %v1329_v49 = vor.u32 %v1328_v5, %v1327_v47  ;;  %v5635_v28 = vsel %vm5395_vm8, %v3801_v1, %v1004_v0  ;;  %v1335_v61 = vshrl.u32 %v5212_v32, 16 }
  0x63   : > { %v1331_v39 = vrot.slane %v6789_v29, 5  ;;  %v1332_v24 = vrot.slane %v6790_v21, 6  ;;  %v1324_v18 = vrot.slane %v1323_v17, 4  ;;  %v5640_v45 = vsel %vm5395_vm8, %v3802_v20, %v1008_v43  ;;  %v6792_v29 = vld [vmem:[#allocation11_spill] sm:$0xff] }
  0x64   : > { %v6791_v44 = vshll.u32 %v5212_v32, 16  ;;  %v6793_v21 = vshrl.u32 %v6792_v29, 16  ;;  %v5652_v1 = vcombine.low %v5635_v28, %v5640_v45  ;;  %v1337_v17 = vrot.slane %v1335_v61, 5 }
  0x65   : > { %v1333_v30 = vor.u32 %v1332_v24, %v1331_v39  ;;  %v5648_v5 = vsel %vm5405_vm9, %v1324_v18, %v1329_v49  ;;  %v6795_v47 = vshll.u32 %v6792_v29, 16  ;;  %v6797_v39 = vld [vmem:[#allocation15_spill] sm:$0xff]  ;;  %v3803_v61 = vrot.slane %v5203_v11, 9 }
  0x66   : > { %v1338_v57 = vrot.slane %v6791_v44, 6  ;;  %v1341_v26 = vrot.slane %v6793_v21, 5  ;;  %6794 = vst [vmem:[#allocation11_spill] sm:$0xff] %v5652_v1  ;;  %v5658_v20 = vcombine.low %v5621_v19, %v5648_v5  ;;  %v1345_v24 = vshrl.u32 %v6797_v39, 16  ;;  %4409 = vmatprep.mubr.msk.bf16.mxu0 %vm644_vm0, %v5652_v1 }
  0x67   : > { %v1342_v0 = vrot.slane %v6795_v47, 6  ;;  %v1334_v43 = vrot.slane %v1333_v30, 4  ;;  %v6798_v44 = vshll.u32 %v6797_v39, 16  ;;  %v1012_v47 = vrot.slane %v5212_v32, 5 }
  0x68   : > { %6796 = vst [vmem:[#allocation35_spill] sm:$0xff] %v5658_v20  ;;  %v1339_v18 = vor.u32 %v1338_v57, %v1337_v17  ;;  %4433 = vmatprep.mubr.msk.bf16.mxu1 %vm644_vm0, %v5658_v20  ;;  %v1347_v30 = vrot.slane %v1345_v24, 5  ;;  %v3804_v35 = vrot.slane %v6792_v29, 9  ;;  %v6799_v13 = vshrl.u32 %v5249_v52, 16 }
  0x69   : > { %v1348_v21 = vrot.slane %v6798_v44, 6  ;;  %v1343_v49 = vor.u32 %v1342_v0, %v1341_v26  ;;  %v1016_v44 = vrot.slane %v6797_v39, 5  ;;  %v5680_v32 = vsel %vm5395_vm8, %v3803_v61, %v1012_v47 }
  0x6a   : > { %v1351_v36 = vrot.slane %v6799_v13, 5  ;;  %v5676_v26 = vsel %vm5405_vm9, %v1334_v43, %v1339_v18  ;;  %v6800_v17 = vshll.u32 %v5249_v52, 16  ;;  %v1355_v39 = vshrl.u32 %v5273_v31, 16 }
  0x6b   : > { %v1344_v57 = vrot.slane %v1343_v49, 4  ;;  %v1349_v24 = vor.u32 %v1348_v21, %v1347_v30  ;;  %v5686_v29 = vsel %vm5395_vm8, %v3804_v35, %v1016_v44  ;;  %v6801_v13 = vshll.u32 %v5273_v31, 16  ;;  %v6803_v49 = vld [vmem:[#allocation19_spill] sm:$0xff] }
  0x6c   : > { %v1352_v0 = vrot.slane %v6800_v17, 6  ;;  %v5693_v43 = vcombine.low %v5680_v32, %v5686_v29  ;;  %v6804_v61 = vshrl.u32 %v6803_v49, 16  ;;  %v6805_v21 = vshll.u32 %v6803_v49, 16  ;;  %v6806_v17 = vld [vmem:[#allocation21_spill] sm:$0xff] }
  0x6d   : > { %v1358_v20 = vrot.slane %v6801_v13, 6  ;;  %v5701_v35 = vsel %vm5405_vm9, %v1344_v57, %v1349_v24  ;;  %v1357_v44 = vrot.slane %v1355_v39, 5  ;;  %v1365_v1 = vshrl.u32 %v6806_v17, 16 }
  0x6e   : > { %6802 = vst [vmem:[#allocation15_spill] sm:$0xff] %v5693_v43  ;;  %v1353_v18 = vor.u32 %v1352_v0, %v1351_v36  ;;  %v1361_v47 = vrot.slane %v6804_v61, 5  ;;  %v1362_v30 = vrot.slane %v6805_v21, 6  ;;  %v6807_v13 = vshll.u32 %v6806_v17, 16  ;;  %4410 = vmatmul.mubr.msk.bf16.gmra.mxu0 %vm644_vm0, %v5693_v43 }
  0x6f   : > { %v5708_v36 = vcombine.low %v5676_v26, %v5701_v35  ;;  %v3805_v21 = vrot.slane %v5249_v52, 9  ;;  %v1359_v12 = vor.u32 %v1358_v20, %v1357_v44  ;;  %v1367_v57 = vrot.slane %v1365_v1, 5 }
  0x70   : > { %v1368_v2 = vrot.slane %v6807_v13, 6  ;;  %v1354_v0 = vrot.slane %v1353_v18, 4  ;;  %v1363_v61 = vor.u32 %v1362_v30, %v1361_v47  ;;  %v1020_v24 = vrot.slane %v5273_v31, 5 }
  0x71   : > { %6808 = vst [vmem:[#allocation19_spill] sm:$0xff] %v5708_v36  ;;  %v3806_v39 = vrot.slane %v6803_v49, 9  ;;  %4434 = vmatmul.mubr.msk.bf16.gmra.mxu1 %vm644_vm0, %v5708_v36  ;;  %v1024_v34 = vrot.slane %v6806_v17, 5  ;;  %v6809_v43 = vshrl.u32 %v5310_v6, 16  ;;  %v6810_v47 = vshll.u32 %v5310_v6, 16 }
  0x72   : > { %v1364_v13 = vrot.slane %v1363_v61, 4  ;;  %v5726_v1 = vsel %vm5405_vm9, %v1354_v0, %v1359_v12  ;;  %v1369_v31 = vor.u32 %v1368_v2, %v1367_v57  ;;  %v5730_v20 = vsel %vm5395_vm8, %v3805_v21, %v1020_v24 }
  0x73   : > { %v1371_v18 = vrot.slane %v6809_v43, 5  ;;  %v1372_v52 = vrot.slane %v6810_v47, 6  ;;  %v1375_v30 = vshrl.u32 %v5316_v14, 16  ;;  %v5735_v44 = vsel %vm5395_vm8, %v3806_v39, %v1024_v34 }
  0x74   : > { %v6811_v43 = vshll.u32 %v5316_v14, 16  ;;  %v6812_v47 = vshrl.u32 %v5313_v3, 16  ;;  %v5743_v12 = vsel %vm5405_vm9, %v1364_v13, %v1369_v31  ;;  %v5747_v2 = vcombine.low %v5730_v20, %v5735_v44 }
  0x75   : > { %v1373_v17 = vor.u32 %v1372_v52, %v1371_v18  ;;  %6813 = vst [vmem:[#allocation21_spill] sm:$0xff] %v5743_v12  ;;  %v1377_v0 = vrot.slane %v1375_v30, 5  ;;  %v6815_v21 = vshll.u32 %v5313_v3, 16  ;;  %v5758_v57 = vcombine.low %v5726_v1, %v5743_v12  ;;  %v5776_v12 = vld [vmem:[%s5754_s13] sm:$0xf] }
  0x76   : > { %v1378_v61 = vrot.slane %v6811_v43, 6  ;;  %v1381_v36 = vrot.slane %v6812_v47, 5  ;;  %6814 = vst [vmem:[#allocation36_spill] sm:$0xff] %v5747_v2  ;;  %v1385_v39 = vshrl.u32 %v5349_v10, 16  ;;  %v6817_v13 = vshll.u32 %v5349_v10, 16  ;;  %4413 = vmatprep.mubr.msk.bf16.mxu0 %vm644_vm0, %v5747_v2  ;;  %6821 = vst [vmem:[#allocation12_spill] sm:$0xff] %v5776_v12 }
  0x77   : > { %v1382_v34 = vrot.slane %v6815_v21, 6  ;;  %6816 = vst [vmem:[#allocation37_spill] sm:$0xff] %v5758_v57  ;;  %v1374_v24 = vrot.slane %v1373_v17, 4  ;;  %v3807_v30 = vrot.slane %v5310_v6, 9  ;;  %v1028_v43 = vrot.slane %v5316_v14, 5  ;;  %4437 = vmatprep.mubr.msk.bf16.mxu1 %vm644_vm0, %v5758_v57  ;;  %v6823_v57 = vld [vmem:[#allocation17_spill] sm:$0xff] }
  0x78   : > { %v1388_v18 = vrot.slane %v6817_v13, 6  ;;  %v1379_v52 = vor.u32 %v1378_v61, %v1377_v0  ;;  %v1387_v47 = vrot.slane %v1385_v39, 5  ;;  %v3808_v17 = vrot.slane %v5313_v3, 9  ;;  %v347_v14 = vld [vmem:[%s5754_s13 + $0x4] sm:$0x3]  ;;  %v6822_v39 = vld [vmem:[#allocation20_spill] sm:$0xff] }
  0x79   : > { %v1383_v31 = vor.u32 %v1382_v34, %v1381_v36  ;;  %v1032_v21 = vrot.slane %v5349_v10, 5  ;;  %v5773_v13 = vcombine.low %v6819_v4, %v6818_v9  ;;  %v5780_v36 = vsel %vm5395_vm8, %v3807_v30, %v1028_v43 }
  0x7a   : > { %v5785_v0 = vsel %vm5405_vm9, %v1374_v24, %v1379_v52  ;;  %v1389_v34 = vor.u32 %v1388_v18, %v1387_v47  ;;  %v5791_v4 = vcombine.low %v6823_v57, %v6822_v39  ;;  %v5802_v43 = vcombine.low %v5360_v46, %v5375_v48  ;;  %v4838_v39 = vld [vmem:[%s4939_s9 + $0x30] sm:$0xf] }
  0x7b   : > { %6820 = vst [vmem:[#allocation14_spill] sm:$0xff] %v5773_v13  ;;  %v1384_v61 = vrot.slane %v1383_v31, 4  ;;  %v1033_v10 = vsel %vm5395_vm8, %v3808_v17, %v1032_v21  ;;  %v6825_v31 = vld [vmem:[#allocation23_spill] sm:$0xff]  ;;  %v5810_v18 = vcombine.low %v5385_v51, %v5418_v37  ;;  %v5814_v57 = vcombine.low %v6803_v49, %v5310_v6  ;;  %v6828_v17 = vld [vmem:[#allocation4_spill] sm:$0xff]  ;;  %v6829_v21 = vld [vmem:[#allocation5_spill] sm:$0xff] }
  0x7c   : > { %v5794_v9 = vcombine.low %v5780_v36, %v1033_v10  ;;  %v5798_v30 = vcombine.low %v6825_v31, %v5335_v25  ;;  %v1766_v46 = vshrl.u32 %v5776_v12, 16  ;;  %v1769_v48 = vshll.u32 %v5776_v12, 16 }
  0x7d   : > { %v5806_v24 = vsel %vm5405_vm9, %v1384_v61, %v1389_v34  ;;  %v1775_v52 = vshll.u32 %v347_v14, 16  ;;  %v6827_v51 = vcombine.low %v4948_v8, %v4965_v16  ;;  %v5830_v6 = vcombine.low %v5313_v3, %v5776_v12 }
  0x7e   : > { %6824 = vst [vmem:[#allocation20_spill] sm:$0xff] %v5794_v9  ;;  %v5818_v25 = vcombine.low %v5785_v0, %v5806_v24  ;;  %4414 = vmatmul.mubr.msk.bf16.gmra.mxu0 %vm644_vm0, %v5794_v9  ;;  %v5838_v47 = vcombine.low %v5529_v33, %v5574_v60  ;;  %v1768_v8 = vrot.slane %v1766_v46, 4  ;;  %v1771_v16 = vrot.slane %v1769_v48, 5  ;;  %v4837_v60 = vld [vmem:[%s4939_s9 + $0x28] sm:$0xf]  ;;  %v4801_v9 = vld [vmem:[%s6637_s2 + $0xc0] sm:$0xff]  }
  0x7f   : > { %4449 = vmatprep.mubr.msk.bf16.mxu0 %vm644_vm0, %v6827_v51  ;;  %v5844_v3 = vcombine.low %v5519_v42, %v5578_v63  ;;  %v6830_v61 = vcombine.low %v6828_v17, %v6829_v21  ;;  %v5852_v34 = vcombine.low %v5597_v38, %v5621_v19  ;;  %v5856_v33 = vcombine.low %v5585_v23, %v5635_v28  ;;  %v4839_v42 = vld [vmem:[%s4939_s9 + $0x38] sm:$0xf]  ;;  %v5867_v21 = vld [vmem:[%s5754_s13 + $0x8] sm:$0xf]  ;;  %v5874_v28 = vld [vmem:[%s5754_s13 + $0xc] sm:$0x3] }
  0x80   : > { %6826 = vst [vmem:[#allocation17_spill] sm:$0xff] %v5818_v25  ;;  %4438 = vmatmul.mubr.msk.bf16.gmra.mxu1 %vm644_vm0, %v5818_v25  ;;  %v5860_v31 = vcombine.low %v4837_v60, %v4838_v39  ;;  %v5864_v63 = vcombine.low %v4839_v42, %v5143_v41  ;;  %v1772_v51 = vor.u32 %v1771_v16, %v1768_v8  ;;  %v1777_v17 = vrot.slane %v1775_v52, 5  ;;  %v4793_v60 = vld [vmem:[%s6637_s2 + $0xd0] sm:$0xff]  }
  0x81   : > { %4473 = vmatprep.mubr.msk.bf16.mxu1 %vm644_vm0, %v6830_v61  ;;  %v5871_v38 = vcombine.low %v5157_v55, %v5203_v11  ;;  %v2142_v19 = vrot.slane %v1766_v46, 5  ;;  %v2143_v61 = vrot.slane %v1769_v48, 6  ;;  %v2146_v23 = vshrl.u32 %v347_v14, 16  ;;  %v6832_v46 = vld [vmem:[#allocation3_spill] sm:$0xff]  ;;  %v4795_v48 = vld [vmem:[%s6637_s2 + $0xf0] sm:$0xff]  }
  0x82   : > { %6831 = vst [vmem:[#allocation23_spill] sm:$0xff] %v5860_v31  ;;  %v1773_v39 = vrot.slane %v1772_v51, 4  ;;  %v2149_v41 = vrot.slane %v1775_v52, 6  ;;  %v3921_v8 = vrot.slane %v5776_v12, 9  ;;  %v1961_v16 = vrot.slane %v347_v14, 5 }
  0x83   : > { %v2144_v42 = vor.u32 %v2143_v61, %v2142_v19  ;;  %v2148_v37 = vrot.slane %v2146_v23, 5  ;;  %v2484_v11 = vshrl.u32 %v5867_v21, 16  ;;  %v2487_v55 = vshll.u32 %v5867_v21, 16  ;;  %v6834_v19 = vld [vmem:[#allocation7_spill] sm:$0xff] }
  0x84   : > { %v5889_v52 = vsel %vm5011_vm3, %v1773_v39, %v1777_v17  ;;  %v5893_v14 = vsel %vm5395_vm8, %v3921_v8, %v1961_v16  ;;  %v2493_v51 = vshll.u32 %v5874_v28, 16  ;;  %v4797_v17 = vld [vmem:[%s6637_s2 + $0xc8] sm:$0xff]   ;;  %v5912_v16 = vld [vmem:[%s5754_s13 + $0x10] sm:$0xf]  ;;  %v6837_v40 = vcombine.low %v5438_v15, %v5434_v62 }
  0x85   : > { %v5906_v61 = vcombine.low %v5453_v56, %v5889_v52  ;;  %v2145_v23 = vrot.slane %v2144_v42, 4  ;;  %v2150_v39 = vor.u32 %v2149_v41, %v2148_v37  ;;  %v5909_v8 = vcombine.low %v1033_v10, %v5893_v14  ;;  %v4799_v42 = vld [vmem:[%s6637_s2 + $0xe8] sm:$0xff]  }
  0x86   : > { %4450 = vmatmul.mubr.msk.bf16.vlgmr.msra.gmra.mxu0 %vm644_vm0, %v6832_v46  ;;  %v2489_v49 = vrot.slane %v2487_v55, 5  ;;  %v5917_v46 = vld [vmem:[%s5754_s13 + $0x14] sm:$0x3]  ;;  %v2804_v25 = vrot.slane %v2484_v11, 5  ;;  %v2805_v10 = vrot.slane %v2487_v55, 6  ;;  %v2808_v37 = vshrl.u32 %v5874_v28, 16 }
  0x87   : > { %4490 = vmatpush3.bf16.msra.mxu0 %v5631_v58  ;;  %4453 = vmatprep.mubr.msk.bf16.mxu0 %vm644_vm0, %v5860_v31  ;;  %6833 = vst [vmem:[#allocation4_spill] sm:$0xff] %v5909_v8  ;;  %v2486_v58 = vrot.slane %v2484_v11, 4  ;;  %v2495_v31 = vrot.slane %v2493_v51, 5  ;;  %v5924_v56 = vsel %vm5405_vm9, %v2145_v23, %v2150_v39  ;;  %v2811_v41 = vrot.slane %v2493_v51, 6  ;;  %v4807_v62 = vld [vmem:[%s6637_s2 + $0x108] sm:$0xff]  }
  0x88   : > { %4474 = vmatmul.mubr.msk.bf16.vlgmr.msra.gmra.mxu1 %vm644_vm0, %v6834_v19  ;;  %4491 = vmatprep.subr.bf16.mxu0 %v4793_v60  ;;  %v5932_v11 = vcombine.low %v5806_v24, %v5924_v56  ;;  %v3121_v19 = vshll.u32 %v5912_v16, 16  ;;  %v2806_v23 = vor.u32 %v2805_v10, %v2804_v25  ;;  %v2810_v55 = vrot.slane %v2808_v37, 5  ;;  %v4802_v10 = vld [vmem:[%s6637_s2 + $0xe0] sm:$0xff]   ;;  %v4808_v15 = vld [vmem:[%s6637_s2 + $0x128] sm:$0xff]  }
  0x89   : > { %4514 = vmatpush3.bf16.msra.mxu1 %v5570_v54  ;;  %4477 = vmatprep.mubr.msk.bf16.mxu1 %vm644_vm0, %v5773_v13  ;;  %v2490_v54 = vor.u32 %v2489_v49, %v2486_v58  ;;  %v3118_v13 = vshrl.u32 %v5912_v16, 16  ;;  %v3127_v39 = vshll.u32 %v5917_v46, 16  ;;  %v3442_v51 = vshrl.u32 %v5917_v46, 16 }
  0x8a   : > { %4515 = vmatprep.subr.bf16.mxu1 %v4795_v48  ;;  %6835 = vst [vmem:[#allocation5_spill] sm:$0xff] %v5932_v11  ;;  %v3439_v12 = vrot.slane %v3121_v19, 6  ;;  %v4020_v49 = vrot.slane %v5867_v21, 9  ;;  %v2807_v58 = vrot.slane %v2806_v23, 4  ;;  %v2812_v11 = vor.u32 %v2811_v41, %v2810_v55 }
  0x8b   : > { %4492 = vmatpush3.bf16.msra.mxu0 %v4793_v60  ;;  %v2491_v2 = vrot.slane %v2490_v54, 4  ;;  %v3438_v24 = vrot.slane %v3118_v13, 5  ;;  %v3444_v60 = vrot.slane %v3442_v51, 5  ;;  %v3445_v25 = vrot.slane %v3127_v39, 6  ;;  %v4840_v51 = vld [vmem:[%s4939_s9 + $0x58] sm:$0xf] }
  0x8c   : > { %4493 = vmatprep.subr.bf16.mxu0 %v4797_v17  ;;  %v2651_v8 = vrot.slane %v5874_v28, 5  ;;  %v5959_v23 = vsel %vm5405_vm9, %v2807_v58, %v2812_v11  ;;  %v3123_v53 = vrot.slane %v3121_v19, 5  ;;  %v4071_v19 = vcombine.low %v5867_v21, %v5912_v16 }
  0x8d   : > { %4516 = vmatpush3.bf16.msra.mxu1 %v4795_v48  ;;  %v5949_v37 = vsel %vm5011_vm3, %v2491_v2, %v2495_v31  ;;  %v3440_v54 = vor.u32 %v3439_v12, %v3438_v24  ;;  %v4105_v48 = vrot.slane %v5912_v16, 9  ;;  %v3446_v2 = vor.u32 %v3445_v25, %v3444_v60  ;;  %v4803_v31 = vld [vmem:[%s6637_s2 + $0x118] sm:$0xff]   ;;  %v4841_v24 = vld [vmem:[%s4939_s9 + $0x60] sm:$0xf] }
  0x8e   : > { %4454 = vmatmul.mubr.msk.bf16.gmra.mxu0 %vm644_vm0, %v5864_v63  ;;  %4517 = vmatprep.subr.bf16.mxu1 %v4799_v42  ;;  %v4007_v41 = vcombine.low %v5889_v52, %v5949_v37  ;;  %v3285_v12 = vrot.slane %v5917_v46, 5  ;;  %v4050_v28 = vcombine.low %v5924_v56, %v5959_v23  ;;  %v5971_v55 = vsel %vm5395_vm8, %v4020_v49, %v2651_v8  ;;  %v4804_v8 = vld [vmem:[%s6637_s2 + $0x138] sm:$0xff]   ;;  %v6861_v52 = vld [vmem:[#allocation32_spill] sm:$0xff] }
  0x8f   : > { %4457 = vmatprep.mubr.msk.bf16.mxu0 %vm644_vm0, %v5871_v38  ;;  %4494 = vmatpush3.bf16.msra.mxu0 %v4797_v17  ;;  %v3441_v17 = vrot.slane %v3440_v54, 4  ;;  %v4029_v46 = vcombine.low %v5893_v14, %v5971_v55  ;;  %v5983_v58 = vcombine.low %v4840_v51, %v4841_v24  ;;  %v3120_v60 = vrot.slane %v3118_v13, 4  ;;  %v6838_v51 = vld [vmem:[#allocation21_spill] sm:$0xff] }
  0x90   : > { %4478 = vmatmul.mubr.msk.bf16.gmra.mxu1 %vm644_vm0, %v5791_v4  ;;  %4495 = vmatprep.subr.bf16.mxu0 %v4801_v9  ;;  %v5979_v11 = vsel %vm5395_vm8, %v4105_v48, %v3285_v12  ;;  %v3129_v25 = vrot.slane %v3127_v39, 5  ;;  %v6836_v13 = vcombine.low %v5442_v59, %v5471_v22  ;;  %v4805_v39 = vld [vmem:[%s6637_s2 + $0x110] sm:$0xff]   ;;  %v6045_v22 = vcombine.low %v5640_v45, %v5680_v32  ;;  %v4811_v45 = vld [vmem:[%s6637_s2 + $0x158] sm:$0xff]  }
  0x91   : > { %4481 = vmatprep.mubr.msk.bf16.mxu1 %vm644_vm0, %v5798_v30  ;;  %4518 = vmatpush3.bf16.msra.mxu1 %v4799_v42  ;;  %v5990_v49 = vsel %vm5405_vm9, %v3441_v17, %v3446_v2  ;;  %v4114_v42 = vcombine.low %v5971_v55, %v5979_v11  ;;  %v4806_v59 = vld [vmem:[%s6637_s2 + $0x130] sm:$0xff]   ;;  %v4809_v2 = vld [vmem:[%s6637_s2 + $0x100] sm:$0xff]   ;;  %v6052_v12 = vcombine.low %v5648_v5, %v5676_v26  ;;  %v4812_v26 = vld [vmem:[%s6637_s2 + $0x178] sm:$0xff]  }
  0x92   : > { %4519 = vmatprep.subr.bf16.mxu1 %v4802_v10  ;;  %v4135_v50 = vcombine.low %v5959_v23, %v5990_v49  ;;  %v6070_v5 = vcombine.low %v5686_v29, %v5730_v20  ;;  %v6077_v32 = vcombine.low %v5735_v44, %v5780_v36  ;;  %v6081_v17 = vcombine.low %v5701_v35, %v5726_v1  ;;  %v6839_v29 = vld [vmem:[#allocation4_spill] sm:$0xff]  ;;  %v6840_v35 = vld [vmem:[#allocation2_spill] sm:$0xff]  ;;  %v6841_v1 = vld [vmem:[#allocation5_spill] sm:$0xff] }
  0x93   : > { %4496 = vmatpush3.bf16.msra.mxu0 %v4801_v9  ;;  %v3124_v9 = vor.u32 %v3123_v53, %v3120_v60  ;;  %v6085_v24 = vcombine.low %v6838_v51, %v5785_v0  ;;  %v6842_v20 = vld [vmem:[#allocation6_spill] sm:$0xff]  ;;  %v4813_v44 = vld [vmem:[%s6637_s2 + $0x150] sm:$0xff]   ;;  %v6845_v60 = vld [vmem:[#allocation13_spill] sm:$0xff] }
  0x94   : > { %4537 = vmatprep.subr.bf16.mxu0 %v4803_v31  ;;  %v6843_v36 = vld [vmem:[#allocation8_spill] sm:$0xff]  ;;  %v4815_v53 = vld [vmem:[%s6637_s2 + $0x148] sm:$0xff]  }
  0x95   : > { %4520 = vmatpush3.bf16.msra.mxu1 %v4802_v10  ;;  %v3125_v54 = vrot.slane %v3124_v9, 4  ;;  %v4814_v0 = vld [vmem:[%s6637_s2 + $0x170] sm:$0xff]   ;;  %v6846_v9 = vld [vmem:[#allocation18_spill] sm:$0xff] }
  0x96   : > { %4458 = vmatmul.mubr.msk.bf16.gmra.mxu0 %vm644_vm0, %v5983_v58  ;;  %4561 = vmatprep.subr.bf16.mxu1 %v4804_v8  ;;  %v6855_v51 = vld [vmem:[#allocation12_spill] sm:$0xff] }
  0x97   : > { %4461 = vmatprep.mubr.msk.bf16.mxu0 %vm644_vm0, %v5814_v57  ;;  %v3130_v10 = vsel %vm5011_vm3, %v3125_v54, %v3129_v25  ;;  %v4816_v25 = vld [vmem:[%s6637_s2 + $0x168] sm:$0xff]   ;;  %v4817_v54 = vld [vmem:[%s6637_s2 + $0x140] sm:$0xff]  }
  0x98   : > { %4482 = vmatmul.mubr.msk.bf16.gmra.mxu1 %vm644_vm0, %v5802_v43  ;;  %v6009_v48 = vcombine.low %v5949_v37, %v3130_v10  ;;  %v6847_v10 = vld [vmem:[#allocation10_spill] sm:$0xff]  ;;  %v4824_v37 = vld [vmem:[%s6637_s2 + $0x188] sm:$0xff]  }
  0x99   : > { %4485 = vmatprep.mubr.msk.bf16.mxu1 %vm644_vm0, %v5810_v18 }
  0x9e   : > { %4462 = vmatmul.mubr.msk.bf16.gmra.mxu0 %vm644_vm0, %v5830_v6 }
  0x9f   : > { %4497 = vmatprep.mubr.msk.bf16.mxu0 %vm644_vm0, %v6836_v13  ;;  %v4819_v13 = vld [vmem:[%s6637_s2 + $0x160] sm:$0xff]  }
  0xa0   : > { %4486 = vmatmul.mubr.msk.bf16.gmra.mxu1 %vm644_vm0, %v5906_v61 }
  0xa1   : > { %4521 = vmatprep.mubr.msk.bf16.mxu1 %vm644_vm0, %v6837_v40  ;;  %v6848_v40 = vld [vmem:[#allocation16_spill] sm:$0xff] }
  0xa6   : > { %4498 = vmatmul.mubr.msk.bf16.vlgmr.msra.gmra.mxu0 %vm644_vm0, %v5521_v27 }
  0xa7   : > { %4538 = vmatpush3.bf16.msra.mxu0 %v4803_v31  ;;  %4501 = vmatprep.mubr.msk.bf16.mxu0 %vm644_vm0, %v5844_v3  ;;  %v4810_v31 = vld [vmem:[%s6637_s2 + $0x120] sm:$0xff]  }
  0xa8   : > { %4522 = vmatmul.mubr.msk.bf16.vlgmr.msra.gmra.mxu1 %vm644_vm0, %v5531_v7  ;;  %4539 = vmatprep.subr.bf16.mxu0 %v4805_v39 }
  0xa9   : > { %4562 = vmatpush3.bf16.msra.mxu1 %v4804_v8  ;;  %4525 = vmatprep.mubr.msk.bf16.mxu1 %vm644_vm0, %v5838_v47  ;;  %v6844_v8 = vld [vmem:[#allocation9_spill] sm:$0xff] }
  0xaa   : > { %4563 = vmatprep.subr.bf16.mxu1 %v4806_v59 }
  0xab   : > { %4540 = vmatpush3.bf16.msra.mxu0 %v4805_v39  ;;  %v6849_v39 = vld [vmem:[#allocation24_spill] sm:$0xff] }
  0xac   : > { %4541 = vmatprep.subr.bf16.mxu0 %v4807_v62 }
  0xad   : > { %4564 = vmatpush3.bf16.msra.mxu1 %v4806_v59  ;;  %v4820_v59 = vld [vmem:[%s6637_s2 + $0x198] sm:$0xff]  }
  0xae   : > { %4502 = vmatmul.mubr.msk.bf16.gmra.mxu0 %vm644_vm0, %v5856_v33  ;;  %4565 = vmatprep.subr.bf16.mxu1 %v4808_v15 }
  0xaf   : > { %4505 = vmatprep.mubr.msk.bf16.mxu0 %vm644_vm0, %v6045_v22  ;;  %4542 = vmatpush3.bf16.msra.mxu0 %v4807_v62  ;;  %v6850_v62 = vld [vmem:[#allocation26_spill] sm:$0xff] }
  0xb0   : > { %4526 = vmatmul.mubr.msk.bf16.gmra.mxu1 %vm644_vm0, %v5852_v34  ;;  %4543 = vmatprep.subr.bf16.mxu0 %v4809_v2 }
  0xb1   : > { %4529 = vmatprep.mubr.msk.bf16.mxu1 %vm644_vm0, %v6052_v12  ;;  %4566 = vmatpush3.bf16.msra.mxu1 %v4808_v15  ;;  %v4821_v15 = vld [vmem:[%s6637_s2 + $0x1b8] sm:$0xff]  }
  0xb2   : > { %4567 = vmatprep.subr.bf16.mxu1 %v4810_v31 }
  0xb3   : > { %4544 = vmatpush3.bf16.msra.mxu0 %v4809_v2  ;;  %v6851_v2 = vld [vmem:[#allocation22_spill] sm:$0xff] }
  0xb4   : > { %4585 = vmatprep.subr.bf16.mxu0 %v4811_v45 }
  0xb5   : > { %4568 = vmatpush3.bf16.msra.mxu1 %v4810_v31  ;;  %v6852_v31 = vld [vmem:[#allocation25_spill] sm:$0xff] }
  0xb6   : > { %4506 = vmatmul.mubr.msk.bf16.gmra.mxu0 %vm644_vm0, %v6070_v5  ;;  %4609 = vmatprep.subr.bf16.mxu1 %v4812_v26 }
  0xb7   : > { %4509 = vmatprep.mubr.msk.bf16.mxu0 %vm644_vm0, %v6077_v32 }
  0xb8   : > { %4530 = vmatmul.mubr.msk.bf16.gmra.mxu1 %vm644_vm0, %v6081_v17 }
  0xb9   : > { %4533 = vmatprep.mubr.msk.bf16.mxu1 %vm644_vm0, %v6085_v24 }
  0xbe   : > { %4510 = vmatmul.mubr.msk.bf16.gmra.mxu0 %vm644_vm0, %v6839_v29 }
  0xbf   : > { %4545 = vmatprep.mubr.msk.bf16.mxu0 %vm644_vm0, %v6840_v35  ;;  %v6856_v35 = vcombine.low %v6855_v51, %v5867_v21  ;;  %v4829_v51 = vld [vmem:[%s6637_s2 + $0x1f8] sm:$0xff]  }
  0xc0   : > { %4534 = vmatmul.mubr.msk.bf16.gmra.mxu1 %vm644_vm0, %v6841_v1 }
  0xc1   : > { %4569 = vmatprep.mubr.msk.bf16.mxu1 %vm644_vm0, %v6842_v20  ;;  %v6857_v20 = vld [vmem:[#allocation30_spill] sm:$0xff] }
  0xc6   : > { %4546 = vmatmul.mubr.msk.bf16.vlgmr.msra.gmra.mxu0 %vm644_vm0, %v6843_v36  ;;  %v4822_v36 = vld [vmem:[%s6637_s2 + $0x190] sm:$0xff]  }
  0xc7   : > { %4586 = vmatpush3.bf16.msra.mxu0 %v4811_v45  ;;  %4549 = vmatprep.mubr.msk.bf16.mxu0 %vm644_vm0, %v6844_v8  ;;  %v6853_v45 = vld [vmem:[#allocation27_spill] sm:$0xff]  ;;  %v4823_v8 = vld [vmem:[%s6637_s2 + $0x1b0] sm:$0xff]  }
  0xc8   : > { %4570 = vmatmul.mubr.msk.bf16.vlgmr.msra.gmra.mxu1 %vm644_vm0, %v6845_v60  ;;  %4587 = vmatprep.subr.bf16.mxu0 %v4813_v44 }
  0xc9   : > { %4610 = vmatpush3.bf16.msra.mxu1 %v4812_v26  ;;  %4573 = vmatprep.mubr.msk.bf16.mxu1 %vm644_vm0, %v6846_v9  ;;  %v6854_v26 = vld [vmem:[#allocation29_spill] sm:$0xff]  ;;  %v6862_v9 = vld [vmem:[#allocation34_spill] sm:$0xff] }
  0xca   : > { %4611 = vmatprep.subr.bf16.mxu1 %v4814_v0 }
  0xcb   : > { %4588 = vmatpush3.bf16.msra.mxu0 %v4813_v44  ;;  %v6858_v44 = vld [vmem:[#allocation28_spill] sm:$0xff] }
  0xcc   : > { %4589 = vmatprep.subr.bf16.mxu0 %v4815_v53 }
  0xcd   : > { %4612 = vmatpush3.bf16.msra.mxu1 %v4814_v0  ;;  %v6859_v0 = vld [vmem:[#allocation31_spill] sm:$0xff] }
  0xce   : > { %4550 = vmatmul.mubr.msk.bf16.gmra.mxu0 %vm644_vm0, %v6847_v10  ;;  %4613 = vmatprep.subr.bf16.mxu1 %v4816_v25 }
  0xcf   : > { %4553 = vmatprep.mubr.msk.bf16.mxu0 %vm644_vm0, %v6848_v40  ;;  %4590 = vmatpush3.bf16.msra.mxu0 %v4815_v53  ;;  %v6860_v53 = vld [vmem:[#allocation33_spill] sm:$0xff]  ;;  %v4827_v40 = vld [vmem:[%s6637_s2 + $0x1a0] sm:$0xff]  }
  0xd0   : > { %4574 = vmatmul.mubr.msk.bf16.gmra.mxu1 %vm644_vm0, %v6849_v39  ;;  %4591 = vmatprep.subr.bf16.mxu0 %v4817_v54  ;;  %v6864_v39 = vld [vmem:[#allocation15_spill] sm:$0xff] }
  0xd1   : > { %4577 = vmatprep.mubr.msk.bf16.mxu1 %vm644_vm0, %v6850_v62  ;;  %4614 = vmatpush3.bf16.msra.mxu1 %v4816_v25  ;;  %v4825_v25 = vld [vmem:[%s6637_s2 + $0x1a8] sm:$0xff]  }
  0xd2   : > { %4615 = vmatprep.subr.bf16.mxu1 %v4819_v13  ;;  %v6865_v62 = vld [vmem:[#allocation35_spill] sm:$0xff] }
  0xd3   : > { %4592 = vmatpush3.bf16.msra.mxu0 %v4817_v54  ;;  %v4826_v54 = vld [vmem:[%s6637_s2 + $0x180] sm:$0xff]  }
  0xd4   : > { %4633 = vmatprep.subr.bf16.mxu0 %v4820_v59 }
  0xd5   : > { %4616 = vmatpush3.bf16.msra.mxu1 %v4819_v13  ;;  %v6863_v13 = vld [vmem:[#allocation11_spill] sm:$0xff] }
  0xd6   : > { %4554 = vmatmul.mubr.msk.bf16.gmra.mxu0 %vm644_vm0, %v6851_v2  ;;  %4657 = vmatprep.subr.bf16.mxu1 %v4821_v15 }
  0xd7   : > { %4557 = vmatprep.mubr.msk.bf16.mxu0 %vm644_vm0, %v6852_v31 }
  0xd8   : > { %4578 = vmatmul.mubr.msk.bf16.gmra.mxu1 %vm644_vm0, %v6853_v45  ;;  %v6866_v45 = vld [vmem:[#allocation19_spill] sm:$0xff] }
  0xd9   : > { %4581 = vmatprep.mubr.msk.bf16.mxu1 %vm644_vm0, %v6854_v26 }
  0xde   : > { %4558 = vmatmul.mubr.msk.bf16.gmra.mxu0 %vm644_vm0, %v6856_v35  ;;  %v4379_v60 = vpop.f32.mrf.mxu1 }
  0xdf   : > { %4593 = vmatprep.mubr.msk.bf16.mxu0 %vm644_vm0, %v6857_v20 }
  0xe0   : > { %4582 = vmatmul.mubr.msk.bf16.gmra.mxu1 %vm644_vm0, %v4007_v41  ;;  %v888_v41 = vpop.f32.mrf.mxu1 }
  0xe1   : > { %4617 = vmatprep.mubr.msk.bf16.mxu1 %vm644_vm0, %v6858_v44 }
  0xe2   : > { %v4380_v10 = vpop.f32.mrf.mxu1 }
  0xe4   : > { %v891_v31 = vpop.f32.mrf.mxu1 }
  0xe6   : > { %4594 = vmatmul.mubr.msk.bf16.vlgmr.msra.gmra.mxu0 %vm644_vm0, %v6859_v0 }
  0xe7   : > { %4634 = vmatpush3.bf16.msra.mxu0 %v4820_v59  ;;  %4597 = vmatprep.mubr.msk.bf16.mxu0 %vm644_vm0, %v6860_v53  ;;  %v4355_v59 = vpop.f32.mrf.mxu0 }
  0xe8   : > { %4618 = vmatmul.mubr.msk.bf16.vlgmr.msra.gmra.mxu1 %vm644_vm0, %v6861_v52  ;;  %4635 = vmatprep.subr.bf16.mxu0 %v4822_v36  ;;  %v6198_v2 = vadd.f32 %v4379_v60, %v4355_v59  ;;  %v6868_v52 = vld [vmem:[#allocation20_spill] sm:$0xff] }
  0xe9   : > { %4658 = vmatpush3.bf16.msra.mxu1 %v4821_v15  ;;  %4621 = vmatprep.mubr.msk.bf16.mxu1 %vm644_vm0, %v6862_v9  ;;  %v4828_v15 = vld [vmem:[%s6637_s2 + $0x1d8] sm:$0xff]   ;;  %v703_v26 = vpop.f32.mrf.mxu0 }
  0xea   : > { %4659 = vmatprep.subr.bf16.mxu1 %v4823_v8  ;;  %v6205_v35 = vadd.f32 %v888_v41, %v703_v26  ;;  %v6870_v9 = vld [vmem:[#allocation17_spill] sm:$0xff] }
  0xeb   : > { %4636 = vmatpush3.bf16.msra.mxu0 %v4822_v36  ;;  %v4356_v20 = vpop.f32.mrf.mxu0  ;;  %v4383_v36 = vpop.f32.mrf.mxu1 }
  0xec   : > { %4637 = vmatprep.subr.bf16.mxu0 %v4824_v37  ;;  %v6207_v44 = vadd.f32 %v4380_v10, %v4356_v20  ;;  %v6871_v10 = vld [vmem:[#allocation3_spill] sm:$0xff]  ;;  %v4831_v20 = vld [vmem:[%s6637_s2 + $0x1f0] sm:$0xff]  }
  0xed   : > { %4660 = vmatpush3.bf16.msra.mxu1 %v4823_v8  ;;  %v706_v0 = vpop.f32.mrf.mxu0  ;;  %v6867_v8 = vld [vmem:[#allocation36_spill] sm:$0xff]  ;;  %v904_v53 = vpop.f32.mrf.mxu1 }
  0xee   : > { %4598 = vmatmul.mubr.msk.bf16.gmra.mxu0 %vm644_vm0, %v6863_v13  ;;  %4661 = vmatprep.subr.bf16.mxu1 %v4825_v25  ;;  %v6211_v60 = vadd.f32 %v891_v31, %v706_v0 }
  0xef   : > { %4601 = vmatprep.mubr.msk.bf16.mxu0 %vm644_vm0, %v6864_v39  ;;  %4638 = vmatpush3.bf16.msra.mxu0 %v4824_v37  ;;  %v6869_v37 = vld [vmem:[#allocation37_spill] sm:$0xff]  ;;  %v4384_v41 = vpop.f32.mrf.mxu1  ;;  %v6872_v39 = vld [vmem:[#allocation7_spill] sm:$0xff] }
  0xf0   : > { %4622 = vmatmul.mubr.msk.bf16.gmra.mxu1 %vm644_vm0, %v6865_v62  ;;  %4639 = vmatprep.subr.bf16.mxu0 %v4826_v54 }
  0xf1   : > { %4625 = vmatprep.mubr.msk.bf16.mxu1 %vm644_vm0, %v6866_v45  ;;  %4662 = vmatpush3.bf16.msra.mxu1 %v4825_v25  ;;  %v907_v25 = vpop.f32.mrf.mxu1 }
  0xf2   : > { %4663 = vmatprep.subr.bf16.mxu1 %v4827_v40 }
  0xf3   : > { %4640 = vmatpush3.bf16.msra.mxu0 %v4826_v54 }
  0xf4   : > { %4681 = vmatprep.subr.bf16.mxu0 %v4828_v15  ;;  %v4387_v54 = vpop.f32.mrf.mxu1 }
  0xf5   : > { %4664 = vmatpush3.bf16.msra.mxu1 %v4827_v40 }
  0xf6   : > { %4602 = vmatmul.mubr.msk.bf16.gmra.mxu0 %vm644_vm0, %v6867_v8  ;;  %4705 = vmatprep.subr.bf16.mxu1 %v4829_v51  ;;  %v4359_v13 = vpop.f32.mrf.mxu0  ;;  %v920_v40 = vpop.f32.mrf.mxu1 }
  0xf7   : > { %4605 = vmatprep.mubr.msk.bf16.mxu0 %vm644_vm0, %v6868_v52  ;;  %v6231_v59 = vadd.f32 %v4383_v36, %v4359_v13  ;;  %v4832_v52 = vld [vmem:[%s6637_s2 + $0x1c8] sm:$0xff]  }
  0xf8   : > { %4626 = vmatmul.mubr.msk.bf16.gmra.mxu1 %vm644_vm0, %v6869_v37  ;;  %v719_v62 = vpop.f32.mrf.mxu0  ;;  %v4388_v14 = vpop.f32.mrf.mxu1 }
  0xf9   : > { %4629 = vmatprep.mubr.msk.bf16.mxu1 %vm644_vm0, %v6870_v9  ;;  %v6233_v31 = vadd.f32 %v904_v53, %v719_v62  ;;  %v6874_v53 = vld [vmem:[#allocation14_spill] sm:$0xff] }
  0xfa   : > { %v4360_v45 = vpop.f32.mrf.mxu0  ;;  %v923_v26 = vpop.f32.mrf.mxu1  ;;  %v4834_v9 = vld [vmem:[%s6637_s2 + $0x1c0] sm:$0xff]  }
  0xfb   : > { %v6238_v56 = vadd.f32 %v4384_v41, %v4360_v45 }
  0xfc   : > { %v722_v36 = vpop.f32.mrf.mxu0 }
  0xfd   : > { %v6247_v0 = vadd.f32 %v907_v25, %v722_v36  ;;  %v4391_v8 = vpop.f32.mrf.mxu1  ;;  %v4836_v25 = vld [vmem:[%s6637_s2 + $0x1e0] sm:$0xff]  }
  0xfe   : > { %4606 = vmatmul.mubr.msk.bf16.gmra.mxu0 %vm644_vm0, %v4029_v46  ;;  %v4830_v46 = vld [vmem:[%s6637_s2 + $0x1d0] sm:$0xff]  }
  0xff   : > { %4641 = vmatprep.mubr.msk.bf16.mxu0 %vm644_vm0, %v6871_v10 }
 0x100   : > { %4630 = vmatmul.mubr.msk.bf16.gmra.mxu1 %vm644_vm0, %v4050_v28  ;;  %v6873_v28 = vld [vmem:[#allocation23_spill] sm:$0xff] }
 0x101   : > { %4665 = vmatprep.mubr.msk.bf16.mxu1 %vm644_vm0, %v6872_v39  ;;  %v4363_v37 = vpop.f32.mrf.mxu0 }
 0x102   : > { %v6259_v41 = vadd.f32 %v4387_v54, %v4363_v37 }
 0x106   : > { %4642 = vmatmul.mubr.msk.bf16.vlgmr.msra.gmra.mxu0 %vm644_vm0, %v6873_v28 }
 0x107   : > { %4682 = vmatpush3.bf16.msra.mxu0 %v4828_v15  ;;  %4645 = vmatprep.mubr.msk.bf16.mxu0 %vm644_vm0, %v5864_v63  ;;  %v4833_v63 = vld [vmem:[%s6637_s2 + $0x1e8] sm:$0xff]   ;;  %v936_v15 = vpop.f32.mrf.mxu1 }
 0x108   : > { %4666 = vmatmul.mubr.msk.bf16.vlgmr.msra.gmra.mxu1 %vm644_vm0, %v6874_v53  ;;  %4683 = vmatprep.subr.bf16.mxu0 %v4830_v46 }
 0x109   : > { %4706 = vmatpush3.bf16.msra.mxu1 %v4829_v51  ;;  %4669 = vmatprep.mubr.msk.bf16.mxu1 %vm644_vm0, %v5791_v4  ;;  %v735_v51 = vpop.f32.mrf.mxu0  ;;  %v4392_v10 = vpop.f32.mrf.mxu1 }
 0x10a   : > { %4707 = vmatprep.subr.bf16.mxu1 %v4831_v20  ;;  %v6266_v4 = vadd.f32 %v920_v40, %v735_v51 }
 0x10b   : > { %4684 = vmatpush3.bf16.msra.mxu0 %v4830_v46  ;;  %v4364_v54 = vpop.f32.mrf.mxu0  ;;  %v939_v39 = vpop.f32.mrf.mxu1 }
 0x10c   : > { %4685 = vmatprep.subr.bf16.mxu0 %v4832_v52  ;;  %v6275_v13 = vadd.f32 %v4388_v14, %v4364_v54 }
 0x10d   : > { %4708 = vmatpush3.bf16.msra.mxu1 %v4831_v20 }
 0x10e   : > { %4646 = vmatmul.mubr.msk.bf16.gmra.mxu0 %vm644_vm0, %v5871_v38  ;;  %4709 = vmatprep.subr.bf16.mxu1 %v4833_v63  ;;  %v738_v38 = vpop.f32.mrf.mxu0 }
 0x10f   : > { %4649 = vmatprep.mubr.msk.bf16.mxu0 %vm644_vm0, %v5983_v58  ;;  %4686 = vmatpush3.bf16.msra.mxu0 %v4832_v52  ;;  %v6279_v40 = vadd.f32 %v923_v26, %v738_v38 }
 0x110   : > { %4670 = vmatmul.mubr.msk.bf16.gmra.mxu1 %vm644_vm0, %v5798_v30  ;;  %4687 = vmatprep.subr.bf16.mxu0 %v4834_v9  ;;  %v4367_v62 = vpop.f32.mrf.mxu0  ;;  %v4427_v30 = vpop.f32.mrf.mxu1 }
 0x111   : > { %4673 = vmatprep.mubr.msk.bf16.mxu1 %vm644_vm0, %v5802_v43  ;;  %4710 = vmatpush3.bf16.msra.mxu1 %v4833_v63  ;;  %v6283_v58 = vadd.f32 %v4391_v8, %v4367_v62 }
 0x112   : > { %4711 = vmatprep.subr.bf16.mxu1 %v4836_v25  ;;  %v751_v14 = vpop.f32.mrf.mxu0  ;;  %v1506_v26 = vpop.f32.mrf.mxu1 }
 0x113   : > { %4688 = vmatpush3.bf16.msra.mxu0 %v4834_v9  ;;  %v6289_v43 = vadd.f32 %v936_v15, %v751_v14 }
 0x114   : > { %v4368_v46 = vpop.f32.mrf.mxu0 }
 0x115   : > { %4712 = vmatpush3.bf16.msra.mxu1 %v4836_v25  ;;  %v6293_v45 = vadd.f32 %v4392_v10, %v4368_v46 }
 0x116   : > { %4650 = vmatmul.mubr.msk.bf16.gmra.mxu0 %vm644_vm0, %v5814_v57  ;;  %v754_v57 = vpop.f32.mrf.mxu0 }
 0x117   : > { %4653 = vmatprep.mubr.msk.bf16.mxu0 %vm644_vm0, %v5830_v6  ;;  %v6295_v28 = vadd.f32 %v939_v39, %v754_v57  ;;  %v4428_v6 = vpop.f32.mrf.mxu1 }
 0x118   : > { %4674 = vmatmul.mubr.msk.bf16.gmra.mxu1 %vm644_vm0, %v5810_v18  ;;  %v4403_v20 = vpop.f32.mrf.mxu0 }
 0x119   : > { %4677 = vmatprep.mubr.msk.bf16.mxu1 %vm644_vm0, %v5906_v61  ;;  %v1214_v18 = vadd.f32 %v4403_v20, %v6198_v2 }
 0x11a   : > { %v1149_v61 = vpop.f32.mrf.mxu0 }
 0x11b   : > { %v1212_v36 = vadd.f32 %v1149_v61, %v6205_v35  ;;  %v6307_v8 = vadd.f32 %v4427_v30, %v1214_v18 }
 0x11c   : > { %v4404_v21 = vpop.f32.mrf.mxu0 }
 0x11d   : > { %v1215_v16 = vadd.f32 %v4404_v21, %v6207_v44  ;;  %v6312_v2 = vadd.f32 %v1506_v26, %v1212_v36 }
 0x11e   : > { %4654 = vmatmul.mubr.msk.bf16.gmra.mxu0 %vm644_vm0, %v4071_v19  ;;  %v1509_v19 = vpop.f32.mrf.mxu1  ;;  %v1152_v53 = vpop.f32.mrf.mxu0 }
 0x11f   : > { %4689 = vmatprep.mubr.msk.bf16.mxu0 %vm644_vm0, %v5521_v27  ;;  %v1213_v27 = vadd.f32 %v1152_v53, %v6211_v60  ;;  %v6315_v52 = vadd.f32 %v4428_v6, %v1215_v16 }
 0x120   : > { %4678 = vmatmul.mubr.msk.bf16.gmra.mxu1 %vm644_vm0, %v6009_v48  ;;  %v4407_v63 = vpop.f32.mrf.mxu0  ;;  %v4431_v48 = vpop.f32.mrf.mxu1 }
 0x121   : > { %4713 = vmatprep.mubr.msk.bf16.mxu1 %vm644_vm0, %v5531_v7  ;;  %v1218_v35 = vadd.f32 %v4407_v63, %v6231_v59  ;;  %v6320_v15 = vadd.f32 %v1509_v19, %v1213_v27 }
 0x122   : > { %v1165_v7 = vpop.f32.mrf.mxu0  ;;  %v1522_v44 = vpop.f32.mrf.mxu1 }
 0x123   : > { %v1216_v60 = vadd.f32 %v1165_v7, %v6233_v31  ;;  %v6327_v37 = vadd.f32 %v4431_v48, %v1218_v35 }
 0x124   : > { %v4432_v9 = vpop.f32.mrf.mxu1 }
 0x125   : > { %v6332_v51 = vadd.f32 %v1522_v44, %v1216_v60 }
 0x126   : > { %4690 = vmatmul.mubr.msk.bf16.vlgmr.msra.gmra.mxu0 %vm644_vm0, %v5844_v3  ;;  %v4408_v3 = vpop.f32.mrf.mxu0 }
 0x127   : > { %4693 = vmatprep.mubr.msk.bf16.mxu0 %vm644_vm0, %v5856_v33  ;;  %v1219_v59 = vadd.f32 %v4408_v3, %v6238_v56 }
 0x128   : > { %4714 = vmatmul.mubr.msk.bf16.vlgmr.msra.gmra.mxu1 %vm644_vm0, %v5838_v47  ;;  %v1168_v25 = vpop.f32.mrf.mxu0  ;;  %v1525_v47 = vpop.f32.mrf.mxu1 }
 0x129   : > { %4717 = vmatprep.mubr.msk.bf16.mxu1 %vm644_vm0, %v5852_v34  ;;  %v1217_v33 = vadd.f32 %v1168_v25, %v6247_v0  ;;  %v6335_v10 = vadd.f32 %v4432_v9, %v1219_v59 }
 0x12b   : > { %v6339_v31 = vadd.f32 %v1525_v47, %v1217_v33 }
 0x12e   : > { %4694 = vmatmul.mubr.msk.bf16.gmra.mxu0 %vm644_vm0, %v6045_v22  ;;  %v4411_v34 = vpop.f32.mrf.mxu0 }
 0x12f   : > { %4697 = vmatprep.mubr.msk.bf16.mxu0 %vm644_vm0, %v6070_v5  ;;  %v1222_v56 = vadd.f32 %v4411_v34, %v6259_v41 }
 0x130   : > { %4718 = vmatmul.mubr.msk.bf16.gmra.mxu1 %vm644_vm0, %v6052_v12  ;;  %v1181_v54 = vpop.f32.mrf.mxu0 }
 0x131   : > { %4721 = vmatprep.mubr.msk.bf16.mxu1 %vm644_vm0, %v6081_v17  ;;  %v4435_v0 = vpop.f32.mrf.mxu1  ;;  %v1220_v38 = vadd.f32 %v1181_v54, %v6266_v4 }
 0x132   : > { %v6349_v39 = vadd.f32 %v4435_v0, %v1222_v56  ;;  %v4412_v62 = vpop.f32.mrf.mxu0 }
 0x133   : > { %v1538_v22 = vpop.f32.mrf.mxu1  ;;  %v1223_v5 = vadd.f32 %v4412_v62, %v6275_v13 }
 0x134   : > { %v6354_v12 = vadd.f32 %v1538_v22, %v1220_v38  ;;  %v1184_v17 = vpop.f32.mrf.mxu0 }
 0x135   : > { %v4436_v30 = vpop.f32.mrf.mxu1  ;;  %v1221_v41 = vadd.f32 %v1184_v17, %v6279_v40 }
 0x136   : > { %4698 = vmatmul.mubr.msk.bf16.gmra.mxu0 %vm644_vm0, %v6077_v32  ;;  %v1580_v4 = vadd.f32 %v4436_v30, %v1223_v5 }
 0x137   : > { %4701 = vmatprep.mubr.msk.bf16.mxu0 %vm644_vm0, %v6839_v29  ;;  %v1541_v14 = vpop.f32.mrf.mxu1 }
 0x138   : > { %4722 = vmatmul.mubr.msk.bf16.gmra.mxu1 %vm644_vm0, %v6085_v24  ;;  %v6363_v32 = vadd.f32 %v1541_v14, %v1221_v41 }
 0x139   : > { %4725 = vmatprep.mubr.msk.bf16.mxu1 %vm644_vm0, %v6841_v1 }
 0x13e   : > { %v4415_v13 = vpop.f32.mrf.mxu0  ;;  %4702 = vmatmul.mubr.msk.bf16.gmra.mxu0 %vm644_vm0, %v4114_v42 }
 0x13f   : > { %v1226_v29 = vadd.f32 %v4415_v13, %v6283_v58 }
 0x140   : > { %v4439_v46 = vpop.f32.mrf.mxu1  ;;  %4726 = vmatmul.mubr.msk.bf16.gmra.mxu1 %vm644_vm0, %v4135_v50  ;;  %v1197_v24 = vpop.f32.mrf.mxu0 }
 0x141   : > { %v1224_v40 = vadd.f32 %v1197_v24, %v6289_v43  ;;  %v1583_v1 = vadd.f32 %v4439_v46, %v1226_v29 }
 0x142   : > { %v1554_v26 = vpop.f32.mrf.mxu1  ;;  %v4416_v57 = vpop.f32.mrf.mxu0 }
 0x143   : > { %v1227_v20 = vadd.f32 %v4416_v57, %v6293_v45  ;;  %v1581_v18 = vadd.f32 %v1554_v26, %v1224_v40 }
 0x144   : > { %v4440_v55 = vpop.f32.mrf.mxu1  ;;  %v1200_v11 = vpop.f32.mrf.mxu0 }
 0x145   : > { %v1225_v42 = vadd.f32 %v1200_v11, %v6295_v28  ;;  %v1584_v58 = vadd.f32 %v4440_v55, %v1227_v20 }
 0x146   : > { %v1557_v6 = vpop.f32.mrf.mxu1  ;;  %v4451_v61 = vpop.f32.mrf.mxu0 }
 0x147   : > { %v1751_v23 = vadd.f32 %v4451_v61, %v6307_v8  ;;  %v1582_v49 = vadd.f32 %v1557_v6, %v1225_v42 }
 0x148   : > { %v4475_v50 = vpop.f32.mrf.mxu1  ;;  %v1686_v36 = vpop.f32.mrf.mxu0 }
 0x149   : > { %v1749_v43 = vadd.f32 %v1686_v36, %v6312_v2  ;;  %v1944_v21 = vadd.f32 %v4475_v50, %v1751_v23 }
 0x14a   : > { %v1879_v16 = vpop.f32.mrf.mxu1  ;;  %v4452_v19 = vpop.f32.mrf.mxu0 }
 0x14b   : > { %v1752_v45 = vadd.f32 %v4452_v19, %v6315_v52  ;;  %v1942_v53 = vadd.f32 %v1879_v16, %v1749_v43 }
 0x14c   : > { %v4476_v27 = vpop.f32.mrf.mxu1  ;;  %v1689_v63 = vpop.f32.mrf.mxu0 }
 0x14d   : > { %v1750_v28 = vadd.f32 %v1689_v63, %v6320_v15  ;;  %v1945_v48 = vadd.f32 %v4476_v27, %v1752_v45 }
 0x14e   : > { %v1882_v35 = vpop.f32.mrf.mxu1  ;;  %v4455_v7 = vpop.f32.mrf.mxu0 }
 0x14f   : > { %v1755_v8 = vadd.f32 %v4455_v7, %v6327_v37  ;;  %v1943_v44 = vadd.f32 %v1882_v35, %v1750_v28 }
 0x150   : > { %v4479_v60 = vpop.f32.mrf.mxu1  ;;  %v1702_v3 = vpop.f32.mrf.mxu0 }
 0x151   : > { %v1753_v2 = vadd.f32 %v1702_v3, %v6332_v51  ;;  %v1948_v9 = vadd.f32 %v4479_v60, %v1755_v8 }
 0x152   : > { %v1895_v59 = vpop.f32.mrf.mxu1  ;;  %v4456_v25 = vpop.f32.mrf.mxu0 }
 0x153   : > { %v1756_v52 = vadd.f32 %v4456_v25, %v6335_v10  ;;  %v1946_v33 = vadd.f32 %v1895_v59, %v1753_v2 }
 0x154   : > { %v4480_v47 = vpop.f32.mrf.mxu1  ;;  %v1705_v34 = vpop.f32.mrf.mxu0 }
 0x155   : > { %v1754_v15 = vadd.f32 %v1705_v34, %v6339_v31  ;;  %v1949_v56 = vadd.f32 %v4480_v47, %v1756_v52 }
 0x156   : > { %v1898_v0 = vpop.f32.mrf.mxu1  ;;  %v4459_v54 = vpop.f32.mrf.mxu0 }
 0x157   : > { %v1759_v37 = vadd.f32 %v4459_v54, %v6349_v39  ;;  %v1947_v38 = vadd.f32 %v1898_v0, %v1754_v15 }
 0x158   : > { %v4483_v22 = vpop.f32.mrf.mxu1  ;;  %v1718_v62 = vpop.f32.mrf.mxu0 }
 0x159   : > { %v1757_v51 = vadd.f32 %v1718_v62, %v6354_v12  ;;  %v1952_v5 = vadd.f32 %v4483_v22, %v1759_v37 }
 0x15a   : > { %v1911_v30 = vpop.f32.mrf.mxu1  ;;  %v4460_v17 = vpop.f32.mrf.mxu0 }
 0x15b   : > { %v1760_v41 = vadd.f32 %v4460_v17, %v1580_v4  ;;  %v1950_v10 = vadd.f32 %v1911_v30, %v1757_v51 }
 0x15c   : > { %v4484_v14 = vpop.f32.mrf.mxu1  ;;  %v1721_v13 = vpop.f32.mrf.mxu0 }
 0x15d   : > { %v1758_v29 = vadd.f32 %v1721_v13, %v6363_v32  ;;  %v1953_v31 = vadd.f32 %v4484_v14, %v1760_v41 }
 0x15e   : > { %v1914_v46 = vpop.f32.mrf.mxu1  ;;  %v4463_v24 = vpop.f32.mrf.mxu0 }
 0x15f   : > { %v1763_v40 = vadd.f32 %v4463_v24, %v1583_v1  ;;  %v1951_v26 = vadd.f32 %v1914_v46, %v1758_v29 }
 0x160   : > { %v4487_v39 = vpop.f32.mrf.mxu1  ;;  %v1734_v57 = vpop.f32.mrf.mxu0 }
 0x161   : > { %v1761_v20 = vadd.f32 %v1734_v57, %v1581_v18  ;;  %v1956_v55 = vadd.f32 %v4487_v39, %v1763_v40 }
 0x162   : > { %v1927_v11 = vpop.f32.mrf.mxu1  ;;  %v4464_v12 = vpop.f32.mrf.mxu0 }
 0x163   : > { %v1764_v42 = vadd.f32 %v4464_v12, %v1584_v58  ;;  %v1954_v6 = vadd.f32 %v1927_v11, %v1761_v20 }
 0x164   : > { %v4488_v61 = vpop.f32.mrf.mxu1  ;;  %v1737_v4 = vpop.f32.mrf.mxu0 }
 0x165   : > { %v1762_v23 = vadd.f32 %v1737_v4, %v1582_v49  ;;  %v1957_v50 = vadd.f32 %v4488_v61, %v1764_v42 }
 0x166   : > { %v1930_v36 = vpop.f32.mrf.mxu1  ;;  %v4499_v43 = vpop.f32.mrf.mxu0 }
 0x167   : > { %v2128_v32 = vadd.f32 %v4499_v43, %v1944_v21  ;;  %v1955_v16 = vadd.f32 %v1930_v36, %v1762_v23 }
 0x168   : > { %v4523_v19 = vpop.f32.mrf.mxu1  ;;  %v2063_v45 = vpop.f32.mrf.mxu0 }
 0x169   : > { %v2126_v1 = vadd.f32 %v2063_v45, %v1942_v53  ;;  %v2317_v27 = vadd.f32 %v4523_v19, %v2128_v32 }
 0x16a   : > { %v2252_v63 = vpop.f32.mrf.mxu1  ;;  %v4500_v28 = vpop.f32.mrf.mxu0 }
 0x16b   : > { %v2129_v18 = vadd.f32 %v4500_v28, %v1945_v48  ;;  %v2315_v35 = vadd.f32 %v2252_v63, %v2126_v1 }
 0x16c   : > { %v4524_v7 = vpop.f32.mrf.mxu1  ;;  %v2066_v8 = vpop.f32.mrf.mxu0 }
 0x16d   : > { %v2127_v58 = vadd.f32 %v2066_v8, %v1943_v44  ;;  %v2318_v60 = vadd.f32 %v4524_v7, %v2129_v18 }
 0x16e   : > { %v2255_v3 = vpop.f32.mrf.mxu1  ;;  %v4503_v2 = vpop.f32.mrf.mxu0 }
 0x16f   : > { %v2132_v49 = vadd.f32 %v4503_v2, %v1948_v9  ;;  %v2316_v59 = vadd.f32 %v2255_v3, %v2127_v58 }
 0x170   : > { %v4527_v25 = vpop.f32.mrf.mxu1  ;;  %v2079_v52 = vpop.f32.mrf.mxu0 }
 0x171   : > { %v2130_v21 = vadd.f32 %v2079_v52, %v1946_v33  ;;  %v2321_v47 = vadd.f32 %v4527_v25, %v2132_v49 }
 0x172   : > { %v2268_v34 = vpop.f32.mrf.mxu1  ;;  %v4504_v15 = vpop.f32.mrf.mxu0 }
 0x173   : > { %v2133_v53 = vadd.f32 %v4504_v15, %v1949_v56  ;;  %v2319_v0 = vadd.f32 %v2268_v34, %v2130_v21 }
 0x174   : > { %v4528_v54 = vpop.f32.mrf.mxu1  ;;  %v2082_v37 = vpop.f32.mrf.mxu0 }
 0x175   : > { %v2131_v48 = vadd.f32 %v2082_v37, %v1947_v38  ;;  %v2322_v22 = vadd.f32 %v4528_v54, %v2133_v53 }
 0x176   : > { %v2271_v62 = vpop.f32.mrf.mxu1  ;;  %v4507_v51 = vpop.f32.mrf.mxu0 }
 0x177   : > { %v2136_v44 = vadd.f32 %v4507_v51, %v1952_v5  ;;  %v2320_v30 = vadd.f32 %v2271_v62, %v2131_v48 }
 0x178   : > { %v4531_v17 = vpop.f32.mrf.mxu1  ;;  %v2095_v41 = vpop.f32.mrf.mxu0 }
 0x179   : > { %v2134_v9 = vadd.f32 %v2095_v41, %v1950_v10  ;;  %v2325_v14 = vadd.f32 %v4531_v17, %v2136_v44 }
 0x17a   : > { %v2284_v13 = vpop.f32.mrf.mxu1  ;;  %v4508_v29 = vpop.f32.mrf.mxu0 }
 0x17b   : > { %v2137_v33 = vadd.f32 %v4508_v29, %v1953_v31  ;;  %v2323_v46 = vadd.f32 %v2284_v13, %v2134_v9 }
 0x17c   : > { %v4532_v24 = vpop.f32.mrf.mxu1  ;;  %v2098_v40 = vpop.f32.mrf.mxu0 }
 0x17d   : > { %v2135_v56 = vadd.f32 %v2098_v40, %v1951_v26  ;;  %v2326_v39 = vadd.f32 %v4532_v24, %v2137_v33 }
 0x17e   : > { %v2287_v57 = vpop.f32.mrf.mxu1  ;;  %v4511_v20 = vpop.f32.mrf.mxu0 }
 0x17f   : > { %v2140_v38 = vadd.f32 %v4511_v20, %v1956_v55  ;;  %v2324_v11 = vadd.f32 %v2287_v57, %v2135_v56 }
 0x180   : > { %v4535_v12 = vpop.f32.mrf.mxu1  ;;  %v2111_v42 = vpop.f32.mrf.mxu0 }
 0x181   : > { %v2138_v5 = vadd.f32 %v2111_v42, %v1954_v6  ;;  %v2329_v61 = vadd.f32 %v4535_v12, %v2140_v38 }
 0x182   : > { %v2300_v4 = vpop.f32.mrf.mxu1  ;;  %v4512_v23 = vpop.f32.mrf.mxu0 }
 0x183   : > { %v2141_v10 = vadd.f32 %v4512_v23, %v1957_v50  ;;  %v2327_v36 = vadd.f32 %v2300_v4, %v2138_v5 }
 0x184   : > { %v4536_v43 = vpop.f32.mrf.mxu1  ;;  %v2114_v32 = vpop.f32.mrf.mxu0 }
 0x185   : > { %v2139_v31 = vadd.f32 %v2114_v32, %v1955_v16  ;;  %v2330_v19 = vadd.f32 %v4536_v43, %v2141_v10 }
 0x186   : > { %v2303_v45 = vpop.f32.mrf.mxu1  ;;  %v4547_v1 = vpop.f32.mrf.mxu0 }
 0x187   : > { %v2469_v26 = vadd.f32 %v4547_v1, %v2317_v27  ;;  %v2328_v63 = vadd.f32 %v2303_v45, %v2139_v31 }
 0x188   : > { %v4571_v28 = vpop.f32.mrf.mxu1  ;;  %v2404_v18 = vpop.f32.mrf.mxu0 }
 0x189   : > { %v2467_v55 = vadd.f32 %v2404_v18, %v2315_v35  ;;  %v6388_v7 = vadd.f32 %v4571_v28, %v2469_v26 }
 0x18a   : > { %v2569_v8 = vpop.f32.mrf.mxu1  ;;  %v4548_v6 = vpop.f32.mrf.mxu0 }
 0x18b   : > { %v2470_v58 = vadd.f32 %v4548_v6, %v2318_v60  ;;  %v6390_v3 = vadd.f32 %v2569_v8, %v2467_v55 }
 0x18c   : > { %v4572_v50 = vpop.f32.mrf.mxu1  ;;  %v2407_v2 = vpop.f32.mrf.mxu0 }
 0x18d   : > { %v2468_v49 = vadd.f32 %v2407_v2, %v2316_v59  ;;  %v6392_v25 = vadd.f32 %v4572_v50, %v2470_v58 }
 0x18e   : > { %v2572_v16 = vpop.f32.mrf.mxu1  ;;  %v4551_v52 = vpop.f32.mrf.mxu0 }
 0x18f   : > { %v2473_v21 = vadd.f32 %v4551_v52, %v2321_v47  ;;  %v6394_v27 = vadd.f32 %v2572_v16, %v2468_v49 }
 0x190   : > { %v4575_v34 = vpop.f32.mrf.mxu1  ;;  %v2420_v15 = vpop.f32.mrf.mxu0 }
 0x191   : > { %v2471_v35 = vadd.f32 %v2420_v15, %v2319_v0  ;;  %v6396_v53 = vadd.f32 %v4575_v34, %v2473_v21 }
 0x192   : > { %v2585_v54 = vpop.f32.mrf.mxu1  ;;  %v4552_v37 = vpop.f32.mrf.mxu0 }
 0x193   : > { %v2474_v60 = vadd.f32 %v4552_v37, %v2322_v22  ;;  %v6398_v48 = vadd.f32 %v2585_v54, %v2471_v35 }
 0x194   : > { %v4576_v62 = vpop.f32.mrf.mxu1  ;;  %v2423_v51 = vpop.f32.mrf.mxu0 }
 0x195   : > { %v2472_v59 = vadd.f32 %v2423_v51, %v2320_v30  ;;  %v6400_v44 = vadd.f32 %v4576_v62, %v2474_v60 }
 0x196   : > { %v2588_v17 = vpop.f32.mrf.mxu1  ;;  %v4555_v41 = vpop.f32.mrf.mxu0 }
 0x197   : > { %v2477_v47 = vadd.f32 %v4555_v41, %v2325_v14  ;;  %v6402_v9 = vadd.f32 %v2588_v17, %v2472_v59 }
 0x198   : > { %v4579_v13 = vpop.f32.mrf.mxu1  ;;  %v2436_v29 = vpop.f32.mrf.mxu0 }
 0x199   : > { %v2475_v0 = vadd.f32 %v2436_v29, %v2323_v46  ;;  %v6404_v33 = vadd.f32 %v4579_v13, %v2477_v47 }
 0x19a   : > { %v2601_v24 = vpop.f32.mrf.mxu1  ;;  %v4556_v40 = vpop.f32.mrf.mxu0 }
 0x19b   : > { %v2478_v22 = vadd.f32 %v4556_v40, %v2326_v39  ;;  %v6406_v56 = vadd.f32 %v2601_v24, %v2475_v0 }
 0x19c   : > { %v4580_v57 = vpop.f32.mrf.mxu1  ;;  %v2439_v20 = vpop.f32.mrf.mxu0 }
 0x19d   : > { %v2476_v30 = vadd.f32 %v2439_v20, %v2324_v11  ;;  %v6408_v38 = vadd.f32 %v4580_v57, %v2478_v22 }
 0x19e   : > { %v2604_v12 = vpop.f32.mrf.mxu1  ;;  %v4559_v42 = vpop.f32.mrf.mxu0 }
 0x19f   : > { %v2481_v14 = vadd.f32 %v4559_v42, %v2329_v61  ;;  %v6410_v5 = vadd.f32 %v2604_v12, %v2476_v30 }
 0x1a0   : > { %v4583_v4 = vpop.f32.mrf.mxu1  ;;  %v2452_v23 = vpop.f32.mrf.mxu0 }
 0x1a1   : > { %v2479_v46 = vadd.f32 %v2452_v23, %v2327_v36  ;;  %v6412_v10 = vadd.f32 %v4583_v4, %v2481_v14 }
 0x1a2   : > { %v2617_v43 = vpop.f32.mrf.mxu1  ;;  %v4560_v32 = vpop.f32.mrf.mxu0 }
 0x1a3   : > { %v2482_v39 = vadd.f32 %v4560_v32, %v2330_v19  ;;  %v6414_v31 = vadd.f32 %v2617_v43, %v2479_v46 }
 0x1a4   : > { %v4584_v45 = vpop.f32.mrf.mxu1  ;;  %v2455_v1 = vpop.f32.mrf.mxu0 }
 0x1a5   : > { %6875 = vst [vmem:[#allocation21_spill] sm:$0xff] %v6414_v31  ;;  %v2480_v11 = vadd.f32 %v2455_v1, %v2328_v63  ;;  %v6416_v26 = vadd.f32 %v4584_v45, %v2482_v39 }
 0x1a6   : > { %v2620_v28 = vpop.f32.mrf.mxu1  ;;  %v4595_v18 = vpop.f32.mrf.mxu0 }
 0x1a7   : > { %6876 = vst [vmem:[#allocation4_spill] sm:$0xff] %v6416_v26  ;;  %v6418_v61 = vadd.f32 %v2620_v28, %v2480_v11 }
 0x1a8   : > { %v4619_v55 = vpop.f32.mrf.mxu1  ;;  %v2725_v8 = vpop.f32.mrf.mxu0 }
 0x1a9   : > { %6877 = vst [vmem:[#allocation2_spill] sm:$0xff] %v6418_v61 }
 0x1aa   : > { %v6420_v6 = vpop.f32.mrf.mxu1  ;;  %v4596_v36 = vpop.f32.mrf.mxu0 }
 0x1ac   : > { %v6422_v58 = vpop.f32.mrf.mxu1  ;;  %v2728_v50 = vpop.f32.mrf.mxu0 }
 0x1ae   : > { %v6424_v19 = vpop.f32.mrf.mxu1  ;;  %v4599_v2 = vpop.f32.mrf.mxu0 }
 0x1b0   : > { %v6426_v49 = vpop.f32.mrf.mxu1  ;;  %v6428_v63 = vpop.f32.mrf.mxu0 }
 0x1b2   : > { %v6430_v16 = vpop.f32.mrf.mxu1  ;;  %v6432_v52 = vpop.f32.mrf.mxu0 }
 0x1b4   : > { %v6434_v21 = vpop.f32.mrf.mxu1  ;;  %v6436_v34 = vpop.f32.mrf.mxu0 }
 0x1b6   : > { %v6438_v15 = vpop.f32.mrf.mxu1  ;;  %v6440_v35 = vpop.f32.mrf.mxu0 }
 0x1b8   : > { %v6442_v54 = vpop.f32.mrf.mxu1  ;;  %v6444_v37 = vpop.f32.mrf.mxu0 }
 0x1ba   : > { %v6446_v60 = vpop.f32.mrf.mxu1  ;;  %v6448_v62 = vpop.f32.mrf.mxu0 }
 0x1bc   : > { %v6450_v51 = vpop.f32.mrf.mxu1  ;;  %v6452_v59 = vpop.f32.mrf.mxu0 }
 0x1be   : > { %v6454_v17 = vpop.f32.mrf.mxu1  ;;  %v6456_v41 = vpop.f32.mrf.mxu0 }
 0x1bf   : > { %6878 = vst [vmem:[#allocation5_spill] sm:$0xff] %v6454_v17  ;;  %v2788_v17 = vadd.f32 %v2725_v8, %v6390_v3 }
 0x1c0   : > { %v6458_v47 = vpop.f32.mrf.mxu1  ;;  %v6460_v13 = vpop.f32.mrf.mxu0 }
 0x1c1   : > { %6879 = vst [vmem:[#allocation6_spill] sm:$0xff] %v6458_v47  ;;  %6880 = vst [vmem:[#allocation8_spill] sm:$0xff] %v6460_v13  ;;  %v2790_v47 = vadd.f32 %v4595_v18, %v6388_v7  ;;  %v2789_v7 = vadd.f32 %v2728_v50, %v6394_v27 }
 0x1c2   : > { %v6462_v29 = vpop.f32.mrf.mxu1  ;;  %v6464_v0 = vpop.f32.mrf.mxu0 }
 0x1c3   : > { %6881 = vst [vmem:[#allocation9_spill] sm:$0xff] %v6462_v29  ;;  %6882 = vst [vmem:[#allocation13_spill] sm:$0xff] %v6464_v0 }
 0x1c4   : > { %v6466_v24 = vpop.f32.mrf.mxu1  ;;  %v6468_v40 = vpop.f32.mrf.mxu0 }
 0x1c5   : > { %6883 = vst [vmem:[#allocation18_spill] sm:$0xff] %v6466_v24  ;;  %6884 = vst [vmem:[#allocation10_spill] sm:$0xff] %v6468_v40 }
 0x1c6   : > { %v6470_v22 = vpop.f32.mrf.mxu1  ;;  %v4643_v57 = vpop.f32.mrf.mxu0 }
 0x1c7   : > { %6885 = vst [vmem:[#allocation16_spill] sm:$0xff] %v6470_v22 }
 0x1c8   : > { %v4667_v20 = vpop.f32.mrf.mxu1  ;;  %v3038_v30 = vpop.f32.mrf.mxu0 }
 0x1ca   : > { %v3203_v12 = vpop.f32.mrf.mxu1  ;;  %v4644_v42 = vpop.f32.mrf.mxu0 }
 0x1cc   : > { %v4668_v14 = vpop.f32.mrf.mxu1  ;;  %v3041_v4 = vpop.f32.mrf.mxu0 }
 0x1ce   : > { %v6472_v23 = vpop.f32.mrf.mxu1  ;;  %v4647_v46 = vpop.f32.mrf.mxu0 }
 0x1d0   : > { %v6474_v43 = vpop.f32.mrf.mxu1  ;;  %v3054_v32 = vpop.f32.mrf.mxu0 }
 0x1d2   : > { %v6476_v39 = vpop.f32.mrf.mxu1  ;;  %v6478_v45 = vpop.f32.mrf.mxu0 }
 0x1d4   : > { %v6480_v1 = vpop.f32.mrf.mxu1  ;;  %v6482_v11 = vpop.f32.mrf.mxu0 }
 0x1d6   : > { %v6484_v28 = vpop.f32.mrf.mxu1  ;;  %v6486_v22 = vpop.f32.mrf.mxu0 }
 0x1d7   : > { %6886 = vst [vmem:[#allocation24_spill] sm:$0xff] %v6484_v28  ;;  %v2951_v28 = vadd.f32 %v4619_v55, %v2790_v47  ;;  %v2792_v55 = vadd.f32 %v6428_v63, %v6398_v48  ;;  %v2793_v63 = vadd.f32 %v6436_v34, %v6402_v9 }
 0x1d8   : > { %v6488_v24 = vpop.f32.mrf.mxu1  ;;  %v6490_v29 = vpop.f32.mrf.mxu0 }
 0x1d9   : > { %6887 = vst [vmem:[#allocation26_spill] sm:$0xff] %v6488_v24  ;;  %v2791_v24 = vadd.f32 %v4596_v36, %v6392_v25  ;;  %v3103_v18 = vadd.f32 %v4643_v57, %v2951_v28 }
 0x1da   : > { %v6492_v40 = vpop.f32.mrf.mxu1  ;;  %v6494_v61 = vpop.f32.mrf.mxu0 }
 0x1db   : > { %6888 = vst [vmem:[#allocation22_spill] sm:$0xff] %v6492_v40  ;;  %6889 = vst [vmem:[#allocation25_spill] sm:$0xff] %v6494_v61  ;;  %v2952_v25 = vadd.f32 %v6422_v58, %v2791_v24  ;;  %v3268_v50 = vadd.f32 %v4667_v20, %v3103_v18 }
 0x1dc   : > { %v6497_v0 = vpop.f32.mrf.mxu1  ;;  %v6499_v26 = vpop.f32.mrf.mxu0 }
 0x1dd   : > { %6890 = vst [vmem:[#allocation27_spill] sm:$0xff] %v6497_v0  ;;  %6891 = vst [vmem:[#allocation29_spill] sm:$0xff] %v6499_v26  ;;  %v2949_v0 = vadd.f32 %v6420_v6, %v2788_v17  ;;  %v2794_v26 = vadd.f32 %v4599_v2, %v6396_v53  ;;  %v3104_v27 = vadd.f32 %v4644_v42, %v2952_v25 }
 0x1de   : > { %v6503_v13 = vpop.f32.mrf.mxu1  ;;  %v6505_v31 = vpop.f32.mrf.mxu0  ;;  %v2950_v6 = vadd.f32 %v6424_v19, %v2789_v7  ;;  %v2795_v53 = vadd.f32 %v6432_v52, %v6400_v44  ;;  %v6538_v44 = vld [vmem:[%s6638_s3] ss:$0 sm:$0xff]  ;;  %v2798_v42 = vadd.f32 %v6440_v35, %v6404_v33  ;;  %v2796_v33 = vadd.f32 %v6444_v37, %v6406_v56 }
 0x1df   : > { %6892 = vst [vmem:[#allocation12_spill] sm:$0xff] %v6503_v13  ;;  %v3101_v13 = vadd.f32 %v3038_v30, %v2949_v0  ;;  %v2955_v2 = vadd.f32 %v6426_v49, %v2794_v26  ;;  %v2953_v30 = vadd.f32 %v6430_v16, %v2792_v55  ;;  %v3269_v20 = vadd.f32 %v4668_v14, %v3104_v27 }
 0x1e0   : > { %v6508_v40 = vpop.f32.mrf.mxu1  ;;  %v6510_v61 = vpop.f32.mrf.mxu0  ;;  %v3102_v0 = vadd.f32 %v3041_v4, %v2950_v6  ;;  %v2959_v56 = vadd.f32 %v6442_v54, %v2798_v42 }
 0x1e1   : > { %v3266_v48 = vadd.f32 %v3203_v12, %v3101_v13  ;;  %v3107_v57 = vadd.f32 %v4647_v46, %v2955_v2  ;;  %v3105_v13 = vadd.f32 %v3054_v32, %v2953_v30  ;;  %v2956_v12 = vadd.f32 %v6434_v21, %v2795_v53  ;;  %v6893_v30 = vld [vmem:[#allocation24_spill] sm:$0xff] }
 0x1e2   : > { %v6515_v3 = vpop.f32.mrf.mxu1  ;;  %v6517_v8 = vpop.f32.mrf.mxu0  ;;  %v3267_v14 = vadd.f32 %v6472_v23, %v3102_v0  ;;  %v2954_v21 = vadd.f32 %v6438_v15, %v2793_v63  ;;  %v2799_v23 = vadd.f32 %v6448_v62, %v6408_v38  ;;  %v2797_v53 = vadd.f32 %v6452_v59, %v6410_v5 }
 0x1e3   : > { %v3272_v28 = vadd.f32 %v6474_v43, %v3107_v57  ;;  %v3108_v7 = vadd.f32 %v6478_v45, %v2956_v12  ;;  %v3270_v15 = vadd.f32 %v6476_v39, %v3105_v13  ;;  %v3111_v2 = vadd.f32 %v6486_v22, %v2959_v56  ;;  %v6904_v56 = vld [vmem:[#allocation2_spill] sm:$0xff] }
 0x1e4   : > { %v6522_v36 = vpop.f32.mrf.mxu1  ;;  %v6524_v47 = vpop.f32.mrf.mxu0  ;;  %v3106_v6 = vadd.f32 %v6482_v11, %v2954_v21  ;;  %v2957_v38 = vadd.f32 %v6446_v60, %v2796_v33  ;;  %v2960_v5 = vadd.f32 %v6450_v51, %v2799_v23  ;;  %v6898_v51 = vld [vmem:[#allocation25_spill] sm:$0xff] }
 0x1e5   : > { %v3273_v0 = vadd.f32 %v6480_v1, %v3108_v7  ;;  %v6903_v7 = vld [vmem:[#allocation29_spill] sm:$0xff] }
 0x1e6   : > { %v6530_v17 = vpop.f32.mrf.mxu1  ;;  %v4691_v58 = vpop.f32.mrf.mxu0  ;;  %v3112_v13 = vadd.f32 %v6898_v51, %v2960_v5 }
 0x1e7   : > { %v3424_v24 = vadd.f32 %v4691_v58, %v3268_v50 }
 0x1e8   : > { %v4715_v19 = vpop.f32.mrf.mxu1  ;;  %v3359_v26 = vpop.f32.mrf.mxu0 }
 0x1e9   : > { %v3585_v49 = vadd.f32 %v4715_v19, %v3424_v24  ;;  %v3422_v52 = vadd.f32 %v3359_v26, %v3266_v48  ;;  %v2802_v24 = vadd.f32 %v6456_v41, %v6412_v10  ;;  %v3109_v48 = vadd.f32 %v6490_v29, %v2957_v38  ;;  %v6894_v26 = vld [vmem:[#allocation21_spill] sm:$0xff]  ;;  %v6897_v29 = vld [vmem:[#allocation26_spill] sm:$0xff] }
 0x1ea   : > { %v3520_v9 = vpop.f32.mrf.mxu1  ;;  %v4692_v16 = vpop.f32.mrf.mxu0  ;;  %v3271_v19 = vadd.f32 %v6893_v30, %v3106_v6  ;;  %v3276_v42 = vadd.f32 %v6897_v29, %v3111_v2  ;;  %v6906_v6 = vld [vmem:[#allocation9_spill] sm:$0xff] }
 0x1eb   : > { %v3608_v34 = vadd.f32 %v6538_v44, %v3585_v49  ;;  %v3583_v4 = vadd.f32 %v3520_v9, %v3422_v52  ;;  %v3425_v46 = vadd.f32 %v4692_v16, %v3269_v20  ;;  %v6895_v49 = vld [vmem:[#allocation8_spill] sm:$0xff]  ;;  %v6896_v52 = vld [vmem:[#allocation5_spill] sm:$0xff] }
 0x1ec   : > { %v4716_v35 = vpop.f32.mrf.mxu1  ;;  %v3362_v32 = vpop.f32.mrf.mxu0  ;;  %v2800_v1 = vadd.f32 %v6895_v49, %v6894_v26  ;;  %v2958_v10 = vadd.f32 %v6896_v52, %v2797_v53 }
 0x1ed   : > { %3624 = vst [vmem:[%s6546_s10 + $0x10] sm:$0xff] %v3608_v34  ;;  %v3606_v18 = vadd.f32 %v6538_v44, %v3583_v4  ;;  %v3586_v25 = vadd.f32 %v4716_v35, %v3425_v46  ;;  %v3423_v55 = vadd.f32 %v3362_v32, %v3267_v14  ;;  %v6899_v34 = vld [vmem:[#allocation4_spill] sm:$0xff]  ;;  %v6900_v4 = vld [vmem:[#allocation13_spill] sm:$0xff]  ;;  %v6901_v14 = vld [vmem:[#allocation6_spill] sm:$0xff] }
 0x1ee   : > { %v3523_v37 = vpop.f32.mrf.mxu1  ;;  %v4695_v27 = vpop.f32.mrf.mxu0  ;;  %v2803_v46 = vadd.f32 %v6900_v4, %v6899_v34  ;;  %v2963_v33 = vadd.f32 %v6901_v14, %v2802_v24  ;;  %v6902_v32 = vld [vmem:[#allocation22_spill] sm:$0xff] }
 0x1ef   : > { %3622 = vst [vmem:[%s6546_s10] sm:$0xff] %v3606_v18  ;;  %v3609_v43 = vadd.f32 %v6538_v44, %v3586_v25  ;;  %v3584_v45 = vadd.f32 %v3523_v37, %v3423_v55  ;;  %v3428_v50 = vadd.f32 %v4695_v27, %v3272_v28  ;;  %v3274_v28 = vadd.f32 %v6902_v32, %v3109_v48  ;;  %v6905_v37 = vld [vmem:[#allocation10_spill] sm:$0xff] }
 0x1f0   : > { %v4719_v54 = vpop.f32.mrf.mxu1  ;;  %v3375_v62 = vpop.f32.mrf.mxu0  ;;  %v3110_v18 = vadd.f32 %v6903_v7, %v2958_v10  ;;  %v2801_v27 = vadd.f32 %v6905_v37, %v6904_v56 }
 0x1f1   : > { %3625 = vst [vmem:[%s6546_s10 + $0x18] sm:$0xff] %v3609_v43  ;;  %v3607_v39 = vadd.f32 %v6538_v44, %v3584_v45  ;;  %v3589_v58 = vadd.f32 %v4719_v54, %v3428_v50  ;;  %v3426_v11 = vadd.f32 %v3375_v62, %v3270_v15  ;;  %v3115_v15 = vadd.f32 %v6505_v31, %v2963_v33  ;;  %v6907_v54 = vld [vmem:[#allocation27_spill] sm:$0xff] }
 0x1f2   : > { %v3536_v59 = vpop.f32.mrf.mxu1  ;;  %v4696_v22 = vpop.f32.mrf.mxu0  ;;  %v2961_v43 = vadd.f32 %v6906_v6, %v2800_v1  ;;  %v3277_v62 = vadd.f32 %v6907_v54, %v3112_v13 }
 0x1f3   : > { %3623 = vst [vmem:[%s6546_s10 + $0x8] sm:$0xff] %v3607_v39  ;;  %v3612_v60 = vadd.f32 %v6538_v44, %v3589_v58  ;;  %v3587_v63 = vadd.f32 %v3536_v59, %v3426_v11  ;;  %v3429_v57 = vadd.f32 %v4696_v22, %v3273_v0  ;;  %v6908_v58 = vld [vmem:[#allocation18_spill] sm:$0xff]  ;;  %v6909_v59 = vld [vmem:[#allocation12_spill] sm:$0xff] }
 0x1f4   : > { %v4720_v41 = vpop.f32.mrf.mxu1  ;;  %v3378_v20 = vpop.f32.mrf.mxu0  ;;  %v3113_v39 = vadd.f32 %v6510_v61, %v2961_v43  ;;  %v2964_v11 = vadd.f32 %v6908_v58, %v2803_v46  ;;  %v3275_v22 = vadd.f32 %v6909_v59, %v3110_v18 }
 0x1f5   : > { %3628 = vst [vmem:[%s6546_s10 + $0x30] sm:$0xff] %v3612_v60  ;;  %v3610_v12 = vadd.f32 %v6538_v44, %v3587_v63  ;;  %v3590_v9 = vadd.f32 %v4720_v41, %v3429_v57  ;;  %v3427_v16 = vadd.f32 %v3378_v20, %v3271_v19  ;;  %v6910_v60 = vld [vmem:[#allocation16_spill] sm:$0xff]  ;;  %v3280_v19 = vadd.f32 %v6508_v40, %v3115_v15 }
 0x1f6   : > { %v3539_v21 = vpop.f32.mrf.mxu1  ;;  %v4699_v35 = vpop.f32.mrf.mxu0  ;;  %v2962_v63 = vadd.f32 %v6910_v60, %v2801_v27  ;;  %v3116_v61 = vadd.f32 %v6517_v8, %v2964_v11  ;;  %v3278_v41 = vadd.f32 %v6515_v3, %v3113_v39 }
 0x1f7   : > { %3626 = vst [vmem:[%s6546_s10 + $0x20] sm:$0xff] %v3610_v12  ;;  %v3613_v25 = vadd.f32 %v6538_v44, %v3590_v9  ;;  %v3588_v55 = vadd.f32 %v3539_v21, %v3427_v16  ;;  %v3432_v23 = vadd.f32 %v4699_v35, %v3276_v42 }
 0x1f8   : > { %v4723_v45 = vpop.f32.mrf.mxu1  ;;  %v3391_v50 = vpop.f32.mrf.mxu0  ;;  %v3114_v20 = vadd.f32 %v6524_v47, %v2962_v63  ;;  %v3281_v16 = vadd.f32 %v6522_v36, %v3116_v61 }
 0x1f9   : > { %3629 = vst [vmem:[%s6546_s10 + $0x38] sm:$0xff] %v3613_v25  ;;  %v3611_v53 = vadd.f32 %v6538_v44, %v3588_v55  ;;  %v3593_v2 = vadd.f32 %v4723_v45, %v3432_v23  ;;  %v3430_v38 = vadd.f32 %v3391_v50, %v3274_v28 }
 0x1fa   : > { %v3552_v0 = vpop.f32.mrf.mxu1  ;;  %v4700_v24 = vpop.f32.mrf.mxu0  ;;  %v3279_v14 = vadd.f32 %v6530_v17, %v3114_v20 }
 0x1fb   : > { %3627 = vst [vmem:[%s6546_s10 + $0x28] sm:$0xff] %v3611_v53  ;;  %v3616_v31 = vadd.f32 %v6538_v44, %v3593_v2  ;;  %v3591_v48 = vadd.f32 %v3552_v0, %v3430_v38  ;;  %v3433_v5 = vadd.f32 %v4700_v24, %v3277_v62 }
 0x1fc   : > { %v4724_v57 = vpop.f32.mrf.mxu1  ;;  %v3394_v30 = vpop.f32.mrf.mxu0 }
 0x1fd   : > { %3632 = vst [vmem:[%s6546_s10 + $0x50] sm:$0xff] %v3616_v31  ;;  %v3614_v26 = vadd.f32 %v6538_v44, %v3591_v48  ;;  %v3594_v49 = vadd.f32 %v4724_v57, %v3433_v5  ;;  %v3431_v1 = vadd.f32 %v3394_v30, %v3275_v22 }
 0x1fe   : > { %v3555_v52 = vpop.f32.mrf.mxu1  ;;  %v4703_v10 = vpop.f32.mrf.mxu0 }
 0x1ff   : > { %3630 = vst [vmem:[%s6546_s10 + $0x40] sm:$0xff] %v3614_v26  ;;  %v3617_v29 = vadd.f32 %v6538_v44, %v3594_v49  ;;  %v3592_v42 = vadd.f32 %v3555_v52, %v3431_v1  ;;  %v3436_v40 = vadd.f32 %v4703_v10, %v3280_v19 }
 0x200   : > { %v4727_v51 = vpop.f32.mrf.mxu1  ;;  %v3407_v8 = vpop.f32.mrf.mxu0 }
 0x201   : > { %3633 = vst [vmem:[%s6546_s10 + $0x58] sm:$0xff] %v3617_v29  ;;  %v3615_v13 = vadd.f32 %v6538_v44, %v3592_v42  ;;  %v3597_v12 = vadd.f32 %v4727_v51, %v3436_v40  ;;  %v3434_v9 = vadd.f32 %v3407_v8, %v3278_v41 }
 0x202   : > { %v3568_v34 = vpop.f32.mrf.mxu1  ;;  %v4704_v3 = vpop.f32.mrf.mxu0 }
 0x203   : > { %3631 = vst [vmem:[%s6546_s10 + $0x48] sm:$0xff] %v3615_v13  ;;  %v3620_v47 = vadd.f32 %v6538_v44, %v3597_v12  ;;  %v3595_v4 = vadd.f32 %v3568_v34, %v3434_v9  ;;  %v3437_v46 = vadd.f32 %v4704_v3, %v3281_v16 }
 0x204   : > { %v4728_v33 = vpop.f32.mrf.mxu1  ;;  %v3410_v21 = vpop.f32.mrf.mxu0 }
 0x205   : > { %3636 = vst [vmem:[%s6546_s10 + $0x70] sm:$0xff] %v3620_v47  ;;  %v3618_v35 = vadd.f32 %v6538_v44, %v3595_v4  ;;  %v3598_v32 = vadd.f32 %v4728_v33, %v3437_v46  ;;  %v3435_v28 = vadd.f32 %v3410_v21, %v3279_v14 }
 0x206   : > { %v3571_v7 = vpop.f32.mrf.mxu1 }
 0x207   : > { %3634 = vst [vmem:[%s6546_s10 + $0x60] sm:$0xff] %v3618_v35  ;;  %v3621_v36 = vadd.f32 %v6538_v44, %v3598_v32  ;;  %v3596_v18 = vadd.f32 %v3571_v7, %v3435_v28 }
 0x209   : > { %3637 = vst [vmem:[%s6546_s10 + $0x78] sm:$0xff] %v3621_v36  ;;  %v3619_v25 = vadd.f32 %v6538_v44, %v3596_v18 }
 0x20b   : > { %3635 = vst [vmem:[%s6546_s10 + $0x68] sm:$0xff] %v3619_v25 }
 0x20c PF: > { %s14_s17 = sadd.s32 1, %s4864_s17   ;;  %s6911_s15 = smov %s4860_s16 }
 0x20d   : > { %p11_p6 = scmp.ge.s32.totalorder %s14_s17, 4   ;;  %s6912_s16 = smov %s6914_s18 }
 0x20f   :  { %13 = sbr.rel (!%p11_p6) target bundleno = 2 (0x2), region = 84 }

</bundles_post_ra>
